<compile_context>
chip_gen: v7x
topology: tpu7x:2x2x1
jax: 0.10.0
libtpu: 0.0.40
codegen_flags: <defaults>
</compile_context>

<pallas_src>
import functools

import jax
import jax.numpy as jnp
from jax import lax
from jax.experimental import pallas as pl
from jax.experimental.pallas import tpu as pltpu

_VMEM_LIMIT = 48 * 1024 * 1024  # safe on v5e/v6e (128 MiB) and v7x (64 MiB)


# ----------------------------- Pallas kernels ------------------------------ #

def conv_relu_pool_kernel(a_ref, wt_ref, b_ref, o_ref):
    """Fused conv-as-matmul + bias + relu + 2x2 maxpool, channel-major.

    a_ref : (4, K, tm)  -- 4 (ph, pw) pool-window slabs of im2col patches,
                           patch dim K=(kh,kw,cin) on sublanes, pooled pixels
                           on lanes (lane-dense loads).
    wt_ref: (Cout, K)   -- conv weight, channel-major matmul form.
    b_ref : (Cout, 1)   -- bias column.
    o_ref : (Cout, tm)  -- pooled output tile (lane-dense stores).
    """
    wt = wt_ref[...]
    acc = jnp.dot(wt, a_ref[0], preferred_element_type=jnp.float32)
    for s in range(1, 4):                       # 2x2 maxpool over the 4 slabs
        acc = jnp.maximum(
            acc, jnp.dot(wt, a_ref[s], preferred_element_type=jnp.float32))
    # bias + relu hoisted out of the slab loop (they commute with the max).
    o_ref[...] = jnp.maximum(acc + b_ref[...], 0.0).astype(o_ref.dtype)


def conv_relu_pool(slabs, w_t, b_col, *, tile_hw=4096):
    """slabs: (B, 4, K, HWp) -> (B, Cout, HWp) pooled, channel-major."""
    B, S, K, HWp = slabs.shape
    assert S == 4
    Cout = w_t.shape[0]
    tm = min(tile_hw, HWp)
    assert HWp % tm == 0
    return pl.pallas_call(
        conv_relu_pool_kernel,
        out_shape=jax.ShapeDtypeStruct((B, Cout, HWp), jnp.float32),
        grid_spec=pltpu.PrefetchScalarGridSpec(
            num_scalar_prefetch=0,
            grid=(B, HWp // tm),
            in_specs=[
                pl.BlockSpec((None, 4, K, tm), lambda b, i: (b, 0, 0, i)),
                pl.BlockSpec((Cout, K), lambda b, i: (0, 0)),
                pl.BlockSpec((Cout, 1), lambda b, i: (0, 0)),
            ],
            out_specs=pl.BlockSpec((None, Cout, tm), lambda b, i: (b, 0, i)),
        ),
        compiler_params=pltpu.CompilerParams(
            dimension_semantics=("parallel", "parallel"),
            vmem_limit_bytes=_VMEM_LIMIT),
    )(slabs, w_t, b_col)


def mlp_kernel(x_ref, w1_ref, b1_ref, w2_ref, o_ref, acc_ref, *, tk):
    """Fused fc1 (K-tiled accumulate) + bias + relu + partial fc2.

    Grid = (n_split, K // tk): axis 0 splits the hidden dim ("parallel", so
    both v7x TensorCores stream weights), axis 1 is the fc1 K reduction
    ("arbitrary").

    x_ref  : (B, K)      -- bf16 activations, resident across the whole grid
    w1_ref : (tk, H/ns)  -- bf16 fc1 weight tile (streamed from HBM)
    b1_ref : (1, H/ns)   -- f32 fc1 bias slice
    w2_ref : (H/ns, 2)   -- bf16 fc2 weight slice
    o_ref  : (B, 2)      -- f32 partial logits for this hidden-half
    acc_ref: (B, H/ns)   -- f32 fc1 accumulator
    """
    k = pl.program_id(1)

    @pl.when(k == 0)
    def _():
        acc_ref[...] = jnp.zeros_like(acc_ref)

    start = pl.multiple_of(k * tk, tk)
    acc_ref[...] += jnp.dot(x_ref[:, pl.ds(start, tk)], w1_ref[...],
                            preferred_element_type=jnp.float32)

    @pl.when(k == pl.num_programs(1) - 1)
    def _():
        h = jnp.maximum(acc_ref[...] + b1_ref[...], 0.0).astype(w2_ref.dtype)
        o_ref[...] = jnp.dot(h, w2_ref[...],
                             preferred_element_type=jnp.float32)


def mlp_head(x, w1, b1, w2, *, tile_k=8192, n_split=2):
    """x:(B,K) bf16, w1:(K,H) bf16, b1:(1,H) f32, w2:(H,2) bf16 ->
    (n_split, B, 2) f32 partial logits (summed + fc2 bias added outside)."""
    B, K = x.shape
    H = w1.shape[1]
    Nout = w2.shape[1]
    tk = min(tile_k, K)
    assert K % tk == 0 and H % n_split == 0
    th = H // n_split
    return pl.pallas_call(
        functools.partial(mlp_kernel, tk=tk),
        out_shape=jax.ShapeDtypeStruct((n_split, B, Nout), jnp.float32),
        grid_spec=pltpu.PrefetchScalarGridSpec(
            num_scalar_prefetch=0,
            grid=(n_split, K // tk),
            in_specs=[
                pl.BlockSpec((B, K), lambda h, k: (0, 0)),     # resident once
                pl.BlockSpec((tk, th), lambda h, k: (k, h)),   # fc1 K-tile
                pl.BlockSpec((1, th), lambda h, k: (0, h)),
                pl.BlockSpec((th, Nout), lambda h, k: (h, 0)),
            ],
            out_specs=pl.BlockSpec((None, B, Nout), lambda h, k: (h, 0, 0)),
            scratch_shapes=[pltpu.VMEM((B, th), jnp.float32)],
        ),
        compiler_params=pltpu.CompilerParams(
            dimension_semantics=("parallel", "arbitrary"),
            vmem_limit_bytes=_VMEM_LIMIT),
    )(x, w1, b1, w2)


# --------------------------------- glue ------------------------------------ #

def im2col_pool_slabs(x_nchw, ksize=3, pad=1):
    """(B, C, H, W) -> (B, 4, ksize*ksize*C, (H//2)*(W//2)) pool-slab im2col.

    Slab axis = the (ph, pw) position inside each 2x2 max-pool window; patch
    axis K is ordered (kh, kw, cin); pooled pixels (i, j) sit on the last
    (lane) axis so the Pallas kernel's loads/stores are lane-dense.
    """
    # TODO(synk): this patch expansion (pad + 9 shifted slices + pool-slab
    # transpose) is still XLA glue; folding it into the Pallas kernel would
    # need overlapping (halo) input blocks / manual DMA.
    B, C, H, W = x_nchw.shape
    xp = jnp.pad(x_nchw, ((0, 0), (0, 0), (pad, pad), (pad, pad)))
    cols = jnp.concatenate(
        [xp[:, :, kh:kh + H, kw:kw + W]
         for kh in range(ksize) for kw in range(ksize)],
        axis=1)                                    # (B, 9C, H, W), (kh, kw, c)
    K = ksize * ksize * C
    cols = cols.reshape(B, K, H // 2, 2, W // 2, 2)
    cols = cols.transpose(0, 3, 5, 1, 2, 4)        # (B, ph, pw, K, H/2, W/2)
    return cols.reshape(B, 4, K, (H // 2) * (W // 2))


def cat_dog_forward(x_nchw, p):
    B = x_nchw.shape[0]

    # conv1 + relu + maxpool(2)   [Pallas, channel-major]
    s1 = im2col_pool_slabs(x_nchw)                        # (B, 4, 27, 64*64)
    y1 = conv_relu_pool(s1, p["w1t"], p["b1c"])           # (B, 16, 64*64)
    y1 = y1.reshape(B, 16, 64, 64)

    # conv2 + relu + maxpool(2)   [Pallas, channel-major]
    s2 = im2col_pool_slabs(y1)                            # (B, 4, 144, 32*32)
    y2 = conv_relu_pool(s2, p["w2t"], p["b2c"])           # (B, 32, 32*32)

    # Channel-major conv output == PyTorch NCHW flatten: this reshape is free.
    feat = y2.reshape(B, -1).astype(jnp.bfloat16)         # (B, 32768)

    # fc1 + relu + fc2 [Pallas, fused; two hidden-halves run in parallel]
    partials = mlp_head(feat, p["wf1"], p["bf1"], p["wf2"])
    return partials.sum(axis=0) + p["bf2"]                # (B, 2) f32


def init_params(key):
    ks = jax.random.split(key, 8)

    def nrm(k, shape, fan_in):
        return jax.random.normal(k, shape, jnp.float32) / jnp.sqrt(fan_in)

    return {
        "w1": nrm(ks[0], (3, 3, 3, 16), 27.0),      # (kh, kw, cin, cout)
        "b1": nrm(ks[1], (16,), 27.0),
        "w2": nrm(ks[2], (3, 3, 16, 32), 144.0),
        "b2": nrm(ks[3], (32,), 144.0),
        "wf1": nrm(ks[4], (32 * 32 * 32, 512), 32768.0),   # (in, out)
        "bf1": nrm(ks[5], (512,), 32768.0),
        "wf2": nrm(ks[6], (512, 2), 512.0),
        "bf2": nrm(ks[7], (2,), 512.0),
    }


def prepare_params(params):
    """One-time repack into kernel-friendly layouts / dtypes (outside jit)."""
    return {
        # conv weights -> (cout, kh*kw*cin) channel-major matmul form
        "w1t": params["w1"].transpose(3, 0, 1, 2).reshape(16, -1),
        "b1c": params["b1"].reshape(16, 1),
        "w2t": params["w2"].transpose(3, 0, 1, 2).reshape(32, -1),
        "b2c": params["b2"].reshape(32, 1),
        # fc weights streamed as bf16 (f32 accumulation happens in-kernel)
        "wf1": params["wf1"].astype(jnp.bfloat16),
        "bf1": params["bf1"].reshape(1, -1),
        "wf2": params["wf2"].astype(jnp.bfloat16),
        "bf2": params["bf2"].reshape(1, -1),
    }


def reference_forward(x_nchw, params):
    """Pure-JAX f32 reference mirroring the PyTorch module."""
    def conv(x, w, b):
        y = lax.conv_general_dilated(
            x, w, window_strides=(1, 1), padding=((1, 1), (1, 1)),
            dimension_numbers=("NCHW", "HWIO", "NCHW"))
        return y + b.reshape(1, -1, 1, 1)

    def pool(x):
        return lax.reduce_window(x, -jnp.inf, lax.max,
                                 (1, 1, 2, 2), (1, 1, 2, 2), "VALID")

    y = pool(jnp.maximum(conv(x_nchw, params["w1"], params["b1"]), 0.0))
    y = pool(jnp.maximum(conv(y, params["w2"], params["b2"]), 0.0))
    y = y.reshape(y.shape[0], -1)
    y = jnp.maximum(y @ params["wf1"] + params["bf1"], 0.0)
    return y @ params["wf2"] + params["bf2"]


if __name__ == "__main__":
    key = jax.random.PRNGKey(0)
    kx, kp = jax.random.split(key)

    # fc1 expects 32*32*32 features => 3-channel 128x128 input.  Batch=2, NCHW.
    x = jax.random.normal(kx, (2, 3, 128, 128), jnp.float32)
    params = init_params(kp)
    prepared = prepare_params(params)

    fwd = jax.jit(cat_dog_forward)
    out = jax.block_until_ready(fwd(x, prepared))
    assert out.shape == (2, 2), out.shape

    ref = reference_forward(x, params)
    assert jnp.allclose(out, ref, rtol=2e-2, atol=2e-2), (out, ref)

    print("KERNEL_OK")
</pallas_src>

<mosaic_0001>
module attributes {stable_mosaic.version = 11 : i64} {
  func.func @conv_relu_pool_kernel(%arg0: i32, %arg1: i32, %arg2: memref<1x4x27x4096xf32, #tpu.memory_space<vmem>>, %arg3: memref<16x27xf32, #tpu.memory_space<vmem>>, %arg4: memref<16x1xf32, #tpu.memory_space<vmem>>, %arg5: memref<1x16x4096xf32, #tpu.memory_space<vmem>>) attributes {dimension_semantics = [#tpu.dimension_semantics<parallel>, #tpu.dimension_semantics<parallel>], iteration_bounds = array<i64: 2, 1>, scalar_prefetch = 0 : i64, scratch_operands = 0 : i64, tpu.core_type = #tpu.core_type<tc>, window_params = [{transform_indices = @transform_0, window_bounds = array<i64: 1, 4, 27, 4096>}, {pipeline_mode = #tpu.pipeline_mode<synchronous>, transform_indices = @transform_1, window_bounds = array<i64: 16, 27>}, {pipeline_mode = #tpu.pipeline_mode<synchronous>, transform_indices = @transform_2, window_bounds = array<i64: 16, 1>}, {transform_indices = @transform_3, window_bounds = array<i64: 1, 16, 4096>}]} {
    %c0 = arith.constant 0 : index
    %c0_0 = arith.constant 0 : index
    %0 = vector.load %arg3[%c0, %c0_0] : memref<16x27xf32, #tpu.memory_space<vmem>>, vector<16x27xf32>
    %c0_1 = arith.constant 0 : index
    %c0_2 = arith.constant 0 : index
    %c0_3 = arith.constant 0 : index
    %c0_4 = arith.constant 0 : index
    %1 = vector.load %arg2[%c0_1, %c0_2, %c0_3, %c0_4] : memref<1x4x27x4096xf32, #tpu.memory_space<vmem>>, vector<1x1x27x4096xf32>
    %2 = vector.shape_cast %1 : vector<1x1x27x4096xf32> to vector<27x4096xf32>
    %cst = arith.constant dense<0.000000e+00> : vector<16x4096xf32>
    %3 = tpu.matmul %0, %2, %cst {dimension_numbers = #tpu.dot_dimension_numbers<[1], [0], [0], [1], [0, 0, 1, 1], [], []>} : vector<16x27xf32>, vector<27x4096xf32>, vector<16x4096xf32> -> vector<16x4096xf32>
    %c0_5 = arith.constant 0 : index
    %c1 = arith.constant 1 : index
    %c0_6 = arith.constant 0 : index
    %c0_7 = arith.constant 0 : index
    %4 = vector.load %arg2[%c0_5, %c1, %c0_6, %c0_7] : memref<1x4x27x4096xf32, #tpu.memory_space<vmem>>, vector<1x1x27x4096xf32>
    %5 = vector.shape_cast %4 : vector<1x1x27x4096xf32> to vector<27x4096xf32>
    %cst_8 = arith.constant dense<0.000000e+00> : vector<16x4096xf32>
    %6 = tpu.matmul %0, %5, %cst_8 {dimension_numbers = #tpu.dot_dimension_numbers<[1], [0], [0], [1], [0, 0, 1, 1], [], []>} : vector<16x27xf32>, vector<27x4096xf32>, vector<16x4096xf32> -> vector<16x4096xf32>
    %7 = arith.maximumf %3, %6 : vector<16x4096xf32>
    %c0_9 = arith.constant 0 : index
    %c2 = arith.constant 2 : index
    %c0_10 = arith.constant 0 : index
    %c0_11 = arith.constant 0 : index
    %8 = vector.load %arg2[%c0_9, %c2, %c0_10, %c0_11] : memref<1x4x27x4096xf32, #tpu.memory_space<vmem>>, vector<1x1x27x4096xf32>
    %9 = vector.shape_cast %8 : vector<1x1x27x4096xf32> to vector<27x4096xf32>
    %cst_12 = arith.constant dense<0.000000e+00> : vector<16x4096xf32>
    %10 = tpu.matmul %0, %9, %cst_12 {dimension_numbers = #tpu.dot_dimension_numbers<[1], [0], [0], [1], [0, 0, 1, 1], [], []>} : vector<16x27xf32>, vector<27x4096xf32>, vector<16x4096xf32> -> vector<16x4096xf32>
    %11 = arith.maximumf %7, %10 : vector<16x4096xf32>
    %c0_13 = arith.constant 0 : index
    %c3 = arith.constant 3 : index
    %c0_14 = arith.constant 0 : index
    %c0_15 = arith.constant 0 : index
    %12 = vector.load %arg2[%c0_13, %c3, %c0_14, %c0_15] : memref<1x4x27x4096xf32, #tpu.memory_space<vmem>>, vector<1x1x27x4096xf32>
    %13 = vector.shape_cast %12 : vector<1x1x27x4096xf32> to vector<27x4096xf32>
    %cst_16 = arith.constant dense<0.000000e+00> : vector<16x4096xf32>
    %14 = tpu.matmul %0, %13, %cst_16 {dimension_numbers = #tpu.dot_dimension_numbers<[1], [0], [0], [1], [0, 0, 1, 1], [], []>} : vector<16x27xf32>, vector<27x4096xf32>, vector<16x4096xf32> -> vector<16x4096xf32>
    %15 = arith.maximumf %11, %14 : vector<16x4096xf32>
    %c0_17 = arith.constant 0 : index
    %c0_18 = arith.constant 0 : index
    %16 = vector.load %arg4[%c0_17, %c0_18] : memref<16x1xf32, #tpu.memory_space<vmem>>, vector<16x1xf32>
    %17 = vector.broadcast %16 : vector<16x1xf32> to vector<16x4096xf32>
    %18 = arith.addf %15, %17 : vector<16x4096xf32>
    %cst_19 = arith.constant 0.000000e+00 : f32
    %19 = vector.broadcast %cst_19 : f32 to vector<16x4096xf32>
    %20 = arith.maximumf %18, %19 : vector<16x4096xf32>
    %c0_20 = arith.constant 0 : index
    %c0_21 = arith.constant 0 : index
    %c0_22 = arith.constant 0 : index
    %21 = vector.load %arg5[%c0_20, %c0_21, %c0_22] : memref<1x16x4096xf32, #tpu.memory_space<vmem>>, vector<1x16x4096xf32>
    %22 = vector.shape_cast %21 : vector<1x16x4096xf32> to vector<16x4096xf32>
    %23 = vector.shape_cast %20 : vector<16x4096xf32> to vector<1x16x4096xf32>
    tpu.vector_store %arg5[%c0_20, %c0_21, %c0_22], %23 {strides = array<i32>} : memref<1x16x4096xf32, #tpu.memory_space<vmem>>, vector<1x16x4096xf32>,
    return
  }
  func.func @transform_0(%arg0: i32, %arg1: i32) -> (i32, i32, i32, i32) {
    %c0_i32 = arith.constant 0 : i32
    %c0_i32_0 = arith.constant 0 : i32
    %c0_i32_1 = arith.constant 0 : i32
    return %arg0, %c0_i32, %c0_i32_0, %arg1 : i32, i32, i32, i32
  }
  func.func @transform_1(%arg0: i32, %arg1: i32) -> (i32, i32) {
    %c0_i32 = arith.constant 0 : i32
    %c0_i32_0 = arith.constant 0 : i32
    %c0_i32_1 = arith.constant 0 : i32
    return %c0_i32, %c0_i32_0 : i32, i32
  }
  func.func @transform_2(%arg0: i32, %arg1: i32) -> (i32, i32) {
    %c0_i32 = arith.constant 0 : i32
    %c0_i32_0 = arith.constant 0 : i32
    %c0_i32_1 = arith.constant 0 : i32
    return %c0_i32, %c0_i32_0 : i32, i32
  }
  func.func @transform_3(%arg0: i32, %arg1: i32) -> (i32, i32, i32) {
    %c0_i32 = arith.constant 0 : i32
    %c0_i32_0 = arith.constant 0 : i32
    return %arg0, %c0_i32, %arg1 : i32, i32, i32
  }
}

module attributes {stable_mosaic.version = 11 : i64} {
  func.func @conv_relu_pool_kernel(%arg0: i32, %arg1: i32, %arg2: memref<1x4x144x1024xf32, #tpu.memory_space<vmem>>, %arg3: memref<32x144xf32, #tpu.memory_space<vmem>>, %arg4: memref<32x1xf32, #tpu.memory_space<vmem>>, %arg5: memref<1x32x1024xf32, #tpu.memory_space<vmem>>) attributes {dimension_semantics = [#tpu.dimension_semantics<parallel>, #tpu.dimension_semantics<parallel>], iteration_bounds = array<i64: 2, 1>, scalar_prefetch = 0 : i64, scratch_operands = 0 : i64, tpu.core_type = #tpu.core_type<tc>, window_params = [{transform_indices = @transform_0, window_bounds = array<i64: 1, 4, 144, 1024>}, {pipeline_mode = #tpu.pipeline_mode<synchronous>, transform_indices = @transform_1, window_bounds = array<i64: 32, 144>}, {pipeline_mode = #tpu.pipeline_mode<synchronous>, transform_indices = @transform_2, window_bounds = array<i64: 32, 1>}, {transform_indices = @transform_3, window_bounds = array<i64: 1, 32, 1024>}]} {
    %c0 = arith.constant 0 : index
    %c0_0 = arith.constant 0 : index
    %0 = vector.load %arg3[%c0, %c0_0] : memref<32x144xf32, #tpu.memory_space<vmem>>, vector<32x144xf32>
    %c0_1 = arith.constant 0 : index
    %c0_2 = arith.constant 0 : index
    %c0_3 = arith.constant 0 : index
    %c0_4 = arith.constant 0 : index
    %1 = vector.load %arg2[%c0_1, %c0_2, %c0_3, %c0_4] : memref<1x4x144x1024xf32, #tpu.memory_space<vmem>>, vector<1x1x144x1024xf32>
    %2 = vector.shape_cast %1 : vector<1x1x144x1024xf32> to vector<144x1024xf32>
    %cst = arith.constant dense<0.000000e+00> : vector<32x1024xf32>
    %3 = tpu.matmul %0, %2, %cst {dimension_numbers = #tpu.dot_dimension_numbers<[1], [0], [0], [1], [0, 0, 1, 1], [], []>} : vector<32x144xf32>, vector<144x1024xf32>, vector<32x1024xf32> -> vector<32x1024xf32>
    %c0_5 = arith.constant 0 : index
    %c1 = arith.constant 1 : index
    %c0_6 = arith.constant 0 : index
    %c0_7 = arith.constant 0 : index
    %4 = vector.load %arg2[%c0_5, %c1, %c0_6, %c0_7] : memref<1x4x144x1024xf32, #tpu.memory_space<vmem>>, vector<1x1x144x1024xf32>
    %5 = vector.shape_cast %4 : vector<1x1x144x1024xf32> to vector<144x1024xf32>
    %cst_8 = arith.constant dense<0.000000e+00> : vector<32x1024xf32>
    %6 = tpu.matmul %0, %5, %cst_8 {dimension_numbers = #tpu.dot_dimension_numbers<[1], [0], [0], [1], [0, 0, 1, 1], [], []>} : vector<32x144xf32>, vector<144x1024xf32>, vector<32x1024xf32> -> vector<32x1024xf32>
    %7 = arith.maximumf %3, %6 : vector<32x1024xf32>
    %c0_9 = arith.constant 0 : index
    %c2 = arith.constant 2 : index
    %c0_10 = arith.constant 0 : index
    %c0_11 = arith.constant 0 : index
    %8 = vector.load %arg2[%c0_9, %c2, %c0_10, %c0_11] : memref<1x4x144x1024xf32, #tpu.memory_space<vmem>>, vector<1x1x144x1024xf32>
    %9 = vector.shape_cast %8 : vector<1x1x144x1024xf32> to vector<144x1024xf32>
    %cst_12 = arith.constant dense<0.000000e+00> : vector<32x1024xf32>
    %10 = tpu.matmul %0, %9, %cst_12 {dimension_numbers = #tpu.dot_dimension_numbers<[1], [0], [0], [1], [0, 0, 1, 1], [], []>} : vector<32x144xf32>, vector<144x1024xf32>, vector<32x1024xf32> -> vector<32x1024xf32>
    %11 = arith.maximumf %7, %10 : vector<32x1024xf32>
    %c0_13 = arith.constant 0 : index
    %c3 = arith.constant 3 : index
    %c0_14 = arith.constant 0 : index
    %c0_15 = arith.constant 0 : index
    %12 = vector.load %arg2[%c0_13, %c3, %c0_14, %c0_15] : memref<1x4x144x1024xf32, #tpu.memory_space<vmem>>, vector<1x1x144x1024xf32>
    %13 = vector.shape_cast %12 : vector<1x1x144x1024xf32> to vector<144x1024xf32>
    %cst_16 = arith.constant dense<0.000000e+00> : vector<32x1024xf32>
    %14 = tpu.matmul %0, %13, %cst_16 {dimension_numbers = #tpu.dot_dimension_numbers<[1], [0], [0], [1], [0, 0, 1, 1], [], []>} : vector<32x144xf32>, vector<144x1024xf32>, vector<32x1024xf32> -> vector<32x1024xf32>
    %15 = arith.maximumf %11, %14 : vector<32x1024xf32>
    %c0_17 = arith.constant 0 : index
    %c0_18 = arith.constant 0 : index
    %16 = vector.load %arg4[%c0_17, %c0_18] : memref<32x1xf32, #tpu.memory_space<vmem>>, vector<32x1xf32>
    %17 = vector.broadcast %16 : vector<32x1xf32> to vector<32x1024xf32>
    %18 = arith.addf %15, %17 : vector<32x1024xf32>
    %cst_19 = arith.constant 0.000000e+00 : f32
    %19 = vector.broadcast %cst_19 : f32 to vector<32x1024xf32>
    %20 = arith.maximumf %18, %19 : vector<32x1024xf32>
    %c0_20 = arith.constant 0 : index
    %c0_21 = arith.constant 0 : index
    %c0_22 = arith.constant 0 : index
    %21 = vector.load %arg5[%c0_20, %c0_21, %c0_22] : memref<1x32x1024xf32, #tpu.memory_space<vmem>>, vector<1x32x1024xf32>
    %22 = vector.shape_cast %21 : vector<1x32x1024xf32> to vector<32x1024xf32>
    %23 = vector.shape_cast %20 : vector<32x1024xf32> to vector<1x32x1024xf32>
    tpu.vector_store %arg5[%c0_20, %c0_21, %c0_22], %23 {strides = array<i32>} : memref<1x32x1024xf32, #tpu.memory_space<vmem>>, vector<1x32x1024xf32>,
    return
  }
  func.func @transform_0(%arg0: i32, %arg1: i32) -> (i32, i32, i32, i32) {
    %c0_i32 = arith.constant 0 : i32
    %c0_i32_0 = arith.constant 0 : i32
    %c0_i32_1 = arith.constant 0 : i32
    return %arg0, %c0_i32, %c0_i32_0, %arg1 : i32, i32, i32, i32
  }
  func.func @transform_1(%arg0: i32, %arg1: i32) -> (i32, i32) {
    %c0_i32 = arith.constant 0 : i32
    %c0_i32_0 = arith.constant 0 : i32
    %c0_i32_1 = arith.constant 0 : i32
    return %c0_i32, %c0_i32_0 : i32, i32
  }
  func.func @transform_2(%arg0: i32, %arg1: i32) -> (i32, i32) {
    %c0_i32 = arith.constant 0 : i32
    %c0_i32_0 = arith.constant 0 : i32
    %c0_i32_1 = arith.constant 0 : i32
    return %c0_i32, %c0_i32_0 : i32, i32
  }
  func.func @transform_3(%arg0: i32, %arg1: i32) -> (i32, i32, i32) {
    %c0_i32 = arith.constant 0 : i32
    %c0_i32_0 = arith.constant 0 : i32
    return %arg0, %c0_i32, %arg1 : i32, i32, i32
  }
}

module attributes {stable_mosaic.version = 11 : i64} {
  func.func @mlp_kernel(%arg0: i32, %arg1: i32, %arg2: memref<2x32768xbf16, #tpu.memory_space<vmem>>, %arg3: memref<8192x256xbf16, #tpu.memory_space<vmem>>, %arg4: memref<1x256xf32, #tpu.memory_space<vmem>>, %arg5: memref<256x2xbf16, #tpu.memory_space<vmem>>, %arg6: memref<1x2x2xf32, #tpu.memory_space<vmem>>, %arg7: memref<2x256xf32, #tpu.memory_space<vmem>>) attributes {dimension_semantics = [#tpu.dimension_semantics<parallel>, #tpu.dimension_semantics<arbitrary>], iteration_bounds = array<i64: 2, 4>, scalar_prefetch = 0 : i64, scratch_operands = 1 : i64, tpu.core_type = #tpu.core_type<tc>, window_params = [{pipeline_mode = #tpu.pipeline_mode<synchronous>, transform_indices = @transform_0, window_bounds = array<i64: 2, 32768>}, {transform_indices = @transform_1, window_bounds = array<i64: 8192, 256>}, {transform_indices = @transform_2, window_bounds = array<i64: 1, 256>}, {transform_indices = @transform_3, window_bounds = array<i64: 256, 2>}, {transform_indices = @transform_4, window_bounds = array<i64: 1, 2, 2>}]} {
    %c0_i32 = arith.constant 0 : i32
    %0 = arith.cmpi eq, %arg1, %c0_i32 : i32
    %1 = arith.extui %0 : i1 to i32
    %c0_i32_0 = arith.constant 0 : i32
    %2 = arith.cmpi ne, %1, %c0_i32_0 : i32
    scf.if %2 {
      %cst_8 = arith.constant 0.000000e+00 : f32
      %15 = vector.broadcast %cst_8 : f32 to vector<2x256xf32>
      %c0_9 = arith.constant 0 : index
      %c0_10 = arith.constant 0 : index
      %16 = vector.load %arg7[%c0_9, %c0_10] : memref<2x256xf32, #tpu.memory_space<vmem>>, vector<2x256xf32>
      tpu.vector_store %arg7[%c0_9, %c0_10], %15 {strides = array<i32>} : memref<2x256xf32, #tpu.memory_space<vmem>>, vector<2x256xf32>,
    } else {
    }
    %c8192_i32 = arith.constant 8192 : i32
    %3 = arith.muli %arg1, %c8192_i32 : i32
    %4 = tpu.assume_multiple %3, 8192 : i32
    %c0 = arith.constant 0 : index
    %c0_1 = arith.constant 0 : index
    %5 = vector.load %arg7[%c0, %c0_1] : memref<2x256xf32, #tpu.memory_space<vmem>>, vector<2x256xf32>
    %c0_2 = arith.constant 0 : index
    %6 = arith.index_cast %4 : i32 to index
    %7 = vector.load %arg2[%c0_2, %6] : memref<2x32768xbf16, #tpu.memory_space<vmem>>, vector<2x8192xbf16>
    %c0_3 = arith.constant 0 : index
    %c0_4 = arith.constant 0 : index
    %8 = vector.load %arg3[%c0_3, %c0_4] : memref<8192x256xbf16, #tpu.memory_space<vmem>>, vector<8192x256xbf16>
    %cst = arith.constant dense<0.000000e+00> : vector<2x256xf32>
    %9 = tpu.matmul %7, %8, %cst {dimension_numbers = #tpu.dot_dimension_numbers<[1], [0], [0], [1], [0, 0, 1, 1], [], []>} : vector<2x8192xbf16>, vector<8192x256xbf16>, vector<2x256xf32> -> vector<2x256xf32>
    %10 = arith.addf %5, %9 : vector<2x256xf32>
    %c0_5 = arith.constant 0 : index
    %c0_6 = arith.constant 0 : index
    %11 = vector.load %arg7[%c0_5, %c0_6] : memref<2x256xf32, #tpu.memory_space<vmem>>, vector<2x256xf32>
    tpu.vector_store %arg7[%c0_5, %c0_6], %10 {strides = array<i32>} : memref<2x256xf32, #tpu.memory_space<vmem>>, vector<2x256xf32>,
    %c3_i32 = arith.constant 3 : i32
    %12 = arith.cmpi eq, %arg1, %c3_i32 : i32
    %13 = arith.extui %12 : i1 to i32
    %c0_i32_7 = arith.constant 0 : i32
    %14 = arith.cmpi ne, %13, %c0_i32_7 : i32
    scf.if %14 {
      %c0_8 = arith.constant 0 : index
      %c0_9 = arith.constant 0 : index
      %15 = vector.load %arg7[%c0_8, %c0_9] : memref<2x256xf32, #tpu.memory_space<vmem>>, vector<2x256xf32>
      %c0_10 = arith.constant 0 : index
      %c0_11 = arith.constant 0 : index
      %16 = vector.load %arg4[%c0_10, %c0_11] : memref<1x256xf32, #tpu.memory_space<vmem>>, vector<1x256xf32>
      %17 = vector.broadcast %16 : vector<1x256xf32> to vector<2x256xf32>
      %18 = arith.addf %15, %17 : vector<2x256xf32>
      %cst_12 = arith.constant 0.000000e+00 : f32
      %19 = vector.broadcast %cst_12 : f32 to vector<2x256xf32>
      %20 = arith.maximumf %18, %19 : vector<2x256xf32>
      %21 = arith.truncf %20 : vector<2x256xf32> to vector<2x256xbf16>
      %c0_13 = arith.constant 0 : index
      %c0_14 = arith.constant 0 : index
      %22 = vector.load %arg5[%c0_13, %c0_14] : memref<256x2xbf16, #tpu.memory_space<vmem>>, vector<256x2xbf16>
      %cst_15 = arith.constant dense<0.000000e+00> : vector<2x2xf32>
      %23 = tpu.matmul %21, %22, %cst_15 {dimension_numbers = #tpu.dot_dimension_numbers<[1], [0], [0], [1], [0, 0, 1, 1], [], []>} : vector<2x256xbf16>, vector<256x2xbf16>, vector<2x2xf32> -> vector<2x2xf32>
      %c0_16 = arith.constant 0 : index
      %c0_17 = arith.constant 0 : index
      %c0_18 = arith.constant 0 : index
      %24 = vector.load %arg6[%c0_16, %c0_17, %c0_18] : memref<1x2x2xf32, #tpu.memory_space<vmem>>, vector<1x2x2xf32>
      %25 = vector.shape_cast %24 : vector<1x2x2xf32> to vector<2x2xf32>
      %26 = vector.shape_cast %23 : vector<2x2xf32> to vector<1x2x2xf32>
      tpu.vector_store %arg6[%c0_16, %c0_17, %c0_18], %26 {strides = array<i32>} : memref<1x2x2xf32, #tpu.memory_space<vmem>>, vector<1x2x2xf32>,
    } else {
    }
    return
  }
  func.func @transform_0(%arg0: i32, %arg1: i32) -> (i32, i32) {
    %c0_i32 = arith.constant 0 : i32
    %c0_i32_0 = arith.constant 0 : i32
    %c0_i32_1 = arith.constant 0 : i32
    return %c0_i32, %c0_i32_0 : i32, i32
  }
  func.func @transform_1(%arg0: i32, %arg1: i32) -> (i32, i32) {
    %c0_i32 = arith.constant 0 : i32
    return %arg1, %arg0 : i32, i32
  }
  func.func @transform_2(%arg0: i32, %arg1: i32) -> (i32, i32) {
    %c0_i32 = arith.constant 0 : i32
    %c0_i32_0 = arith.constant 0 : i32
    return %c0_i32, %arg0 : i32, i32
  }
  func.func @transform_3(%arg0: i32, %arg1: i32) -> (i32, i32) {
    %c0_i32 = arith.constant 0 : i32
    %c0_i32_0 = arith.constant 0 : i32
    return %arg0, %c0_i32 : i32, i32
  }
  func.func @transform_4(%arg0: i32, %arg1: i32) -> (i32, i32, i32) {
    %c0_i32 = arith.constant 0 : i32
    %c0_i32_0 = arith.constant 0 : i32
    %c0_i32_1 = arith.constant 0 : i32
    return %arg0, %c0_i32, %c0_i32_0 : i32, i32, i32
  }
}

</mosaic_0001>

<bundles_post_ra>
// kernel: cat_dog_forward.3
= control target key start
LH: loop header
LB: loop body
LE: loop exit
PB: predicated region body
PF: predicated region fallthrough
CT: control target
= control target key end

     0   :  { %s7902_s12 = smov 0   ;;  %s7904_s13 = smov 0   ;;  %s10035_s0 = inlined_call_operand.vmem [shape: f32[2,4,27,4096], index: 0, kind: input, shape index: {}]   ;;  %s10036_s1 = inlined_call_operand.vmem [shape: f32[16,27], index: 1, kind: input, shape index: {}]   ;;  %s10037_s2 = inlined_call_operand.vmem [shape: f32[16,1], index: 2, kind: input, shape index: {}]   ;;  %s10038_s3 = inlined_call_operand.vmem [shape: f32[2,16,4096], index: 3, kind: output, shape index: {}]  }
   0x1   :  { %s7906_s14 = smov 0  }
   0x2 LB: > { %s25_s15 = sadd.s32 1, %s7873_s13  ;;  %p6534_p0 = scmp.ge.s32.totalorder %s7877_s14, 1  ;;  %s7877_s14 = sphi %s7906_s14, %s13_s14   ;;  %s7873_s13 = sphi %s7904_s13, %s10391_s13   ;;  %s7869_s12 = sphi %s7902_s12, %s10390_s12  }
   0x3   : > { %p27_p1 = scmp.ge.s32.totalorder %s25_s15, 2  ;;  %p158_p2 = scmp.lt.s32.totalorder %s7877_s14, 3 }
   0x5   : > { %s10393_s15 = smov (%p27_p1, %s25_s15), 0  ;;  %p159_p3 = pnand %p6534_p0, %p158_p2 }
   0x7   : > { %162 = sbr.rel (%p159_p3) target bundleno = 504 (0x1f8), region = 32 }
   0xe   : > { %p191_p4 = scmp.lt.s32.totalorder %s7869_s12, 1  ;;  %v7879_v0 = vmov 0.0   ;;  %vm347_vm0 = vcmask 1042432   ;;  %vm7880_vm1 = vmmov 1   ;;  %v7959_v28 = vld [vmem:[%s10036_s1] sm:$0xff]  ;;  %vm340_vm3 = vcmask 220160  }
   0xf   : > { %508 = vmatprep.mubr.f32.mxu0 %v7879_v0  ;;  %585 = vmatprep.mubr.f32.mxu1 %v7879_v0  ;;  %vm7930_vm2 = vmpackc.low %vm347_vm0, %vm7880_vm1  ;;  %v7988_v51 = vld [vmem:[%s10036_s1 + $0x8] sm:$0xff] }
  0x10   : > { %s10395_s12 = smov (!%p191_p4, %s7869_s12), 1  ;;  %v6240_v1 = vld [vmem:[%s10037_s2 + $0x8] sm:$0xff] }
  0x11   : > { %s7181_s16 = sshll.u32 %s10395_s12, 12  ;;  %s7182_s9 = sshll.u32 %s10395_s12, 9 }
  0x12   : > { %s7928_s19 = scalar_lea.vmem %s10035_s0, %s7181_s16  ;;  %s9835_s16 = scalar_lea.vmem %s10038_s3, %s7182_s9 }
  0x13   : > { %v213_v2 = vld [vmem:[%s7928_s19 + $0x8] sm:$0xff]  ;;  %v215_v4 = vld [vmem:[%s7928_s19 + $0x18] sm:$0xff]  ;;  %v212_v7 = vld [vmem:[%s7928_s19] sm:$0xff] }
  0x14   : > { %v245_v3 = vld [vmem:[%s7928_s19 + $0x108] sm:$0xff]  ;;  %v247_v6 = vld [vmem:[%s7928_s19 + $0x118] sm:$0xff]  ;;  %v244_v8 = vld [vmem:[%s7928_s19 + $0x100] sm:$0xff] }
  0x15   : > { %v7183_v5 = vpack.c.bf16 %v245_v3, %v213_v2  ;;  %v7193_v9 = vpack.c.bf16 %v247_v6, %v215_v4  ;;  %v7185_v10 = vpack.c.bf16 %v244_v8, %v212_v7  ;;  %v214_v11 = vld [vmem:[%s7928_s19 + $0x10] sm:$0xff]  ;;  %v277_v13 = vld [vmem:[%s7928_s19 + $0x208] sm:$0xff]  ;;  %v279_v16 = vld [vmem:[%s7928_s19 + $0x218] sm:$0xff] }
  0x16   : > { %v246_v12 = vld [vmem:[%s7928_s19 + $0x110] sm:$0xff]  ;;  %v309_v15 = vld [vmem:[%s7928_s19 + $0x308] sm:$0x7]  ;;  %v311_v17 = vld [vmem:[%s7928_s19 + $0x318] sm:$0x7] }
  0x17   : > { %7184 = vmatprep.subr.bf16.mxu0 %v7183_v5  ;;  %v7195_v14 = vpack.c.bf16 %v246_v12, %v214_v11  ;;  %7194 = vmatprep.subr.bf16.mxu1 %v7193_v9  ;;  %v7187_v18 = vpack.c.bf16 %v309_v15, %v277_v13  ;;  %v7197_v19 = vpack.c.bf16 %v311_v17, %v279_v16  ;;  %v276_v20 = vld [vmem:[%s7928_s19 + $0x200] sm:$0xff]  ;;  %v278_v22 = vld [vmem:[%s7928_s19 + $0x210] sm:$0xff]  ;;  %v217_v25 = vld [vmem:[%s7928_s19 + $0x28] sm:$0xff] }
  0x18   : > { %7186 = vmatpush1.bf16.msra.mxu0 %v7185_v10  ;;  %v308_v21 = vld [vmem:[%s7928_s19 + $0x300] sm:$0x7]  ;;  %v310_v24 = vld [vmem:[%s7928_s19 + $0x310] sm:$0x7]  ;;  %v249_v26 = vld [vmem:[%s7928_s19 + $0x128] sm:$0xff] }
  0x19   : > { %7196 = vmatpush1.bf16.msra.mxu1 %v7195_v14  ;;  %v7190_v23 = vpack.c.bf16 %v308_v21, %v276_v20  ;;  %7189 = vmatprep.subr.msk.bf16.mxu0 %vm7930_vm2, %v7187_v18  ;;  %v7200_v27 = vpack.c.bf16 %v310_v24, %v278_v22  ;;  %v7203_v29 = vpack.c.bf16 %v249_v26, %v217_v25  ;;  %v219_v30 = vld [vmem:[%s7928_s19 + $0x38] sm:$0xff]  ;;  %v216_v32 = vld [vmem:[%s7928_s19 + $0x20] sm:$0xff]  ;;  %v218_v35 = vld [vmem:[%s7928_s19 + $0x30] sm:$0xff] }
  0x1a   : > { %7199 = vmatprep.subr.msk.bf16.mxu1 %vm7930_vm2, %v7197_v19  ;;  %v251_v31 = vld [vmem:[%s7928_s19 + $0x138] sm:$0xff]  ;;  %v248_v34 = vld [vmem:[%s7928_s19 + $0x120] sm:$0xff]  ;;  %v250_v36 = vld [vmem:[%s7928_s19 + $0x130] sm:$0xff] }
  0x1b   : > { %v7213_v33 = vpack.c.bf16 %v251_v31, %v219_v30  ;;  %v7205_v37 = vpack.c.bf16 %v248_v34, %v216_v32  ;;  %v281_v38 = vld [vmem:[%s7928_s19 + $0x228] sm:$0xff]  ;;  %v283_v40 = vld [vmem:[%s7928_s19 + $0x238] sm:$0xff]  ;;  %v7215_v41 = vpack.c.bf16 %v250_v36, %v218_v35  ;;  %v280_v43 = vld [vmem:[%s7928_s19 + $0x220] sm:$0xff] }
  0x1c   : > { %7192 = vmatpush1.bf16.msk.msra.mxu0 %vm7930_vm2, %v7190_v23  ;;  %v313_v39 = vld [vmem:[%s7928_s19 + $0x328] sm:$0x7]  ;;  %v315_v42 = vld [vmem:[%s7928_s19 + $0x338] sm:$0x7]  ;;  %v312_v44 = vld [vmem:[%s7928_s19 + $0x320] sm:$0x7] }
  0x1d   : > { %7202 = vmatpush1.bf16.msk.msra.mxu1 %vm7930_vm2, %v7200_v27  ;;  %7204 = vmatprep.subr.bf16.mxu0 %v7203_v29  ;;  %v7207_v45 = vpack.c.bf16 %v313_v39, %v281_v38  ;;  %v282_v46 = vld [vmem:[%s7928_s19 + $0x230] sm:$0xff]  ;;  %v7217_v48 = vpack.c.bf16 %v315_v42, %v283_v40  ;;  %v221_v49 = vld [vmem:[%s7928_s19 + $0x48] sm:$0xff]  ;;  %v7210_v52 = vpack.c.bf16 %v312_v44, %v280_v43  ;;  %v223_v53 = vld [vmem:[%s7928_s19 + $0x58] sm:$0xff] }
  0x1e   : > { %7214 = vmatprep.subr.bf16.mxu1 %v7213_v33  ;;  %v314_v47 = vld [vmem:[%s7928_s19 + $0x330] sm:$0x7]  ;;  %v253_v50 = vld [vmem:[%s7928_s19 + $0x148] sm:$0xff]  ;;  %v255_v54 = vld [vmem:[%s7928_s19 + $0x158] sm:$0xff] }
  0x1f   : > { %6541 = vmatmul.mubr.msk.f32.vlgmr.msra.gmra.mrb[0].mxu0 %vm340_vm3, %v7959_v28  ;;  %v7220_v55 = vpack.c.bf16 %v314_v47, %v282_v46  ;;  %v220_v56 = vld [vmem:[%s7928_s19 + $0x40] sm:$0xff]  ;;  %v7223_v58 = vpack.c.bf16 %v253_v50, %v221_v49  ;;  %v222_v59 = vld [vmem:[%s7928_s19 + $0x50] sm:$0xff]  ;;  %v7233_v61 = vpack.c.bf16 %v255_v54, %v223_v53  ;;  %v285_v62 = vld [vmem:[%s7928_s19 + $0x248] sm:$0xff] }
  0x20   : > { %6545 = vmatmul.mubr.msk.f32.vlgmr.msra.gmra.mrb[0].mxu1 %vm340_vm3, %v7959_v28  ;;  %7206 = vmatpush1.bf16.msra.mxu0 %v7205_v37  ;;  %v252_v57 = vld [vmem:[%s7928_s19 + $0x140] sm:$0xff]  ;;  %v254_v60 = vld [vmem:[%s7928_s19 + $0x150] sm:$0xff]  ;;  %v317_v63 = vld [vmem:[%s7928_s19 + $0x348] sm:$0x7] }
  0x21   : > { %7216 = vmatpush1.bf16.msra.mxu1 %v7215_v41  ;;  %514 = vmatprep.mubr.f32.mxu0 %v7879_v0  ;;  %v7225_v2 = vpack.c.bf16 %v252_v57, %v220_v56  ;;  %v287_v3 = vld [vmem:[%s7928_s19 + $0x258] sm:$0xff]  ;;  %v7235_v5 = vpack.c.bf16 %v254_v60, %v222_v59  ;;  %v284_v6 = vld [vmem:[%s7928_s19 + $0x240] sm:$0xff]  ;;  %v7227_v8 = vpack.c.bf16 %v317_v63, %v285_v62  ;;  %v286_v9 = vld [vmem:[%s7928_s19 + $0x250] sm:$0xff] }
  0x22   : > { %591 = vmatprep.mubr.f32.mxu1 %v7879_v0  ;;  %7209 = vmatprep.subr.msk.bf16.mxu0 %vm7930_vm2, %v7207_v45  ;;  %v319_v4 = vld [vmem:[%s7928_s19 + $0x358] sm:$0x7]  ;;  %v316_v7 = vld [vmem:[%s7928_s19 + $0x340] sm:$0x7]  ;;  %v318_v10 = vld [vmem:[%s7928_s19 + $0x350] sm:$0x7] }
  0x23   : > { %6542 = vmatmul.mubr.msk.f32.gmra.mrb[2].mxu0 %vm340_vm3, %v7988_v51  ;;  %7219 = vmatprep.subr.msk.bf16.mxu1 %vm7930_vm2, %v7217_v48  ;;  %v7237_v11 = vpack.c.bf16 %v319_v4, %v287_v3  ;;  %v225_v12 = vld [vmem:[%s7928_s19 + $0x68] sm:$0xff]  ;;  %v7230_v14 = vpack.c.bf16 %v316_v7, %v284_v6  ;;  %v227_v15 = vld [vmem:[%s7928_s19 + $0x78] sm:$0xff]  ;;  %v7240_v17 = vpack.c.bf16 %v318_v10, %v286_v9  ;;  %v224_v18 = vld [vmem:[%s7928_s19 + $0x60] sm:$0xff] }
  0x24   : > { %6546 = vmatmul.mubr.msk.f32.gmra.mrb[2].mxu1 %vm340_vm3, %v7988_v51  ;;  %7212 = vmatpush1.bf16.msk.msra.mxu0 %vm7930_vm2, %v7210_v52  ;;  %v257_v13 = vld [vmem:[%s7928_s19 + $0x168] sm:$0xff]  ;;  %v259_v16 = vld [vmem:[%s7928_s19 + $0x178] sm:$0xff]  ;;  %v256_v19 = vld [vmem:[%s7928_s19 + $0x160] sm:$0xff] }
  0x25   : > { %7222 = vmatpush1.bf16.msk.msra.mxu1 %vm7930_vm2, %v7220_v55  ;;  %662 = vmatprep.mubr.f32.mxu0 %v7879_v0  ;;  %v7243_v20 = vpack.c.bf16 %v257_v13, %v225_v12  ;;  %v226_v21 = vld [vmem:[%s7928_s19 + $0x70] sm:$0xff]  ;;  %v7253_v23 = vpack.c.bf16 %v259_v16, %v227_v15  ;;  %v289_v24 = vld [vmem:[%s7928_s19 + $0x268] sm:$0xff]  ;;  %v7245_v26 = vpack.c.bf16 %v256_v19, %v224_v18  ;;  %v291_v27 = vld [vmem:[%s7928_s19 + $0x278] sm:$0xff] }
  0x26   : > { %739 = vmatprep.mubr.f32.mxu1 %v7879_v0  ;;  %7224 = vmatprep.subr.bf16.mxu0 %v7223_v58  ;;  %v258_v22 = vld [vmem:[%s7928_s19 + $0x170] sm:$0xff]  ;;  %v321_v25 = vld [vmem:[%s7928_s19 + $0x368] sm:$0x7]  ;;  %v323_v29 = vld [vmem:[%s7928_s19 + $0x378] sm:$0x7] }
  0x27   : > { %6549 = vmatmul.mubr.msk.f32.vlgmr.msra.gmra.mrb[4].mxu0 %vm340_vm3, %v7959_v28  ;;  %7234 = vmatprep.subr.bf16.mxu1 %v7233_v61  ;;  %v7255_v30 = vpack.c.bf16 %v258_v22, %v226_v21  ;;  %v288_v31 = vld [vmem:[%s7928_s19 + $0x260] sm:$0xff]  ;;  %v7247_v33 = vpack.c.bf16 %v321_v25, %v289_v24  ;;  %v290_v34 = vld [vmem:[%s7928_s19 + $0x270] sm:$0xff]  ;;  %v7257_v36 = vpack.c.bf16 %v323_v29, %v291_v27  ;;  %v229_v37 = vld [vmem:[%s7928_s19 + $0x88] sm:$0xff] }
  0x28   : > { %6553 = vmatmul.mubr.msk.f32.vlgmr.msra.gmra.mrb[4].mxu1 %vm340_vm3, %v7959_v28  ;;  %7226 = vmatpush1.bf16.msra.mxu0 %v7225_v2  ;;  %v320_v32 = vld [vmem:[%s7928_s19 + $0x360] sm:$0x7]  ;;  %v322_v35 = vld [vmem:[%s7928_s19 + $0x370] sm:$0x7]  ;;  %v261_v38 = vld [vmem:[%s7928_s19 + $0x188] sm:$0xff] }
  0x29   : > { %7236 = vmatpush1.bf16.msra.mxu1 %v7235_v5  ;;  %668 = vmatprep.mubr.f32.mxu0 %v7879_v0  ;;  %v7250_v39 = vpack.c.bf16 %v320_v32, %v288_v31  ;;  %v231_v40 = vld [vmem:[%s7928_s19 + $0x98] sm:$0xff]  ;;  %v7260_v42 = vpack.c.bf16 %v322_v35, %v290_v34  ;;  %v228_v43 = vld [vmem:[%s7928_s19 + $0x80] sm:$0xff]  ;;  %v7263_v45 = vpack.c.bf16 %v261_v38, %v229_v37  ;;  %v230_v46 = vld [vmem:[%s7928_s19 + $0x90] sm:$0xff] }
  0x2a   : > { %745 = vmatprep.mubr.f32.mxu1 %v7879_v0  ;;  %7229 = vmatprep.subr.msk.bf16.mxu0 %vm7930_vm2, %v7227_v8  ;;  %v263_v41 = vld [vmem:[%s7928_s19 + $0x198] sm:$0xff]  ;;  %v260_v44 = vld [vmem:[%s7928_s19 + $0x180] sm:$0xff]  ;;  %v262_v47 = vld [vmem:[%s7928_s19 + $0x190] sm:$0xff] }
  0x2b   : > { %6550 = vmatmul.mubr.msk.f32.gmra.mrb[6].mxu0 %vm340_vm3, %v7988_v51  ;;  %7239 = vmatprep.subr.msk.bf16.mxu1 %vm7930_vm2, %v7237_v11  ;;  %v7273_v48 = vpack.c.bf16 %v263_v41, %v231_v40  ;;  %v293_v49 = vld [vmem:[%s7928_s19 + $0x288] sm:$0xff]  ;;  %v7265_v52 = vpack.c.bf16 %v260_v44, %v228_v43  ;;  %v295_v53 = vld [vmem:[%s7928_s19 + $0x298] sm:$0xff]  ;;  %v7275_v55 = vpack.c.bf16 %v262_v47, %v230_v46  ;;  %v292_v56 = vld [vmem:[%s7928_s19 + $0x280] sm:$0xff] }
  0x2c   : > { %6554 = vmatmul.mubr.msk.f32.gmra.mrb[6].mxu1 %vm340_vm3, %v7988_v51  ;;  %7232 = vmatpush1.bf16.msk.msra.mxu0 %vm7930_vm2, %v7230_v14  ;;  %v325_v50 = vld [vmem:[%s7928_s19 + $0x388] sm:$0x7]  ;;  %v327_v54 = vld [vmem:[%s7928_s19 + $0x398] sm:$0x7]  ;;  %v324_v57 = vld [vmem:[%s7928_s19 + $0x380] sm:$0x7] }
  0x2d   : > { %7242 = vmatpush1.bf16.msk.msra.mxu1 %vm7930_vm2, %v7240_v17  ;;  %816 = vmatprep.mubr.f32.mxu0 %v7879_v0  ;;  %v7267_v58 = vpack.c.bf16 %v325_v50, %v293_v49  ;;  %v294_v59 = vld [vmem:[%s7928_s19 + $0x290] sm:$0xff]  ;;  %v7277_v61 = vpack.c.bf16 %v327_v54, %v295_v53  ;;  %v233_v62 = vld [vmem:[%s7928_s19 + $0xa8] sm:$0xff]  ;;  %v7270_v2 = vpack.c.bf16 %v324_v57, %v292_v56  ;;  %v235_v3 = vld [vmem:[%s7928_s19 + $0xb8] sm:$0xff] }
  0x2e   : > { %893 = vmatprep.mubr.f32.mxu1 %v7879_v0  ;;  %7244 = vmatprep.subr.bf16.mxu0 %v7243_v20  ;;  %v326_v60 = vld [vmem:[%s7928_s19 + $0x390] sm:$0x7]  ;;  %v265_v63 = vld [vmem:[%s7928_s19 + $0x1a8] sm:$0xff]  ;;  %v267_v4 = vld [vmem:[%s7928_s19 + $0x1b8] sm:$0xff] }
  0x2f   : > { %6557 = vmatmul.mubr.msk.f32.vlgmr.msra.gmra.mrb[8].mxu0 %vm340_vm3, %v7959_v28  ;;  %7254 = vmatprep.subr.bf16.mxu1 %v7253_v23  ;;  %v7280_v5 = vpack.c.bf16 %v326_v60, %v294_v59  ;;  %v232_v6 = vld [vmem:[%s7928_s19 + $0xa0] sm:$0xff]  ;;  %v7283_v8 = vpack.c.bf16 %v265_v63, %v233_v62  ;;  %v234_v9 = vld [vmem:[%s7928_s19 + $0xb0] sm:$0xff]  ;;  %v7293_v11 = vpack.c.bf16 %v267_v4, %v235_v3  ;;  %v297_v12 = vld [vmem:[%s7928_s19 + $0x2a8] sm:$0xff] }
  0x30   : > { %6561 = vmatmul.mubr.msk.f32.vlgmr.msra.gmra.mrb[8].mxu1 %vm340_vm3, %v7959_v28  ;;  %7246 = vmatpush1.bf16.msra.mxu0 %v7245_v26  ;;  %v264_v7 = vld [vmem:[%s7928_s19 + $0x1a0] sm:$0xff]  ;;  %v266_v10 = vld [vmem:[%s7928_s19 + $0x1b0] sm:$0xff]  ;;  %v329_v13 = vld [vmem:[%s7928_s19 + $0x3a8] sm:$0x7] }
  0x31   : > { %7256 = vmatpush1.bf16.msra.mxu1 %v7255_v30  ;;  %822 = vmatprep.mubr.f32.mxu0 %v7879_v0  ;;  %v7285_v14 = vpack.c.bf16 %v264_v7, %v232_v6  ;;  %v299_v15 = vld [vmem:[%s7928_s19 + $0x2b8] sm:$0xff]  ;;  %v7295_v17 = vpack.c.bf16 %v266_v10, %v234_v9  ;;  %v296_v18 = vld [vmem:[%s7928_s19 + $0x2a0] sm:$0xff]  ;;  %v7287_v20 = vpack.c.bf16 %v329_v13, %v297_v12  ;;  %v298_v21 = vld [vmem:[%s7928_s19 + $0x2b0] sm:$0xff] }
  0x32   : > { %899 = vmatprep.mubr.f32.mxu1 %v7879_v0  ;;  %7249 = vmatprep.subr.msk.bf16.mxu0 %vm7930_vm2, %v7247_v33  ;;  %v331_v16 = vld [vmem:[%s7928_s19 + $0x3b8] sm:$0x7]  ;;  %v328_v19 = vld [vmem:[%s7928_s19 + $0x3a0] sm:$0x7]  ;;  %v330_v22 = vld [vmem:[%s7928_s19 + $0x3b0] sm:$0x7] }
  0x33   : > { %6558 = vmatmul.mubr.msk.f32.gmra.mrb[10].mxu0 %vm340_vm3, %v7988_v51  ;;  %7259 = vmatprep.subr.msk.bf16.mxu1 %vm7930_vm2, %v7257_v36  ;;  %v7297_v23 = vpack.c.bf16 %v331_v16, %v299_v15  ;;  %v237_v24 = vld [vmem:[%s7928_s19 + $0xc8] sm:$0xff]  ;;  %v7290_v26 = vpack.c.bf16 %v328_v19, %v296_v18  ;;  %v239_v27 = vld [vmem:[%s7928_s19 + $0xd8] sm:$0xff]  ;;  %v7300_v30 = vpack.c.bf16 %v330_v22, %v298_v21  ;;  %v236_v31 = vld [vmem:[%s7928_s19 + $0xc0] sm:$0xff] }
  0x34   : > { %6562 = vmatmul.mubr.msk.f32.gmra.mrb[10].mxu1 %vm340_vm3, %v7988_v51  ;;  %7252 = vmatpush1.bf16.msk.msra.mxu0 %vm7930_vm2, %v7250_v39  ;;  %v269_v25 = vld [vmem:[%s7928_s19 + $0x1c8] sm:$0xff]  ;;  %v271_v29 = vld [vmem:[%s7928_s19 + $0x1d8] sm:$0xff]  ;;  %v268_v32 = vld [vmem:[%s7928_s19 + $0x1c0] sm:$0xff] }
  0x35   : > { %7262 = vmatpush1.bf16.msk.msra.mxu1 %vm7930_vm2, %v7260_v42  ;;  %970 = vmatprep.mubr.f32.mxu0 %v7879_v0  ;;  %v7303_v33 = vpack.c.bf16 %v269_v25, %v237_v24  ;;  %v238_v34 = vld [vmem:[%s7928_s19 + $0xd0] sm:$0xff]  ;;  %v7313_v36 = vpack.c.bf16 %v271_v29, %v239_v27  ;;  %v301_v37 = vld [vmem:[%s7928_s19 + $0x2c8] sm:$0xff]  ;;  %v7305_v39 = vpack.c.bf16 %v268_v32, %v236_v31  ;;  %v303_v40 = vld [vmem:[%s7928_s19 + $0x2d8] sm:$0xff] }
  0x36   : > { %1047 = vmatprep.mubr.f32.mxu1 %v7879_v0  ;;  %7264 = vmatprep.subr.bf16.mxu0 %v7263_v45  ;;  %v270_v35 = vld [vmem:[%s7928_s19 + $0x1d0] sm:$0xff]  ;;  %v333_v38 = vld [vmem:[%s7928_s19 + $0x3c8] sm:$0x7]  ;;  %v335_v41 = vld [vmem:[%s7928_s19 + $0x3d8] sm:$0x7] }
  0x37   : > { %6565 = vmatmul.mubr.msk.f32.vlgmr.msra.gmra.mrb[12].mxu0 %vm340_vm3, %v7959_v28  ;;  %7274 = vmatprep.subr.bf16.mxu1 %v7273_v48  ;;  %v7315_v42 = vpack.c.bf16 %v270_v35, %v238_v34  ;;  %v300_v43 = vld [vmem:[%s7928_s19 + $0x2c0] sm:$0xff]  ;;  %v7307_v45 = vpack.c.bf16 %v333_v38, %v301_v37  ;;  %v302_v46 = vld [vmem:[%s7928_s19 + $0x2d0] sm:$0xff]  ;;  %v7317_v48 = vpack.c.bf16 %v335_v41, %v303_v40  ;;  %v241_v49 = vld [vmem:[%s7928_s19 + $0xe8] sm:$0xff] }
  0x38   : > { %6569 = vmatmul.mubr.msk.f32.vlgmr.msra.gmra.mrb[12].mxu1 %vm340_vm3, %v7959_v28  ;;  %7266 = vmatpush1.bf16.msra.mxu0 %v7265_v52  ;;  %v332_v44 = vld [vmem:[%s7928_s19 + $0x3c0] sm:$0x7]  ;;  %v334_v47 = vld [vmem:[%s7928_s19 + $0x3d0] sm:$0x7]  ;;  %v273_v50 = vld [vmem:[%s7928_s19 + $0x1e8] sm:$0xff] }
  0x39   : > { %7276 = vmatpush1.bf16.msra.mxu1 %v7275_v55  ;;  %976 = vmatprep.mubr.f32.mxu0 %v7879_v0  ;;  %v7310_v52 = vpack.c.bf16 %v332_v44, %v300_v43  ;;  %v243_v53 = vld [vmem:[%s7928_s19 + $0xf8] sm:$0xff]  ;;  %v7320_v55 = vpack.c.bf16 %v334_v47, %v302_v46  ;;  %v240_v56 = vld [vmem:[%s7928_s19 + $0xe0] sm:$0xff]  ;;  %v242_v59 = vld [vmem:[%s7928_s19 + $0xf0] sm:$0xff] }
  0x3a   : > { %1053 = vmatprep.mubr.f32.mxu1 %v7879_v0  ;;  %7269 = vmatprep.subr.msk.bf16.mxu0 %vm7930_vm2, %v7267_v58  ;;  %v275_v54 = vld [vmem:[%s7928_s19 + $0x1f8] sm:$0xff]  ;;  %v272_v57 = vld [vmem:[%s7928_s19 + $0x1e0] sm:$0xff]  ;;  %v7323_v58 = vpack.c.bf16 %v273_v50, %v241_v49  ;;  %v274_v60 = vld [vmem:[%s7928_s19 + $0x1f0] sm:$0xff] }
  0x3b   : > { %6566 = vmatmul.mubr.msk.f32.gmra.mrb[14].mxu0 %vm340_vm3, %v7988_v51  ;;  %7279 = vmatprep.subr.msk.bf16.mxu1 %vm7930_vm2, %v7277_v61  ;;  %v7333_v61 = vpack.c.bf16 %v275_v54, %v243_v53  ;;  %v305_v62 = vld [vmem:[%s7928_s19 + $0x2e8] sm:$0xff]  ;;  %v307_v3 = vld [vmem:[%s7928_s19 + $0x2f8] sm:$0xff]  ;;  %v304_v6 = vld [vmem:[%s7928_s19 + $0x2e0] sm:$0xff] }
  0x3c   : > { %6570 = vmatmul.mubr.msk.f32.gmra.mrb[14].mxu1 %vm340_vm3, %v7988_v51  ;;  %7272 = vmatpush1.bf16.msk.msra.mxu0 %vm7930_vm2, %v7270_v2  ;;  %v337_v63 = vld [vmem:[%s7928_s19 + $0x3e8] sm:$0x7]  ;;  %v7325_v2 = vpack.c.bf16 %v272_v57, %v240_v56  ;;  %v339_v4 = vld [vmem:[%s7928_s19 + $0x3f8] sm:$0x7]  ;;  %v336_v7 = vld [vmem:[%s7928_s19 + $0x3e0] sm:$0x7] }
  0x3d   : > { %7282 = vmatpush1.bf16.msk.msra.mxu1 %vm7930_vm2, %v7280_v5  ;;  %1124 = vmatprep.mubr.f32.mxu0 %v7879_v0  ;;  %v7335_v5 = vpack.c.bf16 %v274_v60, %v242_v59  ;;  %v306_v9 = vld [vmem:[%s7928_s19 + $0x2f0] sm:$0xff]  ;;  %v6604_v12 = vld [vmem:[%s7928_s19 + $0x408] sm:$0xff]  ;;  %v6606_v15 = vld [vmem:[%s7928_s19 + $0x418] sm:$0xff] }
  0x3e   : > { %1201 = vmatprep.mubr.f32.mxu1 %v7879_v0  ;;  %7284 = vmatprep.subr.bf16.mxu0 %v7283_v8  ;;  %v7327_v8 = vpack.c.bf16 %v337_v63, %v305_v62  ;;  %v338_v10 = vld [vmem:[%s7928_s19 + $0x3f0] sm:$0x7]  ;;  %v6636_v13 = vld [vmem:[%s7928_s19 + $0x508] sm:$0xff]  ;;  %v6638_v16 = vld [vmem:[%s7928_s19 + $0x518] sm:$0xff] }
  0x3f   : > { %6573 = vmatmul.mubr.msk.f32.vlgmr.msra.gmra.mrb[16].mxu0 %vm340_vm3, %v7959_v28  ;;  %7294 = vmatprep.subr.bf16.mxu1 %v7293_v11  ;;  %v7337_v11 = vpack.c.bf16 %v339_v4, %v307_v3  ;;  %v6603_v18 = vld [vmem:[%s7928_s19 + $0x400] sm:$0xff]  ;;  %v6605_v21 = vld [vmem:[%s7928_s19 + $0x410] sm:$0xff]  ;;  %v6668_v24 = vld [vmem:[%s7928_s19 + $0x608] sm:$0xff] }
  0x40   : > { %6577 = vmatmul.mubr.msk.f32.vlgmr.msra.gmra.mrb[16].mxu1 %vm340_vm3, %v7959_v28  ;;  %7286 = vmatpush1.bf16.msra.mxu0 %v7285_v14  ;;  %v7330_v14 = vpack.c.bf16 %v336_v7, %v304_v6  ;;  %v6635_v19 = vld [vmem:[%s7928_s19 + $0x500] sm:$0xff]  ;;  %v6637_v22 = vld [vmem:[%s7928_s19 + $0x510] sm:$0xff]  ;;  %v6700_v25 = vld [vmem:[%s7928_s19 + $0x708] sm:$0x7] }
  0x41   : > { %7296 = vmatpush1.bf16.msra.mxu1 %v7295_v17  ;;  %1130 = vmatprep.mubr.f32.mxu0 %v7879_v0  ;;  %v7340_v17 = vpack.c.bf16 %v338_v10, %v306_v9  ;;  %v6670_v27 = vld [vmem:[%s7928_s19 + $0x618] sm:$0xff]  ;;  %v6667_v31 = vld [vmem:[%s7928_s19 + $0x600] sm:$0xff]  ;;  %v6669_v34 = vld [vmem:[%s7928_s19 + $0x610] sm:$0xff] }
  0x42   : > { %1207 = vmatprep.mubr.f32.mxu1 %v7879_v0  ;;  %7289 = vmatprep.subr.msk.bf16.mxu0 %vm7930_vm2, %v7287_v20  ;;  %v7343_v20 = vpack.c.bf16 %v6636_v13, %v6604_v12  ;;  %v6702_v29 = vld [vmem:[%s7928_s19 + $0x718] sm:$0x7]  ;;  %v6699_v32 = vld [vmem:[%s7928_s19 + $0x700] sm:$0x7]  ;;  %v6701_v35 = vld [vmem:[%s7928_s19 + $0x710] sm:$0x7] }
  0x43   : > { %6574 = vmatmul.mubr.msk.f32.gmra.mrb[18].mxu0 %vm340_vm3, %v7988_v51  ;;  %7299 = vmatprep.subr.msk.bf16.mxu1 %vm7930_vm2, %v7297_v23  ;;  %v7353_v23 = vpack.c.bf16 %v6638_v16, %v6606_v15  ;;  %v6608_v37 = vld [vmem:[%s7928_s19 + $0x428] sm:$0xff]  ;;  %v6610_v40 = vld [vmem:[%s7928_s19 + $0x438] sm:$0xff]  ;;  %v6607_v43 = vld [vmem:[%s7928_s19 + $0x420] sm:$0xff] }
  0x44   : > { %6578 = vmatmul.mubr.msk.f32.gmra.mrb[18].mxu1 %vm340_vm3, %v7988_v51  ;;  %7292 = vmatpush1.bf16.msk.msra.mxu0 %vm7930_vm2, %v7290_v26  ;;  %v7345_v26 = vpack.c.bf16 %v6635_v19, %v6603_v18  ;;  %v6640_v38 = vld [vmem:[%s7928_s19 + $0x528] sm:$0xff]  ;;  %v6642_v41 = vld [vmem:[%s7928_s19 + $0x538] sm:$0xff]  ;;  %v6639_v44 = vld [vmem:[%s7928_s19 + $0x520] sm:$0xff] }
  0x45   : > { %7302 = vmatpush1.bf16.msk.msra.mxu1 %vm7930_vm2, %v7300_v30  ;;  %1278 = vmatprep.mubr.f32.mxu0 %v7879_v0  ;;  %v7355_v30 = vpack.c.bf16 %v6637_v22, %v6605_v21  ;;  %v6609_v46 = vld [vmem:[%s7928_s19 + $0x430] sm:$0xff]  ;;  %v6672_v49 = vld [vmem:[%s7928_s19 + $0x628] sm:$0xff]  ;;  %v6674_v53 = vld [vmem:[%s7928_s19 + $0x638] sm:$0xff] }
  0x46   : > { %1355 = vmatprep.mubr.f32.mxu1 %v7879_v0  ;;  %7304 = vmatprep.subr.bf16.mxu0 %v7303_v33  ;;  %v7347_v33 = vpack.c.bf16 %v6700_v25, %v6668_v24  ;;  %v6641_v47 = vld [vmem:[%s7928_s19 + $0x530] sm:$0xff]  ;;  %v6704_v50 = vld [vmem:[%s7928_s19 + $0x728] sm:$0x7]  ;;  %v6706_v54 = vld [vmem:[%s7928_s19 + $0x738] sm:$0x7] }
  0x47   : > { %6581 = vmatmul.mubr.msk.f32.vlgmr.msra.gmra.mrb[20].mxu0 %vm340_vm3, %v7959_v28  ;;  %7314 = vmatprep.subr.bf16.mxu1 %v7313_v36  ;;  %v7357_v36 = vpack.c.bf16 %v6702_v29, %v6670_v27  ;;  %v6671_v56 = vld [vmem:[%s7928_s19 + $0x620] sm:$0xff]  ;;  %v6673_v59 = vld [vmem:[%s7928_s19 + $0x630] sm:$0xff]  ;;  %v6612_v62 = vld [vmem:[%s7928_s19 + $0x448] sm:$0xff] }
  0x48   : > { %6585 = vmatmul.mubr.msk.f32.vlgmr.msra.gmra.mrb[20].mxu1 %vm340_vm3, %v7959_v28  ;;  %7306 = vmatpush1.bf16.msra.mxu0 %v7305_v39  ;;  %v7350_v39 = vpack.c.bf16 %v6699_v32, %v6667_v31  ;;  %v6703_v57 = vld [vmem:[%s7928_s19 + $0x720] sm:$0x7]  ;;  %v6705_v60 = vld [vmem:[%s7928_s19 + $0x730] sm:$0x7]  ;;  %v6644_v63 = vld [vmem:[%s7928_s19 + $0x548] sm:$0xff] }
  0x49   : > { %7316 = vmatpush1.bf16.msra.mxu1 %v7315_v42  ;;  %1284 = vmatprep.mubr.f32.mxu0 %v7879_v0  ;;  %v7360_v42 = vpack.c.bf16 %v6701_v35, %v6669_v34  ;;  %v6614_v3 = vld [vmem:[%s7928_s19 + $0x458] sm:$0xff]  ;;  %v6611_v6 = vld [vmem:[%s7928_s19 + $0x440] sm:$0xff]  ;;  %v6613_v9 = vld [vmem:[%s7928_s19 + $0x450] sm:$0xff] }
  0x4a   : > { %1361 = vmatprep.mubr.f32.mxu1 %v7879_v0  ;;  %7309 = vmatprep.subr.msk.bf16.mxu0 %vm7930_vm2, %v7307_v45  ;;  %v7363_v45 = vpack.c.bf16 %v6640_v38, %v6608_v37  ;;  %v6646_v4 = vld [vmem:[%s7928_s19 + $0x558] sm:$0xff]  ;;  %v6643_v7 = vld [vmem:[%s7928_s19 + $0x540] sm:$0xff]  ;;  %v6645_v10 = vld [vmem:[%s7928_s19 + $0x550] sm:$0xff] }
  0x4b   : > { %6582 = vmatmul.mubr.msk.f32.gmra.mrb[22].mxu0 %vm340_vm3, %v7988_v51  ;;  %7319 = vmatprep.subr.msk.bf16.mxu1 %vm7930_vm2, %v7317_v48  ;;  %v7373_v48 = vpack.c.bf16 %v6642_v41, %v6610_v40  ;;  %v6676_v12 = vld [vmem:[%s7928_s19 + $0x648] sm:$0xff]  ;;  %v6678_v15 = vld [vmem:[%s7928_s19 + $0x658] sm:$0xff]  ;;  %v6675_v18 = vld [vmem:[%s7928_s19 + $0x640] sm:$0xff] }
  0x4c   : > { %6586 = vmatmul.mubr.msk.f32.gmra.mrb[22].mxu1 %vm340_vm3, %v7988_v51  ;;  %7312 = vmatpush1.bf16.msk.msra.mxu0 %vm7930_vm2, %v7310_v52  ;;  %v7365_v52 = vpack.c.bf16 %v6639_v44, %v6607_v43  ;;  %v6708_v13 = vld [vmem:[%s7928_s19 + $0x748] sm:$0x7]  ;;  %v6710_v16 = vld [vmem:[%s7928_s19 + $0x758] sm:$0x7]  ;;  %v6707_v19 = vld [vmem:[%s7928_s19 + $0x740] sm:$0x7] }
  0x4d   : > { %7322 = vmatpush1.bf16.msk.msra.mxu1 %vm7930_vm2, %v7320_v55  ;;  %1432 = vmatprep.mubr.f32.mxu0 %v7879_v0  ;;  %v7375_v55 = vpack.c.bf16 %v6641_v47, %v6609_v46  ;;  %v6677_v21 = vld [vmem:[%s7928_s19 + $0x650] sm:$0xff]  ;;  %v6616_v24 = vld [vmem:[%s7928_s19 + $0x468] sm:$0xff]  ;;  %v6618_v27 = vld [vmem:[%s7928_s19 + $0x478] sm:$0xff] }
  0x4e   : > { %1509 = vmatprep.mubr.f32.mxu1 %v7879_v0  ;;  %7324 = vmatprep.subr.bf16.mxu0 %v7323_v58  ;;  %v7367_v58 = vpack.c.bf16 %v6704_v50, %v6672_v49  ;;  %v6709_v22 = vld [vmem:[%s7928_s19 + $0x750] sm:$0x7]  ;;  %v6648_v25 = vld [vmem:[%s7928_s19 + $0x568] sm:$0xff]  ;;  %v6650_v29 = vld [vmem:[%s7928_s19 + $0x578] sm:$0xff] }
  0x4f   : > { %6589 = vmatmul.mubr.msk.f32.vlgmr.msra.gmra.mrb[24].mxu0 %vm340_vm3, %v7959_v28  ;;  %7334 = vmatprep.subr.bf16.mxu1 %v7333_v61  ;;  %v7377_v61 = vpack.c.bf16 %v6706_v54, %v6674_v53  ;;  %v6615_v31 = vld [vmem:[%s7928_s19 + $0x460] sm:$0xff]  ;;  %v6617_v34 = vld [vmem:[%s7928_s19 + $0x470] sm:$0xff]  ;;  %v6680_v37 = vld [vmem:[%s7928_s19 + $0x668] sm:$0xff] }
  0x50   : > { %6593 = vmatmul.mubr.msk.f32.vlgmr.msra.gmra.mrb[24].mxu1 %vm340_vm3, %v7959_v28  ;;  %7326 = vmatpush1.bf16.msra.mxu0 %v7325_v2  ;;  %v7370_v2 = vpack.c.bf16 %v6703_v57, %v6671_v56  ;;  %v6647_v32 = vld [vmem:[%s7928_s19 + $0x560] sm:$0xff]  ;;  %v6649_v35 = vld [vmem:[%s7928_s19 + $0x570] sm:$0xff]  ;;  %v6712_v38 = vld [vmem:[%s7928_s19 + $0x768] sm:$0x7] }
  0x51   : > { %7336 = vmatpush1.bf16.msra.mxu1 %v7335_v5  ;;  %1438 = vmatprep.mubr.f32.mxu0 %v7879_v0  ;;  %v7380_v5 = vpack.c.bf16 %v6705_v60, %v6673_v59  ;;  %v6682_v40 = vld [vmem:[%s7928_s19 + $0x678] sm:$0xff]  ;;  %v6679_v43 = vld [vmem:[%s7928_s19 + $0x660] sm:$0xff]  ;;  %v6681_v46 = vld [vmem:[%s7928_s19 + $0x670] sm:$0xff] }
  0x52   : > { %1515 = vmatprep.mubr.f32.mxu1 %v7879_v0  ;;  %7329 = vmatprep.subr.msk.bf16.mxu0 %vm7930_vm2, %v7327_v8  ;;  %v7383_v8 = vpack.c.bf16 %v6644_v63, %v6612_v62  ;;  %v6714_v41 = vld [vmem:[%s7928_s19 + $0x778] sm:$0x7]  ;;  %v6711_v44 = vld [vmem:[%s7928_s19 + $0x760] sm:$0x7]  ;;  %v6713_v47 = vld [vmem:[%s7928_s19 + $0x770] sm:$0x7] }
  0x53   : > { %6590 = vmatmul.mubr.msk.f32.gmra.mrb[26].mxu0 %vm340_vm3, %v7988_v51  ;;  %7339 = vmatprep.subr.msk.bf16.mxu1 %vm7930_vm2, %v7337_v11  ;;  %v7393_v11 = vpack.c.bf16 %v6646_v4, %v6614_v3  ;;  %v6620_v49 = vld [vmem:[%s7928_s19 + $0x488] sm:$0xff]  ;;  %v6622_v53 = vld [vmem:[%s7928_s19 + $0x498] sm:$0xff]  ;;  %v6619_v56 = vld [vmem:[%s7928_s19 + $0x480] sm:$0xff] }
  0x54   : > { %6594 = vmatmul.mubr.msk.f32.gmra.mrb[26].mxu1 %vm340_vm3, %v7988_v51  ;;  %7332 = vmatpush1.bf16.msk.msra.mxu0 %vm7930_vm2, %v7330_v14  ;;  %v7385_v14 = vpack.c.bf16 %v6643_v7, %v6611_v6  ;;  %v6652_v50 = vld [vmem:[%s7928_s19 + $0x588] sm:$0xff]  ;;  %v6654_v54 = vld [vmem:[%s7928_s19 + $0x598] sm:$0xff]  ;;  %v6651_v57 = vld [vmem:[%s7928_s19 + $0x580] sm:$0xff] }
  0x55   : > { %7342 = vmatpush1.bf16.msk.msra.mxu1 %vm7930_vm2, %v7340_v17  ;;  %1586 = vmatprep.mubr.f32.mxu0 %v7879_v0  ;;  %v7395_v17 = vpack.c.bf16 %v6645_v10, %v6613_v9  ;;  %v6621_v59 = vld [vmem:[%s7928_s19 + $0x490] sm:$0xff]  ;;  %v6684_v62 = vld [vmem:[%s7928_s19 + $0x688] sm:$0xff]  ;;  %v6686_v3 = vld [vmem:[%s7928_s19 + $0x698] sm:$0xff] }
  0x56   : > { %1663 = vmatprep.mubr.f32.mxu1 %v7879_v0  ;;  %7344 = vmatprep.subr.bf16.mxu0 %v7343_v20  ;;  %v7387_v20 = vpack.c.bf16 %v6708_v13, %v6676_v12  ;;  %v6653_v60 = vld [vmem:[%s7928_s19 + $0x590] sm:$0xff]  ;;  %v6716_v63 = vld [vmem:[%s7928_s19 + $0x788] sm:$0x7]  ;;  %v6718_v4 = vld [vmem:[%s7928_s19 + $0x798] sm:$0x7] }
  0x57   : > { %6597 = vmatmul.mubr.msk.f32.vlgmr.msra.gmra.mrb[28].mxu0 %vm340_vm3, %v7959_v28  ;;  %7354 = vmatprep.subr.bf16.mxu1 %v7353_v23  ;;  %v7397_v23 = vpack.c.bf16 %v6710_v16, %v6678_v15  ;;  %v6683_v6 = vld [vmem:[%s7928_s19 + $0x680] sm:$0xff]  ;;  %v6685_v9 = vld [vmem:[%s7928_s19 + $0x690] sm:$0xff]  ;;  %v6624_v12 = vld [vmem:[%s7928_s19 + $0x4a8] sm:$0xff] }
  0x58   : > { %6601 = vmatmul.mubr.msk.f32.vlgmr.msra.gmra.mrb[28].mxu1 %vm340_vm3, %v7959_v28  ;;  %7346 = vmatpush1.bf16.msra.mxu0 %v7345_v26  ;;  %v7390_v26 = vpack.c.bf16 %v6707_v19, %v6675_v18  ;;  %v6715_v7 = vld [vmem:[%s7928_s19 + $0x780] sm:$0x7]  ;;  %v6717_v10 = vld [vmem:[%s7928_s19 + $0x790] sm:$0x7]  ;;  %v6656_v13 = vld [vmem:[%s7928_s19 + $0x5a8] sm:$0xff] }
  0x59   : > { %7356 = vmatpush1.bf16.msra.mxu1 %v7355_v30  ;;  %1592 = vmatprep.mubr.f32.mxu0 %v7879_v0  ;;  %v7400_v30 = vpack.c.bf16 %v6709_v22, %v6677_v21  ;;  %v6626_v15 = vld [vmem:[%s7928_s19 + $0x4b8] sm:$0xff]  ;;  %v6623_v18 = vld [vmem:[%s7928_s19 + $0x4a0] sm:$0xff]  ;;  %v6625_v21 = vld [vmem:[%s7928_s19 + $0x4b0] sm:$0xff] }
  0x5a   : > { %1669 = vmatprep.mubr.f32.mxu1 %v7879_v0  ;;  %7349 = vmatprep.subr.msk.bf16.mxu0 %vm7930_vm2, %v7347_v33  ;;  %v7403_v33 = vpack.c.bf16 %v6648_v25, %v6616_v24  ;;  %v6658_v16 = vld [vmem:[%s7928_s19 + $0x5b8] sm:$0xff]  ;;  %v6655_v19 = vld [vmem:[%s7928_s19 + $0x5a0] sm:$0xff]  ;;  %v6657_v22 = vld [vmem:[%s7928_s19 + $0x5b0] sm:$0xff] }
  0x5b   : > { %6598 = vmatmul.mubr.msk.f32.gmra.mrb[30].mxu0 %vm340_vm3, %v7988_v51  ;;  %7359 = vmatprep.subr.msk.bf16.mxu1 %vm7930_vm2, %v7357_v36  ;;  %v7413_v36 = vpack.c.bf16 %v6650_v29, %v6618_v27  ;;  %v6688_v24 = vld [vmem:[%s7928_s19 + $0x6a8] sm:$0xff]  ;;  %v6690_v27 = vld [vmem:[%s7928_s19 + $0x6b8] sm:$0xff] }
  0x5c   : > { %6602 = vmatmul.mubr.msk.f32.gmra.mrb[30].mxu1 %vm340_vm3, %v7988_v51  ;;  %7352 = vmatpush1.bf16.msk.msra.mxu0 %vm7930_vm2, %v7350_v39  ;;  %v7405_v39 = vpack.c.bf16 %v6647_v32, %v6615_v31  ;;  %v6720_v25 = vld [vmem:[%s7928_s19 + $0x7a8] sm:$0x7]  ;;  %v6722_v29 = vld [vmem:[%s7928_s19 + $0x7b8] sm:$0x7]  ;;  %v6687_v31 = vld [vmem:[%s7928_s19 + $0x6a0] sm:$0xff] }
  0x5d   : > { %7362 = vmatpush1.bf16.msk.msra.mxu1 %vm7930_vm2, %v7360_v42  ;;  %1965 = vmatprep.mubr.f32.mxu0 %v7879_v0  ;;  %v7415_v42 = vpack.c.bf16 %v6649_v35, %v6617_v34  ;;  %v6719_v32 = vld [vmem:[%s7928_s19 + $0x7a0] sm:$0x7]  ;;  %v6689_v34 = vld [vmem:[%s7928_s19 + $0x6b0] sm:$0xff] }
  0x5e   : > { %2042 = vmatprep.mubr.f32.mxu1 %v7879_v0  ;;  %7364 = vmatprep.subr.bf16.mxu0 %v7363_v45  ;;  %v7407_v45 = vpack.c.bf16 %v6712_v38, %v6680_v37  ;;  %v6721_v35 = vld [vmem:[%s7928_s19 + $0x7b0] sm:$0x7]  ;;  %v6628_v37 = vld [vmem:[%s7928_s19 + $0x4c8] sm:$0xff] }
  0x5f   : > { %6733 = vmatmul.mubr.msk.f32.vlgmr.msra.gmra.mrb[32].mxu0 %vm340_vm3, %v7959_v28  ;;  %7374 = vmatprep.subr.bf16.mxu1 %v7373_v48  ;;  %v7417_v48 = vpack.c.bf16 %v6714_v41, %v6682_v40  ;;  %v6660_v38 = vld [vmem:[%s7928_s19 + $0x5c8] sm:$0xff]  ;;  %v6630_v40 = vld [vmem:[%s7928_s19 + $0x4d8] sm:$0xff] }
  0x60   : > { %6737 = vmatmul.mubr.msk.f32.vlgmr.msra.gmra.mrb[32].mxu1 %vm340_vm3, %v7959_v28  ;;  %7366 = vmatpush1.bf16.msra.mxu0 %v7365_v52  ;;  %v7410_v52 = vpack.c.bf16 %v6711_v44, %v6679_v43  ;;  %v6662_v41 = vld [vmem:[%s7928_s19 + $0x5d8] sm:$0xff]  ;;  %v6627_v43 = vld [vmem:[%s7928_s19 + $0x4c0] sm:$0xff] }
  0x61   : > { %7376 = vmatpush1.bf16.msra.mxu1 %v7375_v55  ;;  %1971 = vmatprep.mubr.f32.mxu0 %v7879_v0  ;;  %v7420_v55 = vpack.c.bf16 %v6713_v47, %v6681_v46  ;;  %v6659_v44 = vld [vmem:[%s7928_s19 + $0x5c0] sm:$0xff]  ;;  %v6661_v46 = vld [vmem:[%s7928_s19 + $0x5d0] sm:$0xff]  ;;  %v7473_v47 = vpack.c.bf16 %v6662_v41, %v6630_v40  ;;  %v6862_v40 = vld [vmem:[%s7928_s19 + $0xa18] sm:$0xff] }
  0x62   : > { %2048 = vmatprep.mubr.f32.mxu1 %v7879_v0  ;;  %7369 = vmatprep.subr.msk.bf16.mxu0 %vm7930_vm2, %v7367_v58  ;;  %v7423_v58 = vpack.c.bf16 %v6652_v50, %v6620_v49  ;;  %v6724_v49 = vld [vmem:[%s7928_s19 + $0x7c8] sm:$0x7]  ;;  %v7465_v50 = vpack.c.bf16 %v6659_v44, %v6627_v43  ;;  %v6894_v41 = vld [vmem:[%s7928_s19 + $0xb18] sm:$0x7]  ;;  %v6859_v43 = vld [vmem:[%s7928_s19 + $0xa00] sm:$0xff] }
  0x63   : > { %6734 = vmatmul.mubr.msk.f32.gmra.mrb[34].mxu0 %vm340_vm3, %v7988_v51  ;;  %7379 = vmatprep.subr.msk.bf16.mxu1 %vm7930_vm2, %v7377_v61  ;;  %v7433_v61 = vpack.c.bf16 %v6654_v54, %v6622_v53  ;;  %v6726_v53 = vld [vmem:[%s7928_s19 + $0x7d8] sm:$0x7]  ;;  %v6891_v44 = vld [vmem:[%s7928_s19 + $0xb00] sm:$0x7] }
  0x64   : > { %6738 = vmatmul.mubr.msk.f32.gmra.mrb[34].mxu1 %vm340_vm3, %v7988_v51  ;;  %7372 = vmatpush1.bf16.msk.msra.mxu0 %vm7930_vm2, %v7370_v2  ;;  %v7425_v2 = vpack.c.bf16 %v6651_v57, %v6619_v56  ;;  %v6723_v56 = vld [vmem:[%s7928_s19 + $0x7c0] sm:$0x7]  ;;  %v6693_v57 = vld [vmem:[%s7928_s19 + $0x6d0] sm:$0xff] }
  0x65   : > { %7382 = vmatpush1.bf16.msk.msra.mxu1 %vm7930_vm2, %v7380_v5  ;;  %2119 = vmatprep.mubr.f32.mxu0 %v7879_v0  ;;  %v7435_v5 = vpack.c.bf16 %v6653_v60, %v6621_v59  ;;  %v8455_v59 = vld [vmem:[%s10036_s1] sm:$0xff] }
  0x66   : > { %2196 = vmatprep.mubr.f32.mxu1 %v7879_v0  ;;  %7384 = vmatprep.subr.bf16.mxu0 %v7383_v8  ;;  %v7427_v8 = vpack.c.bf16 %v6716_v63, %v6684_v62  ;;  %v6664_v62 = vld [vmem:[%s7928_s19 + $0x5e8] sm:$0xff] }
  0x67   : > { %6741 = vmatmul.mubr.msk.f32.vlgmr.msra.gmra.mrb[36].mxu0 %vm340_vm3, %v7959_v28  ;;  %7394 = vmatprep.subr.bf16.mxu1 %v7393_v11  ;;  %v7437_v11 = vpack.c.bf16 %v6718_v4, %v6686_v3  ;;  %v6666_v3 = vld [vmem:[%s7928_s19 + $0x5f8] sm:$0xff] }
  0x68   : > { %6745 = vmatmul.mubr.msk.f32.vlgmr.msra.gmra.mrb[36].mxu1 %vm340_vm3, %v7959_v28  ;;  %7386 = vmatpush1.bf16.msra.mxu0 %v7385_v14  ;;  %v7430_v14 = vpack.c.bf16 %v6715_v7, %v6683_v6  ;;  %v6663_v6 = vld [vmem:[%s7928_s19 + $0x5e0] sm:$0xff] }
  0x69   : > { %7396 = vmatpush1.bf16.msra.mxu1 %v7395_v17  ;;  %2125 = vmatprep.mubr.f32.mxu0 %v7879_v0  ;;  %v7440_v17 = vpack.c.bf16 %v6717_v10, %v6685_v9  ;;  %v6665_v9 = vld [vmem:[%s7928_s19 + $0x5f0] sm:$0xff]  ;;  %v8476_v10 = vld [vmem:[%s10036_s1 + $0x8] sm:$0xff] }
  0x6a   : > { %2202 = vmatprep.mubr.f32.mxu1 %v7879_v0  ;;  %7389 = vmatprep.subr.msk.bf16.mxu0 %vm7930_vm2, %v7387_v20  ;;  %v7443_v20 = vpack.c.bf16 %v6656_v13, %v6624_v12  ;;  %v6696_v12 = vld [vmem:[%s7928_s19 + $0x6e8] sm:$0xff] }
  0x6b   : > { %6742 = vmatmul.mubr.msk.f32.gmra.mrb[38].mxu0 %vm340_vm3, %v7988_v51  ;;  %7399 = vmatprep.subr.msk.bf16.mxu1 %vm7930_vm2, %v7397_v23  ;;  %v7453_v23 = vpack.c.bf16 %v6658_v16, %v6626_v15  ;;  %v6728_v13 = vld [vmem:[%s7928_s19 + $0x7e8] sm:$0x7]  ;;  %v6698_v15 = vld [vmem:[%s7928_s19 + $0x6f8] sm:$0xff] }
  0x6c   : > { %6746 = vmatmul.mubr.msk.f32.gmra.mrb[38].mxu1 %vm340_vm3, %v7988_v51  ;;  %7392 = vmatpush1.bf16.msk.msra.mxu0 %vm7930_vm2, %v7390_v26  ;;  %v7445_v26 = vpack.c.bf16 %v6655_v19, %v6623_v18  ;;  %v6730_v16 = vld [vmem:[%s7928_s19 + $0x7f8] sm:$0x7]  ;;  %v6695_v18 = vld [vmem:[%s7928_s19 + $0x6e0] sm:$0xff] }
  0x6d   : > { %7402 = vmatpush1.bf16.msk.msra.mxu1 %vm7930_vm2, %v7400_v30  ;;  %2273 = vmatprep.mubr.f32.mxu0 %v7879_v0  ;;  %v7455_v30 = vpack.c.bf16 %v6657_v22, %v6625_v21  ;;  %v6727_v19 = vld [vmem:[%s7928_s19 + $0x7e0] sm:$0x7]  ;;  %v6697_v21 = vld [vmem:[%s7928_s19 + $0x6f0] sm:$0xff] }
  0x6e   : > { %2350 = vmatprep.mubr.f32.mxu1 %v7879_v0  ;;  %7404 = vmatprep.subr.bf16.mxu0 %v7403_v33  ;;  %v7447_v33 = vpack.c.bf16 %v6720_v25, %v6688_v24  ;;  %v6729_v22 = vld [vmem:[%s7928_s19 + $0x7f0] sm:$0x7]  ;;  %v6796_v24 = vld [vmem:[%s7928_s19 + $0x808] sm:$0xff] }
  0x6f   : > { %6749 = vmatmul.mubr.msk.f32.vlgmr.msra.gmra.mrb[40].mxu0 %vm340_vm3, %v7959_v28  ;;  %7414 = vmatprep.subr.bf16.mxu1 %v7413_v36  ;;  %v7457_v36 = vpack.c.bf16 %v6722_v29, %v6690_v27  ;;  %v6828_v25 = vld [vmem:[%s7928_s19 + $0x908] sm:$0xff]  ;;  %v6798_v27 = vld [vmem:[%s7928_s19 + $0x818] sm:$0xff] }
  0x70   : > { %6753 = vmatmul.mubr.msk.f32.vlgmr.msra.gmra.mrb[40].mxu1 %vm340_vm3, %v7959_v28  ;;  %7406 = vmatpush1.bf16.msra.mxu0 %v7405_v39  ;;  %v7450_v39 = vpack.c.bf16 %v6719_v32, %v6687_v31  ;;  %v6830_v29 = vld [vmem:[%s7928_s19 + $0x918] sm:$0xff]  ;;  %v6795_v31 = vld [vmem:[%s7928_s19 + $0x800] sm:$0xff] }
  0x71   : > { %7416 = vmatpush1.bf16.msra.mxu1 %v7415_v42  ;;  %2279 = vmatprep.mubr.f32.mxu0 %v7879_v0  ;;  %v7460_v42 = vpack.c.bf16 %v6721_v35, %v6689_v34  ;;  %v6827_v32 = vld [vmem:[%s7928_s19 + $0x900] sm:$0xff]  ;;  %v6797_v34 = vld [vmem:[%s7928_s19 + $0x810] sm:$0xff] }
  0x72   : > { %2356 = vmatprep.mubr.f32.mxu1 %v7879_v0  ;;  %7409 = vmatprep.subr.msk.bf16.mxu0 %vm7930_vm2, %v7407_v45  ;;  %v6629_v45 = vld [vmem:[%s7928_s19 + $0x4d0] sm:$0xff] }
  0x73   : > { %6750 = vmatmul.mubr.msk.f32.gmra.mrb[42].mxu0 %vm340_vm3, %v7988_v51  ;;  %7419 = vmatprep.subr.msk.bf16.mxu1 %vm7930_vm2, %v7417_v48  ;;  %v6692_v48 = vld [vmem:[%s7928_s19 + $0x6c8] sm:$0xff]  ;;  %v7475_v54 = vpack.c.bf16 %v6661_v46, %v6629_v45  ;;  %v6829_v35 = vld [vmem:[%s7928_s19 + $0x910] sm:$0xff] }
  0x74   : > { %6754 = vmatmul.mubr.msk.f32.gmra.mrb[42].mxu1 %vm340_vm3, %v7988_v51  ;;  %7412 = vmatpush1.bf16.msk.msra.mxu0 %vm7930_vm2, %v7410_v52  ;;  %v6694_v52 = vld [vmem:[%s7928_s19 + $0x6d8] sm:$0xff]  ;;  %v6861_v45 = vld [vmem:[%s7928_s19 + $0xa10] sm:$0xff] }
  0x75   : > { %7422 = vmatpush1.bf16.msk.msra.mxu1 %vm7930_vm2, %v7420_v55  ;;  %2427 = vmatprep.mubr.f32.mxu0 %v7879_v0  ;;  %v6691_v55 = vld [vmem:[%s7928_s19 + $0x6c0] sm:$0xff]  ;;  %v7477_v60 = vpack.c.bf16 %v6726_v53, %v6694_v52  ;;  %v6893_v46 = vld [vmem:[%s7928_s19 + $0xb10] sm:$0x7]  ;;  %v6802_v52 = vld [vmem:[%s7928_s19 + $0x838] sm:$0xff] }
  0x76   : > { %2504 = vmatprep.mubr.f32.mxu1 %v7879_v0  ;;  %7424 = vmatprep.subr.bf16.mxu0 %v7423_v58  ;;  %v6725_v58 = vld [vmem:[%s7928_s19 + $0x7d0] sm:$0x7]  ;;  %v7470_v63 = vpack.c.bf16 %v6723_v56, %v6691_v55  ;;  %v6834_v53 = vld [vmem:[%s7928_s19 + $0x938] sm:$0xff]  ;;  %v6799_v55 = vld [vmem:[%s7928_s19 + $0x820] sm:$0xff] }
  0x77   : > { %6757 = vmatmul.mubr.msk.f32.vlgmr.msra.gmra.mrb[44].mxu0 %vm340_vm3, %v7959_v28  ;;  %7434 = vmatprep.subr.bf16.mxu1 %v7433_v61  ;;  %v6632_v61 = vld [vmem:[%s7928_s19 + $0x4e8] sm:$0xff]  ;;  %v7480_v4 = vpack.c.bf16 %v6725_v58, %v6693_v57  ;;  %v6831_v56 = vld [vmem:[%s7928_s19 + $0x920] sm:$0xff]  ;;  %v6801_v57 = vld [vmem:[%s7928_s19 + $0x830] sm:$0xff] }
  0x78   : > { %6761 = vmatmul.mubr.msk.f32.vlgmr.msra.gmra.mrb[44].mxu1 %vm340_vm3, %v7959_v28  ;;  %7426 = vmatpush1.bf16.msra.mxu0 %v7425_v2  ;;  %v6634_v2 = vld [vmem:[%s7928_s19 + $0x4f8] sm:$0xff]  ;;  %v7483_v7 = vpack.c.bf16 %v6664_v62, %v6632_v61  ;;  %v6833_v58 = vld [vmem:[%s7928_s19 + $0x930] sm:$0xff]  ;;  %v6864_v61 = vld [vmem:[%s7928_s19 + $0xa28] sm:$0xff] }
  0x79   : > { %7436 = vmatpush1.bf16.msra.mxu1 %v7435_v5  ;;  %2433 = vmatprep.mubr.f32.mxu0 %v7879_v0  ;;  %v6631_v5 = vld [vmem:[%s7928_s19 + $0x4e0] sm:$0xff]  ;;  %v6896_v62 = vld [vmem:[%s7928_s19 + $0xb28] sm:$0x7] }
  0x7a   : > { %2510 = vmatprep.mubr.f32.mxu1 %v7879_v0  ;;  %7429 = vmatprep.subr.msk.bf16.mxu0 %vm7930_vm2, %v7427_v8  ;;  %v6633_v8 = vld [vmem:[%s7928_s19 + $0x4f0] sm:$0xff] }
  0x7b   : > { %6758 = vmatmul.mubr.msk.f32.gmra.mrb[46].mxu0 %vm340_vm3, %v7988_v51  ;;  %7439 = vmatprep.subr.msk.bf16.mxu1 %vm7930_vm2, %v7437_v11  ;;  %v7493_v11 = vpack.c.bf16 %v6666_v3, %v6634_v2  ;;  %v6866_v2 = vld [vmem:[%s7928_s19 + $0xa38] sm:$0xff] }
  0x7c   : > { %6762 = vmatmul.mubr.msk.f32.gmra.mrb[46].mxu1 %vm340_vm3, %v7988_v51  ;;  %7432 = vmatpush1.bf16.msk.msra.mxu0 %vm7930_vm2, %v7430_v14  ;;  %v7485_v14 = vpack.c.bf16 %v6663_v6, %v6631_v5  ;;  %v6898_v3 = vld [vmem:[%s7928_s19 + $0xb38] sm:$0x7]  ;;  %v6863_v5 = vld [vmem:[%s7928_s19 + $0xa20] sm:$0xff] }
  0x7d   : > { %7442 = vmatpush1.bf16.msk.msra.mxu1 %vm7930_vm2, %v7440_v17  ;;  %2581 = vmatprep.mubr.f32.mxu0 %v7879_v0  ;;  %v7495_v17 = vpack.c.bf16 %v6665_v9, %v6633_v8  ;;  %v6895_v6 = vld [vmem:[%s7928_s19 + $0xb20] sm:$0x7]  ;;  %v6865_v8 = vld [vmem:[%s7928_s19 + $0xa30] sm:$0xff] }
  0x7e   : > { %2658 = vmatprep.mubr.f32.mxu1 %v7879_v0  ;;  %7444 = vmatprep.subr.bf16.mxu0 %v7443_v20  ;;  %v7487_v20 = vpack.c.bf16 %v6728_v13, %v6696_v12  ;;  %v6897_v9 = vld [vmem:[%s7928_s19 + $0xb30] sm:$0x7]  ;;  %v6804_v12 = vld [vmem:[%s7928_s19 + $0x848] sm:$0xff] }
  0x7f   : > { %6765 = vmatmul.mubr.msk.f32.vlgmr.msra.gmra.mrb[48].mxu0 %vm340_vm3, %v7959_v28  ;;  %7454 = vmatprep.subr.bf16.mxu1 %v7453_v23  ;;  %v7497_v23 = vpack.c.bf16 %v6730_v16, %v6698_v15  ;;  %v6836_v13 = vld [vmem:[%s7928_s19 + $0x948] sm:$0xff]  ;;  %v6806_v15 = vld [vmem:[%s7928_s19 + $0x858] sm:$0xff] }
  0x80   : > { %6769 = vmatmul.mubr.msk.f32.vlgmr.msra.gmra.mrb[48].mxu1 %vm340_vm3, %v7959_v28  ;;  %7446 = vmatpush1.bf16.msra.mxu0 %v7445_v26  ;;  %v7463_v28 = vpack.c.bf16 %v6660_v38, %v6628_v37  ;;  %v7490_v26 = vpack.c.bf16 %v6727_v19, %v6695_v18  ;;  %v6860_v37 = vld [vmem:[%s7928_s19 + $0xa08] sm:$0xff]  ;;  %v6838_v16 = vld [vmem:[%s7928_s19 + $0x958] sm:$0xff]  ;;  %v6803_v18 = vld [vmem:[%s7928_s19 + $0x840] sm:$0xff] }
  0x81   : > { %7456 = vmatpush1.bf16.msra.mxu1 %v7455_v30  ;;  %2587 = vmatprep.mubr.f32.mxu0 %v7879_v0  ;;  %v7500_v30 = vpack.c.bf16 %v6729_v22, %v6697_v21  ;;  %v6892_v38 = vld [vmem:[%s7928_s19 + $0xb08] sm:$0x7]  ;;  %v6835_v19 = vld [vmem:[%s7928_s19 + $0x940] sm:$0xff]  ;;  %v6805_v21 = vld [vmem:[%s7928_s19 + $0x850] sm:$0xff] }
  0x82   : > { %2664 = vmatprep.mubr.f32.mxu1 %v7879_v0  ;;  %7449 = vmatprep.subr.msk.bf16.mxu0 %vm7930_vm2, %v7447_v33  ;;  %v7503_v33 = vpack.c.bf16 %v6828_v25, %v6796_v24  ;;  %v6837_v22 = vld [vmem:[%s7928_s19 + $0x950] sm:$0xff]  ;;  %v6868_v24 = vld [vmem:[%s7928_s19 + $0xa48] sm:$0xff] }
  0x83   : > { %6766 = vmatmul.mubr.msk.f32.gmra.mrb[50].mxu0 %vm340_vm3, %v7988_v51  ;;  %7459 = vmatprep.subr.msk.bf16.mxu1 %vm7930_vm2, %v7457_v36  ;;  %v7513_v36 = vpack.c.bf16 %v6830_v29, %v6798_v27  ;;  %v6900_v25 = vld [vmem:[%s7928_s19 + $0xb48] sm:$0x7]  ;;  %v6870_v27 = vld [vmem:[%s7928_s19 + $0xa58] sm:$0xff] }
  0x84   : > { %6770 = vmatmul.mubr.msk.f32.gmra.mrb[50].mxu1 %vm340_vm3, %v7988_v51  ;;  %7452 = vmatpush1.bf16.msk.msra.mxu0 %vm7930_vm2, %v7450_v39  ;;  %v7467_v51 = vpack.c.bf16 %v6724_v49, %v6692_v48  ;;  %v7505_v39 = vpack.c.bf16 %v6827_v32, %v6795_v31  ;;  %v6800_v48 = vld [vmem:[%s7928_s19 + $0x828] sm:$0xff]  ;;  %v6902_v29 = vld [vmem:[%s7928_s19 + $0xb58] sm:$0x7]  ;;  %v6867_v31 = vld [vmem:[%s7928_s19 + $0xa40] sm:$0xff] }
  0x85   : > { %7462 = vmatpush1.bf16.msk.msra.mxu1 %vm7930_vm2, %v7460_v42  ;;  %2735 = vmatprep.mubr.f32.mxu0 %v7879_v0  ;;  %v7515_v42 = vpack.c.bf16 %v6829_v35, %v6797_v34  ;;  %v6832_v49 = vld [vmem:[%s7928_s19 + $0x928] sm:$0xff]  ;;  %v6899_v32 = vld [vmem:[%s7928_s19 + $0xb40] sm:$0x7]  ;;  %v6869_v34 = vld [vmem:[%s7928_s19 + $0xa50] sm:$0xff] }
  0x86   : > { %2812 = vmatprep.mubr.f32.mxu1 %v7879_v0  ;;  %7464 = vmatprep.subr.bf16.mxu0 %v7463_v28  ;;  %v7507_v28 = vpack.c.bf16 %v6892_v38, %v6860_v37  ;;  %v6901_v35 = vld [vmem:[%s7928_s19 + $0xb50] sm:$0x7]  ;;  %v6808_v37 = vld [vmem:[%s7928_s19 + $0x868] sm:$0xff] }
  0x87   : > { %6773 = vmatmul.mubr.msk.f32.vlgmr.msra.gmra.mrb[52].mxu0 %vm340_vm3, %v8455_v59  ;;  %7474 = vmatprep.subr.bf16.mxu1 %v7473_v47  ;;  %v7517_v47 = vpack.c.bf16 %v6894_v41, %v6862_v40  ;;  %v6840_v38 = vld [vmem:[%s7928_s19 + $0x968] sm:$0xff]  ;;  %v6810_v40 = vld [vmem:[%s7928_s19 + $0x878] sm:$0xff] }
  0x88   : > { %6777 = vmatmul.mubr.msk.f32.vlgmr.msra.gmra.mrb[52].mxu1 %vm340_vm3, %v8455_v59  ;;  %7466 = vmatpush1.bf16.msra.mxu0 %v7465_v50  ;;  %v7510_v50 = vpack.c.bf16 %v6891_v44, %v6859_v43  ;;  %v6842_v41 = vld [vmem:[%s7928_s19 + $0x978] sm:$0xff]  ;;  %v6807_v43 = vld [vmem:[%s7928_s19 + $0x860] sm:$0xff] }
  0x89   : > { %7476 = vmatpush1.bf16.msra.mxu1 %v7475_v54  ;;  %2741 = vmatprep.mubr.f32.mxu0 %v7879_v0  ;;  %v7520_v54 = vpack.c.bf16 %v6893_v46, %v6861_v45  ;;  %v6839_v44 = vld [vmem:[%s7928_s19 + $0x960] sm:$0xff]  ;;  %v6809_v45 = vld [vmem:[%s7928_s19 + $0x870] sm:$0xff] }
  0x8a   : > { %2818 = vmatprep.mubr.f32.mxu1 %v7879_v0  ;;  %7469 = vmatprep.subr.msk.bf16.mxu0 %vm7930_vm2, %v7467_v51  ;;  %v7523_v51 = vpack.c.bf16 %v6832_v49, %v6800_v48  ;;  %v6841_v46 = vld [vmem:[%s7928_s19 + $0x970] sm:$0xff]  ;;  %v6872_v48 = vld [vmem:[%s7928_s19 + $0xa68] sm:$0xff] }
  0x8b   : > { %6774 = vmatmul.mubr.msk.f32.gmra.mrb[54].mxu0 %vm340_vm3, %v8476_v10  ;;  %7479 = vmatprep.subr.msk.bf16.mxu1 %vm7930_vm2, %v7477_v60  ;;  %v7533_v60 = vpack.c.bf16 %v6834_v53, %v6802_v52  ;;  %v6904_v49 = vld [vmem:[%s7928_s19 + $0xb68] sm:$0x7]  ;;  %v6874_v52 = vld [vmem:[%s7928_s19 + $0xa78] sm:$0xff] }
  0x8c   : > { %6778 = vmatmul.mubr.msk.f32.gmra.mrb[54].mxu1 %vm340_vm3, %v8476_v10  ;;  %7472 = vmatpush1.bf16.msk.msra.mxu0 %vm7930_vm2, %v7470_v63  ;;  %v7525_v63 = vpack.c.bf16 %v6831_v56, %v6799_v55  ;;  %v6906_v53 = vld [vmem:[%s7928_s19 + $0xb78] sm:$0x7]  ;;  %v6871_v55 = vld [vmem:[%s7928_s19 + $0xa60] sm:$0xff] }
  0x8d   : > { %7482 = vmatpush1.bf16.msk.msra.mxu1 %vm7930_vm2, %v7480_v4  ;;  %2889 = vmatprep.mubr.f32.mxu0 %v7879_v0  ;;  %v7535_v4 = vpack.c.bf16 %v6833_v58, %v6801_v57  ;;  %v6903_v56 = vld [vmem:[%s7928_s19 + $0xb60] sm:$0x7]  ;;  %v6873_v57 = vld [vmem:[%s7928_s19 + $0xa70] sm:$0xff] }
  0x8e   : > { %2966 = vmatprep.mubr.f32.mxu1 %v7879_v0  ;;  %7484 = vmatprep.subr.bf16.mxu0 %v7483_v7  ;;  %v7527_v7 = vpack.c.bf16 %v6896_v62, %v6864_v61  ;;  %v6905_v58 = vld [vmem:[%s7928_s19 + $0xb70] sm:$0x7]  ;;  %v6812_v61 = vld [vmem:[%s7928_s19 + $0x888] sm:$0xff] }
  0x8f   : > { %6781 = vmatmul.mubr.msk.f32.vlgmr.msra.gmra.mrb[56].mxu0 %vm340_vm3, %v8455_v59  ;;  %7494 = vmatprep.subr.bf16.mxu1 %v7493_v11  ;;  %v7537_v11 = vpack.c.bf16 %v6898_v3, %v6866_v2  ;;  %v6844_v62 = vld [vmem:[%s7928_s19 + $0x988] sm:$0xff]  ;;  %v6814_v2 = vld [vmem:[%s7928_s19 + $0x898] sm:$0xff] }
  0x90   : > { %6785 = vmatmul.mubr.msk.f32.vlgmr.msra.gmra.mrb[56].mxu1 %vm340_vm3, %v8455_v59  ;;  %7486 = vmatpush1.bf16.msra.mxu0 %v7485_v14  ;;  %v7530_v14 = vpack.c.bf16 %v6895_v6, %v6863_v5  ;;  %v6846_v3 = vld [vmem:[%s7928_s19 + $0x998] sm:$0xff]  ;;  %v6811_v5 = vld [vmem:[%s7928_s19 + $0x880] sm:$0xff] }
  0x91   : > { %7496 = vmatpush1.bf16.msra.mxu1 %v7495_v17  ;;  %2895 = vmatprep.mubr.f32.mxu0 %v7879_v0  ;;  %v7540_v17 = vpack.c.bf16 %v6897_v9, %v6865_v8  ;;  %v6843_v6 = vld [vmem:[%s7928_s19 + $0x980] sm:$0xff]  ;;  %v6813_v8 = vld [vmem:[%s7928_s19 + $0x890] sm:$0xff] }
  0x92   : > { %2972 = vmatprep.mubr.f32.mxu1 %v7879_v0  ;;  %7489 = vmatprep.subr.msk.bf16.mxu0 %vm7930_vm2, %v7487_v20  ;;  %v7543_v20 = vpack.c.bf16 %v6836_v13, %v6804_v12  ;;  %v6845_v9 = vld [vmem:[%s7928_s19 + $0x990] sm:$0xff]  ;;  %v6876_v12 = vld [vmem:[%s7928_s19 + $0xa88] sm:$0xff] }
  0x93   : > { %6782 = vmatmul.mubr.msk.f32.gmra.mrb[58].mxu0 %vm340_vm3, %v8476_v10  ;;  %7499 = vmatprep.subr.msk.bf16.mxu1 %vm7930_vm2, %v7497_v23  ;;  %v7553_v23 = vpack.c.bf16 %v6838_v16, %v6806_v15  ;;  %v6908_v13 = vld [vmem:[%s7928_s19 + $0xb88] sm:$0x7]  ;;  %v6878_v15 = vld [vmem:[%s7928_s19 + $0xa98] sm:$0xff] }
  0x94   : > { %6786 = vmatmul.mubr.msk.f32.gmra.mrb[58].mxu1 %vm340_vm3, %v8476_v10  ;;  %7492 = vmatpush1.bf16.msk.msra.mxu0 %vm7930_vm2, %v7490_v26  ;;  %v7545_v26 = vpack.c.bf16 %v6835_v19, %v6803_v18  ;;  %v6910_v16 = vld [vmem:[%s7928_s19 + $0xb98] sm:$0x7]  ;;  %v6875_v18 = vld [vmem:[%s7928_s19 + $0xa80] sm:$0xff] }
  0x95   : > { %7502 = vmatpush1.bf16.msk.msra.mxu1 %vm7930_vm2, %v7500_v30  ;;  %3043 = vmatprep.mubr.f32.mxu0 %v7879_v0  ;;  %v7555_v30 = vpack.c.bf16 %v6837_v22, %v6805_v21  ;;  %v6907_v19 = vld [vmem:[%s7928_s19 + $0xb80] sm:$0x7]  ;;  %v6877_v21 = vld [vmem:[%s7928_s19 + $0xa90] sm:$0xff] }
  0x96   : > { %3120 = vmatprep.mubr.f32.mxu1 %v7879_v0  ;;  %7504 = vmatprep.subr.bf16.mxu0 %v7503_v33  ;;  %v7547_v33 = vpack.c.bf16 %v6900_v25, %v6868_v24  ;;  %v6909_v22 = vld [vmem:[%s7928_s19 + $0xb90] sm:$0x7]  ;;  %v6816_v24 = vld [vmem:[%s7928_s19 + $0x8a8] sm:$0xff] }
  0x97   : > { %6789 = vmatmul.mubr.msk.f32.vlgmr.msra.gmra.mrb[60].mxu0 %vm340_vm3, %v8455_v59  ;;  %7514 = vmatprep.subr.bf16.mxu1 %v7513_v36  ;;  %v7557_v36 = vpack.c.bf16 %v6902_v29, %v6870_v27  ;;  %v6848_v25 = vld [vmem:[%s7928_s19 + $0x9a8] sm:$0xff]  ;;  %v6818_v27 = vld [vmem:[%s7928_s19 + $0x8b8] sm:$0xff] }
  0x98   : > { %6793 = vmatmul.mubr.msk.f32.vlgmr.msra.gmra.mrb[60].mxu1 %vm340_vm3, %v8455_v59  ;;  %7506 = vmatpush1.bf16.msra.mxu0 %v7505_v39  ;;  %v7550_v39 = vpack.c.bf16 %v6899_v32, %v6867_v31  ;;  %v6850_v29 = vld [vmem:[%s7928_s19 + $0x9b8] sm:$0xff]  ;;  %v6815_v31 = vld [vmem:[%s7928_s19 + $0x8a0] sm:$0xff] }
  0x99   : > { %7516 = vmatpush1.bf16.msra.mxu1 %v7515_v42  ;;  %3049 = vmatprep.mubr.f32.mxu0 %v7879_v0  ;;  %v7560_v42 = vpack.c.bf16 %v6901_v35, %v6869_v34  ;;  %v6847_v32 = vld [vmem:[%s7928_s19 + $0x9a0] sm:$0xff]  ;;  %v6817_v34 = vld [vmem:[%s7928_s19 + $0x8b0] sm:$0xff] }
  0x9a   : > { %3126 = vmatprep.mubr.f32.mxu1 %v7879_v0  ;;  %7509 = vmatprep.subr.msk.bf16.mxu0 %vm7930_vm2, %v7507_v28  ;;  %v7563_v28 = vpack.c.bf16 %v6840_v38, %v6808_v37  ;;  %v6849_v35 = vld [vmem:[%s7928_s19 + $0x9b0] sm:$0xff]  ;;  %v6880_v37 = vld [vmem:[%s7928_s19 + $0xaa8] sm:$0xff] }
  0x9b   : > { %6790 = vmatmul.mubr.msk.f32.gmra.mrb[62].mxu0 %vm340_vm3, %v8476_v10  ;;  %7519 = vmatprep.subr.msk.bf16.mxu1 %vm7930_vm2, %v7517_v47  ;;  %v7573_v47 = vpack.c.bf16 %v6842_v41, %v6810_v40  ;;  %v6912_v38 = vld [vmem:[%s7928_s19 + $0xba8] sm:$0x7]  ;;  %v6882_v40 = vld [vmem:[%s7928_s19 + $0xab8] sm:$0xff] }
  0x9c   : > { %6794 = vmatmul.mubr.msk.f32.gmra.mrb[62].mxu1 %vm340_vm3, %v8476_v10  ;;  %7512 = vmatpush1.bf16.msk.msra.mxu0 %vm7930_vm2, %v7510_v50  ;;  %v7565_v50 = vpack.c.bf16 %v6839_v44, %v6807_v43  ;;  %v6914_v41 = vld [vmem:[%s7928_s19 + $0xbb8] sm:$0x7]  ;;  %v6879_v43 = vld [vmem:[%s7928_s19 + $0xaa0] sm:$0xff] }
  0x9d   : > { %7522 = vmatpush1.bf16.msk.msra.mxu1 %vm7930_vm2, %v7520_v54  ;;  %3486 = vmatprep.mubr.f32.mxu0 %v7879_v0  ;;  %v7575_v54 = vpack.c.bf16 %v6841_v46, %v6809_v45  ;;  %v6911_v44 = vld [vmem:[%s7928_s19 + $0xba0] sm:$0x7]  ;;  %v6881_v45 = vld [vmem:[%s7928_s19 + $0xab0] sm:$0xff] }
  0x9e   : > { %3563 = vmatprep.mubr.f32.mxu1 %v7879_v0  ;;  %7524 = vmatprep.subr.bf16.mxu0 %v7523_v51  ;;  %v7567_v51 = vpack.c.bf16 %v6904_v49, %v6872_v48  ;;  %v6913_v46 = vld [vmem:[%s7928_s19 + $0xbb0] sm:$0x7]  ;;  %v6820_v48 = vld [vmem:[%s7928_s19 + $0x8c8] sm:$0xff] }
  0x9f   : > { %6925 = vmatmul.mubr.msk.f32.vlgmr.msra.gmra.mrb[64].mxu0 %vm340_vm3, %v8455_v59  ;;  %7534 = vmatprep.subr.bf16.mxu1 %v7533_v60  ;;  %v7577_v60 = vpack.c.bf16 %v6906_v53, %v6874_v52  ;;  %v6852_v49 = vld [vmem:[%s7928_s19 + $0x9c8] sm:$0xff]  ;;  %v6822_v52 = vld [vmem:[%s7928_s19 + $0x8d8] sm:$0xff] }
  0xa0   : > { %6929 = vmatmul.mubr.msk.f32.vlgmr.msra.gmra.mrb[64].mxu1 %vm340_vm3, %v8455_v59  ;;  %7526 = vmatpush1.bf16.msra.mxu0 %v7525_v63  ;;  %v7570_v63 = vpack.c.bf16 %v6903_v56, %v6871_v55  ;;  %v6854_v53 = vld [vmem:[%s7928_s19 + $0x9d8] sm:$0xff]  ;;  %v6819_v55 = vld [vmem:[%s7928_s19 + $0x8c0] sm:$0xff] }
  0xa1   : > { %7536 = vmatpush1.bf16.msra.mxu1 %v7535_v4  ;;  %3492 = vmatprep.mubr.f32.mxu0 %v7879_v0  ;;  %v7580_v4 = vpack.c.bf16 %v6905_v58, %v6873_v57  ;;  %v6851_v56 = vld [vmem:[%s7928_s19 + $0x9c0] sm:$0xff]  ;;  %v6821_v57 = vld [vmem:[%s7928_s19 + $0x8d0] sm:$0xff] }
  0xa2   : > { %3569 = vmatprep.mubr.f32.mxu1 %v7879_v0  ;;  %7529 = vmatprep.subr.msk.bf16.mxu0 %vm7930_vm2, %v7527_v7  ;;  %v7583_v7 = vpack.c.bf16 %v6844_v62, %v6812_v61  ;;  %v6853_v58 = vld [vmem:[%s7928_s19 + $0x9d0] sm:$0xff]  ;;  %v6884_v61 = vld [vmem:[%s7928_s19 + $0xac8] sm:$0xff] }
  0xa3   : > { %6926 = vmatmul.mubr.msk.f32.gmra.mrb[66].mxu0 %vm340_vm3, %v8476_v10  ;;  %7539 = vmatprep.subr.msk.bf16.mxu1 %vm7930_vm2, %v7537_v11  ;;  %v7593_v11 = vpack.c.bf16 %v6846_v3, %v6814_v2  ;;  %v6916_v62 = vld [vmem:[%s7928_s19 + $0xbc8] sm:$0x7]  ;;  %v6886_v2 = vld [vmem:[%s7928_s19 + $0xad8] sm:$0xff] }
  0xa4   : > { %6930 = vmatmul.mubr.msk.f32.gmra.mrb[66].mxu1 %vm340_vm3, %v8476_v10  ;;  %7532 = vmatpush1.bf16.msk.msra.mxu0 %vm7930_vm2, %v7530_v14  ;;  %v7585_v14 = vpack.c.bf16 %v6843_v6, %v6811_v5  ;;  %v6918_v3 = vld [vmem:[%s7928_s19 + $0xbd8] sm:$0x7]  ;;  %v6883_v5 = vld [vmem:[%s7928_s19 + $0xac0] sm:$0xff] }
  0xa5   : > { %7542 = vmatpush1.bf16.msk.msra.mxu1 %vm7930_vm2, %v7540_v17  ;;  %3640 = vmatprep.mubr.f32.mxu0 %v7879_v0  ;;  %v7595_v17 = vpack.c.bf16 %v6845_v9, %v6813_v8  ;;  %v6915_v6 = vld [vmem:[%s7928_s19 + $0xbc0] sm:$0x7]  ;;  %v6885_v8 = vld [vmem:[%s7928_s19 + $0xad0] sm:$0xff] }
  0xa6   : > { %3717 = vmatprep.mubr.f32.mxu1 %v7879_v0  ;;  %7544 = vmatprep.subr.bf16.mxu0 %v7543_v20  ;;  %v7587_v20 = vpack.c.bf16 %v6908_v13, %v6876_v12  ;;  %v6917_v9 = vld [vmem:[%s7928_s19 + $0xbd0] sm:$0x7]  ;;  %v6824_v12 = vld [vmem:[%s7928_s19 + $0x8e8] sm:$0xff] }
  0xa7   : > { %6933 = vmatmul.mubr.msk.f32.vlgmr.msra.gmra.mrb[68].mxu0 %vm340_vm3, %v8455_v59  ;;  %7554 = vmatprep.subr.bf16.mxu1 %v7553_v23  ;;  %v7597_v23 = vpack.c.bf16 %v6910_v16, %v6878_v15  ;;  %v6856_v13 = vld [vmem:[%s7928_s19 + $0x9e8] sm:$0xff]  ;;  %v6826_v15 = vld [vmem:[%s7928_s19 + $0x8f8] sm:$0xff] }
  0xa8   : > { %6937 = vmatmul.mubr.msk.f32.vlgmr.msra.gmra.mrb[68].mxu1 %vm340_vm3, %v8455_v59  ;;  %7546 = vmatpush1.bf16.msra.mxu0 %v7545_v26  ;;  %v7590_v26 = vpack.c.bf16 %v6907_v19, %v6875_v18  ;;  %v6858_v16 = vld [vmem:[%s7928_s19 + $0x9f8] sm:$0xff]  ;;  %v6823_v18 = vld [vmem:[%s7928_s19 + $0x8e0] sm:$0xff] }
  0xa9   : > { %7556 = vmatpush1.bf16.msra.mxu1 %v7555_v30  ;;  %3646 = vmatprep.mubr.f32.mxu0 %v7879_v0  ;;  %v7600_v30 = vpack.c.bf16 %v6909_v22, %v6877_v21  ;;  %v6855_v19 = vld [vmem:[%s7928_s19 + $0x9e0] sm:$0xff]  ;;  %v6825_v21 = vld [vmem:[%s7928_s19 + $0x8f0] sm:$0xff] }
  0xaa   : > { %3723 = vmatprep.mubr.f32.mxu1 %v7879_v0  ;;  %7549 = vmatprep.subr.msk.bf16.mxu0 %vm7930_vm2, %v7547_v33  ;;  %v7603_v33 = vpack.c.bf16 %v6848_v25, %v6816_v24  ;;  %v6857_v22 = vld [vmem:[%s7928_s19 + $0x9f0] sm:$0xff]  ;;  %v6888_v24 = vld [vmem:[%s7928_s19 + $0xae8] sm:$0xff] }
  0xab   : > { %6934 = vmatmul.mubr.msk.f32.gmra.mrb[70].mxu0 %vm340_vm3, %v8476_v10  ;;  %7559 = vmatprep.subr.msk.bf16.mxu1 %vm7930_vm2, %v7557_v36  ;;  %v7613_v36 = vpack.c.bf16 %v6850_v29, %v6818_v27  ;;  %v6920_v25 = vld [vmem:[%s7928_s19 + $0xbe8] sm:$0x7]  ;;  %v6890_v27 = vld [vmem:[%s7928_s19 + $0xaf8] sm:$0xff] }
  0xac   : > { %6938 = vmatmul.mubr.msk.f32.gmra.mrb[70].mxu1 %vm340_vm3, %v8476_v10  ;;  %7552 = vmatpush1.bf16.msk.msra.mxu0 %vm7930_vm2, %v7550_v39  ;;  %v7605_v39 = vpack.c.bf16 %v6847_v32, %v6815_v31  ;;  %v6922_v29 = vld [vmem:[%s7928_s19 + $0xbf8] sm:$0x7]  ;;  %v6887_v31 = vld [vmem:[%s7928_s19 + $0xae0] sm:$0xff] }
  0xad   : > { %7562 = vmatpush1.bf16.msk.msra.mxu1 %vm7930_vm2, %v7560_v42  ;;  %3794 = vmatprep.mubr.f32.mxu0 %v7879_v0  ;;  %v7615_v42 = vpack.c.bf16 %v6849_v35, %v6817_v34  ;;  %v6919_v32 = vld [vmem:[%s7928_s19 + $0xbe0] sm:$0x7]  ;;  %v6889_v34 = vld [vmem:[%s7928_s19 + $0xaf0] sm:$0xff] }
  0xae   : > { %3871 = vmatprep.mubr.f32.mxu1 %v7879_v0  ;;  %7564 = vmatprep.subr.bf16.mxu0 %v7563_v28  ;;  %v7607_v28 = vpack.c.bf16 %v6912_v38, %v6880_v37  ;;  %v6921_v35 = vld [vmem:[%s7928_s19 + $0xbf0] sm:$0x7]  ;;  %v6988_v37 = vld [vmem:[%s7928_s19 + $0xc08] sm:$0xff] }
  0xaf   : > { %6941 = vmatmul.mubr.msk.f32.vlgmr.msra.gmra.mrb[72].mxu0 %vm340_vm3, %v8455_v59  ;;  %7574 = vmatprep.subr.bf16.mxu1 %v7573_v47  ;;  %v7617_v47 = vpack.c.bf16 %v6914_v41, %v6882_v40  ;;  %v7020_v38 = vld [vmem:[%s7928_s19 + $0xd08] sm:$0xff]  ;;  %v6990_v40 = vld [vmem:[%s7928_s19 + $0xc18] sm:$0xff] }
  0xb0   : > { %6945 = vmatmul.mubr.msk.f32.vlgmr.msra.gmra.mrb[72].mxu1 %vm340_vm3, %v8455_v59  ;;  %7566 = vmatpush1.bf16.msra.mxu0 %v7565_v50  ;;  %v7610_v50 = vpack.c.bf16 %v6911_v44, %v6879_v43  ;;  %v7022_v41 = vld [vmem:[%s7928_s19 + $0xd18] sm:$0xff]  ;;  %v6987_v43 = vld [vmem:[%s7928_s19 + $0xc00] sm:$0xff] }
  0xb1   : > { %7576 = vmatpush1.bf16.msra.mxu1 %v7575_v54  ;;  %3800 = vmatprep.mubr.f32.mxu0 %v7879_v0  ;;  %v7620_v54 = vpack.c.bf16 %v6913_v46, %v6881_v45  ;;  %v7019_v44 = vld [vmem:[%s7928_s19 + $0xd00] sm:$0xff]  ;;  %v6989_v45 = vld [vmem:[%s7928_s19 + $0xc10] sm:$0xff] }
  0xb2   : > { %3877 = vmatprep.mubr.f32.mxu1 %v7879_v0  ;;  %7569 = vmatprep.subr.msk.bf16.mxu0 %vm7930_vm2, %v7567_v51  ;;  %v7623_v51 = vpack.c.bf16 %v6852_v49, %v6820_v48  ;;  %v7021_v46 = vld [vmem:[%s7928_s19 + $0xd10] sm:$0xff]  ;;  %v7052_v48 = vld [vmem:[%s7928_s19 + $0xe08] sm:$0xff] }
  0xb3   : > { %6942 = vmatmul.mubr.msk.f32.gmra.mrb[74].mxu0 %vm340_vm3, %v8476_v10  ;;  %7579 = vmatprep.subr.msk.bf16.mxu1 %vm7930_vm2, %v7577_v60  ;;  %v7633_v60 = vpack.c.bf16 %v6854_v53, %v6822_v52  ;;  %v7084_v49 = vld [vmem:[%s7928_s19 + $0xf08] sm:$0x7]  ;;  %v7054_v52 = vld [vmem:[%s7928_s19 + $0xe18] sm:$0xff] }
  0xb4   : > { %6946 = vmatmul.mubr.msk.f32.gmra.mrb[74].mxu1 %vm340_vm3, %v8476_v10  ;;  %7572 = vmatpush1.bf16.msk.msra.mxu0 %vm7930_vm2, %v7570_v63  ;;  %v7625_v63 = vpack.c.bf16 %v6851_v56, %v6819_v55  ;;  %v7086_v53 = vld [vmem:[%s7928_s19 + $0xf18] sm:$0x7]  ;;  %v7051_v55 = vld [vmem:[%s7928_s19 + $0xe00] sm:$0xff] }
  0xb5   : > { %7582 = vmatpush1.bf16.msk.msra.mxu1 %vm7930_vm2, %v7580_v4  ;;  %3948 = vmatprep.mubr.f32.mxu0 %v7879_v0  ;;  %v7635_v4 = vpack.c.bf16 %v6853_v58, %v6821_v57  ;;  %v7083_v56 = vld [vmem:[%s7928_s19 + $0xf00] sm:$0x7]  ;;  %v7053_v57 = vld [vmem:[%s7928_s19 + $0xe10] sm:$0xff] }
  0xb6   : > { %4025 = vmatprep.mubr.f32.mxu1 %v7879_v0  ;;  %7584 = vmatprep.subr.bf16.mxu0 %v7583_v7  ;;  %v7627_v7 = vpack.c.bf16 %v6916_v62, %v6884_v61  ;;  %v7085_v58 = vld [vmem:[%s7928_s19 + $0xf10] sm:$0x7]  ;;  %v6992_v61 = vld [vmem:[%s7928_s19 + $0xc28] sm:$0xff] }
  0xb7   : > { %6949 = vmatmul.mubr.msk.f32.vlgmr.msra.gmra.mrb[76].mxu0 %vm340_vm3, %v8455_v59  ;;  %7594 = vmatprep.subr.bf16.mxu1 %v7593_v11  ;;  %v7637_v11 = vpack.c.bf16 %v6918_v3, %v6886_v2  ;;  %v7024_v62 = vld [vmem:[%s7928_s19 + $0xd28] sm:$0xff]  ;;  %v6994_v2 = vld [vmem:[%s7928_s19 + $0xc38] sm:$0xff] }
  0xb8   : > { %6953 = vmatmul.mubr.msk.f32.vlgmr.msra.gmra.mrb[76].mxu1 %vm340_vm3, %v8455_v59  ;;  %7586 = vmatpush1.bf16.msra.mxu0 %v7585_v14  ;;  %v7630_v14 = vpack.c.bf16 %v6915_v6, %v6883_v5  ;;  %v7026_v3 = vld [vmem:[%s7928_s19 + $0xd38] sm:$0xff]  ;;  %v6991_v5 = vld [vmem:[%s7928_s19 + $0xc20] sm:$0xff] }
  0xb9   : > { %7596 = vmatpush1.bf16.msra.mxu1 %v7595_v17  ;;  %3954 = vmatprep.mubr.f32.mxu0 %v7879_v0  ;;  %v7640_v17 = vpack.c.bf16 %v6917_v9, %v6885_v8  ;;  %v7023_v6 = vld [vmem:[%s7928_s19 + $0xd20] sm:$0xff]  ;;  %v6993_v8 = vld [vmem:[%s7928_s19 + $0xc30] sm:$0xff] }
  0xba   : > { %4031 = vmatprep.mubr.f32.mxu1 %v7879_v0  ;;  %7589 = vmatprep.subr.msk.bf16.mxu0 %vm7930_vm2, %v7587_v20  ;;  %v7643_v20 = vpack.c.bf16 %v6856_v13, %v6824_v12  ;;  %v7025_v9 = vld [vmem:[%s7928_s19 + $0xd30] sm:$0xff]  ;;  %v7056_v12 = vld [vmem:[%s7928_s19 + $0xe28] sm:$0xff] }
  0xbb   : > { %6950 = vmatmul.mubr.msk.f32.gmra.mrb[78].mxu0 %vm340_vm3, %v8476_v10  ;;  %7599 = vmatprep.subr.msk.bf16.mxu1 %vm7930_vm2, %v7597_v23  ;;  %v7653_v23 = vpack.c.bf16 %v6858_v16, %v6826_v15  ;;  %v7088_v13 = vld [vmem:[%s7928_s19 + $0xf28] sm:$0x7]  ;;  %v7058_v15 = vld [vmem:[%s7928_s19 + $0xe38] sm:$0xff] }
  0xbc   : > { %6954 = vmatmul.mubr.msk.f32.gmra.mrb[78].mxu1 %vm340_vm3, %v8476_v10  ;;  %7592 = vmatpush1.bf16.msk.msra.mxu0 %vm7930_vm2, %v7590_v26  ;;  %v7645_v26 = vpack.c.bf16 %v6855_v19, %v6823_v18  ;;  %v7090_v16 = vld [vmem:[%s7928_s19 + $0xf38] sm:$0x7]  ;;  %v7055_v18 = vld [vmem:[%s7928_s19 + $0xe20] sm:$0xff] }
  0xbd   : > { %7602 = vmatpush1.bf16.msk.msra.mxu1 %vm7930_vm2, %v7600_v30  ;;  %4102 = vmatprep.mubr.f32.mxu0 %v7879_v0  ;;  %v7655_v30 = vpack.c.bf16 %v6857_v22, %v6825_v21  ;;  %v7087_v19 = vld [vmem:[%s7928_s19 + $0xf20] sm:$0x7]  ;;  %v7057_v21 = vld [vmem:[%s7928_s19 + $0xe30] sm:$0xff] }
  0xbe   : > { %4179 = vmatprep.mubr.f32.mxu1 %v7879_v0  ;;  %7604 = vmatprep.subr.bf16.mxu0 %v7603_v33  ;;  %v7647_v33 = vpack.c.bf16 %v6920_v25, %v6888_v24  ;;  %v7089_v22 = vld [vmem:[%s7928_s19 + $0xf30] sm:$0x7]  ;;  %v6996_v24 = vld [vmem:[%s7928_s19 + $0xc48] sm:$0xff] }
  0xbf   : > { %6957 = vmatmul.mubr.msk.f32.vlgmr.msra.gmra.mrb[80].mxu0 %vm340_vm3, %v8455_v59  ;;  %7614 = vmatprep.subr.bf16.mxu1 %v7613_v36  ;;  %v7657_v36 = vpack.c.bf16 %v6922_v29, %v6890_v27  ;;  %v7028_v25 = vld [vmem:[%s7928_s19 + $0xd48] sm:$0xff]  ;;  %v6998_v27 = vld [vmem:[%s7928_s19 + $0xc58] sm:$0xff] }
  0xc0   : > { %6961 = vmatmul.mubr.msk.f32.vlgmr.msra.gmra.mrb[80].mxu1 %vm340_vm3, %v8455_v59  ;;  %7606 = vmatpush1.bf16.msra.mxu0 %v7605_v39  ;;  %v7650_v39 = vpack.c.bf16 %v6919_v32, %v6887_v31  ;;  %v7030_v29 = vld [vmem:[%s7928_s19 + $0xd58] sm:$0xff]  ;;  %v6995_v31 = vld [vmem:[%s7928_s19 + $0xc40] sm:$0xff] }
  0xc1   : > { %7616 = vmatpush1.bf16.msra.mxu1 %v7615_v42  ;;  %4108 = vmatprep.mubr.f32.mxu0 %v7879_v0  ;;  %v7660_v42 = vpack.c.bf16 %v6921_v35, %v6889_v34  ;;  %v7027_v32 = vld [vmem:[%s7928_s19 + $0xd40] sm:$0xff]  ;;  %v6997_v34 = vld [vmem:[%s7928_s19 + $0xc50] sm:$0xff] }
  0xc2   : > { %4185 = vmatprep.mubr.f32.mxu1 %v7879_v0  ;;  %7609 = vmatprep.subr.msk.bf16.mxu0 %vm7930_vm2, %v7607_v28  ;;  %v7663_v28 = vpack.c.bf16 %v7020_v38, %v6988_v37  ;;  %v7029_v35 = vld [vmem:[%s7928_s19 + $0xd50] sm:$0xff]  ;;  %v7060_v37 = vld [vmem:[%s7928_s19 + $0xe48] sm:$0xff] }
  0xc3   : > { %6958 = vmatmul.mubr.msk.f32.gmra.mrb[82].mxu0 %vm340_vm3, %v8476_v10  ;;  %7619 = vmatprep.subr.msk.bf16.mxu1 %vm7930_vm2, %v7617_v47  ;;  %v7673_v47 = vpack.c.bf16 %v7022_v41, %v6990_v40  ;;  %v7092_v38 = vld [vmem:[%s7928_s19 + $0xf48] sm:$0x7]  ;;  %v7062_v40 = vld [vmem:[%s7928_s19 + $0xe58] sm:$0xff] }
  0xc4   : > { %6962 = vmatmul.mubr.msk.f32.gmra.mrb[82].mxu1 %vm340_vm3, %v8476_v10  ;;  %7612 = vmatpush1.bf16.msk.msra.mxu0 %vm7930_vm2, %v7610_v50  ;;  %v7665_v50 = vpack.c.bf16 %v7019_v44, %v6987_v43  ;;  %v7094_v41 = vld [vmem:[%s7928_s19 + $0xf58] sm:$0x7]  ;;  %v7059_v43 = vld [vmem:[%s7928_s19 + $0xe40] sm:$0xff] }
  0xc5   : > { %7622 = vmatpush1.bf16.msk.msra.mxu1 %vm7930_vm2, %v7620_v54  ;;  %4256 = vmatprep.mubr.f32.mxu0 %v7879_v0  ;;  %v7675_v54 = vpack.c.bf16 %v7021_v46, %v6989_v45  ;;  %v7091_v44 = vld [vmem:[%s7928_s19 + $0xf40] sm:$0x7]  ;;  %v7061_v45 = vld [vmem:[%s7928_s19 + $0xe50] sm:$0xff] }
  0xc6   : > { %4333 = vmatprep.mubr.f32.mxu1 %v7879_v0  ;;  %7624 = vmatprep.subr.bf16.mxu0 %v7623_v51  ;;  %v7667_v51 = vpack.c.bf16 %v7084_v49, %v7052_v48  ;;  %v7093_v46 = vld [vmem:[%s7928_s19 + $0xf50] sm:$0x7]  ;;  %v7000_v48 = vld [vmem:[%s7928_s19 + $0xc68] sm:$0xff] }
  0xc7   : > { %6965 = vmatmul.mubr.msk.f32.vlgmr.msra.gmra.mrb[84].mxu0 %vm340_vm3, %v8455_v59  ;;  %7634 = vmatprep.subr.bf16.mxu1 %v7633_v60  ;;  %v7677_v60 = vpack.c.bf16 %v7086_v53, %v7054_v52  ;;  %v7032_v49 = vld [vmem:[%s7928_s19 + $0xd68] sm:$0xff]  ;;  %v7002_v52 = vld [vmem:[%s7928_s19 + $0xc78] sm:$0xff] }
  0xc8   : > { %6969 = vmatmul.mubr.msk.f32.vlgmr.msra.gmra.mrb[84].mxu1 %vm340_vm3, %v8455_v59  ;;  %7626 = vmatpush1.bf16.msra.mxu0 %v7625_v63  ;;  %v7670_v63 = vpack.c.bf16 %v7083_v56, %v7051_v55  ;;  %v7034_v53 = vld [vmem:[%s7928_s19 + $0xd78] sm:$0xff]  ;;  %v6999_v55 = vld [vmem:[%s7928_s19 + $0xc60] sm:$0xff] }
  0xc9   : > { %7636 = vmatpush1.bf16.msra.mxu1 %v7635_v4  ;;  %4262 = vmatprep.mubr.f32.mxu0 %v7879_v0  ;;  %v7680_v4 = vpack.c.bf16 %v7085_v58, %v7053_v57  ;;  %v7031_v56 = vld [vmem:[%s7928_s19 + $0xd60] sm:$0xff]  ;;  %v7033_v57 = vld [vmem:[%s7928_s19 + $0xd70] sm:$0xff]  ;;  %v7733_v58 = vpack.c.bf16 %v7034_v53, %v7002_v52 }
  0xca   : > { %4339 = vmatprep.mubr.f32.mxu1 %v7879_v0  ;;  %7629 = vmatprep.subr.msk.bf16.mxu0 %vm7930_vm2, %v7627_v7  ;;  %v7683_v7 = vpack.c.bf16 %v7024_v62, %v6992_v61  ;;  %v7096_v61 = vld [vmem:[%s7928_s19 + $0xf68] sm:$0x7]  ;;  %v7725_v62 = vpack.c.bf16 %v7031_v56, %v6999_v55  ;;  %v7039_v52 = vld [vmem:[%s7928_s19 + $0xda0] sm:$0xff]  ;;  %v7009_v55 = vld [vmem:[%s7928_s19 + $0xcb0] sm:$0xff] }
  0xcb   : > { %6966 = vmatmul.mubr.msk.f32.gmra.mrb[86].mxu0 %vm340_vm3, %v8476_v10  ;;  %7639 = vmatprep.subr.msk.bf16.mxu1 %vm7930_vm2, %v7637_v11  ;;  %v7693_v11 = vpack.c.bf16 %v7026_v3, %v6994_v2  ;;  %v7098_v2 = vld [vmem:[%s7928_s19 + $0xf78] sm:$0x7]  ;;  %v7041_v56 = vld [vmem:[%s7928_s19 + $0xdb0] sm:$0xff] }
  0xcc   : > { %6970 = vmatmul.mubr.msk.f32.gmra.mrb[86].mxu1 %vm340_vm3, %v8476_v10  ;;  %7632 = vmatpush1.bf16.msk.msra.mxu0 %vm7930_vm2, %v7630_v14  ;;  %v7685_v14 = vpack.c.bf16 %v7023_v6, %v6991_v5  ;;  %v7095_v5 = vld [vmem:[%s7928_s19 + $0xf60] sm:$0x7]  ;;  %v7065_v6 = vld [vmem:[%s7928_s19 + $0xe70] sm:$0xff] }
  0xcd   : > { %7642 = vmatpush1.bf16.msk.msra.mxu1 %vm7930_vm2, %v7640_v17  ;;  %4410 = vmatprep.mubr.f32.mxu0 %v7879_v0  ;;  %v7695_v17 = vpack.c.bf16 %v7025_v9, %v6993_v8  ;;  %v8933_v8 = vld [vmem:[%s10036_s1] sm:$0xff] }
  0xce   : > { %4487 = vmatprep.mubr.f32.mxu1 %v7879_v0  ;;  %7644 = vmatprep.subr.bf16.mxu0 %v7643_v20  ;;  %v7687_v20 = vpack.c.bf16 %v7088_v13, %v7056_v12  ;;  %v7036_v12 = vld [vmem:[%s7928_s19 + $0xd88] sm:$0xff] }
  0xcf   : > { %6973 = vmatmul.mubr.msk.f32.vlgmr.msra.gmra.mrb[88].mxu0 %vm340_vm3, %v8455_v59  ;;  %7654 = vmatprep.subr.bf16.mxu1 %v7653_v23  ;;  %v7697_v23 = vpack.c.bf16 %v7090_v16, %v7058_v15  ;;  %v7038_v15 = vld [vmem:[%s7928_s19 + $0xd98] sm:$0xff] }
  0xd0   : > { %6977 = vmatmul.mubr.msk.f32.vlgmr.msra.gmra.mrb[88].mxu1 %vm340_vm3, %v8455_v59  ;;  %7646 = vmatpush1.bf16.msra.mxu0 %v7645_v26  ;;  %v7690_v26 = vpack.c.bf16 %v7087_v19, %v7055_v18  ;;  %v7035_v18 = vld [vmem:[%s7928_s19 + $0xd80] sm:$0xff] }
  0xd1   : > { %7656 = vmatpush1.bf16.msra.mxu1 %v7655_v30  ;;  %4416 = vmatprep.mubr.f32.mxu0 %v7879_v0  ;;  %v7700_v30 = vpack.c.bf16 %v7089_v22, %v7057_v21  ;;  %v7005_v21 = vld [vmem:[%s7928_s19 + $0xc90] sm:$0xff] }
  0xd2   : > { %4493 = vmatprep.mubr.f32.mxu1 %v7879_v0  ;;  %7649 = vmatprep.subr.msk.bf16.mxu0 %vm7930_vm2, %v7647_v33  ;;  %v7703_v33 = vpack.c.bf16 %v7028_v25, %v6996_v24  ;;  %v7037_v22 = vld [vmem:[%s7928_s19 + $0xd90] sm:$0xff]  ;;  %v8960_v25 = vld [vmem:[%s10036_s1 + $0x8] sm:$0xff] }
  0xd3   : > { %6974 = vmatmul.mubr.msk.f32.gmra.mrb[90].mxu0 %vm340_vm3, %v8476_v10  ;;  %7659 = vmatprep.subr.msk.bf16.mxu1 %vm7930_vm2, %v7657_v36  ;;  %v7713_v36 = vpack.c.bf16 %v7030_v29, %v6998_v27  ;;  %v7068_v27 = vld [vmem:[%s7928_s19 + $0xe88] sm:$0xff] }
  0xd4   : > { %6978 = vmatmul.mubr.msk.f32.gmra.mrb[90].mxu1 %vm340_vm3, %v8476_v10  ;;  %7652 = vmatpush1.bf16.msk.msra.mxu0 %vm7930_vm2, %v7650_v39  ;;  %v7705_v39 = vpack.c.bf16 %v7027_v32, %v6995_v31  ;;  %v7100_v29 = vld [vmem:[%s7928_s19 + $0xf88] sm:$0x7]  ;;  %v7070_v32 = vld [vmem:[%s7928_s19 + $0xe98] sm:$0xff] }
  0xd5   : > { %7662 = vmatpush1.bf16.msk.msra.mxu1 %vm7930_vm2, %v7660_v42  ;;  %4564 = vmatprep.mubr.f32.mxu0 %v7879_v0  ;;  %v7715_v42 = vpack.c.bf16 %v7029_v35, %v6997_v34  ;;  %v7755_v34 = vpack.c.bf16 %v7037_v22, %v7005_v21  ;;  %v7067_v35 = vld [vmem:[%s7928_s19 + $0xe80] sm:$0xff] }
  0xd6   : > { %4641 = vmatprep.mubr.f32.mxu1 %v7879_v0  ;;  %7664 = vmatprep.subr.bf16.mxu0 %v7663_v28  ;;  %v7707_v28 = vpack.c.bf16 %v7092_v38, %v7060_v37  ;;  %v7747_v38 = vpack.c.bf16 %v7100_v29, %v7068_v27  ;;  %v7011_v22 = vld [vmem:[%s7928_s19 + $0xcc0] sm:$0xff] }
  0xd7   : > { %6981 = vmatmul.mubr.msk.f32.vlgmr.msra.gmra.mrb[92].mxu0 %vm340_vm3, %v8455_v59  ;;  %7674 = vmatprep.subr.bf16.mxu1 %v7673_v47  ;;  %v7717_v47 = vpack.c.bf16 %v7094_v41, %v7062_v40  ;;  %v7101_v40 = vld [vmem:[%s7928_s19 + $0xf90] sm:$0x7] }
  0xd8   : > { %6985 = vmatmul.mubr.msk.f32.vlgmr.msra.gmra.mrb[92].mxu1 %vm340_vm3, %v8455_v59  ;;  %7666 = vmatpush1.bf16.msra.mxu0 %v7665_v50  ;;  %v7710_v50 = vpack.c.bf16 %v7091_v44, %v7059_v43  ;;  %v7008_v44 = vld [vmem:[%s7928_s19 + $0xca8] sm:$0xff] }
  0xd9   : > { %7676 = vmatpush1.bf16.msra.mxu1 %v7675_v54  ;;  %4570 = vmatprep.mubr.f32.mxu0 %v7879_v0  ;;  %v7720_v54 = vpack.c.bf16 %v7093_v46, %v7061_v45 }
  0xda   : > { %4647 = vmatprep.mubr.f32.mxu1 %v7879_v0  ;;  %7669 = vmatprep.subr.msk.bf16.mxu0 %vm7930_vm2, %v7667_v51  ;;  %v7001_v51 = vld [vmem:[%s7928_s19 + $0xc70] sm:$0xff] }
  0xdb   : > { %6982 = vmatmul.mubr.msk.f32.gmra.mrb[94].mxu0 %vm340_vm3, %v8476_v10  ;;  %7679 = vmatprep.subr.msk.bf16.mxu1 %vm7930_vm2, %v7677_v60  ;;  %v7064_v60 = vld [vmem:[%s7928_s19 + $0xe68] sm:$0xff]  ;;  %v7735_v3 = vpack.c.bf16 %v7033_v57, %v7001_v51 }
  0xdc   : > { %6986 = vmatmul.mubr.msk.f32.gmra.mrb[94].mxu1 %vm340_vm3, %v8476_v10  ;;  %7672 = vmatpush1.bf16.msk.msra.mxu0 %vm7930_vm2, %v7670_v63  ;;  %v7066_v63 = vld [vmem:[%s7928_s19 + $0xe78] sm:$0xff] }
  0xdd   : > { %7682 = vmatpush1.bf16.msk.msra.mxu1 %vm7930_vm2, %v7680_v4  ;;  %5007 = vmatprep.mubr.f32.mxu0 %v7879_v0  ;;  %v7063_v4 = vld [vmem:[%s7928_s19 + $0xe60] sm:$0xff]  ;;  %v7737_v9 = vpack.c.bf16 %v7098_v2, %v7066_v63  ;;  %v7074_v63 = vld [vmem:[%s7928_s19 + $0xeb8] sm:$0xff] }
  0xde   : > { %5084 = vmatprep.mubr.f32.mxu1 %v7879_v0  ;;  %7684 = vmatprep.subr.bf16.mxu0 %v7683_v7  ;;  %v7097_v7 = vld [vmem:[%s7928_s19 + $0xf70] sm:$0x7]  ;;  %v7730_v13 = vpack.c.bf16 %v7095_v5, %v7063_v4  ;;  %v7106_v2 = vld [vmem:[%s7928_s19 + $0xfb8] sm:$0x7]  ;;  %v7071_v4 = vld [vmem:[%s7928_s19 + $0xea0] sm:$0xff] }
  0xdf   : > { %7117 = vmatmul.mubr.msk.f32.vlgmr.msra.gmra.mrb[96].mxu0 %vm340_vm3, %v8455_v59  ;;  %7694 = vmatprep.subr.bf16.mxu1 %v7693_v11  ;;  %v7004_v11 = vld [vmem:[%s7928_s19 + $0xc88] sm:$0xff]  ;;  %v7740_v16 = vpack.c.bf16 %v7097_v7, %v7065_v6  ;;  %v7103_v5 = vld [vmem:[%s7928_s19 + $0xfa0] sm:$0x7]  ;;  %v7073_v7 = vld [vmem:[%s7928_s19 + $0xeb0] sm:$0xff] }
  0xe0   : > { %7121 = vmatmul.mubr.msk.f32.vlgmr.msra.gmra.mrb[96].mxu1 %vm340_vm3, %v8455_v59  ;;  %7686 = vmatpush1.bf16.msra.mxu0 %v7685_v14  ;;  %v7006_v14 = vld [vmem:[%s7928_s19 + $0xc98] sm:$0xff] }
  0xe1   : > { %7696 = vmatpush1.bf16.msra.mxu1 %v7695_v17  ;;  %5013 = vmatprep.mubr.f32.mxu0 %v7879_v0  ;;  %v7003_v17 = vld [vmem:[%s7928_s19 + $0xc80] sm:$0xff] }
  0xe2   : > { %5090 = vmatprep.mubr.f32.mxu1 %v7879_v0  ;;  %7689 = vmatprep.subr.msk.bf16.mxu0 %vm7930_vm2, %v7687_v20  ;;  %v7743_v20 = vpack.c.bf16 %v7036_v12, %v7004_v11  ;;  %v7745_v31 = vpack.c.bf16 %v7035_v18, %v7003_v17  ;;  %v7770_v17 = vpack.c.bf16 %v7103_v5, %v7071_v4  ;;  %v7014_v18 = vld [vmem:[%s7928_s19 + $0xcd8] sm:$0xff]  ;;  %v7015_v4 = vld [vmem:[%s7928_s19 + $0xce0] sm:$0xff] }
  0xe3   : > { %7118 = vmatmul.mubr.msk.f32.gmra.mrb[98].mxu0 %vm340_vm3, %v8476_v10  ;;  %7699 = vmatprep.subr.msk.bf16.mxu1 %vm7930_vm2, %v7697_v23  ;;  %v7047_v5 = vld [vmem:[%s7928_s19 + $0xde0] sm:$0xff] }
  0xe4   : > { %7122 = vmatmul.mubr.msk.f32.gmra.mrb[98].mxu1 %vm340_vm3, %v8476_v10  ;;  %7692 = vmatpush1.bf16.msk.msra.mxu0 %vm7930_vm2, %v7690_v26  ;;  %v7753_v26 = vpack.c.bf16 %v7038_v15, %v7006_v14  ;;  %v7012_v14 = vld [vmem:[%s7928_s19 + $0xcc8] sm:$0xff] }
  0xe5   : > { %7702 = vmatpush1.bf16.msk.msra.mxu1 %vm7930_vm2, %v7700_v30  ;;  %5161 = vmatprep.mubr.f32.mxu0 %v7879_v0  ;;  %v7044_v15 = vld [vmem:[%s7928_s19 + $0xdc8] sm:$0xff] }
  0xe6   : > { %5238 = vmatprep.mubr.f32.mxu1 %v7879_v0  ;;  %7704 = vmatprep.subr.bf16.mxu0 %v7703_v33  ;;  %v7102_v33 = vld [vmem:[%s7928_s19 + $0xf98] sm:$0x7]  ;;  %v7783_v29 = vpack.c.bf16 %v7044_v15, %v7012_v14 }
  0xe7   : > { %7125 = vmatmul.mubr.msk.f32.vlgmr.msra.gmra.mrb[100].mxu0 %vm340_vm3, %v8455_v59  ;;  %7714 = vmatprep.subr.bf16.mxu1 %v7713_v36  ;;  %v7099_v36 = vld [vmem:[%s7928_s19 + $0xf80] sm:$0x7]  ;;  %v7757_v43 = vpack.c.bf16 %v7102_v33, %v7070_v32  ;;  %v7045_v32 = vld [vmem:[%s7928_s19 + $0xdd0] sm:$0xff] }
  0xe8   : > { %7129 = vmatmul.mubr.msk.f32.vlgmr.msra.gmra.mrb[100].mxu1 %vm340_vm3, %v8455_v59  ;;  %7706 = vmatpush1.bf16.msra.mxu0 %v7705_v39  ;;  %v7723_v59 = vpack.c.bf16 %v7032_v49, %v7000_v48  ;;  %v7069_v39 = vld [vmem:[%s7928_s19 + $0xe90] sm:$0xff]  ;;  %v7750_v46 = vpack.c.bf16 %v7099_v36, %v7067_v35  ;;  %v7042_v48 = vld [vmem:[%s7928_s19 + $0xdb8] sm:$0xff]  ;;  %v7076_v36 = vld [vmem:[%s7928_s19 + $0xec8] sm:$0xff] }
  0xe9   : > { %7716 = vmatpush1.bf16.msra.mxu1 %v7715_v42  ;;  %5167 = vmatprep.mubr.f32.mxu0 %v7879_v0  ;;  %v7760_v49 = vpack.c.bf16 %v7101_v40, %v7069_v39 }
  0xea   : > { %5244 = vmatprep.mubr.f32.mxu1 %v7879_v0  ;;  %7709 = vmatprep.subr.msk.bf16.mxu0 %vm7930_vm2, %v7707_v28  ;;  %v7040_v28 = vld [vmem:[%s7928_s19 + $0xda8] sm:$0xff] }
  0xeb   : > { %7126 = vmatmul.mubr.msk.f32.gmra.mrb[102].mxu0 %vm340_vm3, %v8476_v10  ;;  %7719 = vmatprep.subr.msk.bf16.mxu1 %vm7930_vm2, %v7717_v47  ;;  %v7010_v47 = vld [vmem:[%s7928_s19 + $0xcb8] sm:$0xff] }
  0xec   : > { %7130 = vmatmul.mubr.msk.f32.gmra.mrb[102].mxu1 %vm340_vm3, %v8476_v10  ;;  %7712 = vmatpush1.bf16.msk.msra.mxu0 %vm7930_vm2, %v7710_v50  ;;  %v7727_v10 = vpack.c.bf16 %v7096_v61, %v7064_v60  ;;  %v7007_v50 = vld [vmem:[%s7928_s19 + $0xca0] sm:$0xff]  ;;  %v7773_v57 = vpack.c.bf16 %v7042_v48, %v7010_v47  ;;  %v7104_v60 = vld [vmem:[%s7928_s19 + $0xfa8] sm:$0x7] }
  0xed   : > { %7722 = vmatpush1.bf16.msk.msra.mxu1 %vm7930_vm2, %v7720_v54  ;;  %5315 = vmatprep.mubr.f32.mxu0 %v7879_v0  ;;  %v7763_v54 = vpack.c.bf16 %v7040_v28, %v7008_v44  ;;  %v7110_v44 = vld [vmem:[%s7928_s19 + $0xfd8] sm:$0x7]  ;;  %v7107_v47 = vld [vmem:[%s7928_s19 + $0xfc0] sm:$0x7] }
  0xee   : > { %5392 = vmatprep.mubr.f32.mxu1 %v7879_v0  ;;  %7724 = vmatprep.subr.bf16.mxu0 %v7723_v59 }
  0xef   : > { %7133 = vmatmul.mubr.msk.f32.vlgmr.msra.gmra.mrb[104].mxu0 %vm340_vm3, %v8933_v8  ;;  %7734 = vmatprep.subr.bf16.mxu1 %v7733_v58  ;;  %v7072_v58 = vld [vmem:[%s7928_s19 + $0xea8] sm:$0xff] }
  0xf0   : > { %7137 = vmatmul.mubr.msk.f32.vlgmr.msra.gmra.mrb[104].mxu1 %vm340_vm3, %v8933_v8  ;;  %7726 = vmatpush1.bf16.msra.mxu0 %v7725_v62  ;;  %v7765_v62 = vpack.c.bf16 %v7039_v52, %v7007_v50  ;;  %v7767_v6 = vpack.c.bf16 %v7104_v60, %v7072_v58  ;;  %v7077_v50 = vld [vmem:[%s7928_s19 + $0xed0] sm:$0xff]  ;;  %v7048_v58 = vld [vmem:[%s7928_s19 + $0xde8] sm:$0xff] }
  0xf1   : > { %7736 = vmatpush1.bf16.msra.mxu1 %v7735_v3  ;;  %5321 = vmatprep.mubr.f32.mxu0 %v7879_v0  ;;  %v7775_v3 = vpack.c.bf16 %v7041_v56, %v7009_v55  ;;  %v7109_v52 = vld [vmem:[%s7928_s19 + $0xfd0] sm:$0x7] }
  0xf2   : > { %v8946_v19 = vpop.f32.mrb[0].mxu0  ;;  %5398 = vmatprep.mubr.f32.mxu1 %v7879_v0  ;;  %7729 = vmatprep.subr.msk.bf16.mxu0 %vm7930_vm2, %v7727_v10 }
  0xf3   : > { %10122 = vst [vmem:[#allocation2_spill] sm:$0xff] %v8946_v19  ;;  %v8953_v23 = vpop.f32.mrb[0].mxu1  ;;  %v8955_v24 = vpop.f32.mrb[1].mxu0  ;;  %7134 = vmatmul.mubr.msk.f32.gmra.mrb[106].mxu0 %vm340_vm3, %v8960_v25  ;;  %7739 = vmatprep.subr.msk.bf16.mxu1 %vm7930_vm2, %v7737_v9  ;;  %v7105_v9 = vld [vmem:[%s7928_s19 + $0xfb0] sm:$0x7] }
  0xf4   : > { %v8968_v30 = vpop.f32.mrb[1].mxu1  ;;  %7138 = vmatmul.mubr.msk.f32.gmra.mrb[106].mxu1 %vm340_vm3, %v8960_v25  ;;  %7732 = vmatpush1.bf16.msk.msra.mxu0 %vm7930_vm2, %v7730_v13  ;;  %v7777_v13 = vpack.c.bf16 %v7106_v2, %v7074_v63  ;;  %v7780_v21 = vpack.c.bf16 %v7105_v9, %v7073_v7  ;;  %v7018_v63 = vld [vmem:[%s7928_s19 + $0xcf8] sm:$0xff]  ;;  %v7017_v9 = vld [vmem:[%s7928_s19 + $0xcf0] sm:$0xff] }
  0xf5   : > { %7742 = vmatpush1.bf16.msk.msra.mxu1 %vm7930_vm2, %v7740_v16  ;;  %5469 = vmatprep.mubr.f32.mxu0 %v7879_v0  ;;  %v7050_v2 = vld [vmem:[%s7928_s19 + $0xdf8] sm:$0xff] }
  0xf6   : > { %v8981_v37 = vpop.f32.mrb[2].mxu0  ;;  %5546 = vmatprep.mubr.f32.mxu1 %v7879_v0  ;;  %7744 = vmatprep.subr.bf16.mxu0 %v7743_v20  ;;  %v7046_v20 = vld [vmem:[%s7928_s19 + $0xdd8] sm:$0xff] }
  0xf7   : > { %10123 = vst [vmem:[#allocation3_spill] sm:$0xff] %v8981_v37  ;;  %v8986_v41 = vpop.f32.mrb[2].mxu1  ;;  %v8988_v42 = vpop.f32.mrb[3].mxu0  ;;  %7141 = vmatmul.mubr.msk.f32.vlgmr.msra.gmra.mrb[108].mxu0 %vm340_vm3, %v8933_v8  ;;  %7754 = vmatprep.subr.bf16.mxu1 %v7753_v26  ;;  %v7043_v26 = vld [vmem:[%s7928_s19 + $0xdc0] sm:$0xff]  ;;  %v7793_v35 = vpack.c.bf16 %v7046_v20, %v7014_v18  ;;  %v7080_v18 = vld [vmem:[%s7928_s19 + $0xee8] sm:$0xff] }
  0xf8   : > { %v8994_v45 = vpop.f32.mrb[3].mxu1  ;;  %7145 = vmatmul.mubr.msk.f32.vlgmr.msra.gmra.mrb[108].mxu1 %vm340_vm3, %v8933_v8  ;;  %7746 = vmatpush1.bf16.msra.mxu0 %v7745_v31  ;;  %v7013_v31 = vld [vmem:[%s7928_s19 + $0xcd0] sm:$0xff]  ;;  %v7785_v40 = vpack.c.bf16 %v7043_v26, %v7011_v22  ;;  %v7112_v20 = vld [vmem:[%s7928_s19 + $0xfe8] sm:$0x7]  ;;  %v7805_v22 = vpack.c.bf16 %v7047_v5, %v7015_v4  ;;  %v7082_v26 = vld [vmem:[%s7928_s19 + $0xef8] sm:$0xff] }
  0xf9   : > { %7756 = vmatpush1.bf16.msra.mxu1 %v7755_v34  ;;  %5475 = vmatprep.mubr.f32.mxu0 %v7879_v0  ;;  %v7795_v28 = vpack.c.bf16 %v7045_v32, %v7013_v31  ;;  %v7079_v32 = vld [vmem:[%s7928_s19 + $0xee0] sm:$0xff] }
  0xfa   : > { %v9003_v53 = vpop.f32.mrb[4].mxu0  ;;  %5552 = vmatprep.mubr.f32.mxu1 %v7879_v0  ;;  %7749 = vmatprep.subr.msk.bf16.mxu0 %vm7930_vm2, %v7747_v38  ;;  %v7108_v38 = vld [vmem:[%s7928_s19 + $0xfc8] sm:$0x7] }
  0xfb   : > { %10124 = vst [vmem:[#allocation4_spill] sm:$0xff] %v9003_v53  ;;  %v9010_v59 = vpop.f32.mrb[4].mxu1  ;;  %v9012_v51 = vpop.f32.mrb[5].mxu0  ;;  %7142 = vmatmul.mubr.msk.f32.gmra.mrb[110].mxu0 %vm340_vm3, %v8960_v25  ;;  %7759 = vmatprep.subr.msk.bf16.mxu1 %vm7930_vm2, %v7757_v43  ;;  %v7078_v43 = vld [vmem:[%s7928_s19 + $0xed8] sm:$0xff] }
  0xfc   : > { %v9020_v61 = vpop.f32.mrb[5].mxu1  ;;  %7146 = vmatmul.mubr.msk.f32.gmra.mrb[110].mxu1 %vm340_vm3, %v8960_v25  ;;  %7752 = vmatpush1.bf16.msk.msra.mxu0 %vm7930_vm2, %v7750_v46  ;;  %v7075_v46 = vld [vmem:[%s7928_s19 + $0xec0] sm:$0xff]  ;;  %v7797_v56 = vpack.c.bf16 %v7110_v44, %v7078_v43  ;;  %v7113_v43 = vld [vmem:[%s7928_s19 + $0xff0] sm:$0x7] }
  0xfd   : > { %7762 = vmatpush1.bf16.msk.msra.mxu1 %vm7930_vm2, %v7760_v49  ;;  %5623 = vmatprep.mubr.f32.mxu0 %v7879_v0  ;;  %v7787_v49 = vpack.c.bf16 %v7108_v38, %v7076_v36  ;;  %v7807_v38 = vpack.c.bf16 %v7112_v20, %v7080_v18 }
  0xfe   : > { %v9033_v10 = vpop.f32.mrb[6].mxu0  ;;  %5700 = vmatprep.mubr.f32.mxu1 %v7879_v0  ;;  %7764 = vmatprep.subr.bf16.mxu0 %v7763_v54 }
  0xff   : > { %10125 = vst [vmem:[#allocation5_spill] sm:$0xff] %v9033_v10  ;;  %v9038_v11 = vpop.f32.mrb[6].mxu1  ;;  %v9040_v12 = vpop.f32.mrb[7].mxu0  ;;  %7149 = vmatmul.mubr.msk.f32.vlgmr.msra.gmra.mrb[112].mxu0 %vm340_vm3, %v8933_v8  ;;  %7774 = vmatprep.subr.bf16.mxu1 %v7773_v57  ;;  %v7016_v57 = vld [vmem:[%s7928_s19 + $0xce8] sm:$0xff] }
 0x100   : > { %v9046_v16 = vpop.f32.mrb[7].mxu1  ;;  %7153 = vmatmul.mubr.msk.f32.vlgmr.msra.gmra.mrb[112].mxu1 %vm340_vm3, %v8933_v8  ;;  %7766 = vmatpush1.bf16.msra.mxu0 %v7765_v62  ;;  %v7790_v62 = vpack.c.bf16 %v7107_v47, %v7075_v46  ;;  %v7803_v7 = vpack.c.bf16 %v7048_v58, %v7016_v57 }
 0x101   : > { %7776 = vmatpush1.bf16.msra.mxu1 %v7775_v3  ;;  %5629 = vmatprep.mubr.f32.mxu0 %v7879_v0  ;;  %v7800_v3 = vpack.c.bf16 %v7109_v52, %v7077_v50 }
 0x102   : > { %v9055_v27 = vpop.f32.mrb[8].mxu0  ;;  %5706 = vmatprep.mubr.f32.mxu1 %v7879_v0  ;;  %7769 = vmatprep.subr.msk.bf16.mxu0 %vm7930_vm2, %v7767_v6 }
 0x103   : > { %10126 = vst [vmem:[#allocation6_spill] sm:$0xff] %v9055_v27  ;;  %v9062_v33 = vpop.f32.mrb[8].mxu1  ;;  %v9064_v34 = vpop.f32.mrb[9].mxu0  ;;  %7150 = vmatmul.mubr.msk.f32.gmra.mrb[114].mxu0 %vm340_vm3, %v8960_v25  ;;  %7779 = vmatprep.subr.msk.bf16.mxu1 %vm7930_vm2, %v7777_v13  ;;  %v7049_v13 = vld [vmem:[%s7928_s19 + $0xdf0] sm:$0xff] }
 0x104   : > { %v9072_v39 = vpop.f32.mrb[9].mxu1  ;;  %7154 = vmatmul.mubr.msk.f32.gmra.mrb[114].mxu1 %vm340_vm3, %v8960_v25  ;;  %7772 = vmatpush1.bf16.msk.msra.mxu0 %vm7930_vm2, %v7770_v17  ;;  %v7813_v17 = vpack.c.bf16 %v7050_v2, %v7018_v63  ;;  %v7815_v31 = vpack.c.bf16 %v7049_v13, %v7017_v9  ;;  %v7881_v2 = vmov 0  }
 0x105   : > { %7782 = vmatpush1.bf16.msk.msra.mxu1 %vm7930_vm2, %v7780_v21  ;;  %5777 = vmatprep.mubr.f32.mxu0 %v7879_v0 }
 0x106   : > { %v9085_v48 = vpop.f32.mrb[10].mxu0  ;;  %5854 = vmatprep.mubr.f32.mxu1 %v7879_v0  ;;  %7784 = vmatprep.subr.bf16.mxu0 %v7783_v29  ;;  %v7114_v29 = vld [vmem:[%s7928_s19 + $0xff8] sm:$0x7] }
 0x107   : > { %10127 = vst [vmem:[#allocation7_spill] sm:$0xff] %v9085_v48  ;;  %v9090_v54 = vpop.f32.mrb[10].mxu1  ;;  %v9092_v55 = vpop.f32.mrb[11].mxu0  ;;  %7157 = vmatmul.mubr.msk.f32.vlgmr.msra.gmra.mrb[116].mxu0 %vm340_vm3, %v8933_v8  ;;  %7794 = vmatprep.subr.bf16.mxu1 %v7793_v35  ;;  %v7111_v35 = vld [vmem:[%s7928_s19 + $0xfe0] sm:$0x7]  ;;  %v7817_v46 = vpack.c.bf16 %v7114_v29, %v7082_v26 }
 0x108   : > { %v9098_v60 = vpop.f32.mrb[11].mxu1  ;;  %7161 = vmatmul.mubr.msk.f32.vlgmr.msra.gmra.mrb[116].mxu1 %vm340_vm3, %v8933_v8  ;;  %7786 = vmatpush1.bf16.msra.mxu0 %v7785_v40  ;;  %v7081_v40 = vld [vmem:[%s7928_s19 + $0xef0] sm:$0xff] }
 0x109   : > { %7796 = vmatpush1.bf16.msra.mxu1 %v7795_v28  ;;  %5783 = vmatprep.mubr.f32.mxu0 %v7879_v0  ;;  %v7820_v50 = vpack.c.bf16 %v7113_v43, %v7081_v40 }
 0x10a   : > { %v9107_v6 = vpop.f32.mrb[12].mxu0  ;;  %5860 = vmatprep.mubr.f32.mxu1 %v7879_v0  ;;  %7789 = vmatprep.subr.msk.bf16.mxu0 %vm7930_vm2, %v7787_v49  ;;  %v7810_v49 = vpack.c.bf16 %v7111_v35, %v7079_v32 }
 0x10b   : > { %10128 = vst [vmem:[#allocation8_spill] sm:$0xff] %v9107_v6  ;;  %v9114_v14 = vpop.f32.mrb[12].mxu1  ;;  %v9116_v15 = vpop.f32.mrb[13].mxu0  ;;  %7158 = vmatmul.mubr.msk.f32.gmra.mrb[118].mxu0 %vm340_vm3, %v8960_v25  ;;  %7799 = vmatprep.subr.msk.bf16.mxu1 %vm7930_vm2, %v7797_v56 }
 0x10c   : > { %v9124_v21 = vpop.f32.mrb[13].mxu1  ;;  %7162 = vmatmul.mubr.msk.f32.gmra.mrb[118].mxu1 %vm340_vm3, %v8960_v25  ;;  %7792 = vmatpush1.bf16.msk.msra.mxu0 %vm7930_vm2, %v7790_v62  ;;  %v6239_v62 = vld [vmem:[%s10037_s2] sm:$0xff] }
 0x10d   : > { %7802 = vmatpush1.bf16.msk.msra.mxu1 %vm7930_vm2, %v7800_v3  ;;  %5931 = vmatprep.mubr.f32.mxu0 %v7879_v0 }
 0x10e   : > { %v9137_v36 = vpop.f32.mrb[14].mxu0  ;;  %6008 = vmatprep.mubr.f32.mxu1 %v7879_v0  ;;  %7804 = vmatprep.subr.bf16.mxu0 %v7803_v7 }
 0x10f   : > { %10129 = vst [vmem:[#allocation9_spill] sm:$0xff] %v9137_v36  ;;  %v9142_v44 = vpop.f32.mrb[14].mxu1  ;;  %v9144_v28 = vpop.f32.mrb[15].mxu0  ;;  %7165 = vmatmul.mubr.msk.f32.vlgmr.msra.gmra.mrb[120].mxu0 %vm340_vm3, %v8933_v8  ;;  %7814 = vmatprep.subr.bf16.mxu1 %v7813_v17 }
 0x110   : > { %v9148_v47 = vpop.f32.mrb[15].mxu1  ;;  %7169 = vmatmul.mubr.msk.f32.vlgmr.msra.gmra.mrb[120].mxu1 %vm340_vm3, %v8933_v8  ;;  %7806 = vmatpush1.bf16.msra.mxu0 %v7805_v22 }
 0x111   : > { %7816 = vmatpush1.bf16.msra.mxu1 %v7815_v31  ;;  %5937 = vmatprep.mubr.f32.mxu0 %v7879_v0 }
 0x112   : > { %v9153_v52 = vpop.f32.mrb[16].mxu0  ;;  %6014 = vmatprep.mubr.f32.mxu1 %v7879_v0  ;;  %7809 = vmatprep.subr.msk.bf16.mxu0 %vm7930_vm2, %v7807_v38 }
 0x113   : > { %10130 = vst [vmem:[#allocation10_spill] sm:$0xff] %v9153_v52  ;;  %v9158_v56 = vpop.f32.mrb[16].mxu1  ;;  %v9160_v57 = vpop.f32.mrb[17].mxu0  ;;  %7166 = vmatmul.mubr.msk.f32.gmra.mrb[122].mxu0 %vm340_vm3, %v8960_v25  ;;  %7819 = vmatprep.subr.msk.bf16.mxu1 %vm7930_vm2, %v7817_v46 }
 0x114   : > { %v9166_v58 = vpop.f32.mrb[17].mxu1  ;;  %7170 = vmatmul.mubr.msk.f32.gmra.mrb[122].mxu1 %vm340_vm3, %v8960_v25  ;;  %7812 = vmatpush1.bf16.msk.msra.mxu0 %vm7930_vm2, %v7810_v49 }
 0x115   : > { %7822 = vmatpush1.bf16.msk.msra.mxu1 %vm7930_vm2, %v7820_v50  ;;  %6085 = vmatprep.mubr.f32.mxu0 %v7879_v0 }
 0x116   : > { %v9178_v63 = vpop.f32.mrb[18].mxu0  ;;  %6162 = vmatprep.mubr.f32.mxu1 %v7879_v0  ;;  %7850 = vset.pattern.permute.xlu0 %v7881_v2 }
 0x117   : > { %10131 = vst [vmem:[#allocation11_spill] sm:$0xff] %v9178_v63  ;;  %v9181_v3 = vpop.f32.mrb[18].mxu1  ;;  %v9183_v4 = vpop.f32.mrb[19].mxu0  ;;  %7173 = vmatmul.mubr.msk.f32.vlgmr.msra.gmra.mrb[124].mxu0 %vm340_vm3, %v8933_v8  ;;  %6243 = vperm.xlu0 %7850, %v6239_v62  }
 0x118   : > { %v9187_v5 = vpop.f32.mrb[19].mxu1  ;;  %7177 = vmatmul.mubr.msk.f32.vlgmr.msra.gmra.mrb[124].mxu1 %vm340_vm3, %v8933_v8  ;;  %6091 = vmatprep.mubr.f32.mxu0 %v7879_v0 }
 0x119   : > { %6168 = vmatprep.mubr.f32.mxu1 %v7879_v0 }
 0x11a   : > { %v9196_v7 = vpop.f32.mrb[20].mxu0 }
 0x11b   : > { %10132 = vst [vmem:[#allocation12_spill] sm:$0xff] %v9196_v7  ;;  %v9198_v9 = vpop.f32.mrb[20].mxu1  ;;  %v9200_v13 = vpop.f32.mrb[21].mxu0  ;;  %7174 = vmatmul.mubr.msk.f32.gmra.mrb[126].mxu0 %vm340_vm3, %v8960_v25  ;;  %6248 = vperm.xlu0 %7850, %v6240_v1  }
 0x11c   : > { %v9204_v17 = vpop.f32.mrb[21].mxu1  ;;  %7178 = vmatmul.mubr.msk.f32.gmra.mrb[126].mxu1 %vm340_vm3, %v8960_v25 }
 0x11e   : > { %v9208_v8 = vpop.f32.mrb[22].mxu0 }
 0x11f   : > { %10133 = vst [vmem:[#allocation13_spill] sm:$0xff] %v9208_v8  ;;  %v9210_v18 = vpop.f32.mrb[22].mxu1  ;;  %v9212_v0 = vpop.f32.mrb[23].mxu0 }
 0x120   : > { %v9214_v20 = vpop.f32.mrb[23].mxu1 }
 0x121   : > { %10134 = vst [vmem:[#allocation14_spill] sm:$0xff] %v9214_v20 }
 0x122   : > { %v9216_v22 = vpop.f32.mrb[24].mxu0 }
 0x123   : > { %10135 = vst [vmem:[#allocation15_spill] sm:$0xff] %v9216_v22  ;;  %v9218_v26 = vpop.f32.mrb[24].mxu1  ;;  %v9220_v29 = vpop.f32.mrb[25].mxu0 }
 0x124   : > { %10136 = vst [vmem:[#allocation16_spill] sm:$0xff] %v9218_v26  ;;  %10137 = vst [vmem:[#allocation17_spill] sm:$0xff] %v9220_v29  ;;  %v9222_v31 = vpop.f32.mrb[25].mxu1 }
 0x125   : > { %10138 = vst [vmem:[#allocation18_spill] sm:$0xff] %v9222_v31 }
 0x126   : > { %v9224_v32 = vpop.f32.mrb[26].mxu0 }
 0x127   : > { %10139 = vst [vmem:[#allocation19_spill] sm:$0xff] %v9224_v32  ;;  %v9226_v35 = vpop.f32.mrb[26].mxu1  ;;  %v9228_v25 = vpop.f32.mrb[27].mxu0 }
 0x128   : > { %10140 = vst [vmem:[#allocation20_spill] sm:$0xff] %v9226_v35  ;;  %10141 = vst [vmem:[#allocation21_spill] sm:$0xff] %v9228_v25  ;;  %v9230_v38 = vpop.f32.mrb[27].mxu1  ;;  %v10212_v25 = vld [vmem:[#allocation2_spill] sm:$0xff] }
 0x129   : > { %10142 = vst [vmem:[#allocation22_spill] sm:$0xff] %v9230_v38 }
 0x12a   : > { %v9232_v40 = vpop.f32.mrb[28].mxu0 }
 0x12b   : > { %10143 = vst [vmem:[#allocation23_spill] sm:$0xff] %v9232_v40  ;;  %v9234_v43 = vpop.f32.mrb[28].mxu1  ;;  %v9236_v46 = vpop.f32.mrb[29].mxu0 }
 0x12c   : > { %10144 = vst [vmem:[#allocation24_spill] sm:$0xff] %v9234_v43  ;;  %10145 = vst [vmem:[#allocation25_spill] sm:$0xff] %v9236_v46  ;;  %v9238_v49 = vpop.f32.mrb[29].mxu1 }
 0x12d   : > { %10146 = vst [vmem:[#allocation26_spill] sm:$0xff] %v9238_v49 }
 0x12e   : > { %v9240_v50 = vpop.f32.mrb[30].mxu0 }
 0x12f   : > { %10147 = vst [vmem:[#allocation27_spill] sm:$0xff] %v9240_v50  ;;  %v9242_v62 = vpop.f32.mrb[30].mxu1  ;;  %v9244_v2 = vpop.f32.mrb[31].mxu0 }
 0x130   : > { %10148 = vst [vmem:[#allocation28_spill] sm:$0xff] %v9242_v62  ;;  %10149 = vst [vmem:[#allocation29_spill] sm:$0xff] %v9244_v2  ;;  %v9246_v1 = vpop.f32.mrb[31].mxu1 }
 0x131   : > { %10150 = vst [vmem:[#allocation30_spill] sm:$0xff] %v9246_v1 }
 0x132   : > { %v9248_v35 = vpop.f32.mrb[32].mxu0 }
 0x133   : > { %10151 = vst [vmem:[#allocation31_spill] sm:$0xff] %v9248_v35  ;;  %v9252_v40 = vpop.f32.mrb[32].mxu1  ;;  %v9254_v43 = vpop.f32.mrb[33].mxu0 }
 0x134   : > { %10152 = vst [vmem:[#allocation32_spill] sm:$0xff] %v9254_v43  ;;  %v9260_v62 = vpop.f32.mrb[33].mxu1  ;;  %v10216_v26 = vmax.f32 %v8953_v23, %v9252_v40 }
 0x135   : > { %10153 = vst [vmem:[#allocation33_spill] sm:$0xff] %v9260_v62 }
 0x136   : > { %v9264_v2 = vpop.f32.mrb[34].mxu0 }
 0x137   : > { %10154 = vst [vmem:[#allocation34_spill] sm:$0xff] %v9264_v2  ;;  %v9268_v35 = vpop.f32.mrb[34].mxu1  ;;  %v9270_v19 = vpop.f32.mrb[35].mxu0 }
 0x138   : > { %10155 = vst [vmem:[#allocation35_spill] sm:$0xff] %v9270_v19  ;;  %v9276_v43 = vpop.f32.mrb[35].mxu1 }
 0x139   : > { %10156 = vst [vmem:[#allocation36_spill] sm:$0xff] %v9276_v43 }
 0x13a   : > { %v9280_v62 = vpop.f32.mrb[36].mxu0 }
 0x13b   : > { %10157 = vst [vmem:[#allocation37_spill] sm:$0xff] %v9280_v62  ;;  %v9284_v2 = vpop.f32.mrb[36].mxu1  ;;  %v9286_v37 = vpop.f32.mrb[37].mxu0  ;;  %v10217_v50 = vld [vmem:[#allocation32_spill] sm:$0xff] }
 0x13c   : > { %10158 = vst [vmem:[#allocation38_spill] sm:$0xff] %v9286_v37  ;;  %v9292_v19 = vpop.f32.mrb[37].mxu1  ;;  %v10219_v1 = vld [vmem:[#allocation33_spill] sm:$0xff] }
 0x13d   : > { %10159 = vst [vmem:[#allocation39_spill] sm:$0xff] %v9292_v19 }
 0x13e   : > { %v9296_v43 = vpop.f32.mrb[38].mxu0 }
 0x13f   : > { %10160 = vst [vmem:[#allocation40_spill] sm:$0xff] %v9296_v43  ;;  %v9300_v62 = vpop.f32.mrb[38].mxu1  ;;  %v9302_v53 = vpop.f32.mrb[39].mxu0 }
 0x140   : > { %10161 = vst [vmem:[#allocation41_spill] sm:$0xff] %v9302_v53  ;;  %v9308_v37 = vpop.f32.mrb[39].mxu1 }
 0x141   : > { %10162 = vst [vmem:[#allocation42_spill] sm:$0xff] %v9308_v37 }
 0x142   : > { %v9312_v19 = vpop.f32.mrb[40].mxu0 }
 0x143   : > { %10163 = vst [vmem:[#allocation43_spill] sm:$0xff] %v9312_v19  ;;  %v9316_v43 = vpop.f32.mrb[40].mxu1  ;;  %v9318_v10 = vpop.f32.mrb[41].mxu0 }
 0x144   : > { %10164 = vst [vmem:[#allocation44_spill] sm:$0xff] %v9318_v10  ;;  %v9324_v53 = vpop.f32.mrb[41].mxu1 }
 0x145   : > { %10165 = vst [vmem:[#allocation45_spill] sm:$0xff] %v9324_v53 }
 0x146   : > { %v9328_v37 = vpop.f32.mrb[42].mxu0 }
 0x147   : > { %10166 = vst [vmem:[#allocation46_spill] sm:$0xff] %v9328_v37  ;;  %v9332_v19 = vpop.f32.mrb[42].mxu1  ;;  %v9334_v27 = vpop.f32.mrb[43].mxu0 }
 0x148   : > { %10167 = vst [vmem:[#allocation47_spill] sm:$0xff] %v9334_v27  ;;  %v9340_v10 = vpop.f32.mrb[43].mxu1 }
 0x149   : > { %10168 = vst [vmem:[#allocation48_spill] sm:$0xff] %v9340_v10 }
 0x14a   : > { %v9344_v53 = vpop.f32.mrb[44].mxu0 }
 0x14b   : > { %10169 = vst [vmem:[#allocation49_spill] sm:$0xff] %v9344_v53  ;;  %v9348_v37 = vpop.f32.mrb[44].mxu1  ;;  %v9350_v48 = vpop.f32.mrb[45].mxu0 }
 0x14c   : > { %10170 = vst [vmem:[#allocation50_spill] sm:$0xff] %v9350_v48  ;;  %v9356_v27 = vpop.f32.mrb[45].mxu1 }
 0x14d   : > { %10171 = vst [vmem:[#allocation51_spill] sm:$0xff] %v9356_v27 }
 0x14e   : > { %v9360_v10 = vpop.f32.mrb[46].mxu0 }
 0x14f   : > { %10172 = vst [vmem:[#allocation52_spill] sm:$0xff] %v9360_v10  ;;  %v9364_v53 = vpop.f32.mrb[46].mxu1  ;;  %v9366_v6 = vpop.f32.mrb[47].mxu0 }
 0x150   : > { %10173 = vst [vmem:[#allocation53_spill] sm:$0xff] %v9366_v6  ;;  %v9372_v48 = vpop.f32.mrb[47].mxu1 }
 0x151   : > { %10174 = vst [vmem:[#allocation54_spill] sm:$0xff] %v9372_v48 }
 0x152   : > { %v9376_v27 = vpop.f32.mrb[48].mxu0 }
 0x153   : > { %10175 = vst [vmem:[#allocation55_spill] sm:$0xff] %v9376_v27  ;;  %v9380_v10 = vpop.f32.mrb[48].mxu1  ;;  %v9382_v36 = vpop.f32.mrb[49].mxu0 }
 0x154   : > { %10176 = vst [vmem:[#allocation56_spill] sm:$0xff] %v9382_v36  ;;  %v9388_v6 = vpop.f32.mrb[49].mxu1 }
 0x155   : > { %10177 = vst [vmem:[#allocation57_spill] sm:$0xff] %v9388_v6 }
 0x156   : > { %v9392_v48 = vpop.f32.mrb[50].mxu0 }
 0x157   : > { %10178 = vst [vmem:[#allocation58_spill] sm:$0xff] %v9392_v48  ;;  %v9396_v27 = vpop.f32.mrb[50].mxu1  ;;  %v9398_v52 = vpop.f32.mrb[51].mxu0 }
 0x158   : > { %10179 = vst [vmem:[#allocation59_spill] sm:$0xff] %v9398_v52  ;;  %v9404_v36 = vpop.f32.mrb[51].mxu1 }
 0x159   : > { %10180 = vst [vmem:[#allocation60_spill] sm:$0xff] %v9404_v36 }
 0x15a   : > { %v9408_v6 = vpop.f32.mrb[52].mxu0 }
 0x15b   : > { %10181 = vst [vmem:[#allocation61_spill] sm:$0xff] %v9408_v6  ;;  %v9412_v48 = vpop.f32.mrb[52].mxu1  ;;  %v9414_v63 = vpop.f32.mrb[53].mxu0 }
 0x15c   : > { %10182 = vst [vmem:[#allocation62_spill] sm:$0xff] %v9414_v63  ;;  %v9420_v52 = vpop.f32.mrb[53].mxu1 }
 0x15d   : > { %10183 = vst [vmem:[#allocation63_spill] sm:$0xff] %v9420_v52 }
 0x15e   : > { %v9424_v36 = vpop.f32.mrb[54].mxu0 }
 0x15f   : > { %10184 = vst [vmem:[#allocation64_spill] sm:$0xff] %v9424_v36  ;;  %v9428_v6 = vpop.f32.mrb[54].mxu1  ;;  %v9430_v7 = vpop.f32.mrb[55].mxu0 }
 0x160   : > { %10185 = vst [vmem:[#allocation65_spill] sm:$0xff] %v9430_v7  ;;  %v9436_v63 = vpop.f32.mrb[55].mxu1 }
 0x161   : > { %10186 = vst [vmem:[#allocation66_spill] sm:$0xff] %v9436_v63 }
 0x162   : > { %v9440_v52 = vpop.f32.mrb[56].mxu0 }
 0x163   : > { %10187 = vst [vmem:[#allocation67_spill] sm:$0xff] %v9440_v52  ;;  %v9444_v36 = vpop.f32.mrb[56].mxu1  ;;  %v9446_v8 = vpop.f32.mrb[57].mxu0 }
 0x164   : > { %10188 = vst [vmem:[#allocation68_spill] sm:$0xff] %v9444_v36  ;;  %10189 = vst [vmem:[#allocation69_spill] sm:$0xff] %v9446_v8  ;;  %v9452_v7 = vpop.f32.mrb[57].mxu1  ;;  %v10213_v36 = vld [vmem:[#allocation31_spill] sm:$0xff] }
 0x165   : > { %10190 = vst [vmem:[#allocation70_spill] sm:$0xff] %v9452_v7  ;;  %v10214_v20 = vmax.f32 %v10212_v25, %v10213_v36 }
 0x166   : > { %v9456_v63 = vpop.f32.mrb[58].mxu0 }
 0x167   : > { %10191 = vst [vmem:[#allocation71_spill] sm:$0xff] %v9456_v63  ;;  %v9460_v52 = vpop.f32.mrb[58].mxu1  ;;  %v9462_v22 = vpop.f32.mrb[59].mxu0 }
 0x168   : > { %10192 = vst [vmem:[#allocation72_spill] sm:$0xff] %v9460_v52  ;;  %10193 = vst [vmem:[#allocation73_spill] sm:$0xff] %v9462_v22  ;;  %v9468_v8 = vpop.f32.mrb[59].mxu1  ;;  %v10208_v52 = vld [vmem:[#allocation28_spill] sm:$0xff] }
 0x169   : > { %10195 = vst [vmem:[#allocation74_spill] sm:$0xff] %v9468_v8 }
 0x16a   : > { %v9472_v7 = vpop.f32.mrb[60].mxu0 }
 0x16b   : > { %10197 = vst [vmem:[#allocation75_spill] sm:$0xff] %v9472_v7  ;;  %v9476_v63 = vpop.f32.mrb[60].mxu1  ;;  %v9478_v32 = vpop.f32.mrb[61].mxu0 }
 0x16c   : > { %10199 = vst [vmem:[#allocation76_spill] sm:$0xff] %v9476_v63  ;;  %10200 = vst [vmem:[#allocation77_spill] sm:$0xff] %v9478_v32  ;;  %v9484_v22 = vpop.f32.mrb[61].mxu1 }
 0x16d   : > { %10202 = vst [vmem:[#allocation78_spill] sm:$0xff] %v9484_v22 }
 0x16e   : > { %v9488_v8 = vpop.f32.mrb[62].mxu0 }
 0x16f   : > { %10204 = vst [vmem:[#allocation79_spill] sm:$0xff] %v9488_v8  ;;  %v9492_v7 = vpop.f32.mrb[62].mxu1  ;;  %v9494_v31 = vpop.f32.mrb[63].mxu0 }
 0x170   : > { %10206 = vst [vmem:[#allocation80_spill] sm:$0xff] %v9492_v7  ;;  %10207 = vst [vmem:[#allocation81_spill] sm:$0xff] %v9494_v31  ;;  %v9500_v32 = vpop.f32.mrb[63].mxu1  ;;  %v10218_v31 = vmax.f32 %v8955_v24, %v10217_v50 }
 0x171   : > { %10210 = vst [vmem:[#allocation28_spill] sm:$0xff] %v9500_v32  ;;  %v10220_v32 = vmax.f32 %v8968_v30, %v10219_v1 }
 0x172   : > { %v3488_v22 = vpop.f32.mrb[64].mxu0 }
 0x173   : > { %v9507_v38 = vmax.f32 %v10214_v20, %v3488_v22  ;;  %v3565_v8 = vpop.f32.mrb[64].mxu1  ;;  %v3490_v29 = vpop.f32.mrb[65].mxu0  ;;  %v10221_v20 = vld [vmem:[#allocation3_spill] sm:$0xff]  ;;  %v10222_v22 = vld [vmem:[#allocation34_spill] sm:$0xff] }
 0x174   : > { %v9512_v49 = vmax.f32 %v10216_v26, %v3565_v8  ;;  %v9517_v63 = vmax.f32 %v10218_v31, %v3490_v29  ;;  %v3567_v7 = vpop.f32.mrb[65].mxu1  ;;  %v10223_v25 = vmax.f32 %v10221_v20, %v10222_v22  ;;  %v10224_v26 = vmax.f32 %v8986_v41, %v9268_v35  ;;  %v10225_v29 = vld [vmem:[#allocation35_spill] sm:$0xff]  ;;  %v10230_v20 = vld [vmem:[#allocation37_spill] sm:$0xff] }
 0x175   : > { %10215 = vst [vmem:[#allocation2_spill] sm:$0xff] %v9507_v38  ;;  %v9522_v46 = vmax.f32 %v10220_v32, %v3567_v7  ;;  %v10226_v31 = vmax.f32 %v8988_v42, %v10225_v29  ;;  %v10227_v7 = vld [vmem:[#allocation36_spill] sm:$0xff] }
 0x176   : > { %v3494_v36 = vpop.f32.mrb[66].mxu0  ;;  %v10228_v32 = vmax.f32 %v8994_v45, %v10227_v7 }
 0x177   : > { %v9527_v38 = vmax.f32 %v10223_v25, %v3494_v36  ;;  %v3571_v23 = vpop.f32.mrb[66].mxu1  ;;  %v3496_v8 = vpop.f32.mrb[67].mxu0  ;;  %v10229_v36 = vld [vmem:[#allocation4_spill] sm:$0xff] }
 0x178   : > { %v9532_v24 = vmax.f32 %v10224_v26, %v3571_v23  ;;  %v9537_v40 = vmax.f32 %v10226_v31, %v3496_v8  ;;  %v3573_v30 = vpop.f32.mrb[67].mxu1  ;;  %v10231_v22 = vmax.f32 %v10229_v36, %v10230_v20  ;;  %v10232_v23 = vmax.f32 %v9010_v59, %v9284_v2  ;;  %v10233_v8 = vld [vmem:[#allocation38_spill] sm:$0xff]  ;;  %v10235_v31 = vld [vmem:[#allocation39_spill] sm:$0xff]  ;;  %v10238_v36 = vld [vmem:[#allocation40_spill] sm:$0xff] }
 0x179   : > { %v9542_v50 = vmax.f32 %v10228_v32, %v3573_v30  ;;  %v10234_v26 = vmax.f32 %v9012_v51, %v10233_v8  ;;  %v10236_v30 = vmax.f32 %v9020_v61, %v10235_v31 }
 0x17a   : > { %v3642_v1 = vpop.f32.mrb[68].mxu0 }
 0x17b   : > { %v9547_v25 = vmax.f32 %v10231_v22, %v3642_v1  ;;  %v3719_v41 = vpop.f32.mrb[68].mxu1  ;;  %v3644_v35 = vpop.f32.mrb[69].mxu0  ;;  %v10237_v1 = vld [vmem:[#allocation5_spill] sm:$0xff] }
 0x17c   : > { %v9552_v42 = vmax.f32 %v10232_v23, %v3719_v41  ;;  %v9557_v29 = vmax.f32 %v10234_v26, %v3644_v35  ;;  %v3721_v45 = vpop.f32.mrb[69].mxu1  ;;  %v10239_v20 = vmax.f32 %v10237_v1, %v10238_v36  ;;  %v10240_v41 = vmax.f32 %v9038_v11, %v9300_v62  ;;  %v10241_v35 = vld [vmem:[#allocation41_spill] sm:$0xff]  ;;  %v10243_v26 = vld [vmem:[#allocation42_spill] sm:$0xff]  ;;  %v10246_v1 = vld [vmem:[#allocation43_spill] sm:$0xff] }
 0x17d   : > { %v9562_v7 = vmax.f32 %v10236_v30, %v3721_v45  ;;  %v10242_v23 = vmax.f32 %v9040_v12, %v10241_v35  ;;  %v10244_v45 = vmax.f32 %v9046_v16, %v10243_v26 }
 0x17e   : > { %v3648_v32 = vpop.f32.mrb[70].mxu0 }
 0x17f   : > { %v9567_v22 = vmax.f32 %v10239_v20, %v3648_v32  ;;  %v3725_v59 = vpop.f32.mrb[70].mxu1  ;;  %v3650_v2 = vpop.f32.mrb[71].mxu0  ;;  %v10245_v32 = vld [vmem:[#allocation6_spill] sm:$0xff] }
 0x180   : > { %v9572_v51 = vmax.f32 %v10240_v41, %v3725_v59  ;;  %v9577_v8 = vmax.f32 %v10242_v23, %v3650_v2  ;;  %v3727_v61 = vpop.f32.mrb[71].mxu1  ;;  %v10247_v36 = vmax.f32 %v10245_v32, %v10246_v1  ;;  %v10248_v59 = vmax.f32 %v9062_v33, %v9316_v43  ;;  %v10249_v2 = vld [vmem:[#allocation44_spill] sm:$0xff]  ;;  %v10251_v23 = vld [vmem:[#allocation45_spill] sm:$0xff]  ;;  %v10254_v32 = vld [vmem:[#allocation46_spill] sm:$0xff] }
 0x181   : > { %v9582_v31 = vmax.f32 %v10244_v45, %v3727_v61  ;;  %v10250_v41 = vmax.f32 %v9064_v34, %v10249_v2  ;;  %v10252_v61 = vmax.f32 %v9072_v39, %v10251_v23 }
 0x182   : > { %v3796_v30 = vpop.f32.mrb[72].mxu0 }
 0x183   : > { %v9587_v20 = vmax.f32 %v10247_v36, %v3796_v30  ;;  %v3873_v11 = vpop.f32.mrb[72].mxu1  ;;  %v3798_v62 = vpop.f32.mrb[73].mxu0  ;;  %v10253_v30 = vld [vmem:[#allocation7_spill] sm:$0xff] }
 0x184   : > { %v9592_v12 = vmax.f32 %v10248_v59, %v3873_v11  ;;  %v9597_v35 = vmax.f32 %v10250_v41, %v3798_v62  ;;  %v3875_v16 = vpop.f32.mrb[73].mxu1  ;;  %v10255_v1 = vmax.f32 %v10253_v30, %v10254_v32  ;;  %v10256_v11 = vmax.f32 %v9090_v54, %v9332_v19  ;;  %v10257_v62 = vld [vmem:[#allocation47_spill] sm:$0xff]  ;;  %v10259_v41 = vld [vmem:[#allocation48_spill] sm:$0xff]  ;;  %v10262_v30 = vld [vmem:[#allocation49_spill] sm:$0xff] }
 0x185   : > { %v9602_v26 = vmax.f32 %v10252_v61, %v3875_v16  ;;  %v10258_v59 = vmax.f32 %v9092_v55, %v10257_v62  ;;  %v10260_v16 = vmax.f32 %v9098_v60, %v10259_v41 }
 0x186   : > { %v3802_v45 = vpop.f32.mrb[74].mxu0 }
 0x187   : > { %v9607_v36 = vmax.f32 %v10255_v1, %v3802_v45  ;;  %v3879_v33 = vpop.f32.mrb[74].mxu1  ;;  %v3804_v43 = vpop.f32.mrb[75].mxu0  ;;  %v10261_v45 = vld [vmem:[#allocation8_spill] sm:$0xff] }
 0x188   : > { %v9612_v34 = vmax.f32 %v10256_v11, %v3879_v33  ;;  %v9617_v2 = vmax.f32 %v10258_v59, %v3804_v43  ;;  %v3881_v39 = vpop.f32.mrb[75].mxu1  ;;  %v10263_v32 = vmax.f32 %v10261_v45, %v10262_v30  ;;  %v10264_v33 = vmax.f32 %v9114_v14, %v9348_v37  ;;  %v10265_v43 = vld [vmem:[#allocation50_spill] sm:$0xff]  ;;  %v10267_v59 = vld [vmem:[#allocation51_spill] sm:$0xff]  ;;  %v10270_v45 = vld [vmem:[#allocation52_spill] sm:$0xff] }
 0x189   : > { %v9622_v23 = vmax.f32 %v10260_v16, %v3881_v39  ;;  %v10266_v11 = vmax.f32 %v9116_v15, %v10265_v43  ;;  %v10268_v39 = vmax.f32 %v9124_v21, %v10267_v59 }
 0x18a   : > { %v3950_v61 = vpop.f32.mrb[76].mxu0 }
 0x18b   : > { %v9627_v1 = vmax.f32 %v10263_v32, %v3950_v61  ;;  %v4027_v19 = vpop.f32.mrb[76].mxu1  ;;  %v3952_v54 = vpop.f32.mrb[77].mxu0  ;;  %v10269_v61 = vld [vmem:[#allocation9_spill] sm:$0xff] }
 0x18c   : > { %v9632_v55 = vmax.f32 %v10264_v33, %v4027_v19  ;;  %v9637_v62 = vmax.f32 %v10266_v11, %v3952_v54  ;;  %v4029_v60 = vpop.f32.mrb[77].mxu1  ;;  %v10271_v30 = vmax.f32 %v10269_v61, %v10270_v45  ;;  %v10272_v19 = vmax.f32 %v9142_v44, %v9364_v53  ;;  %v10273_v54 = vld [vmem:[#allocation53_spill] sm:$0xff]  ;;  %v10275_v11 = vld [vmem:[#allocation54_spill] sm:$0xff]  ;;  %v10278_v61 = vld [vmem:[#allocation55_spill] sm:$0xff] }
 0x18d   : > { %v9642_v41 = vmax.f32 %v10268_v39, %v4029_v60  ;;  %v10274_v33 = vmax.f32 %v9144_v28, %v10273_v54  ;;  %v10276_v60 = vmax.f32 %v9148_v47, %v10275_v11 }
 0x18e   : > { %v3956_v16 = vpop.f32.mrb[78].mxu0 }
 0x18f   : > { %v9647_v32 = vmax.f32 %v10271_v30, %v3956_v16  ;;  %v4033_v37 = vpop.f32.mrb[78].mxu1  ;;  %v3958_v14 = vpop.f32.mrb[79].mxu0  ;;  %v10277_v16 = vld [vmem:[#allocation10_spill] sm:$0xff] }
 0x190   : > { %v9652_v15 = vmax.f32 %v10272_v19, %v4033_v37  ;;  %v9657_v43 = vmax.f32 %v10274_v33, %v3958_v14  ;;  %v4035_v21 = vpop.f32.mrb[79].mxu1  ;;  %v10279_v45 = vmax.f32 %v10277_v16, %v10278_v61  ;;  %v10280_v37 = vmax.f32 %v9158_v56, %v9380_v10  ;;  %v10281_v14 = vld [vmem:[#allocation56_spill] sm:$0xff]  ;;  %v10283_v33 = vld [vmem:[#allocation57_spill] sm:$0xff]  ;;  %v10286_v16 = vld [vmem:[#allocation58_spill] sm:$0xff] }
 0x191   : > { %v9662_v59 = vmax.f32 %v10276_v60, %v4035_v21  ;;  %v10282_v19 = vmax.f32 %v9160_v57, %v10281_v14  ;;  %v10284_v21 = vmax.f32 %v9166_v58, %v10283_v33 }
 0x192   : > { %v4104_v39 = vpop.f32.mrb[80].mxu0 }
 0x193   : > { %v9667_v30 = vmax.f32 %v10279_v45, %v4104_v39  ;;  %v4181_v53 = vpop.f32.mrb[80].mxu1  ;;  %v4106_v44 = vpop.f32.mrb[81].mxu0  ;;  %v10285_v39 = vld [vmem:[#allocation11_spill] sm:$0xff] }
 0x194   : > { %v9672_v28 = vmax.f32 %v10280_v37, %v4181_v53  ;;  %v9677_v54 = vmax.f32 %v10282_v19, %v4106_v44  ;;  %v4183_v47 = vpop.f32.mrb[81].mxu1  ;;  %v10287_v61 = vmax.f32 %v10285_v39, %v10286_v16  ;;  %v10288_v53 = vmax.f32 %v9181_v3, %v9396_v27  ;;  %v10289_v44 = vld [vmem:[#allocation59_spill] sm:$0xff]  ;;  %v10291_v19 = vld [vmem:[#allocation60_spill] sm:$0xff]  ;;  %v10294_v39 = vld [vmem:[#allocation61_spill] sm:$0xff] }
 0x195   : > { %v9682_v11 = vmax.f32 %v10284_v21, %v4183_v47  ;;  %v10290_v37 = vmax.f32 %v9183_v4, %v10289_v44  ;;  %v10292_v47 = vmax.f32 %v9187_v5, %v10291_v19 }
 0x196   : > { %v4110_v60 = vpop.f32.mrb[82].mxu0 }
 0x197   : > { %v9687_v45 = vmax.f32 %v10287_v61, %v4110_v60  ;;  %v4187_v10 = vpop.f32.mrb[82].mxu1  ;;  %v4112_v56 = vpop.f32.mrb[83].mxu0  ;;  %v10293_v60 = vld [vmem:[#allocation12_spill] sm:$0xff] }
 0x198   : > { %v9692_v57 = vmax.f32 %v10288_v53, %v4187_v10  ;;  %v9697_v14 = vmax.f32 %v10290_v37, %v4112_v56  ;;  %v4189_v58 = vpop.f32.mrb[83].mxu1  ;;  %v10295_v16 = vmax.f32 %v10293_v60, %v10294_v39  ;;  %v10296_v10 = vmax.f32 %v9198_v9, %v9412_v48  ;;  %v10297_v56 = vld [vmem:[#allocation62_spill] sm:$0xff]  ;;  %v10299_v37 = vld [vmem:[#allocation63_spill] sm:$0xff]  ;;  %v10302_v60 = vld [vmem:[#allocation64_spill] sm:$0xff] }
 0x199   : > { %v9702_v33 = vmax.f32 %v10292_v47, %v4189_v58  ;;  %v10298_v53 = vmax.f32 %v9200_v13, %v10297_v56  ;;  %v10300_v58 = vmax.f32 %v9204_v17, %v10299_v37 }
 0x19a   : > { %v4258_v21 = vpop.f32.mrb[84].mxu0 }
 0x19b   : > { %v9707_v61 = vmax.f32 %v10295_v16, %v4258_v21  ;;  %v4335_v27 = vpop.f32.mrb[84].mxu1  ;;  %v4260_v3 = vpop.f32.mrb[85].mxu0  ;;  %v10301_v21 = vld [vmem:[#allocation13_spill] sm:$0xff] }
 0x19c   : > { %v9712_v4 = vmax.f32 %v10296_v10, %v4335_v27  ;;  %v9717_v44 = vmax.f32 %v10298_v53, %v4260_v3  ;;  %v4337_v5 = vpop.f32.mrb[85].mxu1  ;;  %v10303_v39 = vmax.f32 %v10301_v21, %v10302_v60  ;;  %v10305_v27 = vmax.f32 %v9210_v18, %v9428_v6  ;;  %v10307_v3 = vld [vmem:[#allocation65_spill] sm:$0xff]  ;;  %v10310_v53 = vld [vmem:[#allocation14_spill] sm:$0xff]  ;;  %v10314_v21 = vld [vmem:[#allocation15_spill] sm:$0xff] }
 0x19d   : > { %v9722_v19 = vmax.f32 %v10300_v58, %v4337_v5  ;;  %v10308_v10 = vmax.f32 %v9212_v0, %v10307_v3  ;;  %v10311_v5 = vld [vmem:[#allocation66_spill] sm:$0xff]  ;;  %v10315_v60 = vld [vmem:[#allocation67_spill] sm:$0xff]  ;;  %v10323_v3 = vld [vmem:[#allocation69_spill] sm:$0xff] }
 0x19e   : > { %v4264_v47 = vpop.f32.mrb[86].mxu0  ;;  %v10312_v37 = vmax.f32 %v10310_v53, %v10311_v5  ;;  %v10326_v53 = vld [vmem:[#allocation18_spill] sm:$0xff] }
 0x19f   : > { %v9727_v16 = vmax.f32 %v10303_v39, %v4264_v47  ;;  %v4341_v48 = vpop.f32.mrb[86].mxu1  ;;  %v4266_v9 = vpop.f32.mrb[87].mxu0  ;;  %v10316_v39 = vmax.f32 %v10314_v21, %v10315_v60  ;;  %v10327_v5 = vld [vmem:[#allocation70_spill] sm:$0xff]  ;;  %v10330_v21 = vld [vmem:[#allocation19_spill] sm:$0xff] }
 0x1a0   : > { %v9732_v13 = vmax.f32 %v10305_v27, %v4341_v48  ;;  %v9737_v56 = vmax.f32 %v10308_v10, %v4266_v9  ;;  %v4343_v17 = vpop.f32.mrb[87].mxu1  ;;  %v10318_v48 = vld [vmem:[#allocation16_spill] sm:$0xff]  ;;  %v10322_v9 = vld [vmem:[#allocation17_spill] sm:$0xff]  ;;  %v10331_v60 = vld [vmem:[#allocation71_spill] sm:$0xff] }
 0x1a1   : > { %10304 = vst [vmem:[#allocation31_spill] sm:$0xff] %v9727_v16  ;;  %v9742_v58 = vmax.f32 %v10312_v37, %v4343_v17  ;;  %v10319_v27 = vld [vmem:[#allocation68_spill] sm:$0xff]  ;;  %v10324_v10 = vmax.f32 %v10322_v9, %v10323_v3  ;;  %v10328_v37 = vmax.f32 %v10326_v53, %v10327_v5  ;;  %v10339_v3 = vld [vmem:[#allocation73_spill] sm:$0xff]  ;;  %v10342_v53 = vld [vmem:[#allocation22_spill] sm:$0xff] }
 0x1a2   : > { %10306 = vst [vmem:[#allocation32_spill] sm:$0xff] %v9732_v13  ;;  %10309 = vst [vmem:[#allocation33_spill] sm:$0xff] %v9737_v56  ;;  %v4412_v47 = vpop.f32.mrb[88].mxu0  ;;  %v10320_v13 = vmax.f32 %v10318_v48, %v10319_v27  ;;  %v10335_v27 = vld [vmem:[#allocation72_spill] sm:$0xff]  ;;  %v10343_v5 = vld [vmem:[#allocation74_spill] sm:$0xff] }
 0x1a3   : > { %10313 = vst [vmem:[#allocation3_spill] sm:$0xff] %v9742_v58  ;;  %v9747_v16 = vmax.f32 %v10316_v39, %v4412_v47  ;;  %v4489_v6 = vpop.f32.mrb[88].mxu1  ;;  %v4414_v18 = vpop.f32.mrb[89].mxu0  ;;  %v10332_v39 = vmax.f32 %v10330_v21, %v10331_v60  ;;  %v10346_v21 = vld [vmem:[#allocation23_spill] sm:$0xff] }
 0x1a4   : > { %v9752_v0 = vmax.f32 %v10320_v13, %v4489_v6  ;;  %v9757_v56 = vmax.f32 %v10324_v10, %v4414_v18  ;;  %v4491_v17 = vpop.f32.mrb[89].mxu1  ;;  %v10334_v6 = vld [vmem:[#allocation20_spill] sm:$0xff]  ;;  %v10338_v18 = vld [vmem:[#allocation21_spill] sm:$0xff]  ;;  %v10347_v60 = vld [vmem:[#allocation75_spill] sm:$0xff] }
 0x1a5   : > { %10317 = vst [vmem:[#allocation34_spill] sm:$0xff] %v9747_v16  ;;  %v9762_v58 = vmax.f32 %v10328_v37, %v4491_v17  ;;  %v10340_v10 = vmax.f32 %v10338_v18, %v10339_v3  ;;  %v10344_v37 = vmax.f32 %v10342_v53, %v10343_v5  ;;  %v10354_v3 = vld [vmem:[#allocation77_spill] sm:$0xff]  ;;  %v10357_v53 = vld [vmem:[#allocation26_spill] sm:$0xff] }
 0x1a6   : > { %10321 = vst [vmem:[#allocation35_spill] sm:$0xff] %v9752_v0  ;;  %10325 = vst [vmem:[#allocation36_spill] sm:$0xff] %v9757_v56  ;;  %v4418_v47 = vpop.f32.mrb[90].mxu0  ;;  %v10336_v0 = vmax.f32 %v10334_v6, %v10335_v27  ;;  %v10351_v27 = vld [vmem:[#allocation76_spill] sm:$0xff]  ;;  %v10358_v5 = vld [vmem:[#allocation78_spill] sm:$0xff] }
 0x1a7   : > { %10329 = vst [vmem:[#allocation4_spill] sm:$0xff] %v9762_v58  ;;  %v9767_v16 = vmax.f32 %v10332_v39, %v4418_v47  ;;  %v4495_v48 = vpop.f32.mrb[90].mxu1  ;;  %v4420_v13 = vpop.f32.mrb[91].mxu0  ;;  %v10348_v39 = vmax.f32 %v10346_v21, %v10347_v60  ;;  %v10361_v60 = vld [vmem:[#allocation27_spill] sm:$0xff] }
 0x1a8   : > { %v9772_v9 = vmax.f32 %v10336_v0, %v4495_v48  ;;  %v9777_v56 = vmax.f32 %v10340_v10, %v4420_v13  ;;  %v4497_v17 = vpop.f32.mrb[91].mxu1  ;;  %v10350_v48 = vld [vmem:[#allocation24_spill] sm:$0xff]  ;;  %v10353_v13 = vld [vmem:[#allocation25_spill] sm:$0xff] }
 0x1a9   : > { %10333 = vst [vmem:[#allocation37_spill] sm:$0xff] %v9767_v16  ;;  %v9782_v58 = vmax.f32 %v10344_v37, %v4497_v17  ;;  %v10355_v10 = vmax.f32 %v10353_v13, %v10354_v3  ;;  %v10359_v37 = vmax.f32 %v10357_v53, %v10358_v5  ;;  %v10367_v13 = vld [vmem:[#allocation29_spill] sm:$0xff]  ;;  %v9819_v53 = vpop.permute.xlu0 %6243  ;;  %v10370_v5 = vld [vmem:[#allocation30_spill] sm:$0xff] }
 0x1aa   : > { %10337 = vst [vmem:[#allocation38_spill] sm:$0xff] %v9772_v9  ;;  %10341 = vst [vmem:[#allocation39_spill] sm:$0xff] %v9777_v56  ;;  %v4566_v47 = vpop.f32.mrb[92].mxu0  ;;  %v10352_v9 = vmax.f32 %v10350_v48, %v10351_v27  ;;  %v10365_v48 = vld [vmem:[#allocation80_spill] sm:$0xff]  ;;  %v10368_v3 = vld [vmem:[#allocation81_spill] sm:$0xff] }
 0x1ab   : > { %10345 = vst [vmem:[#allocation5_spill] sm:$0xff] %v9782_v58  ;;  %v9787_v16 = vmax.f32 %v10348_v39, %v4566_v47  ;;  %v4643_v6 = vpop.f32.mrb[92].mxu1  ;;  %v4568_v0 = vpop.f32.mrb[93].mxu0  ;;  %v10362_v39 = vld [vmem:[#allocation79_spill] sm:$0xff]  ;;  %v10366_v27 = vmax.f32 %v10208_v52, %v10365_v48 }
 0x1ac   : > { %v9792_v18 = vmax.f32 %v10352_v9, %v4643_v6  ;;  %v9797_v56 = vmax.f32 %v10355_v10, %v4568_v0  ;;  %v4645_v17 = vpop.f32.mrb[93].mxu1  ;;  %v10369_v10 = vmax.f32 %v10367_v13, %v10368_v3 }
 0x1ad   : > { %10349 = vst [vmem:[#allocation40_spill] sm:$0xff] %v9787_v16  ;;  %v9802_v21 = vmax.f32 %v10359_v37, %v4645_v17  ;;  %v10363_v16 = vmax.f32 %v10361_v60, %v10362_v39  ;;  %v10371_v37 = vld [vmem:[#allocation28_spill] sm:$0xff]  ;;  %v10373_v39 = vld [vmem:[#allocation2_spill] sm:$0xff] }
 0x1ae   : > { %10356 = vst [vmem:[#allocation41_spill] sm:$0xff] %v9797_v56  ;;  %v4572_v47 = vpop.f32.mrb[94].mxu0  ;;  %v10372_v60 = vmax.f32 %v10370_v5, %v10371_v37 }
 0x1af   : > { %10360 = vst [vmem:[#allocation42_spill] sm:$0xff] %v9802_v21  ;;  %v9807_v58 = vmax.f32 %v10363_v16, %v4572_v47  ;;  %v4649_v9 = vpop.f32.mrb[94].mxu1  ;;  %v4574_v6 = vpop.f32.mrb[95].mxu0 }
 0x1b0   : > { %v9812_v0 = vmax.f32 %v10366_v27, %v4649_v9  ;;  %v9817_v56 = vmax.f32 %v10369_v10, %v4574_v6  ;;  %v4651_v17 = vpop.f32.mrb[95].mxu1 }
 0x1b1   : > { %10364 = vst [vmem:[#allocation6_spill] sm:$0xff] %v9807_v58  ;;  %v9824_v16 = vmax.f32 %v10372_v60, %v4651_v17 }
 0x1b2   : > { %v5009_v47 = vpop.f32.mrb[96].mxu0 }
 0x1b3   : > { %v6175_v58 = vmax.f32 %v10373_v39, %v5009_v47  ;;  %v5086_v21 = vpop.f32.mrb[96].mxu1  ;;  %v5011_v52 = vpop.f32.mrb[97].mxu0 }
 0x1b4   : > { %v6177_v9 = vmax.f32 %v9512_v49, %v5086_v21  ;;  %v6176_v48 = vmax.f32 %v9517_v63, %v5011_v52  ;;  %v5088_v6 = vpop.f32.mrb[97].mxu1  ;;  %v9839_v49 = vpop.permute.xlu0 %6248 }
 0x1b5   : > { %v6178_v27 = vmax.f32 %v9522_v46, %v5088_v6  ;;  %v6251_v13 = vadd.f32 %v9819_v53, %v6175_v58 }
 0x1b6   : > { %v6252_v3 = vadd.f32 %v9819_v53, %v6176_v48  ;;  %v6253_v10 = vadd.f32 %v9819_v53, %v6177_v9  ;;  %v5015_v17 = vpop.f32.mrb[98].mxu0 }
 0x1b7   : > { %v6254_v63 = vadd.f32 %v9819_v53, %v6178_v27  ;;  %v6315_v46 = vmax.f32 %v6251_v13, 0.0  ;;  %v6207_v58 = vmax.f32 %v9527_v38, %v5015_v17  ;;  %v5092_v21 = vpop.f32.mrb[98].mxu1  ;;  %v5017_v5 = vpop.f32.mrb[99].mxu0 }
 0x1b8   : > { %v6316_v37 = vmax.f32 %v6252_v3, 0.0  ;;  %v6317_v60 = vmax.f32 %v6253_v10, 0.0  ;;  %v6209_v47 = vmax.f32 %v9532_v24, %v5092_v21  ;;  %v6208_v39 = vmax.f32 %v9537_v40, %v5017_v5  ;;  %v5094_v52 = vpop.f32.mrb[99].mxu1 }
 0x1b9   : > { %v6318_v9 = vmax.f32 %v6254_v63, 0.0  ;;  %6379 = vst [vmem:[%s9835_s16] sm:$0xff] %v6315_v46  ;;  %v6210_v48 = vmax.f32 %v9542_v50, %v5094_v52  ;;  %v6283_v6 = vadd.f32 %v9839_v49, %v6207_v58 }
 0x1ba   : > { %6380 = vst [vmem:[%s9835_s16 + $0x8] sm:$0xff] %v6316_v37  ;;  %6381 = vst [vmem:[%s9835_s16 + $0x10] sm:$0xff] %v6317_v60  ;;  %v6284_v38 = vadd.f32 %v9839_v49, %v6208_v39  ;;  %v6285_v27 = vadd.f32 %v9839_v49, %v6209_v47  ;;  %v5163_v13 = vpop.f32.mrb[100].mxu0 }
 0x1bb   : > { %6382 = vst [vmem:[%s9835_s16 + $0x18] sm:$0xff] %v6318_v9  ;;  %v6286_v24 = vadd.f32 %v9839_v49, %v6210_v48  ;;  %v6347_v40 = vmax.f32 %v6283_v6, 0.0  ;;  %v6179_v3 = vmax.f32 %v9547_v25, %v5163_v13  ;;  %v5240_v10 = vpop.f32.mrb[100].mxu1  ;;  %v5165_v50 = vpop.f32.mrb[101].mxu0 }
 0x1bc   : > { %v6348_v17 = vmax.f32 %v6284_v38, 0.0  ;;  %v6349_v63 = vmax.f32 %v6285_v27, 0.0  ;;  %v6181_v46 = vmax.f32 %v9552_v42, %v5240_v10  ;;  %v6180_v58 = vmax.f32 %v9557_v29, %v5165_v50  ;;  %v5242_v21 = vpop.f32.mrb[101].mxu1 }
 0x1bd   : > { %v6350_v5 = vmax.f32 %v6286_v24, 0.0  ;;  %6411 = vst [vmem:[%s9835_s16 + $0x100] sm:$0xff] %v6347_v40  ;;  %v6255_v37 = vadd.f32 %v9819_v53, %v6179_v3  ;;  %v6182_v60 = vmax.f32 %v9562_v7, %v5242_v21 }
 0x1be   : > { %6412 = vst [vmem:[%s9835_s16 + $0x108] sm:$0xff] %v6348_v17  ;;  %6413 = vst [vmem:[%s9835_s16 + $0x110] sm:$0xff] %v6349_v63  ;;  %v6257_v25 = vadd.f32 %v9819_v53, %v6181_v46  ;;  %v6256_v47 = vadd.f32 %v9819_v53, %v6180_v58  ;;  %v5169_v39 = vpop.f32.mrb[102].mxu0 }
 0x1bf   : > { %6414 = vst [vmem:[%s9835_s16 + $0x118] sm:$0xff] %v6350_v5  ;;  %v6319_v42 = vmax.f32 %v6255_v37, 0.0  ;;  %v6258_v29 = vadd.f32 %v9819_v53, %v6182_v60  ;;  %v6211_v52 = vmax.f32 %v9567_v22, %v5169_v39  ;;  %v5246_v9 = vpop.f32.mrb[102].mxu1  ;;  %v5171_v48 = vpop.f32.mrb[103].mxu0 }
 0x1c0   : > { %v6321_v7 = vmax.f32 %v6257_v25, 0.0  ;;  %v6320_v6 = vmax.f32 %v6256_v47, 0.0  ;;  %v6213_v38 = vmax.f32 %v9572_v51, %v5246_v9  ;;  %v6212_v27 = vmax.f32 %v9577_v8, %v5171_v48  ;;  %v5248_v13 = vpop.f32.mrb[103].mxu1 }
 0x1c1   : > { %6383 = vst [vmem:[%s9835_s16 + $0x20] sm:$0xff] %v6319_v42  ;;  %v6322_v24 = vmax.f32 %v6258_v29, 0.0  ;;  %v6287_v40 = vadd.f32 %v9839_v49, %v6211_v52  ;;  %v6214_v3 = vmax.f32 %v9582_v31, %v5248_v13 }
 0x1c2   : > { %6385 = vst [vmem:[%s9835_s16 + $0x30] sm:$0xff] %v6321_v7  ;;  %6384 = vst [vmem:[%s9835_s16 + $0x28] sm:$0xff] %v6320_v6  ;;  %v6289_v22 = vadd.f32 %v9839_v49, %v6213_v38  ;;  %v6288_v10 = vadd.f32 %v9839_v49, %v6212_v27  ;;  %v5317_v50 = vpop.f32.mrb[104].mxu0 }
 0x1c3   : > { %6386 = vst [vmem:[%s9835_s16 + $0x38] sm:$0xff] %v6322_v24  ;;  %v6351_v51 = vmax.f32 %v6287_v40, 0.0  ;;  %v6290_v8 = vadd.f32 %v9839_v49, %v6214_v3  ;;  %v6183_v17 = vmax.f32 %v9587_v20, %v5317_v50  ;;  %v5394_v63 = vpop.f32.mrb[104].mxu1  ;;  %v5319_v46 = vpop.f32.mrb[105].mxu0 }
 0x1c4   : > { %v6353_v31 = vmax.f32 %v6289_v22, 0.0  ;;  %v6352_v58 = vmax.f32 %v6288_v10, 0.0  ;;  %v6185_v21 = vmax.f32 %v9592_v12, %v5394_v63  ;;  %v6184_v5 = vmax.f32 %v9597_v35, %v5319_v46  ;;  %v5396_v37 = vpop.f32.mrb[105].mxu1 }
 0x1c5   : > { %6415 = vst [vmem:[%s9835_s16 + $0x120] sm:$0xff] %v6351_v51  ;;  %v6354_v60 = vmax.f32 %v6290_v8, 0.0  ;;  %v6259_v25 = vadd.f32 %v9819_v53, %v6183_v17  ;;  %v6186_v47 = vmax.f32 %v9602_v26, %v5396_v37 }
 0x1c6   : > { %6417 = vst [vmem:[%s9835_s16 + $0x130] sm:$0xff] %v6353_v31  ;;  %6416 = vst [vmem:[%s9835_s16 + $0x128] sm:$0xff] %v6352_v58  ;;  %v6261_v20 = vadd.f32 %v9819_v53, %v6185_v21  ;;  %v6260_v39 = vadd.f32 %v9819_v53, %v6184_v5  ;;  %v5323_v42 = vpop.f32.mrb[106].mxu0 }
 0x1c7   : > { %6418 = vst [vmem:[%s9835_s16 + $0x138] sm:$0xff] %v6354_v60  ;;  %v6323_v12 = vmax.f32 %v6259_v25, 0.0  ;;  %v6262_v35 = vadd.f32 %v9819_v53, %v6186_v47  ;;  %v6215_v29 = vmax.f32 %v9607_v36, %v5323_v42  ;;  %v5400_v52 = vpop.f32.mrb[106].mxu1  ;;  %v5325_v9 = vpop.f32.mrb[107].mxu0 }
 0x1c8   : > { %v6325_v26 = vmax.f32 %v6261_v20, 0.0  ;;  %v6324_v48 = vmax.f32 %v6260_v39, 0.0  ;;  %v6217_v7 = vmax.f32 %v9612_v34, %v5400_v52  ;;  %v6216_v6 = vmax.f32 %v9617_v2, %v5325_v9  ;;  %v5402_v38 = vpop.f32.mrb[107].mxu1 }
 0x1c9   : > { %6387 = vst [vmem:[%s9835_s16 + $0x40] sm:$0xff] %v6323_v12  ;;  %v6326_v27 = vmax.f32 %v6262_v35, 0.0  ;;  %v6291_v13 = vadd.f32 %v9839_v49, %v6215_v29  ;;  %v6218_v24 = vmax.f32 %v9622_v23, %v5402_v38 }
 0x1ca   : > { %6389 = vst [vmem:[%s9835_s16 + $0x50] sm:$0xff] %v6325_v26  ;;  %6388 = vst [vmem:[%s9835_s16 + $0x48] sm:$0xff] %v6324_v48  ;;  %v6293_v36 = vadd.f32 %v9839_v49, %v6217_v7  ;;  %v6292_v40 = vadd.f32 %v9839_v49, %v6216_v6  ;;  %v5471_v3 = vpop.f32.mrb[108].mxu0 }
 0x1cb   : > { %6390 = vst [vmem:[%s9835_s16 + $0x58] sm:$0xff] %v6326_v27  ;;  %v6355_v34 = vmax.f32 %v6291_v13, 0.0  ;;  %v6294_v2 = vadd.f32 %v9839_v49, %v6218_v24  ;;  %v6187_v22 = vmax.f32 %v9627_v1, %v5471_v3  ;;  %v5548_v10 = vpop.f32.mrb[108].mxu1  ;;  %v5473_v50 = vpop.f32.mrb[109].mxu0 }
 0x1cc   : > { %v6357_v23 = vmax.f32 %v6293_v36, 0.0  ;;  %v6356_v51 = vmax.f32 %v6292_v40, 0.0  ;;  %v6189_v8 = vmax.f32 %v9632_v55, %v5548_v10  ;;  %v6188_v17 = vmax.f32 %v9637_v62, %v5473_v50  ;;  %v5550_v63 = vpop.f32.mrb[109].mxu1 }
 0x1cd   : > { %6419 = vst [vmem:[%s9835_s16 + $0x140] sm:$0xff] %v6355_v34  ;;  %v6358_v46 = vmax.f32 %v6294_v2, 0.0  ;;  %v6263_v31 = vadd.f32 %v9819_v53, %v6187_v22  ;;  %v6190_v58 = vmax.f32 %v9642_v41, %v5550_v63 }
 0x1ce   : > { %6421 = vst [vmem:[%s9835_s16 + $0x150] sm:$0xff] %v6357_v23  ;;  %6420 = vst [vmem:[%s9835_s16 + $0x148] sm:$0xff] %v6356_v51  ;;  %v6265_v1 = vadd.f32 %v9819_v53, %v6189_v8  ;;  %v6264_v21 = vadd.f32 %v9819_v53, %v6188_v17  ;;  %v5477_v5 = vpop.f32.mrb[110].mxu0 }
 0x1cf   : > { %6422 = vst [vmem:[%s9835_s16 + $0x158] sm:$0xff] %v6358_v46  ;;  %v6327_v55 = vmax.f32 %v6263_v31, 0.0  ;;  %v6266_v62 = vadd.f32 %v9819_v53, %v6190_v58  ;;  %v6219_v37 = vmax.f32 %v9647_v32, %v5477_v5  ;;  %v5554_v60 = vpop.f32.mrb[110].mxu1  ;;  %v5479_v25 = vpop.f32.mrb[111].mxu0 }
 0x1d0   : > { %v6329_v41 = vmax.f32 %v6265_v1, 0.0  ;;  %v6328_v47 = vmax.f32 %v6264_v21, 0.0  ;;  %v6221_v20 = vmax.f32 %v9652_v15, %v5554_v60  ;;  %v6220_v39 = vmax.f32 %v9657_v43, %v5479_v25  ;;  %v5556_v42 = vpop.f32.mrb[111].mxu1 }
 0x1d1   : > { %6391 = vst [vmem:[%s9835_s16 + $0x60] sm:$0xff] %v6327_v55  ;;  %v6330_v12 = vmax.f32 %v6266_v62, 0.0  ;;  %v6295_v35 = vadd.f32 %v9839_v49, %v6219_v37  ;;  %v6222_v29 = vmax.f32 %v9662_v59, %v5556_v42  ;;  %v10374_v42 = vld [vmem:[#allocation31_spill] sm:$0xff] }
 0x1d2   : > { %6393 = vst [vmem:[%s9835_s16 + $0x70] sm:$0xff] %v6329_v41  ;;  %6392 = vst [vmem:[%s9835_s16 + $0x68] sm:$0xff] %v6328_v47  ;;  %v6297_v32 = vadd.f32 %v9839_v49, %v6221_v20  ;;  %v6296_v52 = vadd.f32 %v9839_v49, %v6220_v39  ;;  %v5625_v9 = vpop.f32.mrb[112].mxu0 }
 0x1d3   : > { %6394 = vst [vmem:[%s9835_s16 + $0x78] sm:$0xff] %v6330_v12  ;;  %v6359_v15 = vmax.f32 %v6295_v35, 0.0  ;;  %v6298_v43 = vadd.f32 %v9839_v49, %v6222_v29  ;;  %v6191_v26 = vmax.f32 %v9667_v30, %v5625_v9  ;;  %v5702_v48 = vpop.f32.mrb[112].mxu1  ;;  %v5627_v7 = vpop.f32.mrb[113].mxu0 }
 0x1d4   : > { %v6361_v59 = vmax.f32 %v6297_v32, 0.0  ;;  %v6360_v6 = vmax.f32 %v6296_v52, 0.0  ;;  %v6193_v38 = vmax.f32 %v9672_v28, %v5702_v48  ;;  %v6192_v27 = vmax.f32 %v9677_v54, %v5627_v7  ;;  %v5704_v13 = vpop.f32.mrb[113].mxu1  ;;  %v10375_v52 = vld [vmem:[#allocation32_spill] sm:$0xff] }
 0x1d5   : > { %6423 = vst [vmem:[%s9835_s16 + $0x160] sm:$0xff] %v6359_v15  ;;  %v6362_v24 = vmax.f32 %v6298_v43, 0.0  ;;  %v6267_v36 = vadd.f32 %v9819_v53, %v6191_v26  ;;  %v6194_v40 = vmax.f32 %v9682_v11, %v5704_v13  ;;  %v10376_v15 = vld [vmem:[#allocation33_spill] sm:$0xff] }
 0x1d6   : > { %6425 = vst [vmem:[%s9835_s16 + $0x170] sm:$0xff] %v6361_v59  ;;  %6424 = vst [vmem:[%s9835_s16 + $0x168] sm:$0xff] %v6360_v6  ;;  %v6269_v30 = vadd.f32 %v9819_v53, %v6193_v38  ;;  %v6268_v3 = vadd.f32 %v9819_v53, %v6192_v27  ;;  %v5631_v34 = vpop.f32.mrb[114].mxu0  ;;  %v10377_v59 = vld [vmem:[#allocation3_spill] sm:$0xff] }
 0x1d7   : > { %6426 = vst [vmem:[%s9835_s16 + $0x178] sm:$0xff] %v6362_v24  ;;  %v6331_v28 = vmax.f32 %v6267_v36, 0.0  ;;  %v6270_v54 = vadd.f32 %v9819_v53, %v6194_v40  ;;  %v6223_v2 = vmax.f32 %v9687_v45, %v5631_v34  ;;  %v5708_v22 = vpop.f32.mrb[114].mxu1  ;;  %v5633_v10 = vpop.f32.mrb[115].mxu0  ;;  %v10378_v40 = vld [vmem:[#allocation34_spill] sm:$0xff] }
 0x1d8   : > { %v6333_v11 = vmax.f32 %v6269_v30, 0.0  ;;  %v6332_v50 = vmax.f32 %v6268_v3, 0.0  ;;  %v6225_v23 = vmax.f32 %v9692_v57, %v5708_v22  ;;  %v6224_v51 = vmax.f32 %v9697_v14, %v5633_v10  ;;  %v5710_v8 = vpop.f32.mrb[115].mxu1  ;;  %v10380_v10 = vld [vmem:[#allocation36_spill] sm:$0xff] }
 0x1d9   : > { %6395 = vst [vmem:[%s9835_s16 + $0x80] sm:$0xff] %v6331_v28  ;;  %v6334_v17 = vmax.f32 %v6270_v54, 0.0  ;;  %v6299_v63 = vadd.f32 %v9839_v49, %v6223_v2  ;;  %v6226_v46 = vmax.f32 %v9702_v33, %v5710_v8  ;;  %v10379_v2 = vld [vmem:[#allocation35_spill] sm:$0xff]  ;;  %v10381_v8 = vld [vmem:[#allocation4_spill] sm:$0xff] }
 0x1da   : > { %6397 = vst [vmem:[%s9835_s16 + $0x90] sm:$0xff] %v6333_v11  ;;  %6396 = vst [vmem:[%s9835_s16 + $0x88] sm:$0xff] %v6332_v50  ;;  %v6301_v45 = vadd.f32 %v9839_v49, %v6225_v23  ;;  %v6300_v31 = vadd.f32 %v9839_v49, %v6224_v51  ;;  %v5779_v58 = vpop.f32.mrb[116].mxu0 }
 0x1db   : > { %6398 = vst [vmem:[%s9835_s16 + $0x98] sm:$0xff] %v6334_v17  ;;  %v6363_v57 = vmax.f32 %v6299_v63, 0.0  ;;  %v6302_v14 = vadd.f32 %v9839_v49, %v6226_v46  ;;  %v6195_v1 = vmax.f32 %v9707_v61, %v5779_v58  ;;  %v5856_v21 = vpop.f32.mrb[116].mxu1  ;;  %v5781_v5 = vpop.f32.mrb[117].mxu0 }
 0x1dc   : > { %v6365_v33 = vmax.f32 %v6301_v45, 0.0  ;;  %v6364_v55 = vmax.f32 %v6300_v31, 0.0  ;;  %v6197_v62 = vmax.f32 %v9712_v4, %v5856_v21  ;;  %v6196_v37 = vmax.f32 %v9717_v44, %v5781_v5  ;;  %v5858_v60 = vpop.f32.mrb[117].mxu1 }
 0x1dd   : > { %6427 = vst [vmem:[%s9835_s16 + $0x180] sm:$0xff] %v6363_v57  ;;  %v6366_v25 = vmax.f32 %v6302_v14, 0.0  ;;  %v6271_v41 = vadd.f32 %v9819_v53, %v6195_v1  ;;  %v6198_v47 = vmax.f32 %v9722_v19, %v5858_v60  ;;  %v10382_v57 = vld [vmem:[#allocation37_spill] sm:$0xff] }
 0x1de   : > { %6429 = vst [vmem:[%s9835_s16 + $0x190] sm:$0xff] %v6365_v33  ;;  %6428 = vst [vmem:[%s9835_s16 + $0x188] sm:$0xff] %v6364_v55  ;;  %v6273_v61 = vadd.f32 %v9819_v53, %v6197_v62  ;;  %v6272_v20 = vadd.f32 %v9819_v53, %v6196_v37  ;;  %v5785_v39 = vpop.f32.mrb[118].mxu0  ;;  %v10383_v55 = vld [vmem:[#allocation38_spill] sm:$0xff]  ;;  %v10384_v37 = vld [vmem:[#allocation39_spill] sm:$0xff] }
 0x1df   : > { %6430 = vst [vmem:[%s9835_s16 + $0x198] sm:$0xff] %v6366_v25  ;;  %v6335_v4 = vmax.f32 %v6271_v41, 0.0  ;;  %v6274_v44 = vadd.f32 %v9819_v53, %v6198_v47  ;;  %v6227_v12 = vmax.f32 %v10374_v42, %v5785_v39  ;;  %v5862_v35 = vpop.f32.mrb[118].mxu1  ;;  %v5787_v29 = vpop.f32.mrb[119].mxu0 }
 0x1e0   : > { %v6337_v19 = vmax.f32 %v6273_v61, 0.0  ;;  %v6336_v32 = vmax.f32 %v6272_v20, 0.0  ;;  %v6229_v9 = vmax.f32 %v10375_v52, %v5862_v35  ;;  %v6228_v43 = vmax.f32 %v10376_v15, %v5787_v29  ;;  %v5864_v26 = vpop.f32.mrb[119].mxu1  ;;  %v10385_v61 = vld [vmem:[#allocation5_spill] sm:$0xff]  ;;  %v10386_v35 = vld [vmem:[#allocation40_spill] sm:$0xff] }
 0x1e1   : > { %6399 = vst [vmem:[%s9835_s16 + $0xa0] sm:$0xff] %v6335_v4  ;;  %v6338_v48 = vmax.f32 %v6274_v44, 0.0  ;;  %v6303_v7 = vadd.f32 %v9839_v49, %v6227_v12  ;;  %v6230_v6 = vmax.f32 %v10377_v59, %v5864_v26 }
 0x1e2   : > { %6401 = vst [vmem:[%s9835_s16 + $0xb0] sm:$0xff] %v6337_v19  ;;  %6400 = vst [vmem:[%s9835_s16 + $0xa8] sm:$0xff] %v6336_v32  ;;  %v6305_v38 = vadd.f32 %v9839_v49, %v6229_v9  ;;  %v6304_v27 = vadd.f32 %v9839_v49, %v6228_v43  ;;  %v5933_v13 = vpop.f32.mrb[120].mxu0  ;;  %v10387_v43 = vld [vmem:[#allocation41_spill] sm:$0xff] }
 0x1e3   : > { %6402 = vst [vmem:[%s9835_s16 + $0xb8] sm:$0xff] %v6338_v48  ;;  %v6367_v24 = vmax.f32 %v6303_v7, 0.0  ;;  %v6306_v36 = vadd.f32 %v9839_v49, %v6230_v6  ;;  %v6199_v30 = vmax.f32 %v10378_v40, %v5933_v13  ;;  %v6010_v3 = vpop.f32.mrb[120].mxu1  ;;  %v5935_v34 = vpop.f32.mrb[121].mxu0  ;;  %v10388_v6 = vld [vmem:[#allocation42_spill] sm:$0xff] }
 0x1e4   : > { %v6369_v28 = vmax.f32 %v6305_v38, 0.0  ;;  %v6368_v54 = vmax.f32 %v6304_v27, 0.0  ;;  %v6201_v22 = vmax.f32 %v10379_v2, %v6010_v3  ;;  %v6200_v11 = vmax.f32 %v10380_v10, %v5935_v34  ;;  %v6012_v50 = vpop.f32.mrb[121].mxu1  ;;  %v10389_v40 = vld [vmem:[#allocation6_spill] sm:$0xff] }
 0x1e5   : > { %6431 = vst [vmem:[%s9835_s16 + $0x1a0] sm:$0xff] %v6367_v24  ;;  %v6370_v23 = vmax.f32 %v6306_v36, 0.0  ;;  %v6275_v51 = vadd.f32 %v9819_v53, %v6199_v30  ;;  %v6202_v17 = vmax.f32 %v10381_v8, %v6012_v50 }
 0x1e6   : > { %6433 = vst [vmem:[%s9835_s16 + $0x1b0] sm:$0xff] %v6369_v28  ;;  %6432 = vst [vmem:[%s9835_s16 + $0x1a8] sm:$0xff] %v6368_v54  ;;  %v6277_v63 = vadd.f32 %v9819_v53, %v6201_v22  ;;  %v6276_v46 = vadd.f32 %v9819_v53, %v6200_v11  ;;  %v5939_v45 = vpop.f32.mrb[122].mxu0 }
 0x1e7   : > { %6434 = vst [vmem:[%s9835_s16 + $0x1b8] sm:$0xff] %v6370_v23  ;;  %v6339_v31 = vmax.f32 %v6275_v51, 0.0  ;;  %v6278_v58 = vadd.f32 %v9819_v53, %v6202_v17  ;;  %v6231_v14 = vmax.f32 %v10382_v57, %v5939_v45  ;;  %v6016_v1 = vpop.f32.mrb[122].mxu1  ;;  %v5941_v21 = vpop.f32.mrb[123].mxu0 }
 0x1e8   : > { %v6341_v5 = vmax.f32 %v6277_v63, 0.0  ;;  %v6340_v33 = vmax.f32 %v6276_v46, 0.0  ;;  %v6233_v62 = vmax.f32 %v10383_v55, %v6016_v1  ;;  %v6232_v60 = vmax.f32 %v10384_v37, %v5941_v21  ;;  %v6018_v25 = vpop.f32.mrb[123].mxu1 }
 0x1e9   : > { %6403 = vst [vmem:[%s9835_s16 + $0xc0] sm:$0xff] %v6339_v31  ;;  %v6342_v41 = vmax.f32 %v6278_v58, 0.0  ;;  %v6307_v47 = vadd.f32 %v9839_v49, %v6231_v14  ;;  %v6234_v20 = vmax.f32 %v10385_v61, %v6018_v25 }
 0x1ea   : > { %6405 = vst [vmem:[%s9835_s16 + $0xd0] sm:$0xff] %v6341_v5  ;;  %6404 = vst [vmem:[%s9835_s16 + $0xc8] sm:$0xff] %v6340_v33  ;;  %v6309_v39 = vadd.f32 %v9839_v49, %v6233_v62  ;;  %v6308_v4 = vadd.f32 %v9839_v49, %v6232_v60  ;;  %v6087_v44 = vpop.f32.mrb[124].mxu0 }
 0x1eb   : > { %6406 = vst [vmem:[%s9835_s16 + $0xd8] sm:$0xff] %v6342_v41  ;;  %v6371_v42 = vmax.f32 %v6307_v47, 0.0  ;;  %v6310_v12 = vadd.f32 %v9839_v49, %v6234_v20  ;;  %v6203_v29 = vmax.f32 %v10386_v35, %v6087_v44  ;;  %v6164_v19 = vpop.f32.mrb[124].mxu1  ;;  %v6089_v32 = vpop.f32.mrb[125].mxu0 }
 0x1ec   : > { %v6373_v52 = vmax.f32 %v6309_v39, 0.0  ;;  %v6372_v9 = vmax.f32 %v6308_v4, 0.0  ;;  %v6205_v15 = vmax.f32 %v9792_v18, %v6164_v19  ;;  %v6204_v26 = vmax.f32 %v10387_v43, %v6089_v32  ;;  %v6166_v48 = vpop.f32.mrb[125].mxu1 }
 0x1ed   : > { %6435 = vst [vmem:[%s9835_s16 + $0x1c0] sm:$0xff] %v6371_v42  ;;  %v6374_v7 = vmax.f32 %v6310_v12, 0.0  ;;  %v6279_v59 = vadd.f32 %v9819_v53, %v6203_v29  ;;  %v6206_v38 = vmax.f32 %v10388_v6, %v6166_v48 }
 0x1ee   : > { %6437 = vst [vmem:[%s9835_s16 + $0x1d0] sm:$0xff] %v6373_v52  ;;  %6436 = vst [vmem:[%s9835_s16 + $0x1c8] sm:$0xff] %v6372_v9  ;;  %v6281_v27 = vadd.f32 %v9819_v53, %v6205_v15  ;;  %v6280_v13 = vadd.f32 %v9819_v53, %v6204_v26  ;;  %v6093_v24 = vpop.f32.mrb[126].mxu0 }
 0x1ef   : > { %6438 = vst [vmem:[%s9835_s16 + $0x1d8] sm:$0xff] %v6374_v7  ;;  %v6343_v18 = vmax.f32 %v6279_v59, 0.0  ;;  %v6282_v36 = vadd.f32 %v9819_v53, %v6206_v38  ;;  %v6235_v30 = vmax.f32 %v10389_v40, %v6093_v24  ;;  %v6170_v3 = vpop.f32.mrb[126].mxu1  ;;  %v6095_v34 = vpop.f32.mrb[127].mxu0 }
 0x1f0   : > { %v6345_v28 = vmax.f32 %v6281_v27, 0.0  ;;  %v6344_v54 = vmax.f32 %v6280_v13, 0.0  ;;  %v6237_v2 = vmax.f32 %v9812_v0, %v6170_v3  ;;  %v6236_v22 = vmax.f32 %v9817_v56, %v6095_v34  ;;  %v6172_v10 = vpop.f32.mrb[127].mxu1 }
 0x1f1   : > { %6407 = vst [vmem:[%s9835_s16 + $0xe0] sm:$0xff] %v6343_v18  ;;  %v6346_v11 = vmax.f32 %v6282_v36, 0.0  ;;  %v6311_v53 = vadd.f32 %v9839_v49, %v6235_v30  ;;  %v6238_v50 = vmax.f32 %v9824_v16, %v6172_v10 }
 0x1f2   : > { %6409 = vst [vmem:[%s9835_s16 + $0xf0] sm:$0xff] %v6345_v28  ;;  %6408 = vst [vmem:[%s9835_s16 + $0xe8] sm:$0xff] %v6344_v54  ;;  %v6313_v23 = vadd.f32 %v9839_v49, %v6237_v2  ;;  %v6312_v51 = vadd.f32 %v9839_v49, %v6236_v22 }
 0x1f3   : > { %6410 = vst [vmem:[%s9835_s16 + $0xf8] sm:$0xff] %v6346_v11  ;;  %v6375_v0 = vmax.f32 %v6311_v53, 0.0  ;;  %v6314_v56 = vadd.f32 %v9839_v49, %v6238_v50 }
 0x1f4   : > { %v6377_v8 = vmax.f32 %v6313_v23, 0.0  ;;  %v6376_v17 = vmax.f32 %v6312_v51, 0.0 }
 0x1f5   : > { %6439 = vst [vmem:[%s9835_s16 + $0x1e0] sm:$0xff] %v6375_v0  ;;  %v6378_v63 = vmax.f32 %v6314_v56, 0.0 }
 0x1f6   : > { %6441 = vst [vmem:[%s9835_s16 + $0x1f0] sm:$0xff] %v6377_v8  ;;  %6440 = vst [vmem:[%s9835_s16 + $0x1e8] sm:$0xff] %v6376_v17 }
 0x1f7   : > { %6442 = vst [vmem:[%s9835_s16 + $0x1f8] sm:$0xff] %v6378_v63 }
 0x1f8 PF: > { %s13_s14 = sadd.s32 1, %s7877_s14   ;;  %s10390_s12 = smov %s7873_s13 }
 0x1f9   : > { %p10_p5 = scmp.ge.s32.totalorder %s13_s14, 4   ;;  %s10391_s13 = smov %s10393_s15 }
 0x1fb   :  { %12 = sbr.rel (!%p10_p5) target bundleno = 2 (0x2), region = 65 }

// kernel: cat_dog_forward.4
= control target key start
LH: loop header
LB: loop body
LE: loop exit
PB: predicated region body
PF: predicated region fallthrough
CT: control target
= control target key end

     0   :  { %s3702_s12 = smov 0   ;;  %s3704_s13 = smov 0   ;;  %s5060_s0 = inlined_call_operand.vmem [shape: f32[2,4,144,1024], index: 0, kind: input, shape index: {}]   ;;  %s5061_s1 = inlined_call_operand.vmem [shape: f32[32,144], index: 1, kind: input, shape index: {}]   ;;  %s5062_s2 = inlined_call_operand.vmem [shape: f32[32,1], index: 2, kind: input, shape index: {}]   ;;  %s5063_s3 = inlined_call_operand.vmem [shape: f32[2,32,1024], index: 3, kind: output, shape index: {}]  }
   0x1   :  { %s3706_s14 = smov 0  }
   0x2 LB: > { %s25_s15 = sadd.s32 1, %s3675_s13  ;;  %p2541_p0 = scmp.ge.s32.totalorder %s3679_s14, 1  ;;  %s3679_s14 = sphi %s3706_s14, %s13_s14   ;;  %s3675_s13 = sphi %s3704_s13, %s5133_s13   ;;  %s3671_s12 = sphi %s3702_s12, %s5132_s12  }
   0x3   : > { %p27_p1 = scmp.ge.s32.totalorder %s25_s15, 2  ;;  %p158_p2 = scmp.lt.s32.totalorder %s3679_s14, 3 }
   0x5   : > { %s5135_s15 = smov (%p27_p1, %s25_s15), 0  ;;  %p159_p3 = pnand %p2541_p0, %p158_p2 }
   0x7   : > { %162 = sbr.rel (%p159_p3) target bundleno = 545 (0x221), region = 32 }
   0xe   : > { %p191_p4 = scmp.lt.s32.totalorder %s3671_s12, 1  ;;  %v3723_v0 = vld [vmem:[%s5061_s1 + $0x8] sm:$0xff]  ;;  %vm362_vm0 = vcmask 130048  }
   0xf   : > { %2545 = vmatprep.mubr.msk.f32.mxu0 %vm362_vm0, %v3723_v0  ;;  %2549 = vmatprep.mubr.msk.f32.mxu1 %vm362_vm0, %v3723_v0 }
  0x10   : > { %s5137_s12 = smov (!%p191_p4, %s3671_s12), 1 }
  0x11   : > { %s3620_s18 = smul.u32 4608, %s5137_s12 }
  0x13   : > { %s3735_s21 = scalar_lea.vmem %s5060_s0, %s3620_s18 }
  0x14   : > { %v219_v1 = vld [vmem:[%s3735_s21 + $0x8] sm:$0xff]  ;;  %v221_v3 = vld [vmem:[%s3735_s21 + $0x18] sm:$0xff]  ;;  %v218_v6 = vld [vmem:[%s3735_s21] sm:$0xff] }
  0x15   : > { %v227_v2 = vld [vmem:[%s3735_s21 + $0x48] sm:$0xff]  ;;  %v229_v5 = vld [vmem:[%s3735_s21 + $0x58] sm:$0xff]  ;;  %v226_v7 = vld [vmem:[%s3735_s21 + $0x40] sm:$0xff] }
  0x16   : > { %v3044_v4 = vpack.c.bf16 %v227_v2, %v219_v1  ;;  %v3080_v8 = vpack.c.bf16 %v229_v5, %v221_v3  ;;  %v3046_v9 = vpack.c.bf16 %v226_v7, %v218_v6  ;;  %v220_v10 = vld [vmem:[%s3735_s21 + $0x10] sm:$0xff]  ;;  %v235_v12 = vld [vmem:[%s3735_s21 + $0x88] sm:$0xff]  ;;  %v237_v15 = vld [vmem:[%s3735_s21 + $0x98] sm:$0xff] }
  0x17   : > { %v228_v11 = vld [vmem:[%s3735_s21 + $0x50] sm:$0xff]  ;;  %v243_v14 = vld [vmem:[%s3735_s21 + $0xc8] sm:$0xff]  ;;  %v245_v16 = vld [vmem:[%s3735_s21 + $0xd8] sm:$0xff] }
  0x18   : > { %3045 = vmatprep.subr.bf16.mxu0 %v3044_v4  ;;  %v3082_v13 = vpack.c.bf16 %v228_v11, %v220_v10  ;;  %3081 = vmatprep.subr.bf16.mxu1 %v3080_v8  ;;  %v3048_v17 = vpack.c.bf16 %v243_v14, %v235_v12  ;;  %v3084_v18 = vpack.c.bf16 %v245_v16, %v237_v15  ;;  %v234_v19 = vld [vmem:[%s3735_s21 + $0x80] sm:$0xff]  ;;  %v236_v21 = vld [vmem:[%s3735_s21 + $0x90] sm:$0xff]  ;;  %v251_v24 = vld [vmem:[%s3735_s21 + $0x108] sm:$0xff] }
  0x19   : > { %3047 = vmatpush1.bf16.msra.mxu0 %v3046_v9  ;;  %v242_v20 = vld [vmem:[%s3735_s21 + $0xc0] sm:$0xff]  ;;  %v244_v23 = vld [vmem:[%s3735_s21 + $0xd0] sm:$0xff]  ;;  %v259_v25 = vld [vmem:[%s3735_s21 + $0x148] sm:$0xff] }
  0x1a   : > { %3083 = vmatpush1.bf16.msra.mxu1 %v3082_v13  ;;  %v3050_v22 = vpack.c.bf16 %v242_v20, %v234_v19  ;;  %3049 = vmatprep.subr.bf16.mxu0 %v3048_v17  ;;  %v3086_v26 = vpack.c.bf16 %v244_v23, %v236_v21  ;;  %v3052_v27 = vpack.c.bf16 %v259_v25, %v251_v24  ;;  %v253_v28 = vld [vmem:[%s3735_s21 + $0x118] sm:$0xff]  ;;  %v250_v30 = vld [vmem:[%s3735_s21 + $0x100] sm:$0xff]  ;;  %v252_v33 = vld [vmem:[%s3735_s21 + $0x110] sm:$0xff] }
  0x1b   : > { %3085 = vmatprep.subr.bf16.mxu1 %v3084_v18  ;;  %v261_v29 = vld [vmem:[%s3735_s21 + $0x158] sm:$0xff]  ;;  %v258_v32 = vld [vmem:[%s3735_s21 + $0x140] sm:$0xff]  ;;  %v260_v34 = vld [vmem:[%s3735_s21 + $0x150] sm:$0xff] }
  0x1c   : > { %v3088_v31 = vpack.c.bf16 %v261_v29, %v253_v28  ;;  %v3054_v35 = vpack.c.bf16 %v258_v32, %v250_v30  ;;  %v267_v36 = vld [vmem:[%s3735_s21 + $0x188] sm:$0xff]  ;;  %v269_v38 = vld [vmem:[%s3735_s21 + $0x198] sm:$0xff]  ;;  %v3090_v39 = vpack.c.bf16 %v260_v34, %v252_v33  ;;  %v266_v42 = vld [vmem:[%s3735_s21 + $0x180] sm:$0xff] }
  0x1d   : > { %3051 = vmatpush1.bf16.msra.mxu0 %v3050_v22  ;;  %v275_v37 = vld [vmem:[%s3735_s21 + $0x1c8] sm:$0xff]  ;;  %v277_v41 = vld [vmem:[%s3735_s21 + $0x1d8] sm:$0xff]  ;;  %v274_v43 = vld [vmem:[%s3735_s21 + $0x1c0] sm:$0xff] }
  0x1e   : > { %3087 = vmatpush1.bf16.msra.mxu1 %v3086_v26  ;;  %3053 = vmatprep.subr.bf16.mxu0 %v3052_v27  ;;  %v3056_v40 = vpack.c.bf16 %v275_v37, %v267_v36  ;;  %v3092_v44 = vpack.c.bf16 %v277_v41, %v269_v38  ;;  %v268_v45 = vld [vmem:[%s3735_s21 + $0x190] sm:$0xff]  ;;  %v283_v47 = vld [vmem:[%s3735_s21 + $0x208] sm:$0xff]  ;;  %v285_v49 = vld [vmem:[%s3735_s21 + $0x218] sm:$0xff]  ;;  %v3058_v51 = vpack.c.bf16 %v274_v43, %v266_v42 }
  0x1f   : > { %3089 = vmatprep.subr.bf16.mxu1 %v3088_v31  ;;  %v276_v46 = vld [vmem:[%s3735_s21 + $0x1d0] sm:$0xff]  ;;  %v291_v48 = vld [vmem:[%s3735_s21 + $0x248] sm:$0xff]  ;;  %v293_v50 = vld [vmem:[%s3735_s21 + $0x258] sm:$0xff] }
  0x20   : > { %v3094_v52 = vpack.c.bf16 %v276_v46, %v268_v45  ;;  %v3060_v53 = vpack.c.bf16 %v291_v48, %v283_v47  ;;  %v282_v54 = vld [vmem:[%s3735_s21 + $0x200] sm:$0xff]  ;;  %v284_v56 = vld [vmem:[%s3735_s21 + $0x210] sm:$0xff]  ;;  %v3096_v57 = vpack.c.bf16 %v293_v50, %v285_v49  ;;  %v299_v59 = vld [vmem:[%s3735_s21 + $0x288] sm:$0xff] }
  0x21   : > { %3055 = vmatpush1.bf16.msra.mxu0 %v3054_v35  ;;  %v290_v55 = vld [vmem:[%s3735_s21 + $0x240] sm:$0xff]  ;;  %v292_v58 = vld [vmem:[%s3735_s21 + $0x250] sm:$0xff]  ;;  %v307_v60 = vld [vmem:[%s3735_s21 + $0x2c8] sm:$0xff] }
  0x22   : > { %3091 = vmatpush1.bf16.msra.mxu1 %v3090_v39  ;;  %3057 = vmatprep.subr.bf16.mxu0 %v3056_v40  ;;  %v301_v61 = vld [vmem:[%s3735_s21 + $0x298] sm:$0xff]  ;;  %v3062_v63 = vpack.c.bf16 %v290_v55, %v282_v54  ;;  %v3098_v1 = vpack.c.bf16 %v292_v58, %v284_v56  ;;  %v3064_v2 = vpack.c.bf16 %v307_v60, %v299_v59  ;;  %v298_v3 = vld [vmem:[%s3735_s21 + $0x280] sm:$0xff]  ;;  %v300_v5 = vld [vmem:[%s3735_s21 + $0x290] sm:$0xff] }
  0x23   : > { %3093 = vmatprep.subr.bf16.mxu1 %v3092_v44  ;;  %v309_v62 = vld [vmem:[%s3735_s21 + $0x2d8] sm:$0xff]  ;;  %v306_v4 = vld [vmem:[%s3735_s21 + $0x2c0] sm:$0xff]  ;;  %v308_v7 = vld [vmem:[%s3735_s21 + $0x2d0] sm:$0xff] }
  0x24   : > { %v3100_v6 = vpack.c.bf16 %v309_v62, %v301_v61  ;;  %v315_v8 = vld [vmem:[%s3735_s21 + $0x308] sm:$0xff]  ;;  %v317_v10 = vld [vmem:[%s3735_s21 + $0x318] sm:$0xff]  ;;  %v3066_v12 = vpack.c.bf16 %v306_v4, %v298_v3  ;;  %v3102_v13 = vpack.c.bf16 %v308_v7, %v300_v5  ;;  %v314_v15 = vld [vmem:[%s3735_s21 + $0x300] sm:$0xff] }
  0x25   : > { %3059 = vmatpush1.bf16.msra.mxu0 %v3058_v51  ;;  %v323_v9 = vld [vmem:[%s3735_s21 + $0x348] sm:$0xff]  ;;  %v325_v11 = vld [vmem:[%s3735_s21 + $0x358] sm:$0xff]  ;;  %v322_v16 = vld [vmem:[%s3735_s21 + $0x340] sm:$0xff] }
  0x26   : > { %3095 = vmatpush1.bf16.msra.mxu1 %v3094_v52  ;;  %3061 = vmatprep.subr.bf16.mxu0 %v3060_v53  ;;  %v3068_v14 = vpack.c.bf16 %v323_v9, %v315_v8  ;;  %v316_v17 = vld [vmem:[%s3735_s21 + $0x310] sm:$0xff]  ;;  %v3104_v18 = vpack.c.bf16 %v325_v11, %v317_v10  ;;  %v331_v20 = vld [vmem:[%s3735_s21 + $0x388] sm:$0xff]  ;;  %v333_v22 = vld [vmem:[%s3735_s21 + $0x398] sm:$0xff]  ;;  %v3070_v24 = vpack.c.bf16 %v322_v16, %v314_v15 }
  0x27   : > { %3097 = vmatprep.subr.bf16.mxu1 %v3096_v57  ;;  %v324_v19 = vld [vmem:[%s3735_s21 + $0x350] sm:$0xff]  ;;  %v339_v21 = vld [vmem:[%s3735_s21 + $0x3c8] sm:$0xff]  ;;  %v341_v23 = vld [vmem:[%s3735_s21 + $0x3d8] sm:$0xff] }
  0x28   : > { %v3106_v25 = vpack.c.bf16 %v324_v19, %v316_v17  ;;  %v3072_v26 = vpack.c.bf16 %v339_v21, %v331_v20  ;;  %v330_v27 = vld [vmem:[%s3735_s21 + $0x380] sm:$0xff]  ;;  %v332_v29 = vld [vmem:[%s3735_s21 + $0x390] sm:$0xff]  ;;  %v3108_v30 = vpack.c.bf16 %v341_v23, %v333_v22  ;;  %v347_v32 = vld [vmem:[%s3735_s21 + $0x408] sm:$0xff] }
  0x29   : > { %3063 = vmatpush1.bf16.msra.mxu0 %v3062_v63  ;;  %v338_v28 = vld [vmem:[%s3735_s21 + $0x3c0] sm:$0xff]  ;;  %v340_v31 = vld [vmem:[%s3735_s21 + $0x3d0] sm:$0xff]  ;;  %v355_v33 = vld [vmem:[%s3735_s21 + $0x448] sm:$0xff] }
  0x2a   : > { %3099 = vmatpush1.bf16.msra.mxu1 %v3098_v1  ;;  %3065 = vmatprep.subr.bf16.mxu0 %v3064_v2  ;;  %v349_v34 = vld [vmem:[%s3735_s21 + $0x418] sm:$0xff]  ;;  %v3074_v36 = vpack.c.bf16 %v338_v28, %v330_v27  ;;  %v3110_v37 = vpack.c.bf16 %v340_v31, %v332_v29  ;;  %v3076_v38 = vpack.c.bf16 %v355_v33, %v347_v32  ;;  %v346_v39 = vld [vmem:[%s3735_s21 + $0x400] sm:$0xff]  ;;  %v348_v41 = vld [vmem:[%s3735_s21 + $0x410] sm:$0xff] }
  0x2b   : > { %3101 = vmatprep.subr.bf16.mxu1 %v3100_v6  ;;  %v357_v35 = vld [vmem:[%s3735_s21 + $0x458] sm:$0xff]  ;;  %v354_v40 = vld [vmem:[%s3735_s21 + $0x440] sm:$0xff]  ;;  %v356_v43 = vld [vmem:[%s3735_s21 + $0x450] sm:$0xff] }
  0x2c   : > { %v3112_v42 = vpack.c.bf16 %v357_v35, %v349_v34  ;;  %v223_v44 = vld [vmem:[%s3735_s21 + $0x28] sm:$0xff]  ;;  %v225_v46 = vld [vmem:[%s3735_s21 + $0x38] sm:$0xff]  ;;  %v3078_v48 = vpack.c.bf16 %v354_v40, %v346_v39  ;;  %v3114_v49 = vpack.c.bf16 %v356_v43, %v348_v41  ;;  %v222_v51 = vld [vmem:[%s3735_s21 + $0x20] sm:$0xff] }
  0x2d   : > { %3067 = vmatpush1.bf16.msra.mxu0 %v3066_v12  ;;  %v231_v45 = vld [vmem:[%s3735_s21 + $0x68] sm:$0xff]  ;;  %v233_v47 = vld [vmem:[%s3735_s21 + $0x78] sm:$0xff]  ;;  %v230_v52 = vld [vmem:[%s3735_s21 + $0x60] sm:$0xff] }
  0x2e   : > { %3103 = vmatpush1.bf16.msra.mxu1 %v3102_v13  ;;  %3069 = vmatprep.subr.bf16.mxu0 %v3068_v14  ;;  %v3116_v50 = vpack.c.bf16 %v231_v45, %v223_v44  ;;  %v224_v53 = vld [vmem:[%s3735_s21 + $0x30] sm:$0xff]  ;;  %v3152_v54 = vpack.c.bf16 %v233_v47, %v225_v46  ;;  %v239_v56 = vld [vmem:[%s3735_s21 + $0xa8] sm:$0xff]  ;;  %v241_v58 = vld [vmem:[%s3735_s21 + $0xb8] sm:$0xff]  ;;  %v3118_v61 = vpack.c.bf16 %v230_v52, %v222_v51 }
  0x2f   : > { %3105 = vmatprep.subr.bf16.mxu1 %v3104_v18  ;;  %v232_v55 = vld [vmem:[%s3735_s21 + $0x70] sm:$0xff]  ;;  %v247_v57 = vld [vmem:[%s3735_s21 + $0xe8] sm:$0xff]  ;;  %v249_v59 = vld [vmem:[%s3735_s21 + $0xf8] sm:$0xff] }
  0x30   : > { %v3824_v60 = vld [vmem:[%s5061_s1] sm:$0xff]  ;;  %v3154_v62 = vpack.c.bf16 %v232_v55, %v224_v53  ;;  %v3120_v63 = vpack.c.bf16 %v247_v57, %v239_v56  ;;  %v240_v3 = vld [vmem:[%s3735_s21 + $0xb0] sm:$0xff]  ;;  %v3156_v4 = vpack.c.bf16 %v249_v59, %v241_v58  ;;  %v255_v6 = vld [vmem:[%s3735_s21 + $0x128] sm:$0xff] }
  0x31   : > { %3071 = vmatpush1.bf16.msra.mxu0 %v3070_v24  ;;  %v238_v1 = vld [vmem:[%s3735_s21 + $0xa0] sm:$0xff]  ;;  %v248_v5 = vld [vmem:[%s3735_s21 + $0xf0] sm:$0xff]  ;;  %v263_v7 = vld [vmem:[%s3735_s21 + $0x168] sm:$0xff] }
  0x32   : > { %3107 = vmatpush1.bf16.msra.mxu1 %v3106_v25  ;;  %3073 = vmatprep.subr.bf16.mxu0 %v3072_v26  ;;  %v246_v2 = vld [vmem:[%s3735_s21 + $0xe0] sm:$0xff]  ;;  %v257_v8 = vld [vmem:[%s3735_s21 + $0x138] sm:$0xff]  ;;  %v3844_v12 = vld [vmem:[%s5061_s1 + $0x10] sm:$0xff]  ;;  %v3158_v13 = vpack.c.bf16 %v248_v5, %v240_v3  ;;  %v3124_v14 = vpack.c.bf16 %v263_v7, %v255_v6 }
  0x33   : > { %3109 = vmatprep.subr.bf16.mxu1 %v3108_v30  ;;  %v265_v9 = vld [vmem:[%s3735_s21 + $0x178] sm:$0xff]  ;;  %v3122_v11 = vpack.c.bf16 %v246_v2, %v238_v1  ;;  %v254_v15 = vld [vmem:[%s3735_s21 + $0x120] sm:$0xff]  ;;  %v256_v17 = vld [vmem:[%s3735_s21 + $0x130] sm:$0xff] }
  0x34   : > { %v3838_v10 = vld [vmem:[%s5061_s1 + $0x18] sm:$0xff]  ;;  %v262_v16 = vld [vmem:[%s3735_s21 + $0x160] sm:$0xff]  ;;  %v3160_v18 = vpack.c.bf16 %v265_v9, %v257_v8  ;;  %v264_v19 = vld [vmem:[%s3735_s21 + $0x170] sm:$0xff] }
  0x35   : > { %3075 = vmatpush1.bf16.msra.mxu0 %v3074_v36  ;;  %v271_v20 = vld [vmem:[%s3735_s21 + $0x1a8] sm:$0xff]  ;;  %v273_v22 = vld [vmem:[%s3735_s21 + $0x1b8] sm:$0xff]  ;;  %v3126_v25 = vpack.c.bf16 %v262_v16, %v254_v15  ;;  %v3868_v26 = vld [vmem:[%s5061_s1 + $0x20] sm:$0xff]  ;;  %v3162_v27 = vpack.c.bf16 %v264_v19, %v256_v17 }
  0x36   : > { %3111 = vmatpush1.bf16.msra.mxu1 %v3110_v37  ;;  %3077 = vmatprep.subr.bf16.mxu0 %v3076_v38  ;;  %v279_v21 = vld [vmem:[%s3735_s21 + $0x1e8] sm:$0xff]  ;;  %v281_v23 = vld [vmem:[%s3735_s21 + $0x1f8] sm:$0xff]  ;;  %v270_v29 = vld [vmem:[%s3735_s21 + $0x1a0] sm:$0xff] }
  0x37   : > { %3113 = vmatprep.subr.bf16.mxu1 %v3112_v42  ;;  %v3862_v24 = vld [vmem:[%s5061_s1 + $0x28] sm:$0xff]  ;;  %v3128_v28 = vpack.c.bf16 %v279_v21, %v271_v20  ;;  %v278_v30 = vld [vmem:[%s3735_s21 + $0x1e0] sm:$0xff]  ;;  %v272_v31 = vld [vmem:[%s3735_s21 + $0x1b0] sm:$0xff]  ;;  %v3164_v32 = vpack.c.bf16 %v281_v23, %v273_v22 }
  0x38   : > { %v280_v33 = vld [vmem:[%s3735_s21 + $0x1f0] sm:$0xff]  ;;  %v287_v34 = vld [vmem:[%s3735_s21 + $0x228] sm:$0xff]  ;;  %v289_v36 = vld [vmem:[%s3735_s21 + $0x238] sm:$0xff]  ;;  %v3130_v39 = vpack.c.bf16 %v278_v30, %v270_v29 }
  0x39   : > { %3079 = vmatpush1.bf16.msra.mxu0 %v3078_v48  ;;  %v295_v35 = vld [vmem:[%s3735_s21 + $0x268] sm:$0xff]  ;;  %v297_v37 = vld [vmem:[%s3735_s21 + $0x278] sm:$0xff]  ;;  %v3892_v40 = vld [vmem:[%s5061_s1 + $0x30] sm:$0xff]  ;;  %v3166_v41 = vpack.c.bf16 %v280_v33, %v272_v31 }
  0x3a   : > { %3115 = vmatpush1.bf16.msra.mxu1 %v3114_v49  ;;  %3117 = vmatprep.subr.bf16.mxu0 %v3116_v50  ;;  %v3886_v38 = vld [vmem:[%s5061_s1 + $0x38] sm:$0xff]  ;;  %v3132_v42 = vpack.c.bf16 %v295_v35, %v287_v34  ;;  %v286_v43 = vld [vmem:[%s3735_s21 + $0x220] sm:$0xff]  ;;  %v288_v45 = vld [vmem:[%s3735_s21 + $0x230] sm:$0xff]  ;;  %v3168_v46 = vpack.c.bf16 %v297_v37, %v289_v36 }
  0x3b   : > { %3153 = vmatprep.subr.bf16.mxu1 %v3152_v54  ;;  %v294_v44 = vld [vmem:[%s3735_s21 + $0x260] sm:$0xff]  ;;  %v296_v47 = vld [vmem:[%s3735_s21 + $0x270] sm:$0xff]  ;;  %v303_v48 = vld [vmem:[%s3735_s21 + $0x2a8] sm:$0xff] }
  0x3c   : > { %440 = vmatmul.mubr.f32.vlgmr.msra.gmra.mrb[0].mxu0 %v3824_v60  ;;  %v311_v49 = vld [vmem:[%s3735_s21 + $0x2e8] sm:$0xff]  ;;  %v305_v50 = vld [vmem:[%s3735_s21 + $0x2b8] sm:$0xff]  ;;  %v3134_v52 = vpack.c.bf16 %v294_v44, %v286_v43  ;;  %v3170_v53 = vpack.c.bf16 %v296_v47, %v288_v45  ;;  %v302_v55 = vld [vmem:[%s3735_s21 + $0x2a0] sm:$0xff] }
  0x3d   : > { %529 = vmatmul.mubr.f32.vlgmr.msra.gmra.mrb[0].mxu1 %v3824_v60  ;;  %3119 = vmatpush1.bf16.msra.mxu0 %v3118_v61  ;;  %v313_v51 = vld [vmem:[%s3735_s21 + $0x2f8] sm:$0xff]  ;;  %v3136_v54 = vpack.c.bf16 %v311_v49, %v303_v48  ;;  %v310_v56 = vld [vmem:[%s3735_s21 + $0x2e0] sm:$0xff]  ;;  %v304_v57 = vld [vmem:[%s3735_s21 + $0x2b0] sm:$0xff] }
  0x3e   : > { %3155 = vmatpush1.bf16.msra.mxu1 %v3154_v62  ;;  %3121 = vmatprep.subr.bf16.mxu0 %v3120_v63  ;;  %v3172_v58 = vpack.c.bf16 %v313_v51, %v305_v50  ;;  %v312_v59 = vld [vmem:[%s3735_s21 + $0x2f0] sm:$0xff]  ;;  %v319_v61 = vld [vmem:[%s3735_s21 + $0x328] sm:$0xff]  ;;  %v321_v63 = vld [vmem:[%s3735_s21 + $0x338] sm:$0xff]  ;;  %v3138_v2 = vpack.c.bf16 %v310_v56, %v302_v55 }
  0x3f   : > { %3157 = vmatprep.subr.bf16.mxu1 %v3156_v4  ;;  %2546 = vmatprep.mubr.msk.f32.mxu0 %vm362_vm0, %v3838_v10  ;;  %v327_v62 = vld [vmem:[%s3735_s21 + $0x368] sm:$0xff]  ;;  %v329_v1 = vld [vmem:[%s3735_s21 + $0x378] sm:$0xff]  ;;  %v3174_v3 = vpack.c.bf16 %v312_v59, %v304_v57  ;;  %v318_v5 = vld [vmem:[%s3735_s21 + $0x320] sm:$0xff] }
  0x40   : > { %2550 = vmatprep.mubr.msk.f32.mxu1 %vm362_vm0, %v3838_v10  ;;  %446 = vmatmul.mubr.f32.gmra.mrb[2].mxu0 %v3844_v12  ;;  %v3140_v4 = vpack.c.bf16 %v327_v62, %v319_v61  ;;  %v326_v6 = vld [vmem:[%s3735_s21 + $0x360] sm:$0xff]  ;;  %v320_v7 = vld [vmem:[%s3735_s21 + $0x330] sm:$0xff]  ;;  %v3176_v8 = vpack.c.bf16 %v329_v1, %v321_v63  ;;  %v345_v15 = vld [vmem:[%s3735_s21 + $0x3f8] sm:$0xff] }
  0x41   : > { %3123 = vmatpush1.bf16.msra.mxu0 %v3122_v11  ;;  %535 = vmatmul.mubr.f32.gmra.mrb[2].mxu1 %v3844_v12  ;;  %v328_v9 = vld [vmem:[%s3735_s21 + $0x370] sm:$0xff]  ;;  %v335_v11 = vld [vmem:[%s3735_s21 + $0x3a8] sm:$0xff]  ;;  %v3142_v16 = vpack.c.bf16 %v326_v6, %v318_v5  ;;  %v334_v19 = vld [vmem:[%s3735_s21 + $0x3a0] sm:$0xff] }
  0x42   : > { %3159 = vmatpush1.bf16.msra.mxu1 %v3158_v13  ;;  %3125 = vmatprep.subr.bf16.mxu0 %v3124_v14  ;;  %v343_v13 = vld [vmem:[%s3735_s21 + $0x3e8] sm:$0xff]  ;;  %v337_v14 = vld [vmem:[%s3735_s21 + $0x3b8] sm:$0xff]  ;;  %v3178_v17 = vpack.c.bf16 %v328_v9, %v320_v7  ;;  %v342_v20 = vld [vmem:[%s3735_s21 + $0x3e0] sm:$0xff] }
  0x43   : > { %3161 = vmatprep.subr.bf16.mxu1 %v3160_v18  ;;  %2547 = vmatprep.mubr.msk.f32.mxu0 %vm362_vm0, %v3862_v24  ;;  %v3144_v18 = vpack.c.bf16 %v343_v13, %v335_v11  ;;  %v336_v21 = vld [vmem:[%s3735_s21 + $0x3b0] sm:$0xff]  ;;  %v3180_v22 = vpack.c.bf16 %v345_v15, %v337_v14  ;;  %v361_v29 = vld [vmem:[%s3735_s21 + $0x478] sm:$0xff]  ;;  %v3146_v30 = vpack.c.bf16 %v342_v20, %v334_v19  ;;  %v350_v33 = vld [vmem:[%s3735_s21 + $0x420] sm:$0xff] }
  0x44   : > { %2551 = vmatprep.mubr.msk.f32.mxu1 %vm362_vm0, %v3862_v24  ;;  %452 = vmatmul.mubr.f32.gmra.mrb[4].mxu0 %v3868_v26  ;;  %v344_v23 = vld [vmem:[%s3735_s21 + $0x3f0] sm:$0xff]  ;;  %v358_v34 = vld [vmem:[%s3735_s21 + $0x460] sm:$0xff]  ;;  %v2572_v43 = vld [vmem:[%s3735_s21 + $0x4d8] sm:$0xff] }
  0x45   : > { %3127 = vmatpush1.bf16.msra.mxu0 %v3126_v25  ;;  %541 = vmatmul.mubr.f32.gmra.mrb[4].mxu1 %v3868_v26  ;;  %v351_v25 = vld [vmem:[%s3735_s21 + $0x428] sm:$0xff]  ;;  %v3182_v31 = vpack.c.bf16 %v344_v23, %v336_v21  ;;  %v352_v35 = vld [vmem:[%s3735_s21 + $0x430] sm:$0xff]  ;;  %v3150_v44 = vpack.c.bf16 %v358_v34, %v350_v33  ;;  %v2561_v47 = vld [vmem:[%s3735_s21 + $0x480] sm:$0xff] }
  0x46   : > { %3163 = vmatpush1.bf16.msra.mxu1 %v3162_v27  ;;  %3129 = vmatprep.subr.bf16.mxu0 %v3128_v28  ;;  %v359_v27 = vld [vmem:[%s3735_s21 + $0x468] sm:$0xff]  ;;  %v353_v28 = vld [vmem:[%s3735_s21 + $0x438] sm:$0xff]  ;;  %v360_v37 = vld [vmem:[%s3735_s21 + $0x470] sm:$0xff] }
  0x47   : > { %3165 = vmatprep.subr.bf16.mxu1 %v3164_v32  ;;  %2548 = vmatprep.mubr.msk.f32.mxu0 %vm362_vm0, %v3886_v38  ;;  %v3148_v32 = vpack.c.bf16 %v359_v27, %v351_v25  ;;  %v3184_v36 = vpack.c.bf16 %v361_v29, %v353_v28  ;;  %v3186_v45 = vpack.c.bf16 %v360_v37, %v352_v35  ;;  %v2569_v48 = vld [vmem:[%s3735_s21 + $0x4c0] sm:$0xff]  ;;  %v2563_v49 = vld [vmem:[%s3735_s21 + $0x490] sm:$0xff]  ;;  %v2588_v55 = vld [vmem:[%s3735_s21 + $0x558] sm:$0xff] }
  0x48   : > { %2552 = vmatprep.mubr.msk.f32.mxu1 %vm362_vm0, %v3886_v38  ;;  %458 = vmatmul.mubr.f32.gmra.mrb[6].mxu0 %v3892_v40  ;;  %v2571_v51 = vld [vmem:[%s3735_s21 + $0x4d0] sm:$0xff]  ;;  %v3190_v56 = vpack.c.bf16 %v2569_v48, %v2561_v47  ;;  %v2577_v59 = vld [vmem:[%s3735_s21 + $0x500] sm:$0xff]  ;;  %v2604_v5 = vld [vmem:[%s3735_s21 + $0x5d8] sm:$0xff] }
  0x49   : > { %3131 = vmatpush1.bf16.msra.mxu0 %v3130_v39  ;;  %547 = vmatmul.mubr.f32.gmra.mrb[6].mxu1 %v3892_v40  ;;  %v2562_v39 = vld [vmem:[%s3735_s21 + $0x488] sm:$0xff]  ;;  %v3226_v57 = vpack.c.bf16 %v2571_v51, %v2563_v49  ;;  %v2585_v61 = vld [vmem:[%s3735_s21 + $0x540] sm:$0xff]  ;;  %v2579_v62 = vld [vmem:[%s3735_s21 + $0x510] sm:$0xff] }
  0x4a   : > { %3167 = vmatpush1.bf16.msra.mxu1 %v3166_v41  ;;  %3133 = vmatprep.subr.bf16.mxu0 %v3132_v42  ;;  %v2570_v41 = vld [vmem:[%s3735_s21 + $0x4c8] sm:$0xff]  ;;  %v2564_v42 = vld [vmem:[%s3735_s21 + $0x498] sm:$0xff]  ;;  %v2587_v1 = vld [vmem:[%s3735_s21 + $0x550] sm:$0xff]  ;;  %v3194_v6 = vpack.c.bf16 %v2585_v61, %v2577_v59 }
  0x4b   : > { %3169 = vmatprep.subr.bf16.mxu1 %v3168_v46  ;;  %2553 = vmatprep.mubr.msk.f32.mxu0 %vm362_vm0, %v3723_v0  ;;  %v3188_v46 = vpack.c.bf16 %v2570_v41, %v2562_v39  ;;  %v3224_v50 = vpack.c.bf16 %v2572_v43, %v2564_v42  ;;  %v3230_v7 = vpack.c.bf16 %v2587_v1, %v2579_v62  ;;  %v2593_v9 = vld [vmem:[%s3735_s21 + $0x580] sm:$0xff]  ;;  %v2595_v13 = vld [vmem:[%s3735_s21 + $0x590] sm:$0xff]  ;;  %v2620_v19 = vld [vmem:[%s3735_s21 + $0x658] sm:$0xff] }
  0x4c   : > { %2557 = vmatprep.mubr.msk.f32.mxu1 %vm362_vm0, %v3723_v0  ;;  %v2601_v11 = vld [vmem:[%s3735_s21 + $0x5c0] sm:$0xff]  ;;  %v2603_v15 = vld [vmem:[%s3735_s21 + $0x5d0] sm:$0xff]  ;;  %v2636_v33 = vld [vmem:[%s3735_s21 + $0x6d8] sm:$0xff] }
  0x4d   : > { %3135 = vmatpush1.bf16.msra.mxu0 %v3134_v52  ;;  %v2578_v52 = vld [vmem:[%s3735_s21 + $0x508] sm:$0xff]  ;;  %v3198_v20 = vpack.c.bf16 %v2601_v11, %v2593_v9  ;;  %v3234_v21 = vpack.c.bf16 %v2603_v15, %v2595_v13  ;;  %v2609_v23 = vld [vmem:[%s3735_s21 + $0x600] sm:$0xff]  ;;  %v2611_v27 = vld [vmem:[%s3735_s21 + $0x610] sm:$0xff] }
  0x4e   : > { %3171 = vmatpush1.bf16.msra.mxu1 %v3170_v53  ;;  %3137 = vmatprep.subr.bf16.mxu0 %v3136_v54  ;;  %v2586_v53 = vld [vmem:[%s3735_s21 + $0x548] sm:$0xff]  ;;  %v2580_v54 = vld [vmem:[%s3735_s21 + $0x518] sm:$0xff]  ;;  %v2617_v25 = vld [vmem:[%s3735_s21 + $0x640] sm:$0xff] }
  0x4f   : > { %3173 = vmatprep.subr.bf16.mxu1 %v3172_v58  ;;  %v3192_v58 = vpack.c.bf16 %v2586_v53, %v2578_v52  ;;  %v3228_v63 = vpack.c.bf16 %v2588_v55, %v2580_v54  ;;  %v2619_v29 = vld [vmem:[%s3735_s21 + $0x650] sm:$0xff]  ;;  %v3202_v34 = vpack.c.bf16 %v2617_v25, %v2609_v23  ;;  %v2625_v37 = vld [vmem:[%s3735_s21 + $0x680] sm:$0xff]  ;;  %v2652_v47 = vld [vmem:[%s3735_s21 + $0x758] sm:$0xff] }
  0x50   : > { %v3238_v35 = vpack.c.bf16 %v2619_v29, %v2611_v27  ;;  %v2633_v39 = vld [vmem:[%s3735_s21 + $0x6c0] sm:$0xff]  ;;  %v2627_v41 = vld [vmem:[%s3735_s21 + $0x690] sm:$0xff]  ;;  %v2668_v59 = vld [vmem:[%s3735_s21 + $0x7d8] sm:$0xff] }
  0x51   : > { %3139 = vmatpush1.bf16.msra.mxu0 %v3138_v2  ;;  %v2594_v2 = vld [vmem:[%s3735_s21 + $0x588] sm:$0xff]  ;;  %v2635_v43 = vld [vmem:[%s3735_s21 + $0x6d0] sm:$0xff]  ;;  %v3206_v48 = vpack.c.bf16 %v2633_v39, %v2625_v37  ;;  %v2641_v51 = vld [vmem:[%s3735_s21 + $0x700] sm:$0xff] }
  0x52   : > { %3175 = vmatpush1.bf16.msra.mxu1 %v3174_v3  ;;  %3141 = vmatprep.subr.bf16.mxu0 %v3140_v4  ;;  %v2602_v3 = vld [vmem:[%s3735_s21 + $0x5c8] sm:$0xff]  ;;  %v2596_v4 = vld [vmem:[%s3735_s21 + $0x598] sm:$0xff]  ;;  %v3242_v49 = vpack.c.bf16 %v2635_v43, %v2627_v41  ;;  %v2649_v52 = vld [vmem:[%s3735_s21 + $0x740] sm:$0xff] }
  0x53   : > { %3177 = vmatprep.subr.bf16.mxu1 %v3176_v8  ;;  %v3196_v8 = vpack.c.bf16 %v2602_v3, %v2594_v2  ;;  %v3232_v14 = vpack.c.bf16 %v2604_v5, %v2596_v4  ;;  %v2643_v53 = vld [vmem:[%s3735_s21 + $0x710] sm:$0xff]  ;;  %v3210_v61 = vpack.c.bf16 %v2649_v52, %v2641_v51  ;;  %v2657_v1 = vld [vmem:[%s3735_s21 + $0x780] sm:$0xff]  ;;  %v2592_v51 = vld [vmem:[%s3735_s21 + $0x578] sm:$0xff] }
  0x54   : > { %v2651_v55 = vld [vmem:[%s3735_s21 + $0x750] sm:$0xff]  ;;  %v2665_v2 = vld [vmem:[%s3735_s21 + $0x7c0] sm:$0xff] }
  0x55   : > { %3143 = vmatpush1.bf16.msra.mxu0 %v3142_v16  ;;  %v2610_v16 = vld [vmem:[%s3735_s21 + $0x608] sm:$0xff]  ;;  %v3246_v62 = vpack.c.bf16 %v2651_v55, %v2643_v53  ;;  %v2659_v3 = vld [vmem:[%s3735_s21 + $0x790] sm:$0xff]  ;;  %v3214_v9 = vpack.c.bf16 %v2665_v2, %v2657_v1  ;;  %v2681_v15 = vld [vmem:[%s3735_s21 + $0x840] sm:$0xff] }
  0x56   : > { %3179 = vmatpush1.bf16.msra.mxu1 %v3178_v17  ;;  %3145 = vmatprep.subr.bf16.mxu0 %v3144_v18  ;;  %v2618_v17 = vld [vmem:[%s3735_s21 + $0x648] sm:$0xff]  ;;  %v2612_v18 = vld [vmem:[%s3735_s21 + $0x618] sm:$0xff]  ;;  %v2667_v5 = vld [vmem:[%s3735_s21 + $0x7d0] sm:$0xff] }
  0x57   : > { %3181 = vmatprep.subr.bf16.mxu1 %v3180_v22  ;;  %v3200_v22 = vpack.c.bf16 %v2618_v17, %v2610_v16  ;;  %v3236_v28 = vpack.c.bf16 %v2620_v19, %v2612_v18  ;;  %v3250_v11 = vpack.c.bf16 %v2667_v5, %v2659_v3  ;;  %v2675_v16 = vld [vmem:[%s3735_s21 + $0x810] sm:$0xff]  ;;  %v2690_v19 = vld [vmem:[%s3735_s21 + $0x888] sm:$0xff]  ;;  %v2697_v29 = vld [vmem:[%s3735_s21 + $0x8c0] sm:$0xff] }
  0x58   : > { %v2683_v18 = vld [vmem:[%s3735_s21 + $0x850] sm:$0xff]  ;;  %v2573_v43 = vld [vmem:[%s3735_s21 + $0x4e0] sm:$0xff]  ;;  %v2608_v1 = vld [vmem:[%s3735_s21 + $0x5f8] sm:$0xff] }
  0x59   : > { %3147 = vmatpush1.bf16.msra.mxu0 %v3146_v30  ;;  %v2626_v30 = vld [vmem:[%s3735_s21 + $0x688] sm:$0xff]  ;;  %v3254_v25 = vpack.c.bf16 %v2683_v18, %v2675_v16  ;;  %v2581_v53 = vld [vmem:[%s3735_s21 + $0x520] sm:$0xff]  ;;  %v2615_v18 = vld [vmem:[%s3735_s21 + $0x630] sm:$0xff] }
  0x5a   : > { %3183 = vmatpush1.bf16.msra.mxu1 %v3182_v31  ;;  %3149 = vmatprep.subr.bf16.mxu0 %v3148_v32  ;;  %v2634_v31 = vld [vmem:[%s3735_s21 + $0x6c8] sm:$0xff]  ;;  %v2628_v32 = vld [vmem:[%s3735_s21 + $0x698] sm:$0xff]  ;;  %v2597_v3 = vld [vmem:[%s3735_s21 + $0x5a0] sm:$0xff] }
  0x5b   : > { %3185 = vmatprep.subr.bf16.mxu1 %v3184_v36  ;;  %v3204_v36 = vpack.c.bf16 %v2634_v31, %v2626_v30  ;;  %v3240_v42 = vpack.c.bf16 %v2636_v33, %v2628_v32  ;;  %v2691_v30 = vld [vmem:[%s3735_s21 + $0x890] sm:$0xff]  ;;  %v2566_v33 = vld [vmem:[%s3735_s21 + $0x4a8] sm:$0xff]  ;;  %v2613_v16 = vld [vmem:[%s3735_s21 + $0x620] sm:$0xff] }
  0x5c   : > { %v2699_v32 = vld [vmem:[%s3735_s21 + $0x8d0] sm:$0xff] }
  0x5d   : > { %3151 = vmatpush1.bf16.msra.mxu0 %v3150_v44  ;;  %v2642_v44 = vld [vmem:[%s3735_s21 + $0x708] sm:$0xff]  ;;  %v3258_v39 = vpack.c.bf16 %v2699_v32, %v2691_v30  ;;  %v2637_v32 = vld [vmem:[%s3735_s21 + $0x6e0] sm:$0xff] }
  0x5e   : > { %3187 = vmatpush1.bf16.msra.mxu1 %v3186_v45  ;;  %3189 = vmatprep.subr.bf16.mxu0 %v3188_v46  ;;  %v2650_v45 = vld [vmem:[%s3735_s21 + $0x748] sm:$0xff]  ;;  %v2644_v46 = vld [vmem:[%s3735_s21 + $0x718] sm:$0xff] }
  0x5f   : > { %3225 = vmatprep.subr.bf16.mxu1 %v3224_v50  ;;  %v3208_v50 = vpack.c.bf16 %v2650_v45, %v2642_v44  ;;  %v3244_v54 = vpack.c.bf16 %v2652_v47, %v2644_v46  ;;  %v2567_v45 = vld [vmem:[%s3735_s21 + $0x4b0] sm:$0xff]  ;;  %v2582_v47 = vld [vmem:[%s3735_s21 + $0x528] sm:$0xff] }
  0x60   : > { %618 = vmatmul.mubr.f32.vlgmr.msra.gmra.mrb[8].mxu0 %v3824_v60  ;;  %v2575_v46 = vld [vmem:[%s3735_s21 + $0x4f0] sm:$0xff] }
  0x61   : > { %707 = vmatmul.mubr.f32.vlgmr.msra.gmra.mrb[8].mxu1 %v3824_v60  ;;  %3191 = vmatpush1.bf16.msra.mxu0 %v3190_v56  ;;  %v2658_v56 = vld [vmem:[%s3735_s21 + $0x788] sm:$0xff]  ;;  %v3298_v52 = vpack.c.bf16 %v2575_v46, %v2567_v45  ;;  %v2645_v45 = vld [vmem:[%s3735_s21 + $0x720] sm:$0xff] }
  0x62   : > { %3227 = vmatpush1.bf16.msra.mxu1 %v3226_v57  ;;  %3193 = vmatprep.subr.bf16.mxu0 %v3192_v58  ;;  %v2666_v57 = vld [vmem:[%s3735_s21 + $0x7c8] sm:$0xff]  ;;  %v2660_v58 = vld [vmem:[%s3735_s21 + $0x798] sm:$0xff]  ;;  %v2653_v46 = vld [vmem:[%s3735_s21 + $0x760] sm:$0xff] }
  0x63   : > { %3229 = vmatprep.subr.bf16.mxu1 %v3228_v63  ;;  %2554 = vmatprep.mubr.msk.f32.mxu0 %vm362_vm0, %v3838_v10  ;;  %v3212_v63 = vpack.c.bf16 %v2666_v57, %v2658_v56  ;;  %v3248_v4 = vpack.c.bf16 %v2668_v59, %v2660_v58  ;;  %v2583_v56 = vld [vmem:[%s3735_s21 + $0x530] sm:$0xff]  ;;  %v2598_v59 = vld [vmem:[%s3735_s21 + $0x5a8] sm:$0xff] }
  0x64   : > { %2558 = vmatprep.mubr.msk.f32.mxu1 %vm362_vm0, %v3838_v10  ;;  %624 = vmatmul.mubr.f32.gmra.mrb[10].mxu0 %v3844_v12  ;;  %v2591_v57 = vld [vmem:[%s3735_s21 + $0x570] sm:$0xff] }
  0x65   : > { %3195 = vmatpush1.bf16.msra.mxu0 %v3194_v6  ;;  %713 = vmatmul.mubr.f32.gmra.mrb[10].mxu1 %v3844_v12  ;;  %v2674_v6 = vld [vmem:[%s3735_s21 + $0x808] sm:$0xff]  ;;  %v3302_v2 = vpack.c.bf16 %v2591_v57, %v2583_v56 }
  0x66   : > { %3231 = vmatpush1.bf16.msra.mxu1 %v3230_v7  ;;  %3197 = vmatprep.subr.bf16.mxu0 %v3196_v8  ;;  %v2676_v7 = vld [vmem:[%s3735_s21 + $0x818] sm:$0xff] }
  0x67   : > { %3233 = vmatprep.subr.bf16.mxu1 %v3232_v14  ;;  %2555 = vmatprep.mubr.msk.f32.mxu0 %vm362_vm0, %v3862_v24  ;;  %v2684_v8 = vld [vmem:[%s3735_s21 + $0x858] sm:$0xff]  ;;  %v2673_v14 = vld [vmem:[%s3735_s21 + $0x800] sm:$0xff] }
  0x68   : > { %2559 = vmatprep.mubr.msk.f32.mxu1 %vm362_vm0, %v3862_v24  ;;  %630 = vmatmul.mubr.f32.gmra.mrb[12].mxu0 %v3868_v26  ;;  %v3252_v17 = vpack.c.bf16 %v2684_v8, %v2676_v7  ;;  %v3218_v23 = vpack.c.bf16 %v2681_v15, %v2673_v14  ;;  %v2614_v8 = vld [vmem:[%s3735_s21 + $0x628] sm:$0xff]  ;;  %v2624_v14 = vld [vmem:[%s3735_s21 + $0x678] sm:$0xff] }
  0x69   : > { %3199 = vmatpush1.bf16.msra.mxu0 %v3198_v20  ;;  %719 = vmatmul.mubr.f32.gmra.mrb[12].mxu1 %v3868_v26  ;;  %v2698_v20 = vld [vmem:[%s3735_s21 + $0x8c8] sm:$0xff] }
  0x6a   : > { %3235 = vmatpush1.bf16.msra.mxu1 %v3234_v21  ;;  %3201 = vmatprep.subr.bf16.mxu0 %v3200_v22  ;;  %v2692_v21 = vld [vmem:[%s3735_s21 + $0x898] sm:$0xff]  ;;  %v3220_v27 = vpack.c.bf16 %v2698_v20, %v2690_v19  ;;  %v2623_v20 = vld [vmem:[%s3735_s21 + $0x670] sm:$0xff] }
  0x6b   : > { %3237 = vmatprep.subr.bf16.mxu1 %v3236_v28  ;;  %2556 = vmatprep.mubr.msk.f32.mxu0 %vm362_vm0, %v3886_v38  ;;  %v2700_v22 = vld [vmem:[%s3735_s21 + $0x8d8] sm:$0xff]  ;;  %v2689_v28 = vld [vmem:[%s3735_s21 + $0x880] sm:$0xff] }
  0x6c   : > { %2560 = vmatprep.mubr.msk.f32.mxu1 %vm362_vm0, %v3886_v38  ;;  %636 = vmatmul.mubr.f32.gmra.mrb[14].mxu0 %v3892_v40  ;;  %v3256_v31 = vpack.c.bf16 %v2700_v22, %v2692_v21  ;;  %v3222_v37 = vpack.c.bf16 %v2697_v29, %v2689_v28  ;;  %v2630_v21 = vld [vmem:[%s3735_s21 + $0x6a8] sm:$0xff]  ;;  %v3310_v29 = vpack.c.bf16 %v2623_v20, %v2615_v18 }
  0x6d   : > { %3203 = vmatpush1.bf16.msra.mxu0 %v3202_v34  ;;  %725 = vmatmul.mubr.f32.gmra.mrb[14].mxu1 %v3892_v40  ;;  %v2574_v34 = vld [vmem:[%s3735_s21 + $0x4e8] sm:$0xff] }
  0x6e   : > { %3239 = vmatpush1.bf16.msra.mxu1 %v3238_v35  ;;  %3205 = vmatprep.subr.bf16.mxu0 %v3204_v36  ;;  %v2568_v35 = vld [vmem:[%s3735_s21 + $0x4b8] sm:$0xff]  ;;  %v3260_v41 = vpack.c.bf16 %v2574_v34, %v2566_v33  ;;  %v2638_v22 = vld [vmem:[%s3735_s21 + $0x6e8] sm:$0xff]  ;;  %v2631_v33 = vld [vmem:[%s3735_s21 + $0x6b0] sm:$0xff] }
  0x6f   : > { %3241 = vmatprep.subr.bf16.mxu1 %v3240_v42  ;;  %2705 = vmatprep.mubr.msk.f32.mxu0 %vm362_vm0, %v3723_v0  ;;  %v2576_v36 = vld [vmem:[%s3735_s21 + $0x4f8] sm:$0xff]  ;;  %v2565_v42 = vld [vmem:[%s3735_s21 + $0x4a0] sm:$0xff]  ;;  %v3276_v30 = vpack.c.bf16 %v2638_v22, %v2630_v21 }
  0x70   : > { %2709 = vmatprep.mubr.msk.f32.mxu1 %vm362_vm0, %v3723_v0  ;;  %v2682_v0 = vld [vmem:[%s3735_s21 + $0x848] sm:$0xff]  ;;  %v3296_v44 = vpack.c.bf16 %v2576_v36, %v2568_v35  ;;  %v2639_v35 = vld [vmem:[%s3735_s21 + $0x6f0] sm:$0xff]  ;;  %v2693_v21 = vld [vmem:[%s3735_s21 + $0x8a0] sm:$0xff] }
  0x71   : > { %3207 = vmatpush1.bf16.msra.mxu0 %v3206_v48  ;;  %v3216_v13 = vpack.c.bf16 %v2682_v0, %v2674_v6  ;;  %v2590_v48 = vld [vmem:[%s3735_s21 + $0x568] sm:$0xff]  ;;  %v2599_v6 = vld [vmem:[%s3735_s21 + $0x5b0] sm:$0xff]  ;;  %v2701_v22 = vld [vmem:[%s3735_s21 + $0x8e0] sm:$0xff] }
  0x72   : > { %3243 = vmatpush1.bf16.msra.mxu1 %v3242_v49  ;;  %3209 = vmatprep.subr.bf16.mxu0 %v3208_v50  ;;  %v3262_v49 = vpack.c.bf16 %v2573_v43, %v2565_v42  ;;  %v2584_v50 = vld [vmem:[%s3735_s21 + $0x538] sm:$0xff]  ;;  %v3264_v55 = vpack.c.bf16 %v2590_v48, %v2582_v47  ;;  %v2607_v0 = vld [vmem:[%s3735_s21 + $0x5f0] sm:$0xff]  ;;  %v2646_v36 = vld [vmem:[%s3735_s21 + $0x728] sm:$0xff]  ;;  %v3314_v43 = vpack.c.bf16 %v2639_v35, %v2631_v33 }
  0x73   : > { %3245 = vmatprep.subr.bf16.mxu1 %v3244_v54  ;;  %v2589_v54 = vld [vmem:[%s3735_s21 + $0x560] sm:$0xff]  ;;  %v3300_v58 = vpack.c.bf16 %v2592_v51, %v2584_v50  ;;  %v3306_v15 = vpack.c.bf16 %v2607_v0, %v2599_v6  ;;  %v2647_v47 = vld [vmem:[%s3735_s21 + $0x730] sm:$0xff]  ;;  %v2662_v50 = vld [vmem:[%s3735_s21 + $0x7a8] sm:$0xff] }
  0x74   : > { %v2670_v51 = vld [vmem:[%s3735_s21 + $0x7e8] sm:$0xff]  ;;  %v2721_v35 = vld [vmem:[%s3735_s21 + $0x900] sm:$0xff] }
  0x75   : > { %3211 = vmatpush1.bf16.msra.mxu0 %v3210_v61  ;;  %v2606_v61 = vld [vmem:[%s3735_s21 + $0x5e8] sm:$0xff]  ;;  %v3284_v57 = vpack.c.bf16 %v2670_v51, %v2662_v50  ;;  %v2739_v51 = vld [vmem:[%s3735_s21 + $0x990] sm:$0xff] }
  0x76   : > { %3247 = vmatpush1.bf16.msra.mxu1 %v3246_v62  ;;  %3213 = vmatprep.subr.bf16.mxu0 %v3212_v63  ;;  %v3266_v62 = vpack.c.bf16 %v2589_v54, %v2581_v53  ;;  %v2600_v63 = vld [vmem:[%s3735_s21 + $0x5b8] sm:$0xff]  ;;  %v3268_v5 = vpack.c.bf16 %v2606_v61, %v2598_v59  ;;  %v2669_v59 = vld [vmem:[%s3735_s21 + $0x7e0] sm:$0xff]  ;;  %v2663_v61 = vld [vmem:[%s3735_s21 + $0x7b0] sm:$0xff] }
  0x77   : > { %3249 = vmatprep.subr.bf16.mxu1 %v3248_v4  ;;  %v2605_v4 = vld [vmem:[%s3735_s21 + $0x5e0] sm:$0xff]  ;;  %v3304_v7 = vpack.c.bf16 %v2608_v1, %v2600_v63  ;;  %v2664_v53 = vld [vmem:[%s3735_s21 + $0x7b8] sm:$0xff]  ;;  %v2671_v63 = vld [vmem:[%s3735_s21 + $0x7f0] sm:$0xff] }
  0x78   : > { %v2672_v54 = vld [vmem:[%s3735_s21 + $0x7f8] sm:$0xff]  ;;  %v2678_v1 = vld [vmem:[%s3735_s21 + $0x828] sm:$0xff]  ;;  %v3322_v6 = vpack.c.bf16 %v2671_v63, %v2663_v61  ;;  %v2761_v63 = vld [vmem:[%s3735_s21 + $0xa40] sm:$0xff] }
  0x79   : > { %3215 = vmatpush1.bf16.msra.mxu0 %v3214_v9  ;;  %v2622_v9 = vld [vmem:[%s3735_s21 + $0x668] sm:$0xff] }
  0x7a   : > { %3251 = vmatpush1.bf16.msra.mxu1 %v3250_v11  ;;  %3217 = vmatprep.subr.bf16.mxu0 %v3216_v13  ;;  %v3270_v11 = vpack.c.bf16 %v2605_v4, %v2597_v3  ;;  %v2616_v13 = vld [vmem:[%s3735_s21 + $0x638] sm:$0xff]  ;;  %v3272_v19 = vpack.c.bf16 %v2622_v9, %v2614_v8  ;;  %v2685_v8 = vld [vmem:[%s3735_s21 + $0x860] sm:$0xff]  ;;  %v2679_v9 = vld [vmem:[%s3735_s21 + $0x830] sm:$0xff] }
  0x7b   : > { %3253 = vmatprep.subr.bf16.mxu1 %v3252_v17  ;;  %v2621_v17 = vld [vmem:[%s3735_s21 + $0x660] sm:$0xff]  ;;  %v2680_v3 = vld [vmem:[%s3735_s21 + $0x838] sm:$0xff] }
  0x7c   : > { %v3274_v28 = vpack.c.bf16 %v2621_v17, %v2613_v16  ;;  %v2688_v4 = vld [vmem:[%s3735_s21 + $0x878] sm:$0xff] }
  0x7d   : > { %3219 = vmatpush1.bf16.msra.mxu0 %v3218_v23  ;;  %v3308_v23 = vpack.c.bf16 %v2624_v14, %v2616_v13  ;;  %v2687_v13 = vld [vmem:[%s3735_s21 + $0x870] sm:$0xff]  ;;  %v2694_v14 = vld [vmem:[%s3735_s21 + $0x8a8] sm:$0xff]  ;;  %v2696_v16 = vld [vmem:[%s3735_s21 + $0x8b8] sm:$0xff] }
  0x7e   : > { %3255 = vmatpush1.bf16.msra.mxu1 %v3254_v25  ;;  %3221 = vmatprep.subr.bf16.mxu0 %v3220_v27  ;;  %v2632_v25 = vld [vmem:[%s3735_s21 + $0x6b8] sm:$0xff] }
  0x7f   : > { %3257 = vmatprep.subr.bf16.mxu1 %v3256_v31  ;;  %v2640_v27 = vld [vmem:[%s3735_s21 + $0x6f8] sm:$0xff]  ;;  %v2629_v31 = vld [vmem:[%s3735_s21 + $0x6a0] sm:$0xff] }
  0x80   : > { %v3312_v34 = vpack.c.bf16 %v2640_v27, %v2632_v25  ;;  %v3278_v42 = vpack.c.bf16 %v2637_v32, %v2629_v31  ;;  %v2704_v17 = vld [vmem:[%s3735_s21 + $0x8f8] sm:$0xff]  ;;  %v2703_v27 = vld [vmem:[%s3735_s21 + $0x8f0] sm:$0xff]  ;;  %v3294_v32 = vpack.c.bf16 %v2701_v22, %v2693_v21  ;;  %v2785_v21 = vld [vmem:[%s3735_s21 + $0xb00] sm:$0xff] }
  0x81   : > { %3223 = vmatpush1.bf16.msra.mxu0 %v3222_v37  ;;  %v2654_v37 = vld [vmem:[%s3735_s21 + $0x768] sm:$0xff]  ;;  %v3328_v25 = vpack.c.bf16 %v2704_v17, %v2696_v16  ;;  %v2732_v31 = vld [vmem:[%s3735_s21 + $0x958] sm:$0xff]  ;;  %v2793_v22 = vld [vmem:[%s3735_s21 + $0xb40] sm:$0xff] }
  0x82   : > { %3259 = vmatpush1.bf16.msra.mxu1 %v3258_v39  ;;  %3261 = vmatprep.subr.bf16.mxu0 %v3260_v41  ;;  %v2648_v39 = vld [vmem:[%s3735_s21 + $0x738] sm:$0xff] }
  0x83   : > { %3297 = vmatprep.subr.bf16.mxu1 %v3296_v44  ;;  %v2656_v41 = vld [vmem:[%s3735_s21 + $0x778] sm:$0xff]  ;;  %v3280_v44 = vpack.c.bf16 %v2654_v37, %v2646_v36  ;;  %v2729_v36 = vld [vmem:[%s3735_s21 + $0x940] sm:$0xff] }
  0x84   : > { %941 = vmatmul.mubr.f32.vlgmr.msra.gmra.mrb[16].mxu0 %v3824_v60  ;;  %v3316_v48 = vpack.c.bf16 %v2656_v41, %v2648_v39  ;;  %v2723_v39 = vld [vmem:[%s3735_s21 + $0x910] sm:$0xff]  ;;  %v2788_v17 = vld [vmem:[%s3735_s21 + $0xb18] sm:$0xff] }
  0x85   : > { %1030 = vmatmul.mubr.f32.vlgmr.msra.gmra.mrb[16].mxu1 %v3824_v60  ;;  %3263 = vmatpush1.bf16.msra.mxu0 %v3262_v49  ;;  %v2655_v49 = vld [vmem:[%s3735_s21 + $0x770] sm:$0xff] }
  0x86   : > { %3299 = vmatpush1.bf16.msra.mxu1 %v3298_v52  ;;  %2706 = vmatprep.mubr.msk.f32.mxu0 %vm362_vm0, %v3838_v10  ;;  %v4109_v52 = vld [vmem:[%s5061_s1 + $0x8] sm:$0xff]  ;;  %v3318_v56 = vpack.c.bf16 %v2655_v49, %v2647_v47  ;;  %v2731_v41 = vld [vmem:[%s3735_s21 + $0x950] sm:$0xff]  ;;  %v2745_v49 = vld [vmem:[%s3735_s21 + $0x9c0] sm:$0xff] }
  0x87   : > { %2710 = vmatprep.mubr.msk.f32.mxu1 %vm362_vm0, %v3838_v10  ;;  %3265 = vmatprep.subr.bf16.mxu0 %v3264_v55  ;;  %v3282_v55 = vpack.c.bf16 %v2653_v46, %v2645_v45  ;;  %v2740_v45 = vld [vmem:[%s3735_s21 + $0x998] sm:$0xff]  ;;  %v3370_v47 = vpack.c.bf16 %v2731_v41, %v2723_v39  ;;  %v2818_v39 = vld [vmem:[%s3735_s21 + $0xc08] sm:$0xff] }
  0x88   : > { %947 = vmatmul.mubr.f32.gmra.mrb[18].mxu0 %v3844_v12  ;;  %3301 = vmatprep.subr.bf16.mxu1 %v3300_v58  ;;  %v2661_v58 = vld [vmem:[%s3735_s21 + $0x7a0] sm:$0xff]  ;;  %v2748_v46 = vld [vmem:[%s3735_s21 + $0x9d8] sm:$0xff]  ;;  %v2826_v41 = vld [vmem:[%s3735_s21 + $0xc48] sm:$0xff] }
  0x89   : > { %1036 = vmatmul.mubr.f32.gmra.mrb[18].mxu1 %v3844_v12  ;;  %3267 = vmatpush1.bf16.msra.mxu0 %v3266_v62  ;;  %v3320_v62 = vpack.c.bf16 %v2672_v54, %v2664_v53  ;;  %v2747_v53 = vld [vmem:[%s3735_s21 + $0x9d0] sm:$0xff]  ;;  %v3372_v54 = vpack.c.bf16 %v2748_v46, %v2740_v45  ;;  %v3356_v45 = vpack.c.bf16 %v2826_v41, %v2818_v39  ;;  %v2817_v46 = vld [vmem:[%s3735_s21 + $0xc00] sm:$0xff]  ;;  %v2760_v41 = vld [vmem:[%s3735_s21 + $0xa38] sm:$0xff] }
  0x8a   : > { %3303 = vmatpush1.bf16.msra.mxu1 %v3302_v2  ;;  %2707 = vmatprep.mubr.msk.f32.mxu0 %vm362_vm0, %v3862_v24  ;;  %v2686_v2 = vld [vmem:[%s3735_s21 + $0x868] sm:$0xff]  ;;  %v3374_v61 = vpack.c.bf16 %v2747_v53, %v2739_v51 }
  0x8b   : > { %2711 = vmatprep.mubr.msk.f32.mxu1 %vm362_vm0, %v3862_v24  ;;  %3269 = vmatprep.subr.bf16.mxu0 %v3268_v5  ;;  %v3286_v5 = vpack.c.bf16 %v2669_v59, %v2661_v58  ;;  %v3288_v0 = vpack.c.bf16 %v2686_v2, %v2678_v1  ;;  %v2756_v58 = vld [vmem:[%s3735_s21 + $0xa18] sm:$0xff]  ;;  %v2755_v1 = vld [vmem:[%s3735_s21 + $0xa10] sm:$0xff]  ;;  %v2834_v51 = vld [vmem:[%s3735_s21 + $0xc88] sm:$0xff] }
  0x8c   : > { %953 = vmatmul.mubr.f32.gmra.mrb[20].mxu0 %v3868_v26  ;;  %3305 = vmatprep.subr.bf16.mxu1 %v3304_v7  ;;  %v2677_v7 = vld [vmem:[%s3735_s21 + $0x820] sm:$0xff]  ;;  %v2764_v59 = vld [vmem:[%s3735_s21 + $0xa58] sm:$0xff]  ;;  %v2763_v2 = vld [vmem:[%s3735_s21 + $0xa50] sm:$0xff] }
  0x8d   : > { %1042 = vmatmul.mubr.f32.gmra.mrb[20].mxu1 %v3868_v26  ;;  %3271 = vmatpush1.bf16.msra.mxu0 %v3270_v11  ;;  %v3324_v11 = vpack.c.bf16 %v2688_v4, %v2680_v3  ;;  %v3290_v18 = vpack.c.bf16 %v2685_v8, %v2677_v7  ;;  %v3376_v3 = vpack.c.bf16 %v2764_v59, %v2756_v58  ;;  %v2770_v4 = vld [vmem:[%s3735_s21 + $0xa88] sm:$0xff]  ;;  %v2769_v8 = vld [vmem:[%s3735_s21 + $0xa80] sm:$0xff] }
  0x8e   : > { %3307 = vmatpush1.bf16.msra.mxu1 %v3306_v15  ;;  %2708 = vmatprep.mubr.msk.f32.mxu0 %vm362_vm0, %v3886_v38  ;;  %v2702_v15 = vld [vmem:[%s3735_s21 + $0x8e8] sm:$0xff]  ;;  %v3378_v7 = vpack.c.bf16 %v2763_v2, %v2755_v1  ;;  %v2833_v59 = vld [vmem:[%s3735_s21 + $0xc80] sm:$0xff] }
  0x8f   : > { %2712 = vmatprep.mubr.msk.f32.mxu1 %vm362_vm0, %v3886_v38  ;;  %3273 = vmatprep.subr.bf16.mxu0 %v3272_v19  ;;  %v3326_v19 = vpack.c.bf16 %v2687_v13, %v2679_v9  ;;  %v3292_v20 = vpack.c.bf16 %v2702_v15, %v2694_v14  ;;  %v2777_v9 = vld [vmem:[%s3735_s21 + $0xac0] sm:$0xff]  ;;  %v2779_v13 = vld [vmem:[%s3735_s21 + $0xad0] sm:$0xff]  ;;  %v2786_v14 = vld [vmem:[%s3735_s21 + $0xb08] sm:$0xff] }
  0x90   : > { %959 = vmatmul.mubr.f32.gmra.mrb[22].mxu0 %v3892_v40  ;;  %3309 = vmatprep.subr.bf16.mxu1 %v3308_v23  ;;  %v2695_v23 = vld [vmem:[%s3735_s21 + $0x8b0] sm:$0xff]  ;;  %v2794_v15 = vld [vmem:[%s3735_s21 + $0xb48] sm:$0xff] }
  0x91   : > { %1048 = vmatmul.mubr.f32.gmra.mrb[22].mxu1 %v3892_v40  ;;  %3275 = vmatpush1.bf16.msra.mxu0 %v3274_v28  ;;  %v2722_v28 = vld [vmem:[%s3735_s21 + $0x908] sm:$0xff]  ;;  %v3330_v33 = vpack.c.bf16 %v2703_v27, %v2695_v23  ;;  %v2787_v23 = vld [vmem:[%s3735_s21 + $0xb10] sm:$0xff] }
  0x92   : > { %3311 = vmatpush1.bf16.msra.mxu1 %v3310_v29  ;;  %3277 = vmatprep.subr.bf16.mxu0 %v3276_v30  ;;  %v2730_v29 = vld [vmem:[%s3735_s21 + $0x948] sm:$0xff]  ;;  %v2724_v30 = vld [vmem:[%s3735_s21 + $0x918] sm:$0xff] }
  0x93   : > { %3313 = vmatprep.subr.bf16.mxu1 %v3312_v34  ;;  %2713 = vmatprep.mubr.msk.f32.mxu0 %vm362_vm0, %v4109_v52  ;;  %v3332_v34 = vpack.c.bf16 %v2730_v29, %v2722_v28  ;;  %v3368_v37 = vpack.c.bf16 %v2732_v31, %v2724_v30  ;;  %v2802_v27 = vld [vmem:[%s3735_s21 + $0xb88] sm:$0xff]  ;;  %v2804_v29 = vld [vmem:[%s3735_s21 + $0xb98] sm:$0xff] }
  0x94   : > { %2717 = vmatprep.mubr.msk.f32.mxu1 %vm362_vm0, %v4109_v52  ;;  %v2810_v28 = vld [vmem:[%s3735_s21 + $0xbc8] sm:$0xff]  ;;  %v2812_v30 = vld [vmem:[%s3735_s21 + $0xbd8] sm:$0xff] }
  0x95   : > { %3279 = vmatpush1.bf16.msra.mxu0 %v3278_v42  ;;  %v2738_v42 = vld [vmem:[%s3735_s21 + $0x988] sm:$0xff] }
  0x96   : > { %3315 = vmatpush1.bf16.msra.mxu1 %v3314_v43  ;;  %3281 = vmatprep.subr.bf16.mxu0 %v3280_v44  ;;  %v2746_v43 = vld [vmem:[%s3735_s21 + $0x9c8] sm:$0xff]  ;;  %v3334_v44 = vpack.c.bf16 %v2729_v36, %v2721_v35  ;;  %v2803_v35 = vld [vmem:[%s3735_s21 + $0xb90] sm:$0xff]  ;;  %v3388_v36 = vpack.c.bf16 %v2812_v30, %v2804_v29  ;;  %v2741_v30 = vld [vmem:[%s3735_s21 + $0x9a0] sm:$0xff] }
  0x97   : > { %3317 = vmatprep.subr.bf16.mxu1 %v3316_v48  ;;  %v2737_v48 = vld [vmem:[%s3735_s21 + $0x980] sm:$0xff]  ;;  %v3336_v50 = vpack.c.bf16 %v2746_v43, %v2738_v42  ;;  %v2828_v42 = vld [vmem:[%s3735_s21 + $0xc58] sm:$0xff]  ;;  %v2842_v53 = vld [vmem:[%s3735_s21 + $0xcc8] sm:$0xff] }
  0x98   : > { %v3360_v58 = vpack.c.bf16 %v2842_v53, %v2834_v51  ;;  %v2850_v1 = vld [vmem:[%s3735_s21 + $0xd08] sm:$0xff] }
  0x99   : > { %3283 = vmatpush1.bf16.msra.mxu0 %v3282_v55  ;;  %v2754_v55 = vld [vmem:[%s3735_s21 + $0xa08] sm:$0xff] }
  0x9a   : > { %3319 = vmatpush1.bf16.msra.mxu1 %v3318_v56  ;;  %3285 = vmatprep.subr.bf16.mxu0 %v3284_v57  ;;  %v2762_v56 = vld [vmem:[%s3735_s21 + $0xa48] sm:$0xff]  ;;  %v3338_v57 = vpack.c.bf16 %v2745_v49, %v2737_v48  ;;  %v2819_v48 = vld [vmem:[%s3735_s21 + $0xc10] sm:$0xff] }
  0x9b   : > { %3321 = vmatprep.subr.bf16.mxu1 %v3320_v62  ;;  %v2753_v62 = vld [vmem:[%s3735_s21 + $0xa00] sm:$0xff]  ;;  %v2858_v2 = vld [vmem:[%s3735_s21 + $0xd48] sm:$0xff] }
  0x9c   : > { %v2774_v51 = vld [vmem:[%s3735_s21 + $0xaa8] sm:$0xff] }
  0x9d   : > { %3287 = vmatpush1.bf16.msra.mxu0 %v3286_v5  ;;  %v2778_v5 = vld [vmem:[%s3735_s21 + $0xac8] sm:$0xff] }
  0x9e   : > { %3323 = vmatpush1.bf16.msra.mxu1 %v3322_v6  ;;  %3289 = vmatprep.subr.bf16.mxu0 %v3288_v0  ;;  %v2772_v6 = vld [vmem:[%s3735_s21 + $0xa98] sm:$0xff]  ;;  %v2782_v53 = vld [vmem:[%s3735_s21 + $0xae8] sm:$0xff] }
  0x9f   : > { %3325 = vmatprep.subr.bf16.mxu1 %v3324_v11  ;;  %v2780_v0 = vld [vmem:[%s3735_s21 + $0xad8] sm:$0xff]  ;;  %v2771_v11 = vld [vmem:[%s3735_s21 + $0xa90] sm:$0xff] }
  0xa0   : > { %v3380_v16 = vpack.c.bf16 %v2780_v0, %v2772_v6  ;;  %v3364_v6 = vpack.c.bf16 %v2858_v2, %v2850_v1  ;;  %v2849_v0 = vld [vmem:[%s3735_s21 + $0xd00] sm:$0xff]  ;;  %v2790_v1 = vld [vmem:[%s3735_s21 + $0xb28] sm:$0xff] }
  0xa1   : > { %3291 = vmatpush1.bf16.msra.mxu0 %v3290_v18  ;;  %v2796_v18 = vld [vmem:[%s3735_s21 + $0xb58] sm:$0xff]  ;;  %v2798_v2 = vld [vmem:[%s3735_s21 + $0xb68] sm:$0xff] }
  0xa2   : > { %3327 = vmatpush1.bf16.msra.mxu1 %v3326_v19  ;;  %3293 = vmatprep.subr.bf16.mxu0 %v3292_v20  ;;  %v3382_v19 = vpack.c.bf16 %v2779_v13, %v2771_v11  ;;  %v3348_v20 = vpack.c.bf16 %v2794_v15, %v2786_v14  ;;  %v2859_v11 = vld [vmem:[%s3735_s21 + $0xd50] sm:$0xff]  ;;  %v2734_v13 = vld [vmem:[%s3735_s21 + $0x968] sm:$0xff]  ;;  %v2728_v14 = vld [vmem:[%s3735_s21 + $0x938] sm:$0xff] }
  0xa3   : > { %3329 = vmatprep.subr.bf16.mxu1 %v3328_v25  ;;  %v3384_v25 = vpack.c.bf16 %v2796_v18, %v2788_v17  ;;  %v2736_v15 = vld [vmem:[%s3735_s21 + $0x978] sm:$0xff] }
  0xa5   : > { %3295 = vmatpush1.bf16.msra.mxu0 %v3294_v32  ;;  %v3352_v32 = vpack.c.bf16 %v2810_v28, %v2802_v27  ;;  %v2744_v27 = vld [vmem:[%s3735_s21 + $0x9b8] sm:$0xff] }
  0xa6   : > { %3331 = vmatpush1.bf16.msra.mxu1 %v3330_v33  ;;  %3333 = vmatprep.subr.bf16.mxu0 %v3332_v34  ;;  %v2801_v33 = vld [vmem:[%s3735_s21 + $0xb80] sm:$0xff]  ;;  %v2752_v28 = vld [vmem:[%s3735_s21 + $0x9f8] sm:$0xff] }
  0xa7   : > { %3369 = vmatprep.subr.bf16.mxu1 %v3368_v37  ;;  %v2809_v34 = vld [vmem:[%s3735_s21 + $0xbc0] sm:$0xff]  ;;  %v2811_v37 = vld [vmem:[%s3735_s21 + $0xbd0] sm:$0xff] }
  0xa8   : > { %1119 = vmatmul.mubr.f32.vlgmr.msra.gmra.mrb[24].mxu0 %v3824_v60  ;;  %v3354_v43 = vpack.c.bf16 %v2809_v34, %v2801_v33  ;;  %v2751_v33 = vld [vmem:[%s3735_s21 + $0x9f0] sm:$0xff]  ;;  %v4252_v34 = vld [vmem:[%s5061_s1] sm:$0xff] }
  0xa9   : > { %1208 = vmatmul.mubr.f32.vlgmr.msra.gmra.mrb[24].mxu1 %v3824_v60  ;;  %3335 = vmatpush1.bf16.msra.mxu0 %v3334_v44  ;;  %v3340_v60 = vpack.c.bf16 %v2762_v56, %v2754_v55  ;;  %v3390_v44 = vpack.c.bf16 %v2811_v37, %v2803_v35  ;;  %v2844_v55 = vld [vmem:[%s3735_s21 + $0xcd8] sm:$0xff]  ;;  %v3444_v35 = vpack.c.bf16 %v2752_v28, %v2744_v27  ;;  %v2766_v37 = vld [vmem:[%s3735_s21 + $0xa68] sm:$0xff]  ;;  %v2815_v27 = vld [vmem:[%s3735_s21 + $0xbf0] sm:$0xff] }
  0xaa   : > { %3371 = vmatpush1.bf16.msra.mxu1 %v3370_v47  ;;  %2714 = vmatprep.mubr.msk.f32.mxu0 %vm362_vm0, %v3838_v10  ;;  %v2825_v47 = vld [vmem:[%s3735_s21 + $0xc40] sm:$0xff]  ;;  %v2822_v28 = vld [vmem:[%s3735_s21 + $0xc28] sm:$0xff] }
  0xab   : > { %2718 = vmatprep.mubr.msk.f32.mxu1 %vm362_vm0, %v3838_v10  ;;  %3337 = vmatprep.subr.bf16.mxu0 %v3336_v50  ;;  %v3342_v10 = vpack.c.bf16 %v2761_v63, %v2753_v62  ;;  %v2827_v50 = vld [vmem:[%s3735_s21 + $0xc50] sm:$0xff]  ;;  %v3358_v56 = vpack.c.bf16 %v2825_v47, %v2817_v46 }
  0xac   : > { %1125 = vmatmul.mubr.f32.gmra.mrb[26].mxu0 %v3844_v12  ;;  %3373 = vmatprep.subr.bf16.mxu1 %v3372_v54  ;;  %v2836_v54 = vld [vmem:[%s3735_s21 + $0xc98] sm:$0xff]  ;;  %v2835_v62 = vld [vmem:[%s3735_s21 + $0xc90] sm:$0xff] }
  0xad   : > { %1214 = vmatmul.mubr.f32.gmra.mrb[26].mxu1 %v3844_v12  ;;  %3339 = vmatpush1.bf16.msra.mxu0 %v3338_v57  ;;  %v3344_v12 = vpack.c.bf16 %v2778_v5, %v2770_v4  ;;  %v3394_v57 = vpack.c.bf16 %v2827_v50, %v2819_v48  ;;  %v3396_v63 = vpack.c.bf16 %v2844_v55, %v2836_v54  ;;  %v2860_v4 = vld [vmem:[%s3735_s21 + $0xd58] sm:$0xff]  ;;  %v2759_v47 = vld [vmem:[%s3735_s21 + $0xa30] sm:$0xff] }
  0xae   : > { %3375 = vmatpush1.bf16.msra.mxu1 %v3374_v61  ;;  %2715 = vmatprep.mubr.msk.f32.mxu0 %vm362_vm0, %v3862_v24  ;;  %v2841_v61 = vld [vmem:[%s3735_s21 + $0xcc0] sm:$0xff]  ;;  %v2767_v48 = vld [vmem:[%s3735_s21 + $0xa70] sm:$0xff]  ;;  %v2776_v55 = vld [vmem:[%s3735_s21 + $0xab8] sm:$0xff] }
  0xaf   : > { %2719 = vmatprep.mubr.msk.f32.mxu1 %vm362_vm0, %v3862_v24  ;;  %3341 = vmatprep.subr.bf16.mxu0 %v3340_v60  ;;  %v3346_v24 = vpack.c.bf16 %v2777_v9, %v2769_v8  ;;  %v2843_v60 = vld [vmem:[%s3735_s21 + $0xcd0] sm:$0xff]  ;;  %v3362_v5 = vpack.c.bf16 %v2841_v61, %v2833_v59  ;;  %v2773_v59 = vld [vmem:[%s3735_s21 + $0xaa0] sm:$0xff] }
  0xb0   : > { %1131 = vmatmul.mubr.f32.gmra.mrb[28].mxu0 %v3868_v26  ;;  %3377 = vmatprep.subr.bf16.mxu1 %v3376_v3  ;;  %v2852_v3 = vld [vmem:[%s3735_s21 + $0xd18] sm:$0xff]  ;;  %v2851_v8 = vld [vmem:[%s3735_s21 + $0xd10] sm:$0xff]  ;;  %v2781_v61 = vld [vmem:[%s3735_s21 + $0xae0] sm:$0xff] }
  0xb1   : > { %1220 = vmatmul.mubr.f32.gmra.mrb[28].mxu1 %v3868_v26  ;;  %3343 = vmatpush1.bf16.msra.mxu0 %v3342_v10  ;;  %v2795_v26 = vld [vmem:[%s3735_s21 + $0xb50] sm:$0xff]  ;;  %v3398_v10 = vpack.c.bf16 %v2843_v60, %v2835_v62  ;;  %v3400_v9 = vpack.c.bf16 %v2860_v4, %v2852_v3  ;;  %v3402_v17 = vpack.c.bf16 %v2859_v11, %v2851_v8  ;;  %v4302_v3 = vld [vmem:[%s5061_s1 + $0x20] sm:$0xff] }
  0xb2   : > { %3379 = vmatpush1.bf16.msra.mxu1 %v3378_v7  ;;  %2716 = vmatprep.mubr.msk.f32.mxu0 %vm362_vm0, %v3886_v38  ;;  %v3386_v31 = vpack.c.bf16 %v2795_v26, %v2787_v23  ;;  %v2857_v7 = vld [vmem:[%s3735_s21 + $0xd40] sm:$0xff]  ;;  %v2742_v23 = vld [vmem:[%s3735_s21 + $0x9a8] sm:$0xff]  ;;  %v2775_v62 = vld [vmem:[%s3735_s21 + $0xab0] sm:$0xff]  ;;  %v3420_v8 = vpack.c.bf16 %v2798_v2, %v2790_v1 }
  0xb3   : > { %2720 = vmatprep.mubr.msk.f32.mxu1 %vm362_vm0, %v3886_v38  ;;  %3345 = vmatprep.subr.bf16.mxu0 %v3344_v12  ;;  %v3350_v38 = vpack.c.bf16 %v2793_v22, %v2785_v21  ;;  %v2726_v12 = vld [vmem:[%s3735_s21 + $0x928] sm:$0xff]  ;;  %v2727_v21 = vld [vmem:[%s3735_s21 + $0x930] sm:$0xff]  ;;  %v2797_v11 = vld [vmem:[%s3735_s21 + $0xb60] sm:$0xff] }
  0xb4   : > { %1137 = vmatmul.mubr.f32.gmra.mrb[30].mxu0 %v3892_v40  ;;  %3381 = vmatprep.subr.bf16.mxu1 %v3380_v16  ;;  %v3366_v16 = vpack.c.bf16 %v2857_v7, %v2849_v0  ;;  %v3404_v18 = vpack.c.bf16 %v2734_v13, %v2726_v12  ;;  %v2735_v22 = vld [vmem:[%s3735_s21 + $0x970] sm:$0xff]  ;;  %v4311_v0 = vld [vmem:[%s5061_s1 + $0x38] sm:$0xff] }
  0xb5   : > { %1226 = vmatmul.mubr.f32.gmra.mrb[30].mxu1 %v3892_v40  ;;  %3347 = vmatpush1.bf16.msra.mxu0 %v3346_v24  ;;  %v2820_v40 = vld [vmem:[%s3735_s21 + $0xc18] sm:$0xff]  ;;  %v2725_v24 = vld [vmem:[%s3735_s21 + $0x920] sm:$0xff]  ;;  %v3442_v29 = vpack.c.bf16 %v2735_v22, %v2727_v21  ;;  %v2783_v60 = vld [vmem:[%s3735_s21 + $0xaf0] sm:$0xff] }
  0xb6   : > { %3383 = vmatpush1.bf16.msra.mxu1 %v3382_v19  ;;  %3349 = vmatprep.subr.bf16.mxu0 %v3348_v20  ;;  %v3392_v49 = vpack.c.bf16 %v2828_v42, %v2820_v40  ;;  %v2733_v19 = vld [vmem:[%s3735_s21 + $0x960] sm:$0xff]  ;;  %v3440_v20 = vpack.c.bf16 %v2736_v15, %v2728_v14  ;;  %v2768_v40 = vld [vmem:[%s3735_s21 + $0xa78] sm:$0xff]  ;;  %v3454_v7 = vpack.c.bf16 %v2783_v60, %v2775_v62  ;;  %v2791_v12 = vld [vmem:[%s3735_s21 + $0xb30] sm:$0xff] }
  0xb7   : > { %3385 = vmatprep.subr.bf16.mxu1 %v3384_v25  ;;  %2865 = vmatprep.mubr.msk.f32.mxu0 %vm362_vm0, %v4109_v52  ;;  %v2750_v25 = vld [vmem:[%s3735_s21 + $0x9e8] sm:$0xff]  ;;  %v3406_v26 = vpack.c.bf16 %v2733_v19, %v2725_v24  ;;  %v4263_v42 = vld [vmem:[%s5061_s1 + $0x18] sm:$0xff]  ;;  %v3448_v50 = vpack.c.bf16 %v2768_v40, %v2760_v41  ;;  %v2799_v14 = vld [vmem:[%s3735_s21 + $0xb70] sm:$0xff] }
  0xb8   : > { %2869 = vmatprep.mubr.msk.f32.mxu1 %vm362_vm0, %v4109_v52  ;;  %v2806_v15 = vld [vmem:[%s3735_s21 + $0xba8] sm:$0xff]  ;;  %v2816_v24 = vld [vmem:[%s3735_s21 + $0xbf8] sm:$0xff]  ;;  %v2805_v22 = vld [vmem:[%s3735_s21 + $0xba0] sm:$0xff] }
  0xb9   : > { %3351 = vmatpush1.bf16.msra.mxu0 %v3350_v38  ;;  %v2749_v38 = vld [vmem:[%s3735_s21 + $0x9e0] sm:$0xff]  ;;  %v2831_v41 = vld [vmem:[%s3735_s21 + $0xc70] sm:$0xff]  ;;  %v2838_v40 = vld [vmem:[%s3735_s21 + $0xca8] sm:$0xff] }
  0xba   : > { %3387 = vmatpush1.bf16.msra.mxu1 %v3386_v31  ;;  %3353 = vmatprep.subr.bf16.mxu0 %v3352_v32  ;;  %v3408_v31 = vpack.c.bf16 %v2750_v25, %v2742_v23  ;;  %v2743_v32 = vld [vmem:[%s3735_s21 + $0x9b0] sm:$0xff]  ;;  %v3410_v39 = vpack.c.bf16 %v2749_v38, %v2741_v30  ;;  %v2813_v23 = vld [vmem:[%s3735_s21 + $0xbe0] sm:$0xff]  ;;  %v2824_v30 = vld [vmem:[%s3735_s21 + $0xc38] sm:$0xff] }
  0xbb   : > { %3389 = vmatprep.subr.bf16.mxu1 %v3388_v36  ;;  %v2758_v36 = vld [vmem:[%s3735_s21 + $0xa28] sm:$0xff]  ;;  %v2807_v25 = vld [vmem:[%s3735_s21 + $0xbb0] sm:$0xff]  ;;  %v2832_v38 = vld [vmem:[%s3735_s21 + $0xc78] sm:$0xff] }
  0xbc   : > { %v3412_v46 = vpack.c.bf16 %v2766_v37, %v2758_v36  ;;  %v2829_v36 = vld [vmem:[%s3735_s21 + $0xc60] sm:$0xff]  ;;  %v2823_v37 = vld [vmem:[%s3735_s21 + $0xc30] sm:$0xff] }
  0xbd   : > { %3355 = vmatpush1.bf16.msra.mxu0 %v3354_v43  ;;  %v3446_v43 = vpack.c.bf16 %v2751_v33, %v2743_v32  ;;  %v3462_v32 = vpack.c.bf16 %v2815_v27, %v2807_v25  ;;  %v2861_v60 = vld [vmem:[%s3735_s21 + $0xd60] sm:$0xff]  ;;  %v2898_v25 = vld [vmem:[%s3735_s21 + $0xe08] sm:$0xff] }
  0xbe   : > { %3391 = vmatpush1.bf16.msra.mxu1 %v3390_v44  ;;  %3357 = vmatprep.subr.bf16.mxu0 %v3356_v45  ;;  %v2757_v44 = vld [vmem:[%s3735_s21 + $0xa20] sm:$0xff] }
  0xbf   : > { %3393 = vmatprep.subr.bf16.mxu1 %v3392_v49  ;;  %v2765_v45 = vld [vmem:[%s3735_s21 + $0xa60] sm:$0xff]  ;;  %v4276_v49 = vld [vmem:[%s5061_s1 + $0x10] sm:$0xff] }
  0xc0   : > { %v3414_v54 = vpack.c.bf16 %v2765_v45, %v2757_v44  ;;  %v2840_v44 = vld [vmem:[%s3735_s21 + $0xcb8] sm:$0xff] }
  0xc1   : > { %3359 = vmatpush1.bf16.msra.mxu0 %v3358_v56  ;;  %v2784_v56 = vld [vmem:[%s3735_s21 + $0xaf8] sm:$0xff] }
  0xc2   : > { %3395 = vmatpush1.bf16.msra.mxu1 %v3394_v57  ;;  %3361 = vmatprep.subr.bf16.mxu0 %v3360_v58  ;;  %v4287_v57 = vld [vmem:[%s5061_s1 + $0x28] sm:$0xff]  ;;  %v3450_v58 = vpack.c.bf16 %v2767_v48, %v2759_v47  ;;  %v3452_v4 = vpack.c.bf16 %v2784_v56, %v2776_v55  ;;  %v2848_v45 = vld [vmem:[%s3735_s21 + $0xcf8] sm:$0xff]  ;;  %v3466_v47 = vpack.c.bf16 %v2831_v41, %v2823_v37  ;;  %v2847_v55 = vld [vmem:[%s3735_s21 + $0xcf0] sm:$0xff] }
  0xc3   : > { %3397 = vmatprep.subr.bf16.mxu1 %v3396_v63  ;;  %v3416_v63 = vpack.c.bf16 %v2782_v53, %v2774_v51  ;;  %v2845_v51 = vld [vmem:[%s3735_s21 + $0xce0] sm:$0xff]  ;;  %v2839_v53 = vld [vmem:[%s3735_s21 + $0xcb0] sm:$0xff]  ;;  %v2854_v56 = vld [vmem:[%s3735_s21 + $0xd28] sm:$0xff] }
  0xc4   : > { %v3470_v1 = vpack.c.bf16 %v2847_v55, %v2839_v53  ;;  %v2914_v37 = vld [vmem:[%s3735_s21 + $0xe88] sm:$0xff] }
  0xc5   : > { %3363 = vmatpush1.bf16.msra.mxu0 %v3362_v5  ;;  %v2792_v5 = vld [vmem:[%s3735_s21 + $0xb38] sm:$0xff]  ;;  %v2930_v53 = vld [vmem:[%s3735_s21 + $0xf08] sm:$0xff] }
  0xc6   : > { %3399 = vmatpush1.bf16.msra.mxu1 %v3398_v10  ;;  %3365 = vmatprep.subr.bf16.mxu0 %v3364_v6  ;;  %v2800_v10 = vld [vmem:[%s3735_s21 + $0xb78] sm:$0xff]  ;;  %v3418_v6 = vpack.c.bf16 %v2781_v61, %v2773_v59 }
  0xc7   : > { %3401 = vmatprep.subr.bf16.mxu1 %v3400_v9  ;;  %v2789_v9 = vld [vmem:[%s3735_s21 + $0xb20] sm:$0xff]  ;;  %v3456_v13 = vpack.c.bf16 %v2800_v10, %v2792_v5  ;;  %v2856_v59 = vld [vmem:[%s3735_s21 + $0xd38] sm:$0xff]  ;;  %v2332_v10 = vld [vmem:[%s5062_s2 + $0x10] sm:$0xff] }
  0xc8   : > { %v3422_v19 = vpack.c.bf16 %v2797_v11, %v2789_v9  ;;  %v2864_v61 = vld [vmem:[%s3735_s21 + $0xd78] sm:$0xff]  ;;  %v2330_v5 = vld [vmem:[%s5062_s2] sm:$0xff]  ;;  %v2890_v9 = vld [vmem:[%s3735_s21 + $0xdc8] sm:$0xff]  ;;  %v3681_v11 = vmov 0  }
  0xc9   : > { %3367 = vmatpush1.bf16.msra.mxu0 %v3366_v16  ;;  %v2814_v16 = vld [vmem:[%s3735_s21 + $0xbe8] sm:$0xff]  ;;  %3646 = vset.pattern.permute.xlu0 %v3681_v11 }
  0xca   : > { %3403 = vmatpush1.bf16.msra.mxu1 %v3402_v17  ;;  %3405 = vmatprep.subr.bf16.mxu0 %v3404_v18  ;;  %v4326_v17 = vld [vmem:[%s5061_s1 + $0x30] sm:$0xff]  ;;  %v2808_v18 = vld [vmem:[%s3735_s21 + $0xbb8] sm:$0xff]  ;;  %v3424_v21 = vpack.c.bf16 %v2814_v16, %v2806_v15  ;;  %v2331_v15 = vld [vmem:[%s5062_s2 + $0x8] sm:$0xff] }
  0xcb   : > { %3441 = vmatprep.subr.bf16.mxu1 %v3440_v20  ;;  %v3458_v20 = vpack.c.bf16 %v2799_v14, %v2791_v12  ;;  %v2884_v12 = vld [vmem:[%s3735_s21 + $0xd98] sm:$0xff]  ;;  %2336 = vperm.xlu0 %3646, %v2330_v5  }
  0xcc   : > { %1474 = vmatmul.mubr.f32.vlgmr.msra.gmra.mrb[32].mxu0 %v4252_v34  ;;  %3647 = vset.pattern.permute.xlu1 %v3681_v11  ;;  %v2945_v11 = vld [vmem:[%s3735_s21 + $0xf80] sm:$0xff] }
  0xcd   : > { %1563 = vmatmul.mubr.f32.vlgmr.msra.gmra.mrb[32].mxu1 %v4252_v34  ;;  %3407 = vmatpush1.bf16.msra.mxu0 %v3406_v26  ;;  %v3460_v26 = vpack.c.bf16 %v2816_v24, %v2808_v18  ;;  %v2881_v24 = vld [vmem:[%s3735_s21 + $0xd80] sm:$0xff] }
  0xce   : > { %3443 = vmatpush1.bf16.msra.mxu1 %v3442_v29  ;;  %2866 = vmatprep.mubr.msk.f32.mxu0 %vm362_vm0, %v4263_v42  ;;  %v2830_v29 = vld [vmem:[%s3735_s21 + $0xc68] sm:$0xff] }
  0xcf   : > { %2870 = vmatprep.mubr.msk.f32.mxu1 %vm362_vm0, %v4263_v42  ;;  %3409 = vmatprep.subr.bf16.mxu0 %v3408_v31  ;;  %v3426_v31 = vpack.c.bf16 %v2813_v23, %v2805_v22  ;;  %v3428_v33 = vpack.c.bf16 %v2830_v29, %v2822_v28  ;;  %v2883_v22 = vld [vmem:[%s3735_s21 + $0xd90] sm:$0xff]  ;;  %v2900_v28 = vld [vmem:[%s3735_s21 + $0xe18] sm:$0xff] }
  0xd0   : > { %1480 = vmatmul.mubr.f32.gmra.mrb[34].mxu0 %v4276_v49  ;;  %3445 = vmatprep.subr.bf16.mxu1 %v3444_v35  ;;  %v2821_v35 = vld [vmem:[%s3735_s21 + $0xc20] sm:$0xff]  ;;  %v2891_v23 = vld [vmem:[%s3735_s21 + $0xdd0] sm:$0xff]  ;;  %v2908_v29 = vld [vmem:[%s3735_s21 + $0xe58] sm:$0xff] }
  0xd1   : > { %1569 = vmatmul.mubr.f32.gmra.mrb[34].mxu1 %v4276_v49  ;;  %3411 = vmatpush1.bf16.msra.mxu0 %v3410_v39  ;;  %v3464_v39 = vpack.c.bf16 %v2832_v38, %v2824_v30  ;;  %v3514_v30 = vpack.c.bf16 %v2891_v23, %v2883_v22  ;;  %v2897_v38 = vld [vmem:[%s3735_s21 + $0xe00] sm:$0xff] }
  0xd2   : > { %3447 = vmatpush1.bf16.msra.mxu1 %v3446_v43  ;;  %2867 = vmatprep.mubr.msk.f32.mxu0 %vm362_vm0, %v4287_v57  ;;  %v2846_v43 = vld [vmem:[%s3735_s21 + $0xce8] sm:$0xff]  ;;  %v2961_v23 = vld [vmem:[%s3735_s21 + $0x1000] sm:$0xff] }
  0xd3   : > { %2871 = vmatprep.mubr.msk.f32.mxu1 %vm362_vm0, %v4287_v57  ;;  %3413 = vmatprep.subr.bf16.mxu0 %v3412_v46  ;;  %v3430_v46 = vpack.c.bf16 %v2829_v36, %v2821_v35  ;;  %v3432_v48 = vpack.c.bf16 %v2846_v43, %v2838_v40  ;;  %v2907_v35 = vld [vmem:[%s3735_s21 + $0xe50] sm:$0xff]  ;;  %v3516_v36 = vpack.c.bf16 %v2908_v29, %v2900_v28  ;;  %v2916_v40 = vld [vmem:[%s3735_s21 + $0xe98] sm:$0xff]  ;;  %v2978_v29 = vld [vmem:[%s3735_s21 + $0x1088] sm:$0xff] }
  0xd4   : > { %1486 = vmatmul.mubr.f32.gmra.mrb[36].mxu0 %v4302_v3  ;;  %3449 = vmatprep.subr.bf16.mxu1 %v3448_v50  ;;  %v2837_v50 = vld [vmem:[%s3735_s21 + $0xca0] sm:$0xff]  ;;  %v2924_v43 = vld [vmem:[%s3735_s21 + $0xed8] sm:$0xff]  ;;  %v2971_v28 = vld [vmem:[%s3735_s21 + $0x1050] sm:$0xff] }
  0xd5   : > { %1575 = vmatmul.mubr.f32.gmra.mrb[36].mxu1 %v4302_v3  ;;  %3415 = vmatpush1.bf16.msra.mxu0 %v3414_v54  ;;  %v3468_v54 = vpack.c.bf16 %v2848_v45, %v2840_v44  ;;  %v3434_v62 = vpack.c.bf16 %v2845_v51, %v2837_v50  ;;  %v2913_v45 = vld [vmem:[%s3735_s21 + $0xe80] sm:$0xff]  ;;  %v2923_v50 = vld [vmem:[%s3735_s21 + $0xed0] sm:$0xff]  ;;  %v3520_v51 = vpack.c.bf16 %v2924_v43, %v2916_v40  ;;  %v2994_v43 = vld [vmem:[%s3735_s21 + $0x1108] sm:$0xff] }
  0xd6   : > { %3451 = vmatpush1.bf16.msra.mxu1 %v3450_v58  ;;  %2868 = vmatprep.mubr.msk.f32.mxu0 %vm362_vm0, %v4311_v0  ;;  %v2862_v58 = vld [vmem:[%s3735_s21 + $0xd68] sm:$0xff]  ;;  %v2987_v40 = vld [vmem:[%s3735_s21 + $0x10d0] sm:$0xff] }
  0xd7   : > { %2872 = vmatprep.mubr.msk.f32.mxu1 %vm362_vm0, %v4311_v0  ;;  %3417 = vmatprep.subr.bf16.mxu0 %v3416_v63  ;;  %v2853_v63 = vld [vmem:[%s3735_s21 + $0xd20] sm:$0xff]  ;;  %v3436_v2 = vpack.c.bf16 %v2862_v58, %v2854_v56  ;;  %v2932_v56 = vld [vmem:[%s3735_s21 + $0xf18] sm:$0xff] }
  0xd8   : > { %1492 = vmatmul.mubr.f32.gmra.mrb[38].mxu0 %v4326_v17  ;;  %3453 = vmatprep.subr.bf16.mxu1 %v3452_v4  ;;  %v2855_v4 = vld [vmem:[%s3735_s21 + $0xd30] sm:$0xff]  ;;  %v3438_v14 = vpack.c.bf16 %v2861_v60, %v2853_v63  ;;  %v2940_v58 = vld [vmem:[%s3735_s21 + $0xf58] sm:$0xff] }
  0xd9   : > { %1581 = vmatmul.mubr.f32.gmra.mrb[38].mxu1 %v4326_v17  ;;  %3419 = vmatpush1.bf16.msra.mxu0 %v3418_v6  ;;  %v3472_v6 = vpack.c.bf16 %v2864_v61, %v2856_v59  ;;  %v2929_v61 = vld [vmem:[%s3735_s21 + $0xf00] sm:$0xff]  ;;  %v2931_v63 = vld [vmem:[%s3735_s21 + $0xf10] sm:$0xff]  ;;  %v3524_v5 = vpack.c.bf16 %v2940_v58, %v2932_v56  ;;  %v3010_v56 = vld [vmem:[%s3735_s21 + $0x1188] sm:$0xff] }
  0xda   : > { %3455 = vmatpush1.bf16.msra.mxu1 %v3454_v7  ;;  %3421 = vmatprep.subr.bf16.mxu0 %v3420_v8  ;;  %v2863_v7 = vld [vmem:[%s3735_s21 + $0xd70] sm:$0xff]  ;;  %v2882_v8 = vld [vmem:[%s3735_s21 + $0xd88] sm:$0xff] }
  0xdb   : > { %3457 = vmatprep.subr.bf16.mxu1 %v3456_v13  ;;  %2873 = vmatprep.mubr.msk.f32.mxu0 %vm362_vm0, %v4109_v52  ;;  %v2892_v13 = vld [vmem:[%s3735_s21 + $0xdd8] sm:$0xff]  ;;  %v3474_v16 = vpack.c.bf16 %v2863_v7, %v2855_v4  ;;  %v3476_v18 = vpack.c.bf16 %v2890_v9, %v2882_v8  ;;  %v2954_v4 = vld [vmem:[%s3735_s21 + $0xfc8] sm:$0xff] }
  0xdc   : > { %2877 = vmatprep.mubr.msk.f32.mxu1 %vm362_vm0, %v4109_v52  ;;  %2346 = vperm.xlu1 %3647, %v2332_v10   ;;  %v2948_v10 = vld [vmem:[%s3735_s21 + $0xf98] sm:$0xff]  ;;  %v3018_v58 = vld [vmem:[%s3735_s21 + $0x11c8] sm:$0xff] }
  0xdd   : > { %3423 = vmatpush1.bf16.msra.mxu0 %v3422_v19  ;;  %v2889_v19 = vld [vmem:[%s3735_s21 + $0xdc0] sm:$0xff]  ;;  %2341 = vperm.xlu0 %3646, %v2331_v15   ;;  %v2955_v15 = vld [vmem:[%s3735_s21 + $0xfd0] sm:$0xff] }
  0xde   : > { %3459 = vmatpush1.bf16.msra.mxu1 %v3458_v20  ;;  %3425 = vmatprep.subr.bf16.mxu0 %v3424_v21  ;;  %v2333_v20 = vld [vmem:[%s5062_s2 + $0x18] sm:$0xff]  ;;  %v3512_v21 = vpack.c.bf16 %v2892_v13, %v2884_v12  ;;  %v3478_v27 = vpack.c.bf16 %v2889_v19, %v2881_v24  ;;  %v2953_v12 = vld [vmem:[%s3735_s21 + $0xfc0] sm:$0xff]  ;;  %v2947_v13 = vld [vmem:[%s3735_s21 + $0xf90] sm:$0xff] }
  0xdf   : > { %3461 = vmatprep.subr.bf16.mxu1 %v3460_v26  ;;  %v2906_v26 = vld [vmem:[%s3735_s21 + $0xe48] sm:$0xff]  ;;  %v2964_v24 = vld [vmem:[%s3735_s21 + $0x1018] sm:$0xff] }
  0xe0   : > { %2351 = vperm.xlu1 %3647, %v2333_v20   ;;  %v2972_v19 = vld [vmem:[%s3735_s21 + $0x1058] sm:$0xff]  ;;  %v3494_v20 = vpack.c.bf16 %v2953_v12, %v2945_v11 }
  0xe1   : > { %3427 = vmatpush1.bf16.msra.mxu0 %v3426_v31  ;;  %v2905_v31 = vld [vmem:[%s3735_s21 + $0xe40] sm:$0xff] }
  0xe2   : > { %3463 = vmatpush1.bf16.msra.mxu1 %v3462_v32  ;;  %3429 = vmatprep.subr.bf16.mxu0 %v3428_v33  ;;  %v3480_v32 = vpack.c.bf16 %v2906_v26, %v2898_v25  ;;  %v2899_v33 = vld [vmem:[%s3735_s21 + $0xe10] sm:$0xff]  ;;  %v3482_v41 = vpack.c.bf16 %v2905_v31, %v2897_v38  ;;  %v2969_v25 = vld [vmem:[%s3735_s21 + $0x1040] sm:$0xff]  ;;  %v2980_v38 = vld [vmem:[%s3735_s21 + $0x1098] sm:$0xff] }
  0xe3   : > { %3465 = vmatprep.subr.bf16.mxu1 %v3464_v39  ;;  %v2922_v39 = vld [vmem:[%s3735_s21 + $0xec8] sm:$0xff]  ;;  %v3518_v44 = vpack.c.bf16 %v2907_v35, %v2899_v33  ;;  %v2963_v26 = vld [vmem:[%s3735_s21 + $0x1010] sm:$0xff]  ;;  %v2988_v31 = vld [vmem:[%s3735_s21 + $0x10d8] sm:$0xff] }
  0xe4   : > { %v3534_v33 = vpack.c.bf16 %v2971_v28, %v2963_v26  ;;  %v2912_v28 = vld [vmem:[%s3735_s21 + $0xe78] sm:$0xff] }
  0xe5   : > { %3431 = vmatpush1.bf16.msra.mxu0 %v3430_v46  ;;  %v2921_v46 = vld [vmem:[%s3735_s21 + $0xec0] sm:$0xff] }
  0xe6   : > { %3467 = vmatpush1.bf16.msra.mxu1 %v3466_v47  ;;  %3433 = vmatprep.subr.bf16.mxu0 %v3432_v48  ;;  %v3484_v47 = vpack.c.bf16 %v2922_v39, %v2914_v37  ;;  %v2915_v48 = vld [vmem:[%s3735_s21 + $0xe90] sm:$0xff]  ;;  %v3486_v55 = vpack.c.bf16 %v2921_v46, %v2913_v45  ;;  %v2985_v37 = vld [vmem:[%s3735_s21 + $0x10c0] sm:$0xff]  ;;  %v3004_v45 = vld [vmem:[%s3735_s21 + $0x1158] sm:$0xff] }
  0xe7   : > { %3469 = vmatprep.subr.bf16.mxu1 %v3468_v54  ;;  %v2938_v54 = vld [vmem:[%s3735_s21 + $0xf48] sm:$0xff]  ;;  %v3522_v59 = vpack.c.bf16 %v2923_v50, %v2915_v48  ;;  %v2979_v39 = vld [vmem:[%s3735_s21 + $0x1090] sm:$0xff]  ;;  %v2993_v50 = vld [vmem:[%s3735_s21 + $0x1100] sm:$0xff] }
  0xe8   : > { %v3488_v60 = vpack.c.bf16 %v2938_v54, %v2930_v53  ;;  %v2995_v53 = vld [vmem:[%s3735_s21 + $0x1110] sm:$0xff] }
  0xe9   : > { %3435 = vmatpush1.bf16.msra.mxu0 %v3434_v62  ;;  %v2937_v62 = vld [vmem:[%s3735_s21 + $0xf40] sm:$0xff] }
  0xea   : > { %3471 = vmatpush1.bf16.msra.mxu1 %v3470_v1  ;;  %3437 = vmatprep.subr.bf16.mxu0 %v3436_v2  ;;  %v2939_v1 = vld [vmem:[%s3735_s21 + $0xf50] sm:$0xff]  ;;  %v2946_v2 = vld [vmem:[%s3735_s21 + $0xf88] sm:$0xff]  ;;  %v3490_v7 = vpack.c.bf16 %v2937_v62, %v2929_v61  ;;  %v3020_v61 = vld [vmem:[%s3735_s21 + $0x11d8] sm:$0xff] }
  0xeb   : > { %3473 = vmatprep.subr.bf16.mxu1 %v3472_v6  ;;  %v2956_v6 = vld [vmem:[%s3735_s21 + $0xfd8] sm:$0xff]  ;;  %v3526_v8 = vpack.c.bf16 %v2939_v1, %v2931_v63  ;;  %v3492_v9 = vpack.c.bf16 %v2954_v4, %v2946_v2  ;;  %v3009_v1 = vld [vmem:[%s3735_s21 + $0x1180] sm:$0xff]  ;;  %v3011_v4 = vld [vmem:[%s3735_s21 + $0x1190] sm:$0xff] }
  0xec   : > { %v3017_v2 = vld [vmem:[%s3735_s21 + $0x11c0] sm:$0xff] }
  0xed   : > { %3439 = vmatpush1.bf16.msra.mxu0 %v3438_v14  ;;  %v3528_v14 = vpack.c.bf16 %v2956_v6, %v2948_v10  ;;  %v3019_v10 = vld [vmem:[%s3735_s21 + $0x11d0] sm:$0xff]  ;;  %v2886_v6 = vld [vmem:[%s3735_s21 + $0xda8] sm:$0xff]  ;;  %v3510_v11 = vpack.c.bf16 %v3017_v2, %v3009_v1 }
  0xee   : > { %3475 = vmatpush1.bf16.msra.mxu1 %v3474_v16  ;;  %3477 = vmatprep.subr.bf16.mxu0 %v3476_v18  ;;  %v2962_v16 = vld [vmem:[%s3735_s21 + $0x1008] sm:$0xff]  ;;  %v3546_v12 = vpack.c.bf16 %v3019_v10, %v3011_v4  ;;  %v2933_v4 = vld [vmem:[%s3735_s21 + $0xf20] sm:$0xff]  ;;  %v2935_v10 = vld [vmem:[%s3735_s21 + $0xf30] sm:$0xff] }
  0xef   : > { %3513 = vmatprep.subr.bf16.mxu1 %v3512_v21  ;;  %v2970_v18 = vld [vmem:[%s3735_s21 + $0x1048] sm:$0xff]  ;;  %v3530_v21 = vpack.c.bf16 %v2955_v15, %v2947_v13  ;;  %v2893_v15 = vld [vmem:[%s3735_s21 + $0xde0] sm:$0xff] }
  0xf0   : > { %1652 = vmatmul.mubr.f32.vlgmr.msra.gmra.mrb[40].mxu0 %v4252_v34  ;;  %v3496_v22 = vpack.c.bf16 %v2970_v18, %v2962_v16 }
  0xf1   : > { %1741 = vmatmul.mubr.f32.vlgmr.msra.gmra.mrb[40].mxu1 %v4252_v34  ;;  %3479 = vmatpush1.bf16.msra.mxu0 %v3478_v27  ;;  %v3532_v27 = vpack.c.bf16 %v2972_v19, %v2964_v24  ;;  %v2887_v24 = vld [vmem:[%s3735_s21 + $0xdb0] sm:$0xff] }
  0xf2   : > { %3515 = vmatpush1.bf16.msra.mxu1 %v3514_v30  ;;  %2874 = vmatprep.mubr.msk.f32.mxu0 %vm362_vm0, %v4263_v42  ;;  %v2986_v30 = vld [vmem:[%s3735_s21 + $0x10c8] sm:$0xff]  ;;  %v2895_v19 = vld [vmem:[%s3735_s21 + $0xdf0] sm:$0xff] }
  0xf3   : > { %2878 = vmatprep.mubr.msk.f32.mxu1 %vm362_vm0, %v4263_v42  ;;  %3481 = vmatprep.subr.bf16.mxu0 %v3480_v32  ;;  %v3498_v32 = vpack.c.bf16 %v2969_v25, %v2961_v23  ;;  %v3500_v35 = vpack.c.bf16 %v2986_v30, %v2978_v29  ;;  %v2910_v23 = vld [vmem:[%s3735_s21 + $0xe68] sm:$0xff]  ;;  %v3586_v29 = vpack.c.bf16 %v2895_v19, %v2887_v24  ;;  %v2901_v30 = vld [vmem:[%s3735_s21 + $0xe20] sm:$0xff] }
  0xf4   : > { %1658 = vmatmul.mubr.f32.gmra.mrb[42].mxu0 %v4276_v49  ;;  %3517 = vmatprep.subr.bf16.mxu1 %v3516_v36  ;;  %v2977_v36 = vld [vmem:[%s3735_s21 + $0x1080] sm:$0xff] }
  0xf5   : > { %1747 = vmatmul.mubr.f32.gmra.mrb[42].mxu1 %v4276_v49  ;;  %3483 = vmatpush1.bf16.msra.mxu0 %v3482_v41  ;;  %v3536_v41 = vpack.c.bf16 %v2988_v31, %v2980_v38  ;;  %v3502_v46 = vpack.c.bf16 %v2985_v37, %v2977_v36  ;;  %v2909_v38 = vld [vmem:[%s3735_s21 + $0xe60] sm:$0xff]  ;;  %v2918_v37 = vld [vmem:[%s3735_s21 + $0xea8] sm:$0xff] }
  0xf6   : > { %3519 = vmatpush1.bf16.msra.mxu1 %v3518_v44  ;;  %2875 = vmatprep.mubr.msk.f32.mxu0 %vm362_vm0, %v4287_v57  ;;  %v2996_v44 = vld [vmem:[%s3735_s21 + $0x1118] sm:$0xff] }
  0xf7   : > { %2879 = vmatprep.mubr.msk.f32.mxu1 %vm362_vm0, %v4287_v57  ;;  %3485 = vmatprep.subr.bf16.mxu0 %v3484_v47  ;;  %v3538_v47 = vpack.c.bf16 %v2987_v40, %v2979_v39  ;;  %v3540_v54 = vpack.c.bf16 %v3004_v45, %v2996_v44  ;;  %v2926_v39 = vld [vmem:[%s3735_s21 + $0xee8] sm:$0xff]  ;;  %v2928_v44 = vld [vmem:[%s3735_s21 + $0xef8] sm:$0xff] }
  0xf8   : > { %1664 = vmatmul.mubr.f32.gmra.mrb[44].mxu0 %v4302_v3  ;;  %3521 = vmatprep.subr.bf16.mxu1 %v3520_v51  ;;  %v3001_v51 = vld [vmem:[%s3735_s21 + $0x1140] sm:$0xff] }
  0xf9   : > { %1753 = vmatmul.mubr.f32.gmra.mrb[44].mxu1 %v4302_v3  ;;  %3487 = vmatpush1.bf16.msra.mxu0 %v3486_v55  ;;  %v3003_v55 = vld [vmem:[%s3735_s21 + $0x1150] sm:$0xff]  ;;  %v3506_v62 = vpack.c.bf16 %v3001_v51, %v2993_v50  ;;  %v3556_v50 = vpack.c.bf16 %v2926_v39, %v2918_v37 }
  0xfa   : > { %3523 = vmatpush1.bf16.msra.mxu1 %v3522_v59  ;;  %2876 = vmatprep.mubr.msk.f32.mxu0 %vm362_vm0, %v4311_v0  ;;  %v3012_v59 = vld [vmem:[%s3735_s21 + $0x1198] sm:$0xff]  ;;  %v3542_v63 = vpack.c.bf16 %v3003_v55, %v2995_v53  ;;  %v2919_v51 = vld [vmem:[%s3735_s21 + $0xeb0] sm:$0xff] }
  0xfb   : > { %2880 = vmatprep.mubr.msk.f32.mxu1 %vm362_vm0, %v4311_v0  ;;  %3489 = vmatprep.subr.bf16.mxu0 %v3488_v60  ;;  %v3508_v60 = vpack.c.bf16 %v3018_v58, %v3010_v56  ;;  %v2927_v53 = vld [vmem:[%s3735_s21 + $0xef0] sm:$0xff]  ;;  %v2934_v56 = vld [vmem:[%s3735_s21 + $0xf28] sm:$0xff] }
  0xfc   : > { %1670 = vmatmul.mubr.f32.gmra.mrb[46].mxu0 %v4326_v17  ;;  %3525 = vmatprep.subr.bf16.mxu1 %v3524_v5  ;;  %v3544_v5 = vpack.c.bf16 %v3020_v61, %v3012_v59  ;;  %v2942_v58 = vld [vmem:[%s3735_s21 + $0xf68] sm:$0xff]  ;;  %v3594_v2 = vpack.c.bf16 %v2927_v53, %v2919_v51  ;;  %v2984_v53 = vld [vmem:[%s3735_s21 + $0x10b8] sm:$0xff] }
  0xfd   : > { %1759 = vmatmul.mubr.f32.gmra.mrb[46].mxu1 %v4326_v17  ;;  %3491 = vmatpush1.bf16.msra.mxu0 %v3490_v7  ;;  %v2894_v7 = vld [vmem:[%s3735_s21 + $0xde8] sm:$0xff] }
  0xfe   : > { %3527 = vmatpush1.bf16.msra.mxu1 %v3526_v8  ;;  %3493 = vmatprep.subr.bf16.mxu0 %v3492_v9  ;;  %v2888_v8 = vld [vmem:[%s3735_s21 + $0xdb8] sm:$0xff]  ;;  %v3548_v13 = vpack.c.bf16 %v2894_v7, %v2886_v6  ;;  %v3560_v6 = vpack.c.bf16 %v2942_v58, %v2934_v56  ;;  %v2943_v7 = vld [vmem:[%s3735_s21 + $0xf70] sm:$0xff]  ;;  %v3656_v51 = vld [vmem:[%s5061_s1 + $0x8] sm:$0xff] }
  0xff   : > { %3529 = vmatprep.subr.bf16.mxu1 %v3528_v14  ;;  %3025 = vmatprep.mubr.msk.f32.mxu0 %vm362_vm0, %v4109_v52  ;;  %v2896_v9 = vld [vmem:[%s3735_s21 + $0xdf8] sm:$0xff]  ;;  %v2885_v14 = vld [vmem:[%s3735_s21 + $0xda0] sm:$0xff] }
 0x100   : > { %3029 = vmatprep.mubr.msk.f32.mxu1 %vm362_vm0, %v4109_v52  ;;  %v3002_v52 = vld [vmem:[%s3735_s21 + $0x1148] sm:$0xff]  ;;  %v3584_v18 = vpack.c.bf16 %v2896_v9, %v2888_v8  ;;  %v3550_v26 = vpack.c.bf16 %v2893_v15, %v2885_v14  ;;  %v2960_v14 = vld [vmem:[%s3735_s21 + $0xff8] sm:$0xff] }
 0x101   : > { %3495 = vmatpush1.bf16.msra.mxu0 %v3494_v20  ;;  %v3504_v48 = vpack.c.bf16 %v3002_v52, %v2994_v43  ;;  %v3554_v43 = vpack.c.bf16 %v2909_v38, %v2901_v30  ;;  %v2920_v52 = vld [vmem:[%s3735_s21 + $0xeb8] sm:$0xff]  ;;  %v2950_v8 = vld [vmem:[%s3735_s21 + $0xfa8] sm:$0xff]  ;;  %v2959_v30 = vld [vmem:[%s3735_s21 + $0xff0] sm:$0xff] }
 0x102   : > { %3531 = vmatpush1.bf16.msra.mxu1 %v3530_v21  ;;  %3497 = vmatprep.subr.bf16.mxu0 %v3496_v22  ;;  %v2902_v22 = vld [vmem:[%s3735_s21 + $0xe28] sm:$0xff]  ;;  %v3592_v55 = vpack.c.bf16 %v2928_v44, %v2920_v52  ;;  %v2973_v52 = vld [vmem:[%s3735_s21 + $0x1060] sm:$0xff]  ;;  %v2967_v44 = vld [vmem:[%s3735_s21 + $0x1030] sm:$0xff] }
 0x103   : > { %3533 = vmatprep.subr.bf16.mxu1 %v3532_v27  ;;  %v2904_v27 = vld [vmem:[%s3735_s21 + $0xe38] sm:$0xff]  ;;  %v3552_v31 = vpack.c.bf16 %v2910_v23, %v2902_v22  ;;  %v2958_v9 = vld [vmem:[%s3735_s21 + $0xfe8] sm:$0xff]  ;;  %v3598_v22 = vpack.c.bf16 %v2943_v7, %v2935_v10 }
 0x104   : > { %v3588_v36 = vpack.c.bf16 %v2912_v28, %v2904_v27  ;;  %v3564_v23 = vpack.c.bf16 %v2958_v9, %v2950_v8  ;;  %v2957_v27 = vld [vmem:[%s3735_s21 + $0xfe0] sm:$0xff]  ;;  %v2951_v28 = vld [vmem:[%s3735_s21 + $0xfb0] sm:$0xff]  ;;  %v2966_v38 = vld [vmem:[%s3735_s21 + $0x1028] sm:$0xff] }
 0x105   : > { %3499 = vmatpush1.bf16.msra.mxu0 %v3498_v32  ;;  %v2903_v32 = vld [vmem:[%s3735_s21 + $0xe30] sm:$0xff]  ;;  %v3602_v37 = vpack.c.bf16 %v2959_v30, %v2951_v28  ;;  %v2998_v10 = vld [vmem:[%s3735_s21 + $0x1128] sm:$0xff]  ;;  %v3000_v7 = vld [vmem:[%s3735_s21 + $0x1138] sm:$0xff] }
 0x106   : > { %3535 = vmatpush1.bf16.msra.mxu1 %v3534_v33  ;;  %3501 = vmatprep.subr.bf16.mxu0 %v3500_v35  ;;  %v2911_v33 = vld [vmem:[%s3735_s21 + $0xe70] sm:$0xff]  ;;  %v3008_v8 = vld [vmem:[%s3735_s21 + $0x1178] sm:$0xff]  ;;  %v3022_v28 = vld [vmem:[%s3735_s21 + $0x11e8] sm:$0xff] }
 0x107   : > { %3537 = vmatprep.subr.bf16.mxu1 %v3536_v41  ;;  %v3024_v30 = vld [vmem:[%s3735_s21 + $0x11f8] sm:$0xff] }
 0x109   : > { %3503 = vmatpush1.bf16.msra.mxu0 %v3502_v46  ;;  %v3590_v46 = vpack.c.bf16 %v2911_v33, %v2903_v32  ;;  %v2968_v32 = vld [vmem:[%s3735_s21 + $0x1038] sm:$0xff] }
 0x10a   : > { %3539 = vmatpush1.bf16.msra.mxu1 %v3538_v47  ;;  %3505 = vmatprep.subr.bf16.mxu0 %v3504_v48  ;;  %v2917_v47 = vld [vmem:[%s3735_s21 + $0xea0] sm:$0xff]  ;;  %v2976_v33 = vld [vmem:[%s3735_s21 + $0x1078] sm:$0xff] }
 0x10b   : > { %3541 = vmatprep.subr.bf16.mxu1 %v3540_v54  ;;  %v2925_v48 = vld [vmem:[%s3735_s21 + $0xee0] sm:$0xff] }
 0x10d   : > { %3507 = vmatpush1.bf16.msra.mxu0 %v3506_v62  ;;  %v3558_v62 = vpack.c.bf16 %v2925_v48, %v2917_v47  ;;  %v2975_v47 = vld [vmem:[%s3735_s21 + $0x1070] sm:$0xff]  ;;  %v2982_v48 = vld [vmem:[%s3735_s21 + $0x10a8] sm:$0xff] }
 0x10e   : > { %3543 = vmatpush1.bf16.msra.mxu1 %v3542_v63  ;;  %3509 = vmatprep.subr.bf16.mxu0 %v3508_v60  ;;  %v2936_v63 = vld [vmem:[%s3735_s21 + $0xf38] sm:$0xff]  ;;  %v3606_v58 = vpack.c.bf16 %v2975_v47, %v2967_v44 }
 0x10f   : > { %v4478_v16 = vpop.f32.mrb[0].mxu0  ;;  %3545 = vmatprep.subr.bf16.mxu1 %v3544_v5  ;;  %v2944_v60 = vld [vmem:[%s3735_s21 + $0xf78] sm:$0xff]  ;;  %v2941_v5 = vld [vmem:[%s3735_s21 + $0xf60] sm:$0xff] }
 0x110   : > { %v4482_v20 = vpop.f32.mrb[0].mxu1  ;;  %v4484_v21 = vpop.f32.mrb[1].mxu0  ;;  %v3562_v24 = vpack.c.bf16 %v2941_v5, %v2933_v4  ;;  %v2991_v5 = vld [vmem:[%s3735_s21 + $0x10f0] sm:$0xff] }
 0x111   : > { %v4488_v25 = vpop.f32.mrb[1].mxu1  ;;  %3511 = vmatpush1.bf16.msra.mxu0 %v3510_v11 }
 0x112   : > { %3547 = vmatpush1.bf16.msra.mxu1 %v3546_v12  ;;  %3549 = vmatprep.subr.bf16.mxu0 %v3548_v13  ;;  %v3596_v12 = vpack.c.bf16 %v2944_v60, %v2936_v63  ;;  %v2952_v13 = vld [vmem:[%s3735_s21 + $0xfb8] sm:$0xff]  ;;  %v2981_v63 = vld [vmem:[%s3735_s21 + $0x10a0] sm:$0xff] }
 0x113   : > { %3585 = vmatprep.subr.bf16.mxu1 %v3584_v18  ;;  %v4496_v35 = vpop.f32.mrb[2].mxu0  ;;  %v2989_v60 = vld [vmem:[%s3735_s21 + $0x10e0] sm:$0xff] }
 0x114   : > { %2007 = vmatmul.mubr.f32.vlgmr.msra.gmra.mrb[48].mxu0 %v4252_v34  ;;  %v4501_v41 = vpop.f32.mrb[2].mxu1  ;;  %v4503_v40 = vpop.f32.mrb[3].mxu0  ;;  %v3574_v9 = vpack.c.bf16 %v2989_v60, %v2981_v63 }
 0x115   : > { %2096 = vmatmul.mubr.f32.vlgmr.msra.gmra.mrb[48].mxu1 %v4252_v34  ;;  %3551 = vmatpush1.bf16.msra.mxu0 %v3550_v26  ;;  %v4508_v45 = vpop.f32.mrb[3].mxu1  ;;  %v2949_v26 = vld [vmem:[%s3735_s21 + $0xfa0] sm:$0xff] }
 0x116   : > { %3587 = vmatpush1.bf16.msra.mxu1 %v3586_v29  ;;  %3026 = vmatprep.mubr.msk.f32.mxu0 %vm362_vm0, %v4263_v42  ;;  %v3600_v29 = vpack.c.bf16 %v2960_v14, %v2952_v13  ;;  %v2997_v14 = vld [vmem:[%s3735_s21 + $0x1120] sm:$0xff] }
 0x117   : > { %3030 = vmatprep.mubr.msk.f32.mxu1 %vm362_vm0, %v4263_v42  ;;  %3553 = vmatprep.subr.bf16.mxu0 %v3552_v31  ;;  %v4518_v54 = vpop.f32.mrb[4].mxu0  ;;  %v2974_v31 = vld [vmem:[%s3735_s21 + $0x1068] sm:$0xff] }
 0x118   : > { %2013 = vmatmul.mubr.f32.gmra.mrb[50].mxu0 %v4276_v49  ;;  %3589 = vmatprep.subr.bf16.mxu1 %v3588_v36  ;;  %v4523_v59 = vpop.f32.mrb[4].mxu1  ;;  %v4525_v61 = vpop.f32.mrb[5].mxu0  ;;  %v3566_v36 = vpack.c.bf16 %v2957_v27, %v2949_v26  ;;  %v3568_v39 = vpack.c.bf16 %v2974_v31, %v2966_v38  ;;  %v3007_v26 = vld [vmem:[%s3735_s21 + $0x1170] sm:$0xff]  ;;  %v3014_v27 = vld [vmem:[%s3735_s21 + $0x11a8] sm:$0xff] }
 0x119   : > { %2102 = vmatmul.mubr.f32.gmra.mrb[50].mxu1 %v4276_v49  ;;  %3555 = vmatpush1.bf16.msra.mxu0 %v3554_v43  ;;  %v4530_v1 = vpop.f32.mrb[5].mxu1  ;;  %v2965_v43 = vld [vmem:[%s3735_s21 + $0x1020] sm:$0xff] }
 0x11a   : > { %3591 = vmatpush1.bf16.msra.mxu1 %v3590_v46  ;;  %3027 = vmatprep.mubr.msk.f32.mxu0 %vm362_vm0, %v4287_v57  ;;  %v3604_v46 = vpack.c.bf16 %v2976_v33, %v2968_v32  ;;  %v3570_v56 = vpack.c.bf16 %v2973_v52, %v2965_v43  ;;  %v3580_v32 = vpack.c.bf16 %v3022_v28, %v3014_v27  ;;  %v3013_v33 = vld [vmem:[%s3735_s21 + $0x11a0] sm:$0xff]  ;;  %v3023_v43 = vld [vmem:[%s3735_s21 + $0x11f0] sm:$0xff] }
 0x11b   : > { %3031 = vmatprep.mubr.msk.f32.mxu1 %vm362_vm0, %v4287_v57  ;;  %3557 = vmatprep.subr.bf16.mxu0 %v3556_v50  ;;  %v4542_v11 = vpop.f32.mrb[6].mxu0  ;;  %v2990_v50 = vld [vmem:[%s3735_s21 + $0x10e8] sm:$0xff] }
 0x11c   : > { %2019 = vmatmul.mubr.f32.gmra.mrb[52].mxu0 %v4302_v3  ;;  %3593 = vmatprep.subr.bf16.mxu1 %v3592_v55  ;;  %v4547_v15 = vpop.f32.mrb[6].mxu1  ;;  %v4549_v18 = vpop.f32.mrb[7].mxu0  ;;  %v2992_v55 = vld [vmem:[%s3735_s21 + $0x10f8] sm:$0xff] }
 0x11d   : > { %2108 = vmatmul.mubr.f32.gmra.mrb[52].mxu1 %v4302_v3  ;;  %3559 = vmatpush1.bf16.msra.mxu0 %v3558_v62  ;;  %v4552_v19 = vpop.f32.mrb[7].mxu1  ;;  %v3572_v62 = vpack.c.bf16 %v2990_v50, %v2982_v48  ;;  %v3608_v4 = vpack.c.bf16 %v2992_v55, %v2984_v53 }
 0x11e   : > { %3595 = vmatpush1.bf16.msra.mxu1 %v3594_v2  ;;  %3028 = vmatprep.mubr.msk.f32.mxu0 %vm362_vm0, %v4311_v0  ;;  %v2983_v2 = vld [vmem:[%s3735_s21 + $0x10b0] sm:$0xff] }
 0x11f   : > { %3032 = vmatprep.mubr.msk.f32.mxu1 %vm362_vm0, %v4311_v0  ;;  %3561 = vmatprep.subr.bf16.mxu0 %v3560_v6  ;;  %v3006_v6 = vld [vmem:[%s3735_s21 + $0x1168] sm:$0xff] }
 0x120   : > { %2025 = vmatmul.mubr.f32.gmra.mrb[54].mxu0 %v4326_v17  ;;  %3597 = vmatprep.subr.bf16.mxu1 %v3596_v12  ;;  %v3610_v12 = vpack.c.bf16 %v2991_v5, %v2983_v2  ;;  %v3576_v13 = vpack.c.bf16 %v3006_v6, %v2998_v10 }
 0x121   : > { %2114 = vmatmul.mubr.f32.gmra.mrb[54].mxu1 %v4326_v17  ;;  %3563 = vmatpush1.bf16.msra.mxu0 %v3562_v24  ;;  %v3005_v24 = vld [vmem:[%s3735_s21 + $0x1160] sm:$0xff] }
 0x122   : > { %3599 = vmatpush1.bf16.msra.mxu1 %v3598_v22  ;;  %3565 = vmatprep.subr.bf16.mxu0 %v3564_v23  ;;  %v2999_v22 = vld [vmem:[%s3735_s21 + $0x1130] sm:$0xff]  ;;  %v3612_v23 = vpack.c.bf16 %v3008_v8, %v3000_v7  ;;  %v3578_v38 = vpack.c.bf16 %v3005_v24, %v2997_v14 }
 0x123   : > { %3601 = vmatprep.subr.bf16.mxu1 %v3600_v29  ;;  %3033 = vmatprep.mubr.msk.f32.mxu0 %vm362_vm0, %v3656_v51  ;;  %v3016_v29 = vld [vmem:[%s3735_s21 + $0x11b8] sm:$0xff]  ;;  %v3614_v31 = vpack.c.bf16 %v3007_v26, %v2999_v22 }
 0x124   : > { %3037 = vmatprep.mubr.msk.f32.mxu1 %vm362_vm0, %v3656_v51 }
 0x125   : > { %3567 = vmatpush1.bf16.msra.mxu0 %v3566_v36  ;;  %v3021_v36 = vld [vmem:[%s3735_s21 + $0x11e0] sm:$0xff] }
 0x126   : > { %3603 = vmatpush1.bf16.msra.mxu1 %v3602_v37  ;;  %3569 = vmatprep.subr.bf16.mxu0 %v3568_v39  ;;  %v3616_v37 = vpack.c.bf16 %v3024_v30, %v3016_v29  ;;  %v3015_v39 = vld [vmem:[%s3735_s21 + $0x11b0] sm:$0xff]  ;;  %v3582_v52 = vpack.c.bf16 %v3021_v36, %v3013_v33  ;;  %s3043_s21 = sshll.u32 %s5137_s12, 8 }
 0x127   : > { %3605 = vmatprep.subr.bf16.mxu1 %v3604_v46  ;;  %v3618_v44 = vpack.c.bf16 %v3023_v43, %v3015_v39  ;;  %s4952_s19 = scalar_lea.vmem %s5063_s3, %s3043_s21 }
 0x129   : > { %3571 = vmatpush1.bf16.msra.mxu0 %v3570_v56 }
 0x12a   : > { %3607 = vmatpush1.bf16.msra.mxu1 %v3606_v58  ;;  %3573 = vmatprep.subr.bf16.mxu0 %v3572_v62 }
 0x12b   : > { %3609 = vmatprep.subr.bf16.mxu1 %v3608_v4 }
 0x12d   : > { %3575 = vmatpush1.bf16.msra.mxu0 %v3574_v9 }
 0x12e   : > { %3611 = vmatpush1.bf16.msra.mxu1 %v3610_v12  ;;  %3577 = vmatprep.subr.bf16.mxu0 %v3576_v13 }
 0x12f   : > { %3613 = vmatprep.subr.bf16.mxu1 %v3612_v23 }
 0x131   : > { %3579 = vmatpush1.bf16.msra.mxu0 %v3578_v38 }
 0x132   : > { %3615 = vmatpush1.bf16.msra.mxu1 %v3614_v31  ;;  %3581 = vmatprep.subr.bf16.mxu0 %v3580_v32 }
 0x133   : > { %v4601_v46 = vpop.f32.mrb[8].mxu0  ;;  %3617 = vmatprep.subr.bf16.mxu1 %v3616_v37 }
 0x134   : > { %v4603_v47 = vpop.f32.mrb[8].mxu1  ;;  %v4605_v48 = vpop.f32.mrb[9].mxu0 }
 0x135   : > { %v4607_v50 = vpop.f32.mrb[9].mxu1  ;;  %3583 = vmatpush1.bf16.msra.mxu0 %v3582_v52 }
 0x136   : > { %3619 = vmatpush1.bf16.msra.mxu1 %v3618_v44 }
 0x137   : > { %v4609_v51 = vpop.f32.mrb[10].mxu0 }
 0x138   : > { %2185 = vmatmul.mubr.f32.vlgmr.msra.gmra.mrb[56].mxu0 %v4252_v34  ;;  %v4612_v53 = vpop.f32.mrb[10].mxu1  ;;  %v4614_v55 = vpop.f32.mrb[11].mxu0 }
 0x139   : > { %2274 = vmatmul.mubr.f32.vlgmr.msra.gmra.mrb[56].mxu1 %v4252_v34  ;;  %3034 = vmatprep.mubr.msk.f32.mxu0 %vm362_vm0, %v4263_v42  ;;  %v4619_v56 = vpop.f32.mrb[11].mxu1 }
 0x13a   : > { %3038 = vmatprep.mubr.msk.f32.mxu1 %vm362_vm0, %v4263_v42 }
 0x13b   : > { %v4623_v58 = vpop.f32.mrb[12].mxu0 }
 0x13c   : > { %5076 = vst [vmem:[#allocation2_spill] sm:$0xff] %v4623_v58  ;;  %2191 = vmatmul.mubr.f32.gmra.mrb[58].mxu0 %v4276_v49  ;;  %v4626_v62 = vpop.f32.mrb[12].mxu1  ;;  %v4628_v63 = vpop.f32.mrb[13].mxu0 }
 0x13d   : > { %5077 = vst [vmem:[#allocation3_spill] sm:$0xff] %v4628_v63  ;;  %2280 = vmatmul.mubr.f32.gmra.mrb[58].mxu1 %v4276_v49  ;;  %3035 = vmatprep.mubr.msk.f32.mxu0 %vm362_vm0, %v4287_v57  ;;  %v4633_v34 = vpop.f32.mrb[13].mxu1 }
 0x13e   : > { %5078 = vst [vmem:[#allocation4_spill] sm:$0xff] %v4633_v34  ;;  %3039 = vmatprep.mubr.msk.f32.mxu1 %vm362_vm0, %v4287_v57 }
 0x13f   : > { %v4637_v60 = vpop.f32.mrb[14].mxu0 }
 0x140   : > { %5079 = vst [vmem:[#allocation5_spill] sm:$0xff] %v4637_v60  ;;  %2197 = vmatmul.mubr.f32.gmra.mrb[60].mxu0 %v4302_v3  ;;  %v4640_v42 = vpop.f32.mrb[14].mxu1  ;;  %v4642_v2 = vpop.f32.mrb[15].mxu0 }
 0x141   : > { %5080 = vst [vmem:[#allocation6_spill] sm:$0xff] %v4642_v2  ;;  %2286 = vmatmul.mubr.f32.gmra.mrb[60].mxu1 %v4302_v3  ;;  %3036 = vmatprep.mubr.msk.f32.mxu0 %vm362_vm0, %v4311_v0  ;;  %v4647_v49 = vpop.f32.mrb[15].mxu1 }
 0x142   : > { %3040 = vmatprep.mubr.msk.f32.mxu1 %vm362_vm0, %v4311_v0 }
 0x144   : > { %2203 = vmatmul.mubr.f32.gmra.mrb[62].mxu0 %v4326_v17 }
 0x145   : > { %2292 = vmatmul.mubr.f32.gmra.mrb[62].mxu1 %v4326_v17 }
 0x157   : > { %v4653_v57 = vpop.f32.mrb[16].mxu0 }
 0x158   : > { %v4657_v5 = vpop.f32.mrb[16].mxu1  ;;  %v4659_v3 = vpop.f32.mrb[17].mxu0  ;;  %v5088_v34 = vmax.f32 %v4478_v16, %v4653_v57 }
 0x159   : > { %v4665_v0 = vpop.f32.mrb[17].mxu1  ;;  %v5089_v63 = vmax.f32 %v4482_v20, %v4657_v5  ;;  %v5090_v43 = vmax.f32 %v4484_v21, %v4659_v3 }
 0x15a   : > { %v5091_v44 = vmax.f32 %v4488_v25, %v4665_v0 }
 0x15b   : > { %v4669_v7 = vpop.f32.mrb[18].mxu0 }
 0x15c   : > { %v4673_v9 = vpop.f32.mrb[18].mxu1  ;;  %v4675_v12 = vpop.f32.mrb[19].mxu0 }
 0x15d   : > { %v4681_v24 = vpop.f32.mrb[19].mxu1 }
 0x15f   : > { %v4685_v23 = vpop.f32.mrb[20].mxu0 }
 0x160   : > { %v4689_v27 = vpop.f32.mrb[20].mxu1  ;;  %v4691_v28 = vpop.f32.mrb[21].mxu0  ;;  %v5096_v0 = vmax.f32 %v4518_v54, %v4685_v23 }
 0x161   : > { %v4697_v38 = vpop.f32.mrb[21].mxu1 }
 0x163   : > { %v4701_v32 = vpop.f32.mrb[22].mxu0 }
 0x164   : > { %v4705_v36 = vpop.f32.mrb[22].mxu1  ;;  %v4707_v37 = vpop.f32.mrb[23].mxu0  ;;  %v5100_v23 = vmax.f32 %v4542_v11, %v4701_v32 }
 0x165   : > { %v4713_v52 = vpop.f32.mrb[23].mxu1 }
 0x17b   : > { %v4717_v31 = vpop.f32.mrb[24].mxu0 }
 0x17c   : > { %v4721_v30 = vpop.f32.mrb[24].mxu1  ;;  %v4723_v29 = vpop.f32.mrb[25].mxu0  ;;  %v5104_v32 = vmax.f32 %v4601_v46, %v4717_v31 }
 0x17d   : > { %v4729_v26 = vpop.f32.mrb[25].mxu1 }
 0x17f   : > { %v4733_v22 = vpop.f32.mrb[26].mxu0 }
 0x180   : > { %v4737_v14 = vpop.f32.mrb[26].mxu1  ;;  %v4739_v13 = vpop.f32.mrb[27].mxu0  ;;  %v5108_v31 = vmax.f32 %v4609_v51, %v4733_v22  ;;  %v5113_v22 = vld [vmem:[#allocation2_spill] sm:$0xff] }
 0x181   : > { %v4745_v8 = vpop.f32.mrb[27].mxu1 }
 0x182   : > { %5081 = vst [vmem:[#allocation7_spill] sm:$0xff] %v4745_v8 }
 0x183   : > { %v4749_v17 = vpop.f32.mrb[28].mxu0 }
 0x184   : > { %5082 = vst [vmem:[#allocation8_spill] sm:$0xff] %v4749_v17  ;;  %v4753_v6 = vpop.f32.mrb[28].mxu1  ;;  %v4755_v10 = vpop.f32.mrb[29].mxu0 }
 0x185   : > { %5083 = vst [vmem:[#allocation9_spill] sm:$0xff] %v4755_v10  ;;  %v4761_v4 = vpop.f32.mrb[29].mxu1 }
 0x186   : > { %5084 = vst [vmem:[#allocation10_spill] sm:$0xff] %v4761_v4 }
 0x187   : > { %v4765_v8 = vpop.f32.mrb[30].mxu0 }
 0x188   : > { %5085 = vst [vmem:[#allocation11_spill] sm:$0xff] %v4765_v8  ;;  %v4769_v17 = vpop.f32.mrb[30].mxu1  ;;  %v4771_v58 = vpop.f32.mrb[31].mxu0 }
 0x189   : > { %5086 = vst [vmem:[#allocation12_spill] sm:$0xff] %v4771_v58  ;;  %v4777_v10 = vpop.f32.mrb[31].mxu1 }
 0x18a   : > { %5087 = vst [vmem:[#allocation13_spill] sm:$0xff] %v4777_v10 }
 0x19f   : > { %v1475_v4 = vpop.f32.mrb[32].mxu0 }
 0x1a0   : > { %v4784_v33 = vmax.f32 %v5088_v34, %v1475_v4  ;;  %v1564_v8 = vpop.f32.mrb[32].mxu1  ;;  %v1477_v60 = vpop.f32.mrb[33].mxu0  ;;  %v5092_v34 = vmax.f32 %v4496_v35, %v4669_v7  ;;  %v5093_v4 = vmax.f32 %v4501_v41, %v4673_v9  ;;  %v5097_v9 = vmax.f32 %v4523_v59, %v4689_v27 }
 0x1a1   : > { %v4789_v39 = vmax.f32 %v5089_v63, %v1564_v8  ;;  %v4794_v58 = vmax.f32 %v5090_v43, %v1477_v60  ;;  %v1566_v2 = vpop.f32.mrb[33].mxu1  ;;  %v5094_v60 = vmax.f32 %v4503_v40, %v4675_v12  ;;  %v5098_v12 = vmax.f32 %v4525_v61, %v4691_v28 }
 0x1a2   : > { %v4799_v10 = vmax.f32 %v5091_v44, %v1566_v2  ;;  %v5095_v2 = vmax.f32 %v4508_v45, %v4681_v24  ;;  %v5099_v24 = vmax.f32 %v4530_v1, %v4697_v38  ;;  %v5102_v28 = vmax.f32 %v4549_v18, %v4707_v37 }
 0x1a3   : > { %v1481_v16 = vpop.f32.mrb[34].mxu0  ;;  %v5103_v38 = vmax.f32 %v4552_v19, %v4713_v52  ;;  %v5106_v37 = vmax.f32 %v4605_v48, %v4723_v29  ;;  %v5107_v52 = vmax.f32 %v4607_v50, %v4729_v26  ;;  %v5110_v29 = vmax.f32 %v4614_v55, %v4739_v13  ;;  %v5111_v26 = vld [vmem:[#allocation7_spill] sm:$0xff] }
 0x1a4   : > { %v4804_v57 = vmax.f32 %v5092_v34, %v1481_v16  ;;  %v1570_v20 = vpop.f32.mrb[34].mxu1  ;;  %v1483_v63 = vpop.f32.mrb[35].mxu0  ;;  %v5101_v34 = vmax.f32 %v4547_v15, %v4705_v36  ;;  %v5117_v13 = vld [vmem:[#allocation3_spill] sm:$0xff] }
 0x1a5   : > { %v4809_v21 = vmax.f32 %v5093_v4, %v1570_v20  ;;  %v4814_v5 = vmax.f32 %v5094_v60, %v1483_v63  ;;  %v1572_v25 = vpop.f32.mrb[35].mxu1  ;;  %v5105_v60 = vmax.f32 %v4603_v47, %v4721_v30 }
 0x1a6   : > { %v4819_v3 = vmax.f32 %v5095_v2, %v1572_v25 }
 0x1a7   : > { %v1487_v35 = vpop.f32.mrb[36].mxu0 }
 0x1a8   : > { %v4824_v7 = vmax.f32 %v5096_v0, %v1487_v35  ;;  %v1576_v41 = vpop.f32.mrb[36].mxu1  ;;  %v1489_v8 = vpop.f32.mrb[37].mxu0  ;;  %v5109_v0 = vmax.f32 %v4612_v53, %v4737_v14 }
 0x1a9   : > { %v4829_v40 = vmax.f32 %v5097_v9, %v1576_v41  ;;  %v4834_v43 = vmax.f32 %v5098_v12, %v1489_v8  ;;  %v1578_v45 = vpop.f32.mrb[37].mxu1  ;;  %v5112_v8 = vmax.f32 %v4619_v56, %v5111_v26  ;;  %v5114_v12 = vld [vmem:[#allocation8_spill] sm:$0xff]  ;;  %v4941_v26 = vpop.permute.xlu0 %2336 }
 0x1aa   : > { %v4839_v44 = vmax.f32 %v5099_v24, %v1578_v45  ;;  %v5115_v45 = vmax.f32 %v5113_v22, %v5114_v12 }
 0x1ab   : > { %v1493_v54 = vpop.f32.mrb[38].mxu0 }
 0x1ac   : > { %v4844_v16 = vmax.f32 %v5100_v23, %v1493_v54  ;;  %v1582_v59 = vpop.f32.mrb[38].mxu1  ;;  %v1495_v27 = vpop.f32.mrb[39].mxu0  ;;  %v5116_v54 = vmax.f32 %v4626_v62, %v4753_v6  ;;  %v5118_v23 = vld [vmem:[#allocation9_spill] sm:$0xff] }
 0x1ad   : > { %v4849_v61 = vmax.f32 %v5101_v34, %v1582_v59  ;;  %v4854_v20 = vmax.f32 %v5102_v28, %v1495_v27  ;;  %v1584_v1 = vpop.f32.mrb[39].mxu1  ;;  %v5119_v59 = vmax.f32 %v5117_v13, %v5118_v23  ;;  %v5120_v34 = vld [vmem:[#allocation4_spill] sm:$0xff]  ;;  %v5121_v28 = vld [vmem:[#allocation10_spill] sm:$0xff]  ;;  %v4956_v13 = vpop.permute.xlu0 %2341 }
 0x1ae   : > { %v4859_v63 = vmax.f32 %v5103_v38, %v1584_v1  ;;  %v5122_v1 = vmax.f32 %v5120_v34, %v5121_v28 }
 0x1c3   : > { %v1653_v11 = vpop.f32.mrb[40].mxu0 }
 0x1c4   : > { %v4864_v4 = vmax.f32 %v5104_v32, %v1653_v11  ;;  %v1742_v15 = vpop.f32.mrb[40].mxu1  ;;  %v1655_v36 = vpop.f32.mrb[41].mxu0  ;;  %v5123_v32 = vld [vmem:[#allocation5_spill] sm:$0xff] }
 0x1c5   : > { %v4869_v18 = vmax.f32 %v5105_v60, %v1742_v15  ;;  %v4874_v25 = vmax.f32 %v5106_v37, %v1655_v36  ;;  %v1744_v19 = vpop.f32.mrb[41].mxu1  ;;  %v5124_v15 = vld [vmem:[#allocation11_spill] sm:$0xff]  ;;  %v5126_v37 = vmax.f32 %v4640_v42, %v4769_v17 }
 0x1c6   : > { %v4879_v2 = vmax.f32 %v5107_v52, %v1744_v19  ;;  %v5125_v36 = vmax.f32 %v5123_v32, %v5124_v15  ;;  %v5127_v52 = vld [vmem:[#allocation6_spill] sm:$0xff]  ;;  %v4962_v32 = vpop.permute.xlu1 %2346 }
 0x1c7   : > { %v1659_v46 = vpop.f32.mrb[42].mxu0 }
 0x1c8   : > { %v4884_v35 = vmax.f32 %v5108_v31, %v1659_v46  ;;  %v1748_v47 = vpop.f32.mrb[42].mxu1  ;;  %v1661_v30 = vpop.f32.mrb[43].mxu0  ;;  %v5128_v46 = vld [vmem:[#allocation12_spill] sm:$0xff] }
 0x1c9   : > { %v4889_v48 = vmax.f32 %v5109_v0, %v1748_v47  ;;  %v4894_v41 = vmax.f32 %v5110_v29, %v1661_v30  ;;  %v1750_v50 = vpop.f32.mrb[43].mxu1  ;;  %v5129_v31 = vmax.f32 %v5127_v52, %v5128_v46  ;;  %v5130_v0 = vld [vmem:[#allocation13_spill] sm:$0xff] }
 0x1ca   : > { %v4899_v9 = vmax.f32 %v5112_v8, %v1750_v50  ;;  %v5131_v29 = vmax.f32 %v4647_v49, %v5130_v0 }
 0x1cb   : > { %v1665_v51 = vpop.f32.mrb[44].mxu0 }
 0x1cc   : > { %v4904_v24 = vmax.f32 %v5115_v45, %v1665_v51  ;;  %v1754_v53 = vpop.f32.mrb[44].mxu1  ;;  %v1667_v14 = vpop.f32.mrb[45].mxu0 }
 0x1cd   : > { %v4909_v55 = vmax.f32 %v5116_v54, %v1754_v53  ;;  %v4914_v27 = vmax.f32 %v5119_v59, %v1667_v14  ;;  %v1756_v56 = vpop.f32.mrb[45].mxu1 }
 0x1ce   : > { %v4919_v38 = vmax.f32 %v5122_v1, %v1756_v56 }
 0x1cf   : > { %v1671_v11 = vpop.f32.mrb[46].mxu0 }
 0x1d0   : > { %v4924_v60 = vmax.f32 %v5125_v36, %v1671_v11  ;;  %v1760_v62 = vpop.f32.mrb[46].mxu1  ;;  %v1673_v6 = vpop.f32.mrb[47].mxu0 }
 0x1d1   : > { %v4929_v19 = vmax.f32 %v5126_v37, %v1760_v62  ;;  %v4934_v47 = vmax.f32 %v5129_v31, %v1673_v6  ;;  %v1762_v30 = vpop.f32.mrb[47].mxu1 }
 0x1d2   : > { %v4939_v50 = vmax.f32 %v5131_v29, %v1762_v30 }
 0x1e7   : > { %v2008_v8 = vpop.f32.mrb[48].mxu0 }
 0x1e8   : > { %v2298_v51 = vmax.f32 %v4784_v33, %v2008_v8  ;;  %v2097_v22 = vpop.f32.mrb[48].mxu1  ;;  %v2010_v42 = vpop.f32.mrb[49].mxu0 }
 0x1e9   : > { %v2300_v17 = vmax.f32 %v4789_v39, %v2097_v22  ;;  %v2299_v12 = vmax.f32 %v4794_v58, %v2010_v42  ;;  %v2099_v45 = vpop.f32.mrb[49].mxu1 }
 0x1ea   : > { %v2301_v53 = vmax.f32 %v4799_v10, %v2099_v45  ;;  %v2354_v14 = vadd.f32 %v4941_v26, %v2298_v51  ;;  %v4983_v45 = vpop.permute.xlu1 %2351 }
 0x1eb   : > { %v2355_v49 = vadd.f32 %v4941_v26, %v2299_v12  ;;  %v2356_v33 = vadd.f32 %v4941_v26, %v2300_v17  ;;  %v2014_v54 = vpop.f32.mrb[50].mxu0 }
 0x1ec   : > { %v2357_v58 = vadd.f32 %v4941_v26, %v2301_v53  ;;  %v2386_v10 = vmax.f32 %v2354_v14, 0.0  ;;  %v2306_v39 = vmax.f32 %v4804_v57, %v2014_v54  ;;  %v2103_v23 = vpop.f32.mrb[50].mxu1  ;;  %v2016_v59 = vpop.f32.mrb[51].mxu0 }
 0x1ed   : > { %v2387_v56 = vmax.f32 %v2355_v49, 0.0  ;;  %v2388_v34 = vmax.f32 %v2356_v33, 0.0  ;;  %v2308_v28 = vmax.f32 %v4809_v21, %v2103_v23  ;;  %v2307_v1 = vmax.f32 %v4814_v5, %v2016_v59  ;;  %v2105_v11 = vpop.f32.mrb[51].mxu1 }
 0x1ee   : > { %v2389_v15 = vmax.f32 %v2357_v58, 0.0  ;;  %2418 = vst [vmem:[%s4952_s19] sm:$0xff] %v2386_v10  ;;  %v2309_v36 = vmax.f32 %v4819_v3, %v2105_v11  ;;  %v2362_v62 = vadd.f32 %v4956_v13, %v2306_v39 }
 0x1ef   : > { %2419 = vst [vmem:[%s4952_s19 + $0x8] sm:$0xff] %v2387_v56  ;;  %2420 = vst [vmem:[%s4952_s19 + $0x10] sm:$0xff] %v2388_v34  ;;  %v2363_v57 = vadd.f32 %v4956_v13, %v2307_v1  ;;  %v2364_v6 = vadd.f32 %v4956_v13, %v2308_v28  ;;  %v2020_v37 = vpop.f32.mrb[52].mxu0 }
 0x1f0   : > { %2421 = vst [vmem:[%s4952_s19 + $0x18] sm:$0xff] %v2389_v15  ;;  %v2365_v21 = vadd.f32 %v4956_v13, %v2309_v36  ;;  %v2394_v5 = vmax.f32 %v2362_v62, 0.0  ;;  %v2314_v52 = vmax.f32 %v4824_v7, %v2020_v37  ;;  %v2109_v46 = vpop.f32.mrb[52].mxu1  ;;  %v2022_v3 = vpop.f32.mrb[53].mxu0 }
 0x1f1   : > { %v2395_v31 = vmax.f32 %v2363_v57, 0.0  ;;  %v2396_v30 = vmax.f32 %v2364_v6, 0.0  ;;  %v2316_v0 = vmax.f32 %v4829_v40, %v2109_v46  ;;  %v2315_v29 = vmax.f32 %v4834_v43, %v2022_v3  ;;  %v2111_v8 = vpop.f32.mrb[53].mxu1 }
 0x1f2   : > { %v2397_v51 = vmax.f32 %v2365_v21, 0.0  ;;  %2426 = vst [vmem:[%s4952_s19 + $0x40] sm:$0xff] %v2394_v5  ;;  %v2317_v22 = vmax.f32 %v4839_v44, %v2111_v8  ;;  %v2370_v42 = vadd.f32 %v4962_v32, %v2314_v52 }
 0x1f3   : > { %2427 = vst [vmem:[%s4952_s19 + $0x48] sm:$0xff] %v2395_v31  ;;  %2428 = vst [vmem:[%s4952_s19 + $0x50] sm:$0xff] %v2396_v30  ;;  %v2371_v7 = vadd.f32 %v4962_v32, %v2315_v29  ;;  %v2372_v17 = vadd.f32 %v4962_v32, %v2316_v0  ;;  %v2026_v12 = vpop.f32.mrb[54].mxu0 }
 0x1f4   : > { %2429 = vst [vmem:[%s4952_s19 + $0x58] sm:$0xff] %v2397_v51  ;;  %v2373_v40 = vadd.f32 %v4962_v32, %v2317_v22  ;;  %v2402_v43 = vmax.f32 %v2370_v42, 0.0  ;;  %v2322_v44 = vmax.f32 %v4844_v16, %v2026_v12  ;;  %v2115_v53 = vpop.f32.mrb[54].mxu1  ;;  %v2028_v14 = vpop.f32.mrb[55].mxu0 }
 0x1f5   : > { %v2403_v49 = vmax.f32 %v2371_v7, 0.0  ;;  %v2404_v33 = vmax.f32 %v2372_v17, 0.0  ;;  %v2324_v54 = vmax.f32 %v4849_v61, %v2115_v53  ;;  %v2323_v58 = vmax.f32 %v4854_v20, %v2028_v14  ;;  %v2117_v10 = vpop.f32.mrb[55].mxu1 }
 0x1f6   : > { %v2405_v39 = vmax.f32 %v2373_v40, 0.0  ;;  %2434 = vst [vmem:[%s4952_s19 + $0x80] sm:$0xff] %v2402_v43  ;;  %v2325_v23 = vmax.f32 %v4859_v63, %v2117_v10  ;;  %v2378_v16 = vadd.f32 %v4983_v45, %v2322_v44 }
 0x1f7   : > { %2435 = vst [vmem:[%s4952_s19 + $0x88] sm:$0xff] %v2403_v49  ;;  %2436 = vst [vmem:[%s4952_s19 + $0x90] sm:$0xff] %v2404_v33  ;;  %v2379_v59 = vadd.f32 %v4983_v45, %v2323_v58  ;;  %v2380_v56 = vadd.f32 %v4983_v45, %v2324_v54 }
 0x1f8   : > { %2437 = vst [vmem:[%s4952_s19 + $0x98] sm:$0xff] %v2405_v39  ;;  %v2381_v61 = vadd.f32 %v4983_v45, %v2325_v23  ;;  %v2410_v20 = vmax.f32 %v2378_v16, 0.0 }
 0x1f9   : > { %v2411_v34 = vmax.f32 %v2379_v59, 0.0  ;;  %v2412_v28 = vmax.f32 %v2380_v56, 0.0 }
 0x1fa   : > { %v2413_v1 = vmax.f32 %v2381_v61, 0.0  ;;  %2442 = vst [vmem:[%s4952_s19 + $0xc0] sm:$0xff] %v2410_v20 }
 0x1fb   : > { %2443 = vst [vmem:[%s4952_s19 + $0xc8] sm:$0xff] %v2411_v34  ;;  %2444 = vst [vmem:[%s4952_s19 + $0xd0] sm:$0xff] %v2412_v28 }
 0x1fc   : > { %2445 = vst [vmem:[%s4952_s19 + $0xd8] sm:$0xff] %v2413_v1 }
 0x20b   : > { %v2186_v63 = vpop.f32.mrb[56].mxu0 }
 0x20c   : > { %v2302_v11 = vmax.f32 %v4864_v4, %v2186_v63  ;;  %v2275_v15 = vpop.f32.mrb[56].mxu1  ;;  %v2188_v36 = vpop.f32.mrb[57].mxu0 }
 0x20d   : > { %v2304_v62 = vmax.f32 %v4869_v18, %v2275_v15  ;;  %v2303_v57 = vmax.f32 %v4874_v25, %v2188_v36  ;;  %v2277_v6 = vpop.f32.mrb[57].mxu1 }
 0x20e   : > { %v2358_v37 = vadd.f32 %v4941_v26, %v2302_v11  ;;  %v2305_v21 = vmax.f32 %v4879_v2, %v2277_v6 }
 0x20f   : > { %v2360_v5 = vadd.f32 %v4941_v26, %v2304_v62  ;;  %v2359_v52 = vadd.f32 %v4941_v26, %v2303_v57  ;;  %v2192_v46 = vpop.f32.mrb[58].mxu0 }
 0x210   : > { %v2390_v4 = vmax.f32 %v2358_v37, 0.0  ;;  %v2361_v3 = vadd.f32 %v4941_v26, %v2305_v21  ;;  %v2310_v18 = vmax.f32 %v4884_v35, %v2192_v46  ;;  %v2281_v31 = vpop.f32.mrb[58].mxu1  ;;  %v2194_v25 = vpop.f32.mrb[59].mxu0 }
 0x211   : > { %v2392_v30 = vmax.f32 %v2360_v5, 0.0  ;;  %v2391_v0 = vmax.f32 %v2359_v52, 0.0  ;;  %v2312_v29 = vmax.f32 %v4889_v48, %v2281_v31  ;;  %v2311_v2 = vmax.f32 %v4894_v41, %v2194_v25  ;;  %v2283_v8 = vpop.f32.mrb[59].mxu1 }
 0x212   : > { %2422 = vst [vmem:[%s4952_s19 + $0x20] sm:$0xff] %v2390_v4  ;;  %v2393_v51 = vmax.f32 %v2361_v3, 0.0  ;;  %v2366_v22 = vadd.f32 %v4956_v13, %v2310_v18  ;;  %v2313_v42 = vmax.f32 %v4899_v9, %v2283_v8 }
 0x213   : > { %2424 = vst [vmem:[%s4952_s19 + $0x30] sm:$0xff] %v2392_v30  ;;  %2423 = vst [vmem:[%s4952_s19 + $0x28] sm:$0xff] %v2391_v0  ;;  %v2368_v35 = vadd.f32 %v4956_v13, %v2312_v29  ;;  %v2367_v26 = vadd.f32 %v4956_v13, %v2311_v2  ;;  %v2198_v7 = vpop.f32.mrb[60].mxu0 }
 0x214   : > { %2425 = vst [vmem:[%s4952_s19 + $0x38] sm:$0xff] %v2393_v51  ;;  %v2398_v48 = vmax.f32 %v2366_v22, 0.0  ;;  %v2369_v41 = vadd.f32 %v4956_v13, %v2313_v42  ;;  %v2318_v17 = vmax.f32 %v4904_v24, %v2198_v7  ;;  %v2287_v12 = vpop.f32.mrb[60].mxu1  ;;  %v2200_v40 = vpop.f32.mrb[61].mxu0 }
 0x215   : > { %v2400_v9 = vmax.f32 %v2368_v35, 0.0  ;;  %v2399_v43 = vmax.f32 %v2367_v26, 0.0  ;;  %v2320_v44 = vmax.f32 %v4909_v55, %v2287_v12  ;;  %v2319_v53 = vmax.f32 %v4914_v27, %v2200_v40  ;;  %v2289_v14 = vpop.f32.mrb[61].mxu1 }
 0x216   : > { %2430 = vst [vmem:[%s4952_s19 + $0x60] sm:$0xff] %v2398_v48  ;;  %v2401_v49 = vmax.f32 %v2369_v41, 0.0  ;;  %v2374_v33 = vadd.f32 %v4962_v32, %v2318_v17  ;;  %v2321_v54 = vmax.f32 %v4919_v38, %v2289_v14 }
 0x217   : > { %2432 = vst [vmem:[%s4952_s19 + $0x70] sm:$0xff] %v2400_v9  ;;  %2431 = vst [vmem:[%s4952_s19 + $0x68] sm:$0xff] %v2399_v43  ;;  %v2376_v24 = vadd.f32 %v4962_v32, %v2320_v44  ;;  %v2375_v13 = vadd.f32 %v4962_v32, %v2319_v53  ;;  %v2204_v58 = vpop.f32.mrb[62].mxu0 }
 0x218   : > { %2433 = vst [vmem:[%s4952_s19 + $0x78] sm:$0xff] %v2401_v49  ;;  %v2406_v55 = vmax.f32 %v2374_v33, 0.0  ;;  %v2377_v27 = vadd.f32 %v4962_v32, %v2321_v54  ;;  %v2326_v10 = vmax.f32 %v4924_v60, %v2204_v58  ;;  %v2293_v39 = vpop.f32.mrb[62].mxu1  ;;  %v2206_v23 = vpop.f32.mrb[63].mxu0 }
 0x219   : > { %v2408_v38 = vmax.f32 %v2376_v24, 0.0  ;;  %v2407_v16 = vmax.f32 %v2375_v13, 0.0  ;;  %v2328_v59 = vmax.f32 %v4929_v19, %v2293_v39  ;;  %v2327_v56 = vmax.f32 %v4934_v47, %v2206_v23  ;;  %v2295_v61 = vpop.f32.mrb[63].mxu1 }
 0x21a   : > { %2438 = vst [vmem:[%s4952_s19 + $0xa0] sm:$0xff] %v2406_v55  ;;  %v2409_v20 = vmax.f32 %v2377_v27, 0.0  ;;  %v2382_v32 = vadd.f32 %v4983_v45, %v2326_v10  ;;  %v2329_v60 = vmax.f32 %v4939_v50, %v2295_v61 }
 0x21b   : > { %2440 = vst [vmem:[%s4952_s19 + $0xb0] sm:$0xff] %v2408_v38  ;;  %2439 = vst [vmem:[%s4952_s19 + $0xa8] sm:$0xff] %v2407_v16  ;;  %v2384_v34 = vadd.f32 %v4983_v45, %v2328_v59  ;;  %v2383_v28 = vadd.f32 %v4983_v45, %v2327_v56 }
 0x21c   : > { %2441 = vst [vmem:[%s4952_s19 + $0xb8] sm:$0xff] %v2409_v20  ;;  %v2414_v19 = vmax.f32 %v2382_v32, 0.0  ;;  %v2385_v47 = vadd.f32 %v4983_v45, %v2329_v60 }
 0x21d   : > { %v2416_v1 = vmax.f32 %v2384_v34, 0.0  ;;  %v2415_v63 = vmax.f32 %v2383_v28, 0.0 }
 0x21e   : > { %2446 = vst [vmem:[%s4952_s19 + $0xe0] sm:$0xff] %v2414_v19  ;;  %v2417_v11 = vmax.f32 %v2385_v47, 0.0 }
 0x21f   : > { %2448 = vst [vmem:[%s4952_s19 + $0xf0] sm:$0xff] %v2416_v1  ;;  %2447 = vst [vmem:[%s4952_s19 + $0xe8] sm:$0xff] %v2415_v63 }
 0x220   : > { %2449 = vst [vmem:[%s4952_s19 + $0xf8] sm:$0xff] %v2417_v11 }
 0x221 PF: > { %s13_s14 = sadd.s32 1, %s3679_s14   ;;  %s5132_s12 = smov %s3675_s13 }
 0x222   : > { %p10_p5 = scmp.ge.s32.totalorder %s13_s14, 4   ;;  %s5133_s13 = smov %s5135_s15 }
 0x224   :  { %12 = sbr.rel (!%p10_p5) target bundleno = 2 (0x2), region = 65 }

// kernel: cat_dog_forward.5
= control target key start
LH: loop header
LB: loop body
LE: loop exit
PB: predicated region body
PF: predicated region fallthrough
CT: control target
= control target key end

     0   :  { %9 = vsyncpa [#allocation4], 0  ;;  %s13048_s0 = inlined_call_operand.vmem [shape: bf16[2,32768], index: 0, kind: input, shape index: {}]   ;;  %s13049_s1 = inlined_call_operand.hbm [shape: bf16[32768,512], index: 1, kind: input, shape index: {}]   ;;  %s13050_s2 = inlined_call_operand.vmem [shape: f32[1,512], index: 2, kind: input, shape index: {}]   ;;  %s13051_s3 = inlined_call_operand.vmem [shape: bf16[512,2], index: 3, kind: input, shape index: {}]   ;;  %s13052_s4 = inlined_call_operand.vmem [shape: f32[2,2,2], index: 4, kind: output, shape index: {}]  }
   0x1   :  { %11 = vsyncpa [#allocation4 + $0x1], 0  ;;  %s11514_s15 = smov 0   ;;  %s11516_s16 = smov 0  }
   0x2   :  { %s11518_s17 = smov 0   ;;  %s11520_s18 = smov 0  }
   0x3   :  { %s11522_s19 = smov 0   ;;  %s11524_s20 = smov 0  }
   0x4   :  { %s11526_s21 = smov 0   ;;  %s11528_s22 = smov 0  }
   0x5 LB: > { %s8538_s23 = sadd.s32 4294967295, %s11480_s22   ;;  %s26_s24 = sadd.s32 1, %s11472_s20  ;;  %s11480_s22 = sphi %s11528_s22, %s17_s22   ;;  %s11476_s21 = sphi %s11526_s21, %s13065_s21   ;;  %s11472_s20 = sphi %s11524_s20, %s13064_s20   ;;  %s11468_s19 = sphi %s11522_s19, %s13063_s19   ;;  %s11464_s18 = sphi %s11520_s18, %s13062_s18   ;;  %s11460_s17 = sphi %s11518_s17, %s13061_s17   ;;  %s11456_s16 = sphi %s11516_s16, %s13060_s16   ;;  %s11452_s15 = sphi %s11514_s15, %s13059_s15  }
   0x6   : > { %p27_p0 = scmp.ge.s32.totalorder %s26_s24, 4  ;;  %s29_s25 = sadd.s32 1, %s11476_s21 }
   0x7   : > { %s59_s26 = sadd.s32 1, %s11460_s17  ;;  %p66_p1 = scmp.ne.s32.totalorder %s11460_s17, %s11456_s16 }
   0x8   : > { %s13067_s24 = smov (%p27_p0, %s26_s24), 0  ;;  %s13069_s25 = smov (!%p27_p0, %s29_s25), %s11476_s21 }
   0x9   : > { %13054 = sst [smem:[#allocation6_spill]] %s13067_s24  ;;  %s54_s27 = ssub.s32 %s11472_s20, %s13067_s24 }
   0xa   : > { %p67_p2 = scmp.eq.s32.totalorder %s11480_s22, 0  ;;  %p31_p3 = scmp.ge.s32.totalorder %s13069_s25, 2 }
   0xb   : > { %p72_p4 = scmp.ne.s32.totalorder %s11456_s16, %s11452_s15  ;;  %p73_p6 = scmp.eq.s32.totalorder %s8538_s23, 0 }
   0xc   : > { %p11565_p5 = por %p67_p2, %p66_p1  ;;  %s13071_s25 = smov (%p31_p3, %s13069_s25), 0 }
   0xd   : > { %p11571_p7 = por %p73_p6, %p72_p4  ;;  %s55_s30 = ssub.s32 %s11476_s21, %s13071_s25 }
   0xe   : > { %p9749_p8 = scmp.lt.s32.totalorder %s11480_s22, 8  ;;  %s56_s5 = sor.u32 %s55_s30, %s54_s27 }
   0xf   : > { %s177_s6 = sand.u32 1, %s11460_s17   ;;  %p57_p9 = scmp.eq.s32.totalorder %s56_s5, 0 }
  0x10   : > { %s8542_s7 = sshll.u32 %s177_s6, 13  ;;  %s8544_s8 = sshll.u32 %s11476_s21, 1 }
  0x11   : > { %s11581_s9 = scalar_select %p57_p9, %s11460_s17, %s59_s26  }
  0x12   : > { %s9598_s10 = sshll.u32 %s11472_s20, 12  ;;  %s181_s12 = scalar_lea.vmem [#allocation3], %s8542_s7 }
  0x13   : > { %s188_s11 = sadd.s32 %s9598_s10, %s8544_s8  ;;  %s191_s13 = sshll.u32 %s181_s12, 4  ;;  %s11584_s13 = int_to_ptr.vmem [resolvable:$true] %s191_s13 }
  0x14   : > { %s8546_s14 = sshll.u32 %s188_s11, 6  ;;  %p11595_p10 = pnand %p9749_p8, %p11565_p5 }
  0x15   : > { %s11589_s24 = scalar_lea.hbm %s13049_s1, %s8546_s14  ;;  %s11599_s27 = scalar_lea.sflag [#allocation4], %s177_s6 }
  0x16   : > { %s11384_s30 = scalar_lea.hbm %s11589_s24, 131072  ;;  %p11386_p12 = pneg %p11595_p10 }
  0x17   : > { %p11385_p11 = scmp.ne.s32.totalorder %s11589_s24, %s11384_s30  ;;  %s11389_s7 = scalar_lea.hbm %s13049_s1, 1048576 }
  0x18   : > { %p11390_p1 = scmp.lt.u32.totalorder %s11589_s24, %s13049_s1  ;;  %p11391_p2 = scmp.lt.u32.totalorder %s11389_s7, %s11384_s30 }
  0x19   : > { %p11387_p13 = pnand %p11386_p12, %p11385_p11  ;;  %p11393_p4 = scmp.lt.u32.totalorder %s11384_s30, %s11589_s24 }
  0x1a   : > { %p11392_p3 = por %p11391_p2, %p11390_p1 }
  0x1b   : > { %p11388_p0 = pneg %p11387_p13 }
  0x1c   : > { %p11394_p5 = por %p11393_p4, %p11392_p3 }
  0x1e   : > { %p11395_p6 = pnand %p11394_p5, %p11388_p0 }
  0x20   : > { %11398 = shalt.err (!%p11395_p6)
}
  0x21   : > { %s11399_s6 = scalar_lea.vmem %s11584_s13, 131072  ;;  %s11482_s11 = smov [#allocation3]  }
  0x22   : > { %p11400_p8 = scmp.ne.s32.totalorder %s11584_s13, %s11399_s6  ;;  %s11404_s12 = sshll.u32 %s11482_s11, 4  ;;  %s11405_s12 = int_to_ptr.vmem [resolvable:$false] %s11404_s12 }
  0x23   : > { %s11406_s14 = scalar_lea.vmem %s11405_s12, 262144  ;;  %p11407_p13 = scmp.lt.s32.totalorder %s11584_s13, %s11405_s12 }
  0x24   : > { %p11402_p9 = pnand %p11400_p8, %p11386_p12  ;;  %p11408_p1 = scmp.lt.s32.totalorder %s11406_s14, %s11399_s6 }
  0x26   : > { %p11403_p11 = pneg %p11402_p9  ;;  %p11409_p2 = por %p11408_p1, %p11407_p13 }
  0x28   : > { %p11410_p3 = pnand %p11409_p2, %p11403_p11 }
  0x2a   : > { %11413 = shalt.err (!%p11410_p3)
}
  0x2b   : > { %s11483_s15 = smov 256   ;;  %s11484_s23 = smov 128  }
  0x2c   : > { %s11485_s30 = smov 8   ;;  %p8547_p12 = scmp.ge.s32.totalorder %s11480_s22, 1 }
  0x2d   : > { %9748 = dma.hbm_to_vmem [thread:$0]  (!%p11595_p10), %s11589_s24, 131072, %s11584_s13, %s11599_s27, %s11483_s15, %s11484_s23, %s11485_s30  }
  0x2e   : > { %p216_p0 = scmp.lt.s32.totalorder %s11480_s22, 9 }
  0x30   : > { %p217_p4 = pnand %p8547_p12, %p216_p0 }
  0x31   : > { %s222_s28 = sand.u32 (!%p217_p4), 1, %s11456_s16  }
  0x32   : > { %220 = sbr.rel (%p217_p4) target bundleno = 1553 (0x611), region = 36  ;;  %s8548_s5 = sshll.u32 (!%p217_p4), %s222_s28, 13 }
  0x33   : > { %s223_s7 = scalar_lea.sflag (!%p217_p4), [#allocation4], %s222_s28  ;;  %s11630_s8 = scalar_lea.vmem (!%p217_p4), [#allocation3], %s8548_s5 }
  0x39   : > { %11447 = dma.done.wait (%p11571_p7), %s223_s7, 131072  }
  0x3a   : > { %11449 = vsyncadd (%p11571_p7), %s223_s7, 4294836224  ;;  %s8549_s24 = sshll.u32 %s11468_s19, 1  ;;  %s8550_s13 = sshll.u32 %s11468_s19, 5 }
  0x3b   : > { %p262_p10 = scmp.lt.s32.totalorder %s8549_s24, 3  ;;  %p267_p5 = scmp.lt.s32.totalorder %s8550_s13, 63 }
  0x3c   : > { %p272_p6 = scmp.lt.s32.totalorder %s11468_s19, 1  ;;  %p8553_p7 = scmp.ne.s32.totalorder %s11464_s18, 0 }
  0x3d   : > { %s13073_s24 = smov (!%p262_p10, %s8549_s24), 3  ;;  %s13075_s13 = smov (!%p267_p5, %s8550_s13), 63 }
  0x3e   : > { %s264_s10 = scalar_lea.vmem %s13050_s2, %s13073_s24  ;;  %s8551_s6 = sshll.u32 %s13075_s13, 2  ;;  %v11486_v0 = vmov (!%p8553_p7), 0.0  }
  0x3f   : > { %s11648_s12 = scalar_lea.vmem %s13051_s3, %s8551_s6  ;;  %s13077_s19 = smov (!%p272_p6, %s11468_s19), 1  ;;  %281 = vst [vmem:[#allocation2] sm:$0xf] (!%p8553_p7), %v11486_v0 }
  0x40   : > { %s8552_s14 = sshll.u32 %s13077_s19, 1  ;;  %280 = sbr.rel (%p8553_p7) target bundleno = 71 (0x47), region = 44 }
  0x41   : > { %s11654_s30 = scalar_lea.vmem %s13052_s4, %s8552_s14 }
  0x47 PF: > { %v9820_v1 = vld [vmem:[%s11630_s8 + $0x4] ss:$8 sps:$4 sm:$0xff]   ;;  %v9824_v3 = vld [vmem:[%s11630_s8] ss:$8 sps:$4 sm:$0xff]   ;;  %v9826_v5 = vld [vmem:[%s11630_s8 + $0x14] ss:$8 sps:$4 sm:$0xff]   ;;  %v1331_v39 = vlaneseq }
  0x48   : > { %v9822_v2 = vld [vmem:[%s11630_s8 + $0x1004] ss:$8 sps:$4 sm:$0xff]   ;;  %6903 = vmatprep.subr.bf16.mxu1 %v9820_v1  ;;  %v9825_v4 = vld [vmem:[%s11630_s8 + $0x1000] ss:$8 sps:$4 sm:$0xff]   ;;  %v9828_v6 = vld [vmem:[%s11630_s8 + $0x1014] ss:$8 sps:$4 sm:$0xff]  }
  0x49   : > { %7559 = vmatprep.subr.bf16.mxu0 %v9822_v2  ;;  %6904 = vmatpush1.bf16.msra.mxu1 %v9824_v3  ;;  %v9830_v7 = vld [vmem:[%s11630_s8 + $0x10] ss:$8 sps:$4 sm:$0xff]   ;;  %v9832_v9 = vld [vmem:[%s11630_s8 + $0x24] ss:$8 sps:$4 sm:$0xff]   ;;  %v9836_v11 = vld [vmem:[%s11630_s8 + $0x20] ss:$8 sps:$4 sm:$0xff]  }
  0x4a   : > { %7560 = vmatpush1.bf16.msra.mxu0 %v9825_v4  ;;  %6905 = vmatprep.subr.bf16.mxu1 %v9826_v5  ;;  %v9831_v8 = vld [vmem:[%s11630_s8 + $0x1010] ss:$8 sps:$4 sm:$0xff]   ;;  %v9834_v10 = vld [vmem:[%s11630_s8 + $0x1024] ss:$8 sps:$4 sm:$0xff]   ;;  %v9837_v12 = vld [vmem:[%s11630_s8 + $0x1020] ss:$8 sps:$4 sm:$0xff]  }
  0x4b   : > { %7561 = vmatprep.subr.bf16.mxu0 %v9828_v6  ;;  %v9838_v13 = vld [vmem:[%s11630_s8 + $0x34] ss:$8 sps:$4 sm:$0xff]   ;;  %v9842_v15 = vld [vmem:[%s11630_s8 + $0x30] ss:$8 sps:$4 sm:$0xff]   ;;  %v9844_v17 = vld [vmem:[%s11630_s8 + $0x44] ss:$8 sps:$4 sm:$0xff]  }
  0x4c   : > { %v9840_v14 = vld [vmem:[%s11630_s8 + $0x1034] ss:$8 sps:$4 sm:$0xff]   ;;  %v9843_v16 = vld [vmem:[%s11630_s8 + $0x1030] ss:$8 sps:$4 sm:$0xff]   ;;  %v9846_v18 = vld [vmem:[%s11630_s8 + $0x1044] ss:$8 sps:$4 sm:$0xff]  }
  0x4d   : > { %6906 = vmatpush1.bf16.msra.mxu1 %v9830_v7  ;;  %v9848_v19 = vld [vmem:[%s11630_s8 + $0x40] ss:$8 sps:$4 sm:$0xff]   ;;  %v9850_v21 = vld [vmem:[%s11630_s8 + $0x54] ss:$8 sps:$4 sm:$0xff]   ;;  %v9854_v23 = vld [vmem:[%s11630_s8 + $0x50] ss:$8 sps:$4 sm:$0xff]  }
  0x4e   : > { %7562 = vmatpush1.bf16.msra.mxu0 %v9831_v8  ;;  %6907 = vmatprep.subr.bf16.mxu1 %v9832_v9  ;;  %v9849_v20 = vld [vmem:[%s11630_s8 + $0x1040] ss:$8 sps:$4 sm:$0xff]   ;;  %v9852_v22 = vld [vmem:[%s11630_s8 + $0x1054] ss:$8 sps:$4 sm:$0xff]   ;;  %v9855_v24 = vld [vmem:[%s11630_s8 + $0x1050] ss:$8 sps:$4 sm:$0xff]  }
  0x4f   : > { %7563 = vmatprep.subr.bf16.mxu0 %v9834_v10  ;;  %v9856_v25 = vld [vmem:[%s11630_s8 + $0x64] ss:$8 sps:$4 sm:$0xff]   ;;  %v9860_v27 = vld [vmem:[%s11630_s8 + $0x60] ss:$8 sps:$4 sm:$0xff]   ;;  %v9862_v29 = vld [vmem:[%s11630_s8 + $0x74] ss:$8 sps:$4 sm:$0xff]  }
  0x50   : > { %v9858_v26 = vld [vmem:[%s11630_s8 + $0x1064] ss:$8 sps:$4 sm:$0xff]   ;;  %v9861_v28 = vld [vmem:[%s11630_s8 + $0x1060] ss:$8 sps:$4 sm:$0xff]   ;;  %v9864_v30 = vld [vmem:[%s11630_s8 + $0x1074] ss:$8 sps:$4 sm:$0xff]  }
  0x51   : > { %6908 = vmatpush1.bf16.msra.mxu1 %v9836_v11  ;;  %v9866_v31 = vld [vmem:[%s11630_s8 + $0x70] ss:$8 sps:$4 sm:$0xff]   ;;  %v9868_v33 = vld [vmem:[%s11630_s8 + $0x84] ss:$8 sps:$4 sm:$0xff]   ;;  %v9872_v35 = vld [vmem:[%s11630_s8 + $0x80] ss:$8 sps:$4 sm:$0xff]  }
  0x52   : > { %7564 = vmatpush1.bf16.msra.mxu0 %v9837_v12  ;;  %6909 = vmatprep.subr.bf16.mxu1 %v9838_v13  ;;  %v9867_v32 = vld [vmem:[%s11630_s8 + $0x1070] ss:$8 sps:$4 sm:$0xff]   ;;  %v9870_v34 = vld [vmem:[%s11630_s8 + $0x1084] ss:$8 sps:$4 sm:$0xff]   ;;  %v9873_v36 = vld [vmem:[%s11630_s8 + $0x1080] ss:$8 sps:$4 sm:$0xff]  }
  0x53   : > { %7565 = vmatprep.subr.bf16.mxu0 %v9840_v14  ;;  %v11487_v37 = vmov 1966171168   ;;  %v9874_v40 = vld [vmem:[%s11630_s8 + $0x94] ss:$8 sps:$4 sm:$0xff]   ;;  %s8554_s19 = sshll.u32 %s11464_s18, 13  ;;  %v11697_v44 = vshrl.u32 %v1331_v39, 7 }
  0x54   : > { %v1329_v38 = vunpack.c.l.s4 %v11487_v37  ;;  %v9876_v41 = vld [vmem:[%s11630_s8 + $0x1094] ss:$8 sps:$4 sm:$0xff]   ;;  %v9878_v42 = vld [vmem:[%s11630_s8 + $0x90] ss:$8 sps:$4 sm:$0xff]   ;;  %v9880_v46 = vld [vmem:[%s11630_s8 + $0xa4] ss:$8 sps:$4 sm:$0xff]  }
  0x55   : > { %6910 = vmatpush1.bf16.msra.mxu1 %v9842_v15  ;;  %v9879_v45 = vld [vmem:[%s11630_s8 + $0x1090] ss:$8 sps:$4 sm:$0xff]   ;;  %s284_s28 = sshra.s32 %s8554_s19, 7  ;;  %v9882_v47 = vld [vmem:[%s11630_s8 + $0x10a4] ss:$8 sps:$4 sm:$0xff]   ;;  %p9579_p8 = scmp.ne.s32.totalorder %s11464_s18, 3 }
  0x56   : > { %7566 = vmatpush1.bf16.msra.mxu0 %v9843_v16  ;;  %6911 = vmatprep.subr.bf16.mxu1 %v9844_v17  ;;  %v1330_v43 = vunpack.c.0.s8 %v1329_v38  ;;  %v9884_v48 = vld [vmem:[%s11630_s8 + $0xa0] ss:$8 sps:$4 sm:$0xff]   ;;  %s11707_s13 = scalar_lea.vmem %s13048_s0, %s284_s28  ;;  %v9886_v51 = vld [vmem:[%s11630_s8 + $0xb4] ss:$8 sps:$4 sm:$0xff]   ;;  %v9890_v54 = vld [vmem:[%s11630_s8 + $0xb0] ss:$8 sps:$4 sm:$0xff]  }
  0x57   : > { %7567 = vmatprep.subr.bf16.mxu0 %v9846_v18  ;;  %v9885_v49 = vld [vmem:[%s11630_s8 + $0x10a0] ss:$8 sps:$4 sm:$0xff]   ;;  %v9888_v52 = vld [vmem:[%s11630_s8 + $0x10b4] ss:$8 sps:$4 sm:$0xff]   ;;  %v9891_v56 = vld [vmem:[%s11630_s8 + $0x10b0] ss:$8 sps:$4 sm:$0xff]  }
  0x58   : > { %v11710_v50 = vsub.s32 %v1330_v43, %v11697_v44  ;;  %v11715_v53 = vld [vmem:[%s11707_s13] sm:$0xff]  ;;  %v9892_v58 = vld [vmem:[%s11630_s8 + $0xc4] ss:$8 sps:$4 sm:$0xff]   ;;  %v9902_v5 = vld [vmem:[%s11630_s8 + $0xd0] ss:$8 sps:$4 sm:$0xff]   ;;  %vm8435_vm0 = vcmask (!%p9579_p8), 9216  }
  0x59   : > { %6912 = vmatpush1.bf16.msra.mxu1 %v9848_v19  ;;  %v11722_v57 = vld [vmem:[%s11707_s13 + $0x20] sm:$0xff]  ;;  %v9894_v59 = vld [vmem:[%s11630_s8 + $0x10c4] ss:$8 sps:$4 sm:$0xff]   ;;  %v9903_v6 = vld [vmem:[%s11630_s8 + $0x10d0] ss:$8 sps:$4 sm:$0xff]  }
  0x5a   : > { %7568 = vmatpush1.bf16.msra.mxu0 %v9849_v20  ;;  %6913 = vmatprep.subr.bf16.mxu1 %v9850_v21  ;;  %v1334_v55 = vrot.slane %v11715_v53, %v11710_v50  ;;  %v1530_v61 = vrot.slane %v11722_v57, %v11710_v50  ;;  %v9896_v0 = vld [vmem:[%s11630_s8 + $0xc0] ss:$8 sps:$4 sm:$0xff]   ;;  %v9898_v2 = vld [vmem:[%s11630_s8 + $0xd4] ss:$8 sps:$4 sm:$0xff]   ;;  %v9904_v7 = vld [vmem:[%s11630_s8 + $0xe4] ss:$8 sps:$4 sm:$0xff]  }
  0x5b   : > { %7569 = vmatprep.subr.bf16.mxu0 %v9852_v22  ;;  %v9897_v1 = vld [vmem:[%s11630_s8 + $0x10c0] ss:$8 sps:$4 sm:$0xff]   ;;  %v9900_v3 = vld [vmem:[%s11630_s8 + $0x10d4] ss:$8 sps:$4 sm:$0xff]   ;;  %v9906_v8 = vld [vmem:[%s11630_s8 + $0x10e4] ss:$8 sps:$4 sm:$0xff]  }
  0x5c   : > { %v1342_v60 = vcombine.high %v1334_v55, %v1334_v55  ;;  %v1538_v63 = vcombine.high %v1530_v61, %v1530_v61  ;;  %v9908_v9 = vld [vmem:[%s11630_s8 + $0xe0] ss:$8 sps:$4 sm:$0xff]   ;;  %v9910_v11 = vld [vmem:[%s11630_s8 + $0xf4] ss:$8 sps:$4 sm:$0xff]   ;;  %v9914_v13 = vld [vmem:[%s11630_s8 + $0xf0] ss:$8 sps:$4 sm:$0xff]   ;;  %v11747_v17 = vrot.slane %v1334_v55, %v11710_v50  ;;  %v11750_v18 = vrot.slane %v1530_v61, %v11710_v50 }
  0x5d   : > { %6914 = vmatpush1.bf16.msra.mxu1 %v9854_v23  ;;  %v9909_v10 = vld [vmem:[%s11630_s8 + $0x10e0] ss:$8 sps:$4 sm:$0xff]   ;;  %v9912_v12 = vld [vmem:[%s11630_s8 + $0x10f4] ss:$8 sps:$4 sm:$0xff]   ;;  %v9915_v14 = vld [vmem:[%s11630_s8 + $0x10f0] ss:$8 sps:$4 sm:$0xff]  }
  0x5e   : > { %7570 = vmatpush1.bf16.msra.mxu0 %v9855_v24  ;;  %6915 = vmatprep.subr.bf16.mxu1 %v9856_v25  ;;  %v1364_v62 = vrot.slane %v1342_v60, %v11710_v50  ;;  %v1560_v4 = vrot.slane %v1538_v63, %v11710_v50  ;;  %v9919_v15 = vld [vmem:[%s11630_s8 + $0x104] ss:$8 sps:$4 sm:$0xff]   ;;  %v9917_v19 = vld [vmem:[%s11630_s8 + $0x100] ss:$8 sps:$4 sm:$0xff]   ;;  %v9926_v21 = vld [vmem:[%s11630_s8 + $0x114] ss:$8 sps:$4 sm:$0xff]  }
  0x5f   : > { %7571 = vmatprep.subr.bf16.mxu0 %v9858_v26  ;;  %v9923_v16 = vld [vmem:[%s11630_s8 + $0x1104] ss:$8 sps:$4 sm:$0xff]   ;;  %v9921_v20 = vld [vmem:[%s11630_s8 + $0x1100] ss:$8 sps:$4 sm:$0xff]   ;;  %v9929_v22 = vld [vmem:[%s11630_s8 + $0x1114] ss:$8 sps:$4 sm:$0xff]  }
  0x60   : > { %6935 = vmatprep.mubr.bf16.mxu1 %v1364_v62  ;;  %7591 = vmatprep.mubr.bf16.mxu0 %v1560_v4  ;;  %v1374_v23 = vcombine.high %v1364_v62, %v1364_v62  ;;  %v1570_v24 = vcombine.high %v1560_v4, %v1560_v4  ;;  %v9924_v25 = vld [vmem:[%s11630_s8 + $0x110] ss:$8 sps:$4 sm:$0xff]   ;;  %v9942_v37 = vld [vmem:[%s11630_s8 + $0x140] ss:$8 sps:$4 sm:$0xff]   ;;  %v9950_v39 = vld [vmem:[%s11630_s8 + $0x154] ss:$8 sps:$4 sm:$0xff]  }
  0x61   : > { %6916 = vmatpush1.bf16.msra.mxu1 %v9860_v27  ;;  %v9927_v26 = vld [vmem:[%s11630_s8 + $0x1110] ss:$8 sps:$4 sm:$0xff]   ;;  %v9932_v27 = vld [vmem:[%s11630_s8 + $0x124] ss:$8 sps:$4 sm:$0xff]   ;;  %v9945_v38 = vld [vmem:[%s11630_s8 + $0x1140] ss:$8 sps:$4 sm:$0xff]  }
  0x62   : > { %7572 = vmatpush1.bf16.msra.mxu0 %v9861_v28  ;;  %6917 = vmatprep.subr.bf16.mxu1 %v9862_v29  ;;  %v9935_v28 = vld [vmem:[%s11630_s8 + $0x1124] ss:$8 sps:$4 sm:$0xff]   ;;  %v9930_v29 = vld [vmem:[%s11630_s8 + $0x120] ss:$8 sps:$4 sm:$0xff]   ;;  %v9977_v60 = vld [vmem:[%s11630_s8 + $0x1194] ss:$8 sps:$4 sm:$0xff]  }
  0x63   : > { %7573 = vmatprep.subr.bf16.mxu0 %v9864_v30  ;;  %v9933_v30 = vld [vmem:[%s11630_s8 + $0x1120] ss:$8 sps:$4 sm:$0xff]   ;;  %v9956_v43 = vld [vmem:[%s11630_s8 + $0x164] ss:$8 sps:$4 sm:$0xff]   ;;  %v9972_v61 = vld [vmem:[%s11630_s8 + $0x190] ss:$8 sps:$4 sm:$0xff]  }
  0x64   : > { %v9971_v55 = vld [vmem:[%s11630_s8 + $0x1184] ss:$8 sps:$4 sm:$0xff]   ;;  %v9975_v62 = vld [vmem:[%s11630_s8 + $0x1190] ss:$8 sps:$4 sm:$0xff]   ;;  %v9989_v4 = vld [vmem:[%s11630_s8 + $0x11b4] ss:$8 sps:$4 sm:$0xff]  }
  0x65   : > { %6918 = vmatpush1.bf16.msra.mxu1 %v9866_v31  ;;  %v9938_v31 = vld [vmem:[%s11630_s8 + $0x134] ss:$8 sps:$4 sm:$0xff]   ;;  %v9980_v63 = vld [vmem:[%s11630_s8 + $0x1a4] ss:$8 sps:$4 sm:$0xff]  }
  0x66   : > { %7574 = vmatpush1.bf16.msra.mxu0 %v9867_v32  ;;  %6919 = vmatprep.subr.bf16.mxu1 %v9868_v33  ;;  %v9941_v32 = vld [vmem:[%s11630_s8 + $0x1134] ss:$8 sps:$4 sm:$0xff]   ;;  %v9936_v33 = vld [vmem:[%s11630_s8 + $0x130] ss:$8 sps:$4 sm:$0xff]  }
  0x67   : > { %7575 = vmatprep.subr.bf16.mxu0 %v9870_v34  ;;  %v9939_v34 = vld [vmem:[%s11630_s8 + $0x1130] ss:$8 sps:$4 sm:$0xff]  }
  0x69   : > { %6920 = vmatpush1.bf16.msra.mxu1 %v9872_v35  ;;  %v9944_v35 = vld [vmem:[%s11630_s8 + $0x144] ss:$8 sps:$4 sm:$0xff]  }
  0x6a   : > { %7576 = vmatpush1.bf16.msra.mxu0 %v9873_v36  ;;  %6921 = vmatprep.subr.bf16.mxu1 %v9874_v40  ;;  %v9947_v36 = vld [vmem:[%s11630_s8 + $0x1144] ss:$8 sps:$4 sm:$0xff]   ;;  %v9953_v40 = vld [vmem:[%s11630_s8 + $0x1154] ss:$8 sps:$4 sm:$0xff]  }
  0x6b   : > { %7577 = vmatprep.subr.bf16.mxu0 %v9876_v41  ;;  %v9948_v41 = vld [vmem:[%s11630_s8 + $0x150] ss:$8 sps:$4 sm:$0xff]  }
  0x6d   : > { %6922 = vmatpush1.bf16.msra.mxu1 %v9878_v42  ;;  %v9951_v42 = vld [vmem:[%s11630_s8 + $0x1150] ss:$8 sps:$4 sm:$0xff]  }
  0x6e   : > { %7578 = vmatpush1.bf16.msra.mxu0 %v9879_v45  ;;  %6923 = vmatprep.subr.bf16.mxu1 %v9880_v46  ;;  %v9959_v45 = vld [vmem:[%s11630_s8 + $0x1164] ss:$8 sps:$4 sm:$0xff]   ;;  %v9954_v46 = vld [vmem:[%s11630_s8 + $0x160] ss:$8 sps:$4 sm:$0xff]  }
  0x6f   : > { %7579 = vmatprep.subr.bf16.mxu0 %v9882_v47  ;;  %v9957_v47 = vld [vmem:[%s11630_s8 + $0x1160] ss:$8 sps:$4 sm:$0xff]  }
  0x71   : > { %6924 = vmatpush1.bf16.msra.mxu1 %v9884_v48  ;;  %v9962_v48 = vld [vmem:[%s11630_s8 + $0x174] ss:$8 sps:$4 sm:$0xff]  }
  0x72   : > { %7580 = vmatpush1.bf16.msra.mxu0 %v9885_v49  ;;  %6925 = vmatprep.subr.bf16.mxu1 %v9886_v51  ;;  %v9965_v49 = vld [vmem:[%s11630_s8 + $0x1174] ss:$8 sps:$4 sm:$0xff]   ;;  %v9960_v51 = vld [vmem:[%s11630_s8 + $0x170] ss:$8 sps:$4 sm:$0xff]  }
  0x73   : > { %7581 = vmatprep.subr.bf16.mxu0 %v9888_v52  ;;  %v9963_v52 = vld [vmem:[%s11630_s8 + $0x1170] ss:$8 sps:$4 sm:$0xff]  }
  0x75   : > { %6926 = vmatpush1.bf16.msra.mxu1 %v9890_v54  ;;  %v9968_v54 = vld [vmem:[%s11630_s8 + $0x184] ss:$8 sps:$4 sm:$0xff]  }
  0x76   : > { %7582 = vmatpush1.bf16.msra.mxu0 %v9891_v56  ;;  %6927 = vmatprep.subr.bf16.mxu1 %v9892_v58  ;;  %v9966_v56 = vld [vmem:[%s11630_s8 + $0x180] ss:$8 sps:$4 sm:$0xff]  }
  0x77   : > { %7583 = vmatprep.subr.bf16.mxu0 %v9894_v59  ;;  %v9969_v58 = vld [vmem:[%s11630_s8 + $0x1180] ss:$8 sps:$4 sm:$0xff]   ;;  %v9974_v59 = vld [vmem:[%s11630_s8 + $0x194] ss:$8 sps:$4 sm:$0xff]  }
  0x79   : > { %6928 = vmatpush1.bf16.msra.mxu1 %v9896_v0  ;;  %v9983_v0 = vld [vmem:[%s11630_s8 + $0x11a4] ss:$8 sps:$4 sm:$0xff]  }
  0x7a   : > { %7584 = vmatpush1.bf16.msra.mxu0 %v9897_v1  ;;  %6929 = vmatprep.subr.bf16.mxu1 %v9898_v2  ;;  %v9978_v1 = vld [vmem:[%s11630_s8 + $0x1a0] ss:$8 sps:$4 sm:$0xff]  }
  0x7b   : > { %7585 = vmatprep.subr.bf16.mxu0 %v9900_v3  ;;  %v9981_v2 = vld [vmem:[%s11630_s8 + $0x11a0] ss:$8 sps:$4 sm:$0xff]   ;;  %v9986_v3 = vld [vmem:[%s11630_s8 + $0x1b4] ss:$8 sps:$4 sm:$0xff]  }
  0x7d   : > { %6930 = vmatpush1.bf16.msra.mxu1 %v9902_v5  ;;  %v9984_v5 = vld [vmem:[%s11630_s8 + $0x1b0] ss:$8 sps:$4 sm:$0xff]  }
  0x7e   : > { %7586 = vmatpush1.bf16.msra.mxu0 %v9903_v6  ;;  %6931 = vmatprep.subr.bf16.mxu1 %v9904_v7  ;;  %v9987_v6 = vld [vmem:[%s11630_s8 + $0x11b0] ss:$8 sps:$4 sm:$0xff]   ;;  %v9992_v7 = vld [vmem:[%s11630_s8 + $0x1c4] ss:$8 sps:$4 sm:$0xff]  }
  0x7f   : > { %7587 = vmatprep.subr.bf16.mxu0 %v9906_v8  ;;  %v9995_v8 = vld [vmem:[%s11630_s8 + $0x11c4] ss:$8 sps:$4 sm:$0xff]  }
  0x81   : > { %6932 = vmatpush1.bf16.msra.mxu1 %v9908_v9  ;;  %v9990_v9 = vld [vmem:[%s11630_s8 + $0x1c0] ss:$8 sps:$4 sm:$0xff]  }
  0x82   : > { %7588 = vmatpush1.bf16.msra.mxu0 %v9909_v10  ;;  %6933 = vmatprep.subr.bf16.mxu1 %v9910_v11  ;;  %v9993_v10 = vld [vmem:[%s11630_s8 + $0x11c0] ss:$8 sps:$4 sm:$0xff]   ;;  %v9998_v11 = vld [vmem:[%s11630_s8 + $0x1d4] ss:$8 sps:$4 sm:$0xff]  }
  0x83   : > { %7589 = vmatprep.subr.bf16.mxu0 %v9912_v12  ;;  %v10001_v12 = vld [vmem:[%s11630_s8 + $0x11d4] ss:$8 sps:$4 sm:$0xff]  }
  0x85   : > { %6934 = vmatpush1.bf16.msra.mxu1 %v9914_v13  ;;  %v9996_v13 = vld [vmem:[%s11630_s8 + $0x1d0] ss:$8 sps:$4 sm:$0xff]  }
  0x86   : > { %7590 = vmatpush1.bf16.msra.mxu0 %v9915_v14  ;;  %6944 = vmatprep.subr.bf16.mxu1 %v9919_v15  ;;  %v9999_v14 = vld [vmem:[%s11630_s8 + $0x11d0] ss:$8 sps:$4 sm:$0xff]   ;;  %v10004_v15 = vld [vmem:[%s11630_s8 + $0x1e4] ss:$8 sps:$4 sm:$0xff]  }
  0x87   : > { %7600 = vmatprep.subr.bf16.mxu0 %v9923_v16  ;;  %v10007_v16 = vld [vmem:[%s11630_s8 + $0x11e4] ss:$8 sps:$4 sm:$0xff]  }
  0x88   : > { %6936 = vmatmul.mubr.bf16.vlgmr.msra.gmra.mrb[0].mxu1 %v11747_v17 }
  0x89   : > { %7592 = vmatmul.mubr.bf16.vlgmr.msra.gmra.mrb[0].mxu0 %v11750_v18  ;;  %6945 = vmatpush1.bf16.msra.mxu1 %v9917_v19  ;;  %v1327_v19 = vcombine.high %v11715_v53, %v11715_v53  ;;  %v10008_v53 = vld [vmem:[%s11630_s8 + $0x1f0] ss:$8 sps:$4 sm:$0xff]  }
  0x8a   : > { %7601 = vmatpush1.bf16.msra.mxu0 %v9921_v20  ;;  %6946 = vmatprep.subr.bf16.mxu1 %v9926_v21  ;;  %v1523_v20 = vcombine.high %v11722_v57, %v11722_v57  ;;  %v10002_v21 = vld [vmem:[%s11630_s8 + $0x1e0] ss:$8 sps:$4 sm:$0xff]   ;;  %v10011_v57 = vld [vmem:[%s11630_s8 + $0x11f0] ss:$8 sps:$4 sm:$0xff]  }
  0x8b   : > { %7602 = vmatprep.subr.bf16.mxu0 %v9929_v22  ;;  %6976 = vmatprep.mubr.bf16.mxu1 %v1374_v23  ;;  %v10005_v22 = vld [vmem:[%s11630_s8 + $0x11e0] ss:$8 sps:$4 sm:$0xff]   ;;  %v10010_v23 = vld [vmem:[%s11630_s8 + $0x1f4] ss:$8 sps:$4 sm:$0xff]  }
  0x8c   : > { %7632 = vmatprep.mubr.bf16.mxu0 %v1570_v24  ;;  %v10013_v24 = vld [vmem:[%s11630_s8 + $0x11f4] ss:$8 sps:$4 sm:$0xff]  }
  0x8d   : > { %6947 = vmatpush1.bf16.msra.mxu1 %v9924_v25  ;;  %v11819_v25 = vrot.slane %v1327_v19, %v11710_v50  ;;  %v10080_v19 = vld [vmem:[%s11630_s8 + $0x2b0] ss:$8 sps:$4 sm:$0xff]  }
  0x8e   : > { %7603 = vmatpush1.bf16.msra.mxu0 %v9927_v26  ;;  %6948 = vmatprep.subr.bf16.mxu1 %v9932_v27  ;;  %v11822_v26 = vrot.slane %v1523_v20, %v11710_v50  ;;  %v10016_v27 = vld [vmem:[%s11630_s8 + $0x204] ss:$8 sps:$4 sm:$0xff]   ;;  %v10083_v20 = vld [vmem:[%s11630_s8 + $0x12b0] ss:$8 sps:$4 sm:$0xff]  }
  0x8f   : > { %7604 = vmatprep.subr.bf16.mxu0 %v9935_v28  ;;  %v10019_v28 = vld [vmem:[%s11630_s8 + $0x1204] ss:$8 sps:$4 sm:$0xff]  }
  0x91   : > { %6949 = vmatpush1.bf16.msra.mxu1 %v9930_v29  ;;  %v1343_v29 = vcombine.high %v11819_v25, %v11819_v25 }
  0x92   : > { %7605 = vmatpush1.bf16.msra.mxu0 %v9933_v30  ;;  %6950 = vmatprep.subr.bf16.mxu1 %v9938_v31  ;;  %v1539_v30 = vcombine.high %v11822_v26, %v11822_v26  ;;  %v1372_v31 = vcombine.high %v11747_v17, %v11747_v17 }
  0x93   : > { %7606 = vmatprep.subr.bf16.mxu0 %v9941_v32  ;;  %v1568_v32 = vcombine.high %v11750_v18, %v11750_v18  ;;  %v10020_v18 = vld [vmem:[%s11630_s8 + $0x210] ss:$8 sps:$4 sm:$0xff]  }
  0x94   : > { %v11844_v17 = vrot.slane %v1539_v30, %v11710_v50  ;;  %v10103_v30 = vld [vmem:[%s11630_s8 + $0x12e4] ss:$8 sps:$4 sm:$0xff]  }
  0x95   : > { %6951 = vmatpush1.bf16.msra.mxu1 %v9936_v33  ;;  %v10014_v33 = vld [vmem:[%s11630_s8 + $0x200] ss:$8 sps:$4 sm:$0xff]  }
  0x96   : > { %7607 = vmatpush1.bf16.msra.mxu0 %v9939_v34  ;;  %6952 = vmatprep.subr.bf16.mxu1 %v9944_v35  ;;  %v10017_v34 = vld [vmem:[%s11630_s8 + $0x1200] ss:$8 sps:$4 sm:$0xff]   ;;  %v10022_v35 = vld [vmem:[%s11630_s8 + $0x214] ss:$8 sps:$4 sm:$0xff]  }
  0x97   : > { %7608 = vmatprep.subr.bf16.mxu0 %v9947_v36  ;;  %v10025_v36 = vld [vmem:[%s11630_s8 + $0x1214] ss:$8 sps:$4 sm:$0xff]  }
  0x99   : > { %6953 = vmatpush1.bf16.msra.mxu1 %v9942_v37  ;;  %v11841_v37 = vrot.slane %v1343_v29, %v11710_v50  ;;  %v10100_v29 = vld [vmem:[%s11630_s8 + $0x2e4] ss:$8 sps:$4 sm:$0xff]  }
  0x9a   : > { %7609 = vmatpush1.bf16.msra.mxu0 %v9945_v38  ;;  %6954 = vmatprep.subr.bf16.mxu1 %v9950_v39  ;;  %v10023_v38 = vld [vmem:[%s11630_s8 + $0x1210] ss:$8 sps:$4 sm:$0xff]   ;;  %v10028_v39 = vld [vmem:[%s11630_s8 + $0x224] ss:$8 sps:$4 sm:$0xff]  }
  0x9b   : > { %7610 = vmatprep.subr.bf16.mxu0 %v9953_v40  ;;  %v10031_v40 = vld [vmem:[%s11630_s8 + $0x1224] ss:$8 sps:$4 sm:$0xff]  }
  0x9d   : > { %6955 = vmatpush1.bf16.msra.mxu1 %v9948_v41  ;;  %v10026_v41 = vld [vmem:[%s11630_s8 + $0x220] ss:$8 sps:$4 sm:$0xff]  }
  0x9e   : > { %7611 = vmatpush1.bf16.msra.mxu0 %v9951_v42  ;;  %6956 = vmatprep.subr.bf16.mxu1 %v9956_v43  ;;  %v10029_v42 = vld [vmem:[%s11630_s8 + $0x1220] ss:$8 sps:$4 sm:$0xff]   ;;  %v10034_v43 = vld [vmem:[%s11630_s8 + $0x234] ss:$8 sps:$4 sm:$0xff]  }
  0x9f   : > { %7612 = vmatprep.subr.bf16.mxu0 %v9959_v45  ;;  %v10037_v45 = vld [vmem:[%s11630_s8 + $0x1234] ss:$8 sps:$4 sm:$0xff]  }
  0xa1   : > { %6957 = vmatpush1.bf16.msra.mxu1 %v9954_v46  ;;  %v10032_v46 = vld [vmem:[%s11630_s8 + $0x230] ss:$8 sps:$4 sm:$0xff]  }
  0xa2   : > { %7613 = vmatpush1.bf16.msra.mxu0 %v9957_v47  ;;  %6958 = vmatprep.subr.bf16.mxu1 %v9962_v48  ;;  %v10035_v47 = vld [vmem:[%s11630_s8 + $0x1230] ss:$8 sps:$4 sm:$0xff]   ;;  %v10040_v48 = vld [vmem:[%s11630_s8 + $0x244] ss:$8 sps:$4 sm:$0xff]  }
  0xa3   : > { %7614 = vmatprep.subr.bf16.mxu0 %v9965_v49  ;;  %v10043_v49 = vld [vmem:[%s11630_s8 + $0x1244] ss:$8 sps:$4 sm:$0xff]  }
  0xa5   : > { %6959 = vmatpush1.bf16.msra.mxu1 %v9960_v51  ;;  %v10038_v51 = vld [vmem:[%s11630_s8 + $0x240] ss:$8 sps:$4 sm:$0xff]  }
  0xa6   : > { %7615 = vmatpush1.bf16.msra.mxu0 %v9963_v52  ;;  %6960 = vmatprep.subr.bf16.mxu1 %v9968_v54  ;;  %v10041_v52 = vld [vmem:[%s11630_s8 + $0x1240] ss:$8 sps:$4 sm:$0xff]   ;;  %v10046_v54 = vld [vmem:[%s11630_s8 + $0x254] ss:$8 sps:$4 sm:$0xff]  }
  0xa7   : > { %7616 = vmatprep.subr.bf16.mxu0 %v9971_v55  ;;  %v10049_v55 = vld [vmem:[%s11630_s8 + $0x1254] ss:$8 sps:$4 sm:$0xff]  }
  0xa9   : > { %6961 = vmatpush1.bf16.msra.mxu1 %v9966_v56  ;;  %v10044_v56 = vld [vmem:[%s11630_s8 + $0x250] ss:$8 sps:$4 sm:$0xff]  }
  0xaa   : > { %7617 = vmatpush1.bf16.msra.mxu0 %v9969_v58  ;;  %6962 = vmatprep.subr.bf16.mxu1 %v9974_v59  ;;  %v10047_v58 = vld [vmem:[%s11630_s8 + $0x1250] ss:$8 sps:$4 sm:$0xff]   ;;  %v10052_v59 = vld [vmem:[%s11630_s8 + $0x264] ss:$8 sps:$4 sm:$0xff]  }
  0xab   : > { %7618 = vmatprep.subr.bf16.mxu0 %v9977_v60  ;;  %v10055_v60 = vld [vmem:[%s11630_s8 + $0x1264] ss:$8 sps:$4 sm:$0xff]  }
  0xad   : > { %6963 = vmatpush1.bf16.msra.mxu1 %v9972_v61  ;;  %v10050_v61 = vld [vmem:[%s11630_s8 + $0x260] ss:$8 sps:$4 sm:$0xff]  }
  0xae   : > { %7619 = vmatpush1.bf16.msra.mxu0 %v9975_v62  ;;  %6964 = vmatprep.subr.bf16.mxu1 %v9980_v63  ;;  %v10053_v62 = vld [vmem:[%s11630_s8 + $0x1260] ss:$8 sps:$4 sm:$0xff]   ;;  %v10058_v63 = vld [vmem:[%s11630_s8 + $0x274] ss:$8 sps:$4 sm:$0xff]  }
  0xaf   : > { %7620 = vmatprep.subr.bf16.mxu0 %v9983_v0  ;;  %v10061_v0 = vld [vmem:[%s11630_s8 + $0x1274] ss:$8 sps:$4 sm:$0xff]  }
  0xb1   : > { %6965 = vmatpush1.bf16.msra.mxu1 %v9978_v1  ;;  %v10056_v1 = vld [vmem:[%s11630_s8 + $0x270] ss:$8 sps:$4 sm:$0xff]  }
  0xb2   : > { %7621 = vmatpush1.bf16.msra.mxu0 %v9981_v2  ;;  %6966 = vmatprep.subr.bf16.mxu1 %v9986_v3  ;;  %v10059_v2 = vld [vmem:[%s11630_s8 + $0x1270] ss:$8 sps:$4 sm:$0xff]   ;;  %v10064_v3 = vld [vmem:[%s11630_s8 + $0x284] ss:$8 sps:$4 sm:$0xff]  }
  0xb3   : > { %7622 = vmatprep.subr.bf16.mxu0 %v9989_v4  ;;  %v10067_v4 = vld [vmem:[%s11630_s8 + $0x1284] ss:$8 sps:$4 sm:$0xff]  }
  0xb5   : > { %6967 = vmatpush1.bf16.msra.mxu1 %v9984_v5  ;;  %v10062_v5 = vld [vmem:[%s11630_s8 + $0x280] ss:$8 sps:$4 sm:$0xff]  }
  0xb6   : > { %7623 = vmatpush1.bf16.msra.mxu0 %v9987_v6  ;;  %6968 = vmatprep.subr.bf16.mxu1 %v9992_v7  ;;  %v10065_v6 = vld [vmem:[%s11630_s8 + $0x1280] ss:$8 sps:$4 sm:$0xff]   ;;  %v10070_v7 = vld [vmem:[%s11630_s8 + $0x294] ss:$8 sps:$4 sm:$0xff]  }
  0xb7   : > { %7624 = vmatprep.subr.bf16.mxu0 %v9995_v8  ;;  %v10073_v8 = vld [vmem:[%s11630_s8 + $0x1294] ss:$8 sps:$4 sm:$0xff]  }
  0xb9   : > { %6969 = vmatpush1.bf16.msra.mxu1 %v9990_v9  ;;  %v10068_v9 = vld [vmem:[%s11630_s8 + $0x290] ss:$8 sps:$4 sm:$0xff]  }
  0xba   : > { %7625 = vmatpush1.bf16.msra.mxu0 %v9993_v10  ;;  %6970 = vmatprep.subr.bf16.mxu1 %v9998_v11  ;;  %v10071_v10 = vld [vmem:[%s11630_s8 + $0x1290] ss:$8 sps:$4 sm:$0xff]   ;;  %v10076_v11 = vld [vmem:[%s11630_s8 + $0x2a4] ss:$8 sps:$4 sm:$0xff]  }
  0xbb   : > { %7626 = vmatprep.subr.bf16.mxu0 %v10001_v12  ;;  %v10079_v12 = vld [vmem:[%s11630_s8 + $0x12a4] ss:$8 sps:$4 sm:$0xff]  }
  0xbd   : > { %6971 = vmatpush1.bf16.msra.mxu1 %v9996_v13  ;;  %v10074_v13 = vld [vmem:[%s11630_s8 + $0x2a0] ss:$8 sps:$4 sm:$0xff]  }
  0xbe   : > { %7627 = vmatpush1.bf16.msra.mxu0 %v9999_v14  ;;  %6972 = vmatprep.subr.bf16.mxu1 %v10004_v15  ;;  %v10077_v14 = vld [vmem:[%s11630_s8 + $0x12a0] ss:$8 sps:$4 sm:$0xff]   ;;  %v10082_v15 = vld [vmem:[%s11630_s8 + $0x2b4] ss:$8 sps:$4 sm:$0xff]  }
  0xbf   : > { %7628 = vmatprep.subr.bf16.mxu0 %v10007_v16  ;;  %v10085_v16 = vld [vmem:[%s11630_s8 + $0x12b4] ss:$8 sps:$4 sm:$0xff]  }
  0xc1   : > { %6973 = vmatpush1.bf16.msra.mxu1 %v10002_v21  ;;  %v10088_v21 = vld [vmem:[%s11630_s8 + $0x2c4] ss:$8 sps:$4 sm:$0xff]  }
  0xc2   : > { %7629 = vmatpush1.bf16.msra.mxu0 %v10005_v22  ;;  %6974 = vmatprep.subr.bf16.mxu1 %v10010_v23  ;;  %v10091_v22 = vld [vmem:[%s11630_s8 + $0x12c4] ss:$8 sps:$4 sm:$0xff]   ;;  %v10086_v23 = vld [vmem:[%s11630_s8 + $0x2c0] ss:$8 sps:$4 sm:$0xff]  }
  0xc3   : > { %7630 = vmatprep.subr.bf16.mxu0 %v10013_v24  ;;  %v10089_v24 = vld [vmem:[%s11630_s8 + $0x12c0] ss:$8 sps:$4 sm:$0xff]  }
  0xc5   : > { %6975 = vmatpush1.bf16.msra.mxu1 %v10008_v53  ;;  %v10094_v53 = vld [vmem:[%s11630_s8 + $0x2d4] ss:$8 sps:$4 sm:$0xff]  }
  0xc6   : > { %7631 = vmatpush1.bf16.msra.mxu0 %v10011_v57  ;;  %6985 = vmatprep.subr.bf16.mxu1 %v10016_v27  ;;  %v10097_v57 = vld [vmem:[%s11630_s8 + $0x12d4] ss:$8 sps:$4 sm:$0xff]   ;;  %v10092_v27 = vld [vmem:[%s11630_s8 + $0x2d0] ss:$8 sps:$4 sm:$0xff]  }
  0xc7   : > { %7641 = vmatprep.subr.bf16.mxu0 %v10019_v28  ;;  %v10095_v28 = vld [vmem:[%s11630_s8 + $0x12d0] ss:$8 sps:$4 sm:$0xff]  }
  0xc8   : > { %6977 = vmatmul.mubr.bf16.vlgmr.msra.gmra.mrb[0].mxu1 %v1372_v31  ;;  %v10098_v31 = vld [vmem:[%s11630_s8 + $0x2e0] ss:$8 sps:$4 sm:$0xff]  }
  0xc9   : > { %7633 = vmatmul.mubr.bf16.vlgmr.msra.gmra.mrb[0].mxu0 %v1568_v32  ;;  %6986 = vmatpush1.bf16.msra.mxu1 %v10014_v33  ;;  %v10101_v32 = vld [vmem:[%s11630_s8 + $0x12e0] ss:$8 sps:$4 sm:$0xff]   ;;  %v10106_v33 = vld [vmem:[%s11630_s8 + $0x2f4] ss:$8 sps:$4 sm:$0xff]  }
  0xca   : > { %7642 = vmatpush1.bf16.msra.mxu0 %v10017_v34  ;;  %6987 = vmatprep.subr.bf16.mxu1 %v10022_v35  ;;  %v10109_v34 = vld [vmem:[%s11630_s8 + $0x12f4] ss:$8 sps:$4 sm:$0xff]   ;;  %v10104_v35 = vld [vmem:[%s11630_s8 + $0x2f0] ss:$8 sps:$4 sm:$0xff]  }
  0xcb   : > { %7643 = vmatprep.subr.bf16.mxu0 %v10025_v36  ;;  %7017 = vmatprep.mubr.bf16.mxu1 %v11841_v37  ;;  %v10107_v36 = vld [vmem:[%s11630_s8 + $0x12f0] ss:$8 sps:$4 sm:$0xff]  }
  0xcc   : > { %7673 = vmatprep.mubr.bf16.mxu0 %v11844_v17 }
  0xcd   : > { %6988 = vmatpush1.bf16.msra.mxu1 %v10020_v18  ;;  %v10112_v18 = vld [vmem:[%s11630_s8 + $0x304] ss:$8 sps:$4 sm:$0xff]  }
  0xce   : > { %7644 = vmatpush1.bf16.msra.mxu0 %v10023_v38  ;;  %6989 = vmatprep.subr.bf16.mxu1 %v10028_v39  ;;  %v10115_v38 = vld [vmem:[%s11630_s8 + $0x1304] ss:$8 sps:$4 sm:$0xff]   ;;  %v11910_v39 = vrot.slane %v11819_v25, %v11710_v50  ;;  %v1375_v25 = vcombine.high %v11841_v37, %v11841_v37 }
  0xcf   : > { %7645 = vmatprep.subr.bf16.mxu0 %v10031_v40  ;;  %v11914_v40 = vrot.slane %v11822_v26, %v11710_v50  ;;  %v10116_v26 = vld [vmem:[%s11630_s8 + $0x310] ss:$8 sps:$4 sm:$0xff]   ;;  %v10124_v37 = vld [vmem:[%s11630_s8 + $0x324] ss:$8 sps:$4 sm:$0xff]  }
  0xd1   : > { %6990 = vmatpush1.bf16.msra.mxu1 %v10026_v41  ;;  %v10110_v41 = vld [vmem:[%s11630_s8 + $0x300] ss:$8 sps:$4 sm:$0xff]  }
  0xd2   : > { %7646 = vmatpush1.bf16.msra.mxu0 %v10029_v42  ;;  %6991 = vmatprep.subr.bf16.mxu1 %v10034_v43  ;;  %v10113_v42 = vld [vmem:[%s11630_s8 + $0x1300] ss:$8 sps:$4 sm:$0xff]   ;;  %v10118_v43 = vld [vmem:[%s11630_s8 + $0x314] ss:$8 sps:$4 sm:$0xff]  }
  0xd3   : > { %7647 = vmatprep.subr.bf16.mxu0 %v10037_v45  ;;  %v10121_v45 = vld [vmem:[%s11630_s8 + $0x1314] ss:$8 sps:$4 sm:$0xff]  }
  0xd5   : > { %6992 = vmatpush1.bf16.msra.mxu1 %v10032_v46  ;;  %v1571_v46 = vcombine.high %v11844_v17, %v11844_v17  ;;  %v10122_v17 = vld [vmem:[%s11630_s8 + $0x320] ss:$8 sps:$4 sm:$0xff]  }
  0xd6   : > { %7648 = vmatpush1.bf16.msra.mxu0 %v10035_v47  ;;  %6993 = vmatprep.subr.bf16.mxu1 %v10040_v48  ;;  %v10119_v47 = vld [vmem:[%s11630_s8 + $0x1310] ss:$8 sps:$4 sm:$0xff]   ;;  %v10127_v48 = vld [vmem:[%s11630_s8 + $0x1324] ss:$8 sps:$4 sm:$0xff]  }
  0xd7   : > { %7649 = vmatprep.subr.bf16.mxu0 %v10043_v49  ;;  %v10125_v49 = vld [vmem:[%s11630_s8 + $0x1320] ss:$8 sps:$4 sm:$0xff]  }
  0xd9   : > { %6994 = vmatpush1.bf16.msra.mxu1 %v10038_v51  ;;  %v10130_v51 = vld [vmem:[%s11630_s8 + $0x334] ss:$8 sps:$4 sm:$0xff]  }
  0xda   : > { %7650 = vmatpush1.bf16.msra.mxu0 %v10041_v52  ;;  %6995 = vmatprep.subr.bf16.mxu1 %v10046_v54  ;;  %v10133_v52 = vld [vmem:[%s11630_s8 + $0x1334] ss:$8 sps:$4 sm:$0xff]   ;;  %v10128_v54 = vld [vmem:[%s11630_s8 + $0x330] ss:$8 sps:$4 sm:$0xff]  }
  0xdb   : > { %7651 = vmatprep.subr.bf16.mxu0 %v10049_v55  ;;  %v10131_v55 = vld [vmem:[%s11630_s8 + $0x1330] ss:$8 sps:$4 sm:$0xff]  }
  0xdd   : > { %6996 = vmatpush1.bf16.msra.mxu1 %v10044_v56  ;;  %v10136_v56 = vld [vmem:[%s11630_s8 + $0x344] ss:$8 sps:$4 sm:$0xff]  }
  0xde   : > { %7652 = vmatpush1.bf16.msra.mxu0 %v10047_v58  ;;  %6997 = vmatprep.subr.bf16.mxu1 %v10052_v59  ;;  %v10139_v58 = vld [vmem:[%s11630_s8 + $0x1344] ss:$8 sps:$4 sm:$0xff]   ;;  %v10134_v59 = vld [vmem:[%s11630_s8 + $0x340] ss:$8 sps:$4 sm:$0xff]  }
  0xdf   : > { %7653 = vmatprep.subr.bf16.mxu0 %v10055_v60  ;;  %v10137_v60 = vld [vmem:[%s11630_s8 + $0x1340] ss:$8 sps:$4 sm:$0xff]  }
  0xe1   : > { %6998 = vmatpush1.bf16.msra.mxu1 %v10050_v61  ;;  %v10142_v61 = vld [vmem:[%s11630_s8 + $0x354] ss:$8 sps:$4 sm:$0xff]  }
  0xe2   : > { %7654 = vmatpush1.bf16.msra.mxu0 %v10053_v62  ;;  %6999 = vmatprep.subr.bf16.mxu1 %v10058_v63  ;;  %v10145_v62 = vld [vmem:[%s11630_s8 + $0x1354] ss:$8 sps:$4 sm:$0xff]   ;;  %v10140_v63 = vld [vmem:[%s11630_s8 + $0x350] ss:$8 sps:$4 sm:$0xff]  }
  0xe3   : > { %7655 = vmatprep.subr.bf16.mxu0 %v10061_v0  ;;  %v10143_v0 = vld [vmem:[%s11630_s8 + $0x1350] ss:$8 sps:$4 sm:$0xff]  }
  0xe5   : > { %7000 = vmatpush1.bf16.msra.mxu1 %v10056_v1  ;;  %v10148_v1 = vld [vmem:[%s11630_s8 + $0x364] ss:$8 sps:$4 sm:$0xff]  }
  0xe6   : > { %7656 = vmatpush1.bf16.msra.mxu0 %v10059_v2  ;;  %7001 = vmatprep.subr.bf16.mxu1 %v10064_v3  ;;  %v10151_v2 = vld [vmem:[%s11630_s8 + $0x1364] ss:$8 sps:$4 sm:$0xff]   ;;  %v10146_v3 = vld [vmem:[%s11630_s8 + $0x360] ss:$8 sps:$4 sm:$0xff]  }
  0xe7   : > { %7657 = vmatprep.subr.bf16.mxu0 %v10067_v4  ;;  %v10149_v4 = vld [vmem:[%s11630_s8 + $0x1360] ss:$8 sps:$4 sm:$0xff]  }
  0xe9   : > { %7002 = vmatpush1.bf16.msra.mxu1 %v10062_v5  ;;  %v10154_v5 = vld [vmem:[%s11630_s8 + $0x374] ss:$8 sps:$4 sm:$0xff]  }
  0xea   : > { %7658 = vmatpush1.bf16.msra.mxu0 %v10065_v6  ;;  %7003 = vmatprep.subr.bf16.mxu1 %v10070_v7  ;;  %v10157_v6 = vld [vmem:[%s11630_s8 + $0x1374] ss:$8 sps:$4 sm:$0xff]   ;;  %v10152_v7 = vld [vmem:[%s11630_s8 + $0x370] ss:$8 sps:$4 sm:$0xff]  }
  0xeb   : > { %7659 = vmatprep.subr.bf16.mxu0 %v10073_v8  ;;  %v10155_v8 = vld [vmem:[%s11630_s8 + $0x1370] ss:$8 sps:$4 sm:$0xff]  }
  0xed   : > { %7004 = vmatpush1.bf16.msra.mxu1 %v10068_v9  ;;  %v10160_v9 = vld [vmem:[%s11630_s8 + $0x384] ss:$8 sps:$4 sm:$0xff]  }
  0xee   : > { %7660 = vmatpush1.bf16.msra.mxu0 %v10071_v10  ;;  %7005 = vmatprep.subr.bf16.mxu1 %v10076_v11  ;;  %v10163_v10 = vld [vmem:[%s11630_s8 + $0x1384] ss:$8 sps:$4 sm:$0xff]   ;;  %v10158_v11 = vld [vmem:[%s11630_s8 + $0x380] ss:$8 sps:$4 sm:$0xff]  }
  0xef   : > { %7661 = vmatprep.subr.bf16.mxu0 %v10079_v12  ;;  %v10161_v12 = vld [vmem:[%s11630_s8 + $0x1380] ss:$8 sps:$4 sm:$0xff]  }
  0xf1   : > { %7006 = vmatpush1.bf16.msra.mxu1 %v10074_v13  ;;  %v10166_v13 = vld [vmem:[%s11630_s8 + $0x394] ss:$8 sps:$4 sm:$0xff]  }
  0xf2   : > { %7662 = vmatpush1.bf16.msra.mxu0 %v10077_v14  ;;  %7007 = vmatprep.subr.bf16.mxu1 %v10082_v15  ;;  %v10169_v14 = vld [vmem:[%s11630_s8 + $0x1394] ss:$8 sps:$4 sm:$0xff]   ;;  %v10164_v15 = vld [vmem:[%s11630_s8 + $0x390] ss:$8 sps:$4 sm:$0xff]  }
  0xf3   : > { %7663 = vmatprep.subr.bf16.mxu0 %v10085_v16  ;;  %v10167_v16 = vld [vmem:[%s11630_s8 + $0x1390] ss:$8 sps:$4 sm:$0xff]  }
  0xf5   : > { %7008 = vmatpush1.bf16.msra.mxu1 %v10080_v19  ;;  %v10172_v19 = vld [vmem:[%s11630_s8 + $0x3a4] ss:$8 sps:$4 sm:$0xff]  }
  0xf6   : > { %7664 = vmatpush1.bf16.msra.mxu0 %v10083_v20  ;;  %7009 = vmatprep.subr.bf16.mxu1 %v10088_v21  ;;  %v10175_v20 = vld [vmem:[%s11630_s8 + $0x13a4] ss:$8 sps:$4 sm:$0xff]   ;;  %v10170_v21 = vld [vmem:[%s11630_s8 + $0x3a0] ss:$8 sps:$4 sm:$0xff]  }
  0xf7   : > { %7665 = vmatprep.subr.bf16.mxu0 %v10091_v22  ;;  %v10173_v22 = vld [vmem:[%s11630_s8 + $0x13a0] ss:$8 sps:$4 sm:$0xff]  }
  0xf9   : > { %7010 = vmatpush1.bf16.msra.mxu1 %v10086_v23  ;;  %v10178_v23 = vld [vmem:[%s11630_s8 + $0x3b4] ss:$8 sps:$4 sm:$0xff]  }
  0xfa   : > { %7666 = vmatpush1.bf16.msra.mxu0 %v10089_v24  ;;  %7011 = vmatprep.subr.bf16.mxu1 %v10094_v53  ;;  %v10181_v24 = vld [vmem:[%s11630_s8 + $0x13b4] ss:$8 sps:$4 sm:$0xff]   ;;  %v10176_v53 = vld [vmem:[%s11630_s8 + $0x3b0] ss:$8 sps:$4 sm:$0xff]  }
  0xfb   : > { %7667 = vmatprep.subr.bf16.mxu0 %v10097_v57  ;;  %v10179_v57 = vld [vmem:[%s11630_s8 + $0x13b0] ss:$8 sps:$4 sm:$0xff]  }
  0xfd   : > { %7012 = vmatpush1.bf16.msra.mxu1 %v10092_v27  ;;  %v10184_v27 = vld [vmem:[%s11630_s8 + $0x3c4] ss:$8 sps:$4 sm:$0xff]  }
  0xfe   : > { %7668 = vmatpush1.bf16.msra.mxu0 %v10095_v28  ;;  %7013 = vmatprep.subr.bf16.mxu1 %v10100_v29  ;;  %v10187_v28 = vld [vmem:[%s11630_s8 + $0x13c4] ss:$8 sps:$4 sm:$0xff]   ;;  %v10182_v29 = vld [vmem:[%s11630_s8 + $0x3c0] ss:$8 sps:$4 sm:$0xff]  }
  0xff   : > { %7669 = vmatprep.subr.bf16.mxu0 %v10103_v30  ;;  %v10185_v30 = vld [vmem:[%s11630_s8 + $0x13c0] ss:$8 sps:$4 sm:$0xff]  }
 0x101   : > { %7014 = vmatpush1.bf16.msra.mxu1 %v10098_v31  ;;  %v10190_v31 = vld [vmem:[%s11630_s8 + $0x3d4] ss:$8 sps:$4 sm:$0xff]  }
 0x102   : > { %7670 = vmatpush1.bf16.msra.mxu0 %v10101_v32  ;;  %7015 = vmatprep.subr.bf16.mxu1 %v10106_v33  ;;  %v10193_v32 = vld [vmem:[%s11630_s8 + $0x13d4] ss:$8 sps:$4 sm:$0xff]   ;;  %v10188_v33 = vld [vmem:[%s11630_s8 + $0x3d0] ss:$8 sps:$4 sm:$0xff]  }
 0x103   : > { %7671 = vmatprep.subr.bf16.mxu0 %v10109_v34  ;;  %v10191_v34 = vld [vmem:[%s11630_s8 + $0x13d0] ss:$8 sps:$4 sm:$0xff]  }
 0x105   : > { %7016 = vmatpush1.bf16.msra.mxu1 %v10104_v35  ;;  %v10196_v35 = vld [vmem:[%s11630_s8 + $0x3e4] ss:$8 sps:$4 sm:$0xff]  }
 0x106   : > { %7672 = vmatpush1.bf16.msra.mxu0 %v10107_v36  ;;  %7026 = vmatprep.subr.bf16.mxu1 %v10112_v18  ;;  %v10199_v36 = vld [vmem:[%s11630_s8 + $0x13e4] ss:$8 sps:$4 sm:$0xff]   ;;  %v10194_v18 = vld [vmem:[%s11630_s8 + $0x3e0] ss:$8 sps:$4 sm:$0xff]  }
 0x107   : > { %7682 = vmatprep.subr.bf16.mxu0 %v10115_v38  ;;  %v10197_v38 = vld [vmem:[%s11630_s8 + $0x13e0] ss:$8 sps:$4 sm:$0xff]  }
 0x108   : > { %7018 = vmatmul.mubr.bf16.vlgmr.msra.gmra.mrb[0].mxu1 %v11910_v39 }
 0x109   : > { %7674 = vmatmul.mubr.bf16.vlgmr.msra.gmra.mrb[0].mxu0 %v11914_v40  ;;  %7027 = vmatpush1.bf16.msra.mxu1 %v10110_v41  ;;  %v11981_v41 = vld.sshfl [vmem:[%s11707_s13 + $0x8] sm:$0xff pattern:$0x75316420] }
 0x10a   : > { %7683 = vmatpush1.bf16.msra.mxu0 %v10113_v42  ;;  %7028 = vmatprep.subr.bf16.mxu1 %v10118_v43  ;;  %v11984_v42 = vld.sshfl [vmem:[%s11707_s13 + $0x28] sm:$0xff pattern:$0x75316420]  ;;  %v10202_v43 = vld [vmem:[%s11630_s8 + $0x3f4] ss:$8 sps:$4 sm:$0xff]  }
 0x10b   : > { %7684 = vmatprep.subr.bf16.mxu0 %v10121_v45  ;;  %7058 = vmatprep.mubr.bf16.mxu1 %v1375_v25  ;;  %v10205_v45 = vld [vmem:[%s11630_s8 + $0x13f4] ss:$8 sps:$4 sm:$0xff]   ;;  %v10200_v25 = vld [vmem:[%s11630_s8 + $0x3f0] ss:$8 sps:$4 sm:$0xff]  }
 0x10c   : > { %7714 = vmatprep.mubr.bf16.mxu0 %v1571_v46  ;;  %v10203_v46 = vld [vmem:[%s11630_s8 + $0x13f0] ss:$8 sps:$4 sm:$0xff]  }
 0x10d   : > { %7029 = vmatpush1.bf16.msra.mxu1 %v10116_v26  ;;  %v10208_v26 = vld [vmem:[%s11630_s8 + $0x404] ss:$8 sps:$4 sm:$0xff]  }
 0x10e   : > { %7685 = vmatpush1.bf16.msra.mxu0 %v10119_v47  ;;  %7030 = vmatprep.subr.bf16.mxu1 %v10124_v37  ;;  %v10211_v47 = vld [vmem:[%s11630_s8 + $0x1404] ss:$8 sps:$4 sm:$0xff]   ;;  %v1391_v37 = vcombine.high %v11981_v41, %v11981_v41 }
 0x10f   : > { %7686 = vmatprep.subr.bf16.mxu0 %v10127_v48  ;;  %v1587_v48 = vcombine.high %v11984_v42, %v11984_v42 }
 0x111   : > { %7031 = vmatpush1.bf16.msra.mxu1 %v10122_v17  ;;  %v10206_v17 = vld [vmem:[%s11630_s8 + $0x400] ss:$8 sps:$4 sm:$0xff]  }
 0x112   : > { %7687 = vmatpush1.bf16.msra.mxu0 %v10125_v49  ;;  %7032 = vmatprep.subr.bf16.mxu1 %v10130_v51  ;;  %v10209_v49 = vld [vmem:[%s11630_s8 + $0x1400] ss:$8 sps:$4 sm:$0xff]   ;;  %v1373_v51 = vcombine.high %v11910_v39, %v11910_v39  ;;  %v10212_v39 = vld [vmem:[%s11630_s8 + $0x410] ss:$8 sps:$4 sm:$0xff]  }
 0x113   : > { %7688 = vmatprep.subr.bf16.mxu0 %v10133_v52  ;;  %v1569_v52 = vcombine.high %v11914_v40, %v11914_v40  ;;  %v10215_v40 = vld [vmem:[%s11630_s8 + $0x1410] ss:$8 sps:$4 sm:$0xff]  }
 0x115   : > { %7033 = vmatpush1.bf16.msra.mxu1 %v10128_v54  ;;  %v10214_v54 = vld [vmem:[%s11630_s8 + $0x414] ss:$8 sps:$4 sm:$0xff]  }
 0x116   : > { %7689 = vmatpush1.bf16.msra.mxu0 %v10131_v55  ;;  %7034 = vmatprep.subr.bf16.mxu1 %v10136_v56  ;;  %v10217_v55 = vld [vmem:[%s11630_s8 + $0x1414] ss:$8 sps:$4 sm:$0xff]   ;;  %v12005_v56 = vrot.slane %v1391_v37, %v11710_v50  ;;  %v10292_v37 = vld [vmem:[%s11630_s8 + $0x4e4] ss:$8 sps:$4 sm:$0xff]  }
 0x117   : > { %7690 = vmatprep.subr.bf16.mxu0 %v10139_v58  ;;  %v12008_v58 = vrot.slane %v1587_v48, %v11710_v50  ;;  %v10295_v48 = vld [vmem:[%s11630_s8 + $0x14e4] ss:$8 sps:$4 sm:$0xff]  }
 0x119   : > { %7035 = vmatpush1.bf16.msra.mxu1 %v10134_v59  ;;  %v10220_v59 = vld [vmem:[%s11630_s8 + $0x424] ss:$8 sps:$4 sm:$0xff]  }
 0x11a   : > { %7691 = vmatpush1.bf16.msra.mxu0 %v10137_v60  ;;  %7036 = vmatprep.subr.bf16.mxu1 %v10142_v61  ;;  %v10223_v60 = vld [vmem:[%s11630_s8 + $0x1424] ss:$8 sps:$4 sm:$0xff]   ;;  %v10218_v61 = vld [vmem:[%s11630_s8 + $0x420] ss:$8 sps:$4 sm:$0xff]  }
 0x11b   : > { %7692 = vmatprep.subr.bf16.mxu0 %v10145_v62  ;;  %v10221_v62 = vld [vmem:[%s11630_s8 + $0x1420] ss:$8 sps:$4 sm:$0xff]  }
 0x11d   : > { %7037 = vmatpush1.bf16.msra.mxu1 %v10140_v63  ;;  %v10226_v63 = vld [vmem:[%s11630_s8 + $0x434] ss:$8 sps:$4 sm:$0xff]  }
 0x11e   : > { %7693 = vmatpush1.bf16.msra.mxu0 %v10143_v0  ;;  %7038 = vmatprep.subr.bf16.mxu1 %v10148_v1  ;;  %v10229_v0 = vld [vmem:[%s11630_s8 + $0x1434] ss:$8 sps:$4 sm:$0xff]   ;;  %v10224_v1 = vld [vmem:[%s11630_s8 + $0x430] ss:$8 sps:$4 sm:$0xff]  }
 0x11f   : > { %7694 = vmatprep.subr.bf16.mxu0 %v10151_v2  ;;  %v10227_v2 = vld [vmem:[%s11630_s8 + $0x1430] ss:$8 sps:$4 sm:$0xff]  }
 0x121   : > { %7039 = vmatpush1.bf16.msra.mxu1 %v10146_v3  ;;  %v10232_v3 = vld [vmem:[%s11630_s8 + $0x444] ss:$8 sps:$4 sm:$0xff]  }
 0x122   : > { %7695 = vmatpush1.bf16.msra.mxu0 %v10149_v4  ;;  %7040 = vmatprep.subr.bf16.mxu1 %v10154_v5  ;;  %v10235_v4 = vld [vmem:[%s11630_s8 + $0x1444] ss:$8 sps:$4 sm:$0xff]   ;;  %v10230_v5 = vld [vmem:[%s11630_s8 + $0x440] ss:$8 sps:$4 sm:$0xff]  }
 0x123   : > { %7696 = vmatprep.subr.bf16.mxu0 %v10157_v6  ;;  %v10233_v6 = vld [vmem:[%s11630_s8 + $0x1440] ss:$8 sps:$4 sm:$0xff]  }
 0x125   : > { %7041 = vmatpush1.bf16.msra.mxu1 %v10152_v7  ;;  %v10238_v7 = vld [vmem:[%s11630_s8 + $0x454] ss:$8 sps:$4 sm:$0xff]  }
 0x126   : > { %7697 = vmatpush1.bf16.msra.mxu0 %v10155_v8  ;;  %7042 = vmatprep.subr.bf16.mxu1 %v10160_v9  ;;  %v10241_v8 = vld [vmem:[%s11630_s8 + $0x1454] ss:$8 sps:$4 sm:$0xff]   ;;  %v10236_v9 = vld [vmem:[%s11630_s8 + $0x450] ss:$8 sps:$4 sm:$0xff]  }
 0x127   : > { %7698 = vmatprep.subr.bf16.mxu0 %v10163_v10  ;;  %v10239_v10 = vld [vmem:[%s11630_s8 + $0x1450] ss:$8 sps:$4 sm:$0xff]  }
 0x129   : > { %7043 = vmatpush1.bf16.msra.mxu1 %v10158_v11  ;;  %v10244_v11 = vld [vmem:[%s11630_s8 + $0x464] ss:$8 sps:$4 sm:$0xff]  }
 0x12a   : > { %7699 = vmatpush1.bf16.msra.mxu0 %v10161_v12  ;;  %7044 = vmatprep.subr.bf16.mxu1 %v10166_v13  ;;  %v10247_v12 = vld [vmem:[%s11630_s8 + $0x1464] ss:$8 sps:$4 sm:$0xff]   ;;  %v10242_v13 = vld [vmem:[%s11630_s8 + $0x460] ss:$8 sps:$4 sm:$0xff]  }
 0x12b   : > { %7700 = vmatprep.subr.bf16.mxu0 %v10169_v14  ;;  %v10245_v14 = vld [vmem:[%s11630_s8 + $0x1460] ss:$8 sps:$4 sm:$0xff]  }
 0x12d   : > { %7045 = vmatpush1.bf16.msra.mxu1 %v10164_v15  ;;  %v10250_v15 = vld [vmem:[%s11630_s8 + $0x474] ss:$8 sps:$4 sm:$0xff]  }
 0x12e   : > { %7701 = vmatpush1.bf16.msra.mxu0 %v10167_v16  ;;  %7046 = vmatprep.subr.bf16.mxu1 %v10172_v19  ;;  %v10253_v16 = vld [vmem:[%s11630_s8 + $0x1474] ss:$8 sps:$4 sm:$0xff]   ;;  %v10248_v19 = vld [vmem:[%s11630_s8 + $0x470] ss:$8 sps:$4 sm:$0xff]  }
 0x12f   : > { %7702 = vmatprep.subr.bf16.mxu0 %v10175_v20  ;;  %v10251_v20 = vld [vmem:[%s11630_s8 + $0x1470] ss:$8 sps:$4 sm:$0xff]  }
 0x131   : > { %7047 = vmatpush1.bf16.msra.mxu1 %v10170_v21  ;;  %v10256_v21 = vld [vmem:[%s11630_s8 + $0x484] ss:$8 sps:$4 sm:$0xff]  }
 0x132   : > { %7703 = vmatpush1.bf16.msra.mxu0 %v10173_v22  ;;  %7048 = vmatprep.subr.bf16.mxu1 %v10178_v23  ;;  %v10259_v22 = vld [vmem:[%s11630_s8 + $0x1484] ss:$8 sps:$4 sm:$0xff]   ;;  %v10254_v23 = vld [vmem:[%s11630_s8 + $0x480] ss:$8 sps:$4 sm:$0xff]  }
 0x133   : > { %7704 = vmatprep.subr.bf16.mxu0 %v10181_v24  ;;  %v10257_v24 = vld [vmem:[%s11630_s8 + $0x1480] ss:$8 sps:$4 sm:$0xff]  }
 0x135   : > { %7049 = vmatpush1.bf16.msra.mxu1 %v10176_v53  ;;  %v10262_v53 = vld [vmem:[%s11630_s8 + $0x494] ss:$8 sps:$4 sm:$0xff]  }
 0x136   : > { %7705 = vmatpush1.bf16.msra.mxu0 %v10179_v57  ;;  %7050 = vmatprep.subr.bf16.mxu1 %v10184_v27  ;;  %v10265_v57 = vld [vmem:[%s11630_s8 + $0x1494] ss:$8 sps:$4 sm:$0xff]   ;;  %v10260_v27 = vld [vmem:[%s11630_s8 + $0x490] ss:$8 sps:$4 sm:$0xff]  }
 0x137   : > { %7706 = vmatprep.subr.bf16.mxu0 %v10187_v28  ;;  %v10263_v28 = vld [vmem:[%s11630_s8 + $0x1490] ss:$8 sps:$4 sm:$0xff]  }
 0x139   : > { %7051 = vmatpush1.bf16.msra.mxu1 %v10182_v29  ;;  %v10268_v29 = vld [vmem:[%s11630_s8 + $0x4a4] ss:$8 sps:$4 sm:$0xff]  }
 0x13a   : > { %7707 = vmatpush1.bf16.msra.mxu0 %v10185_v30  ;;  %7052 = vmatprep.subr.bf16.mxu1 %v10190_v31  ;;  %v10271_v30 = vld [vmem:[%s11630_s8 + $0x14a4] ss:$8 sps:$4 sm:$0xff]   ;;  %v10266_v31 = vld [vmem:[%s11630_s8 + $0x4a0] ss:$8 sps:$4 sm:$0xff]  }
 0x13b   : > { %7708 = vmatprep.subr.bf16.mxu0 %v10193_v32  ;;  %v10269_v32 = vld [vmem:[%s11630_s8 + $0x14a0] ss:$8 sps:$4 sm:$0xff]  }
 0x13d   : > { %7053 = vmatpush1.bf16.msra.mxu1 %v10188_v33  ;;  %v10274_v33 = vld [vmem:[%s11630_s8 + $0x4b4] ss:$8 sps:$4 sm:$0xff]  }
 0x13e   : > { %7709 = vmatpush1.bf16.msra.mxu0 %v10191_v34  ;;  %7054 = vmatprep.subr.bf16.mxu1 %v10196_v35  ;;  %v10277_v34 = vld [vmem:[%s11630_s8 + $0x14b4] ss:$8 sps:$4 sm:$0xff]   ;;  %v10272_v35 = vld [vmem:[%s11630_s8 + $0x4b0] ss:$8 sps:$4 sm:$0xff]  }
 0x13f   : > { %7710 = vmatprep.subr.bf16.mxu0 %v10199_v36  ;;  %v10275_v36 = vld [vmem:[%s11630_s8 + $0x14b0] ss:$8 sps:$4 sm:$0xff]  }
 0x141   : > { %7055 = vmatpush1.bf16.msra.mxu1 %v10194_v18  ;;  %v10280_v18 = vld [vmem:[%s11630_s8 + $0x4c4] ss:$8 sps:$4 sm:$0xff]  }
 0x142   : > { %7711 = vmatpush1.bf16.msra.mxu0 %v10197_v38  ;;  %7056 = vmatprep.subr.bf16.mxu1 %v10202_v43  ;;  %v10283_v38 = vld [vmem:[%s11630_s8 + $0x14c4] ss:$8 sps:$4 sm:$0xff]   ;;  %v10278_v43 = vld [vmem:[%s11630_s8 + $0x4c0] ss:$8 sps:$4 sm:$0xff]  }
 0x143   : > { %7712 = vmatprep.subr.bf16.mxu0 %v10205_v45  ;;  %v10281_v45 = vld [vmem:[%s11630_s8 + $0x14c0] ss:$8 sps:$4 sm:$0xff]  }
 0x145   : > { %7057 = vmatpush1.bf16.msra.mxu1 %v10200_v25  ;;  %v10286_v25 = vld [vmem:[%s11630_s8 + $0x4d4] ss:$8 sps:$4 sm:$0xff]  }
 0x146   : > { %7713 = vmatpush1.bf16.msra.mxu0 %v10203_v46  ;;  %7067 = vmatprep.subr.bf16.mxu1 %v10208_v26  ;;  %v10289_v46 = vld [vmem:[%s11630_s8 + $0x14d4] ss:$8 sps:$4 sm:$0xff]   ;;  %v10284_v26 = vld [vmem:[%s11630_s8 + $0x4d0] ss:$8 sps:$4 sm:$0xff]  }
 0x147   : > { %7723 = vmatprep.subr.bf16.mxu0 %v10211_v47  ;;  %v10287_v47 = vld [vmem:[%s11630_s8 + $0x14d0] ss:$8 sps:$4 sm:$0xff]  }
 0x148   : > { %7059 = vmatmul.mubr.bf16.vlgmr.msra.gmra.mrb[0].mxu1 %v1373_v51  ;;  %v10298_v51 = vld [vmem:[%s11630_s8 + $0x4f4] ss:$8 sps:$4 sm:$0xff]  }
 0x149   : > { %7715 = vmatmul.mubr.bf16.vlgmr.msra.gmra.mrb[0].mxu0 %v1569_v52  ;;  %7068 = vmatpush1.bf16.msra.mxu1 %v10206_v17  ;;  %v10290_v17 = vld [vmem:[%s11630_s8 + $0x4e0] ss:$8 sps:$4 sm:$0xff]   ;;  %v10301_v52 = vld [vmem:[%s11630_s8 + $0x14f4] ss:$8 sps:$4 sm:$0xff]  }
 0x14a   : > { %7724 = vmatpush1.bf16.msra.mxu0 %v10209_v49  ;;  %7069 = vmatprep.subr.bf16.mxu1 %v10214_v54  ;;  %v10293_v49 = vld [vmem:[%s11630_s8 + $0x14e0] ss:$8 sps:$4 sm:$0xff]   ;;  %v10296_v54 = vld [vmem:[%s11630_s8 + $0x4f0] ss:$8 sps:$4 sm:$0xff]  }
 0x14b   : > { %7725 = vmatprep.subr.bf16.mxu0 %v10217_v55  ;;  %7099 = vmatprep.mubr.bf16.mxu1 %v12005_v56  ;;  %v10299_v55 = vld [vmem:[%s11630_s8 + $0x14f0] ss:$8 sps:$4 sm:$0xff]  }
 0x14c   : > { %7755 = vmatprep.mubr.bf16.mxu0 %v12008_v58 }
 0x14d   : > { %7070 = vmatpush1.bf16.msra.mxu1 %v10212_v39  ;;  %v10304_v39 = vld [vmem:[%s11630_s8 + $0x504] ss:$8 sps:$4 sm:$0xff]  }
 0x14e   : > { %7726 = vmatpush1.bf16.msra.mxu0 %v10215_v40  ;;  %7071 = vmatprep.subr.bf16.mxu1 %v10220_v59  ;;  %v10307_v40 = vld [vmem:[%s11630_s8 + $0x1504] ss:$8 sps:$4 sm:$0xff]   ;;  %v12074_v59 = vrot.slane %v11981_v41, %v11710_v50  ;;  %v1423_v41 = vcombine.high %v12005_v56, %v12005_v56 }
 0x14f   : > { %7727 = vmatprep.subr.bf16.mxu0 %v10223_v60  ;;  %v12078_v60 = vrot.slane %v11984_v42, %v11710_v50  ;;  %v10308_v42 = vld [vmem:[%s11630_s8 + $0x510] ss:$8 sps:$4 sm:$0xff]   ;;  %v10316_v56 = vld [vmem:[%s11630_s8 + $0x524] ss:$8 sps:$4 sm:$0xff]  }
 0x151   : > { %7072 = vmatpush1.bf16.msra.mxu1 %v10218_v61  ;;  %v10302_v61 = vld [vmem:[%s11630_s8 + $0x500] ss:$8 sps:$4 sm:$0xff]  }
 0x152   : > { %7728 = vmatpush1.bf16.msra.mxu0 %v10221_v62  ;;  %7073 = vmatprep.subr.bf16.mxu1 %v10226_v63  ;;  %v10305_v62 = vld [vmem:[%s11630_s8 + $0x1500] ss:$8 sps:$4 sm:$0xff]   ;;  %v10310_v63 = vld [vmem:[%s11630_s8 + $0x514] ss:$8 sps:$4 sm:$0xff]  }
 0x153   : > { %7729 = vmatprep.subr.bf16.mxu0 %v10229_v0  ;;  %v10313_v0 = vld [vmem:[%s11630_s8 + $0x1514] ss:$8 sps:$4 sm:$0xff]  }
 0x155   : > { %7074 = vmatpush1.bf16.msra.mxu1 %v10224_v1  ;;  %v1619_v1 = vcombine.high %v12008_v58, %v12008_v58  ;;  %v10314_v58 = vld [vmem:[%s11630_s8 + $0x520] ss:$8 sps:$4 sm:$0xff]  }
 0x156   : > { %7730 = vmatpush1.bf16.msra.mxu0 %v10227_v2  ;;  %7075 = vmatprep.subr.bf16.mxu1 %v10232_v3  ;;  %v10311_v2 = vld [vmem:[%s11630_s8 + $0x1510] ss:$8 sps:$4 sm:$0xff]   ;;  %v10319_v3 = vld [vmem:[%s11630_s8 + $0x1524] ss:$8 sps:$4 sm:$0xff]  }
 0x157   : > { %7731 = vmatprep.subr.bf16.mxu0 %v10235_v4  ;;  %v10317_v4 = vld [vmem:[%s11630_s8 + $0x1520] ss:$8 sps:$4 sm:$0xff]  }
 0x159   : > { %7076 = vmatpush1.bf16.msra.mxu1 %v10230_v5  ;;  %v10322_v5 = vld [vmem:[%s11630_s8 + $0x534] ss:$8 sps:$4 sm:$0xff]  }
 0x15a   : > { %7732 = vmatpush1.bf16.msra.mxu0 %v10233_v6  ;;  %7077 = vmatprep.subr.bf16.mxu1 %v10238_v7  ;;  %v10325_v6 = vld [vmem:[%s11630_s8 + $0x1534] ss:$8 sps:$4 sm:$0xff]   ;;  %v10320_v7 = vld [vmem:[%s11630_s8 + $0x530] ss:$8 sps:$4 sm:$0xff]  }
 0x15b   : > { %7733 = vmatprep.subr.bf16.mxu0 %v10241_v8  ;;  %v10323_v8 = vld [vmem:[%s11630_s8 + $0x1530] ss:$8 sps:$4 sm:$0xff]  }
 0x15d   : > { %7078 = vmatpush1.bf16.msra.mxu1 %v10236_v9  ;;  %v10328_v9 = vld [vmem:[%s11630_s8 + $0x544] ss:$8 sps:$4 sm:$0xff]  }
 0x15e   : > { %7734 = vmatpush1.bf16.msra.mxu0 %v10239_v10  ;;  %7079 = vmatprep.subr.bf16.mxu1 %v10244_v11  ;;  %v10331_v10 = vld [vmem:[%s11630_s8 + $0x1544] ss:$8 sps:$4 sm:$0xff]   ;;  %v10326_v11 = vld [vmem:[%s11630_s8 + $0x540] ss:$8 sps:$4 sm:$0xff]  }
 0x15f   : > { %7735 = vmatprep.subr.bf16.mxu0 %v10247_v12  ;;  %v10329_v12 = vld [vmem:[%s11630_s8 + $0x1540] ss:$8 sps:$4 sm:$0xff]  }
 0x161   : > { %7080 = vmatpush1.bf16.msra.mxu1 %v10242_v13  ;;  %v10334_v13 = vld [vmem:[%s11630_s8 + $0x554] ss:$8 sps:$4 sm:$0xff]  }
 0x162   : > { %7736 = vmatpush1.bf16.msra.mxu0 %v10245_v14  ;;  %7081 = vmatprep.subr.bf16.mxu1 %v10250_v15  ;;  %v10337_v14 = vld [vmem:[%s11630_s8 + $0x1554] ss:$8 sps:$4 sm:$0xff]   ;;  %v10332_v15 = vld [vmem:[%s11630_s8 + $0x550] ss:$8 sps:$4 sm:$0xff]  }
 0x163   : > { %7737 = vmatprep.subr.bf16.mxu0 %v10253_v16  ;;  %v10335_v16 = vld [vmem:[%s11630_s8 + $0x1550] ss:$8 sps:$4 sm:$0xff]  }
 0x165   : > { %7082 = vmatpush1.bf16.msra.mxu1 %v10248_v19  ;;  %v10340_v19 = vld [vmem:[%s11630_s8 + $0x564] ss:$8 sps:$4 sm:$0xff]  }
 0x166   : > { %7738 = vmatpush1.bf16.msra.mxu0 %v10251_v20  ;;  %7083 = vmatprep.subr.bf16.mxu1 %v10256_v21  ;;  %v10343_v20 = vld [vmem:[%s11630_s8 + $0x1564] ss:$8 sps:$4 sm:$0xff]   ;;  %v10338_v21 = vld [vmem:[%s11630_s8 + $0x560] ss:$8 sps:$4 sm:$0xff]  }
 0x167   : > { %7739 = vmatprep.subr.bf16.mxu0 %v10259_v22  ;;  %v10341_v22 = vld [vmem:[%s11630_s8 + $0x1560] ss:$8 sps:$4 sm:$0xff]  }
 0x169   : > { %7084 = vmatpush1.bf16.msra.mxu1 %v10254_v23  ;;  %v10346_v23 = vld [vmem:[%s11630_s8 + $0x574] ss:$8 sps:$4 sm:$0xff]  }
 0x16a   : > { %7740 = vmatpush1.bf16.msra.mxu0 %v10257_v24  ;;  %7085 = vmatprep.subr.bf16.mxu1 %v10262_v53  ;;  %v10349_v24 = vld [vmem:[%s11630_s8 + $0x1574] ss:$8 sps:$4 sm:$0xff]   ;;  %v10344_v53 = vld [vmem:[%s11630_s8 + $0x570] ss:$8 sps:$4 sm:$0xff]  }
 0x16b   : > { %7741 = vmatprep.subr.bf16.mxu0 %v10265_v57  ;;  %v10347_v57 = vld [vmem:[%s11630_s8 + $0x1570] ss:$8 sps:$4 sm:$0xff]  }
 0x16d   : > { %7086 = vmatpush1.bf16.msra.mxu1 %v10260_v27  ;;  %v10352_v27 = vld [vmem:[%s11630_s8 + $0x584] ss:$8 sps:$4 sm:$0xff]  }
 0x16e   : > { %7742 = vmatpush1.bf16.msra.mxu0 %v10263_v28  ;;  %7087 = vmatprep.subr.bf16.mxu1 %v10268_v29  ;;  %v10355_v28 = vld [vmem:[%s11630_s8 + $0x1584] ss:$8 sps:$4 sm:$0xff]   ;;  %v10350_v29 = vld [vmem:[%s11630_s8 + $0x580] ss:$8 sps:$4 sm:$0xff]  }
 0x16f   : > { %7743 = vmatprep.subr.bf16.mxu0 %v10271_v30  ;;  %v10353_v30 = vld [vmem:[%s11630_s8 + $0x1580] ss:$8 sps:$4 sm:$0xff]  }
 0x171   : > { %7088 = vmatpush1.bf16.msra.mxu1 %v10266_v31  ;;  %v10358_v31 = vld [vmem:[%s11630_s8 + $0x594] ss:$8 sps:$4 sm:$0xff]  }
 0x172   : > { %7744 = vmatpush1.bf16.msra.mxu0 %v10269_v32  ;;  %7089 = vmatprep.subr.bf16.mxu1 %v10274_v33  ;;  %v10361_v32 = vld [vmem:[%s11630_s8 + $0x1594] ss:$8 sps:$4 sm:$0xff]   ;;  %v10356_v33 = vld [vmem:[%s11630_s8 + $0x590] ss:$8 sps:$4 sm:$0xff]  }
 0x173   : > { %7745 = vmatprep.subr.bf16.mxu0 %v10277_v34  ;;  %v10359_v34 = vld [vmem:[%s11630_s8 + $0x1590] ss:$8 sps:$4 sm:$0xff]  }
 0x175   : > { %7090 = vmatpush1.bf16.msra.mxu1 %v10272_v35  ;;  %v10364_v35 = vld [vmem:[%s11630_s8 + $0x5a4] ss:$8 sps:$4 sm:$0xff]  }
 0x176   : > { %7746 = vmatpush1.bf16.msra.mxu0 %v10275_v36  ;;  %7091 = vmatprep.subr.bf16.mxu1 %v10280_v18  ;;  %v10367_v36 = vld [vmem:[%s11630_s8 + $0x15a4] ss:$8 sps:$4 sm:$0xff]   ;;  %v10362_v18 = vld [vmem:[%s11630_s8 + $0x5a0] ss:$8 sps:$4 sm:$0xff]  }
 0x177   : > { %7747 = vmatprep.subr.bf16.mxu0 %v10283_v38  ;;  %v10365_v38 = vld [vmem:[%s11630_s8 + $0x15a0] ss:$8 sps:$4 sm:$0xff]  }
 0x179   : > { %7092 = vmatpush1.bf16.msra.mxu1 %v10278_v43  ;;  %v10370_v43 = vld [vmem:[%s11630_s8 + $0x5b4] ss:$8 sps:$4 sm:$0xff]  }
 0x17a   : > { %7748 = vmatpush1.bf16.msra.mxu0 %v10281_v45  ;;  %7093 = vmatprep.subr.bf16.mxu1 %v10286_v25  ;;  %v10373_v45 = vld [vmem:[%s11630_s8 + $0x15b4] ss:$8 sps:$4 sm:$0xff]   ;;  %v10368_v25 = vld [vmem:[%s11630_s8 + $0x5b0] ss:$8 sps:$4 sm:$0xff]  }
 0x17b   : > { %7749 = vmatprep.subr.bf16.mxu0 %v10289_v46  ;;  %v10371_v46 = vld [vmem:[%s11630_s8 + $0x15b0] ss:$8 sps:$4 sm:$0xff]  }
 0x17d   : > { %7094 = vmatpush1.bf16.msra.mxu1 %v10284_v26  ;;  %v10376_v26 = vld [vmem:[%s11630_s8 + $0x5c4] ss:$8 sps:$4 sm:$0xff]  }
 0x17e   : > { %7750 = vmatpush1.bf16.msra.mxu0 %v10287_v47  ;;  %7095 = vmatprep.subr.bf16.mxu1 %v10292_v37  ;;  %v10379_v47 = vld [vmem:[%s11630_s8 + $0x15c4] ss:$8 sps:$4 sm:$0xff]   ;;  %v10374_v37 = vld [vmem:[%s11630_s8 + $0x5c0] ss:$8 sps:$4 sm:$0xff]  }
 0x17f   : > { %7751 = vmatprep.subr.bf16.mxu0 %v10295_v48  ;;  %v10377_v48 = vld [vmem:[%s11630_s8 + $0x15c0] ss:$8 sps:$4 sm:$0xff]  }
 0x181   : > { %7096 = vmatpush1.bf16.msra.mxu1 %v10290_v17  ;;  %v10382_v17 = vld [vmem:[%s11630_s8 + $0x5d4] ss:$8 sps:$4 sm:$0xff]  }
 0x182   : > { %7752 = vmatpush1.bf16.msra.mxu0 %v10293_v49  ;;  %7097 = vmatprep.subr.bf16.mxu1 %v10298_v51  ;;  %v10385_v49 = vld [vmem:[%s11630_s8 + $0x15d4] ss:$8 sps:$4 sm:$0xff]   ;;  %v10380_v51 = vld [vmem:[%s11630_s8 + $0x5d0] ss:$8 sps:$4 sm:$0xff]  }
 0x183   : > { %7753 = vmatprep.subr.bf16.mxu0 %v10301_v52  ;;  %v10383_v52 = vld [vmem:[%s11630_s8 + $0x15d0] ss:$8 sps:$4 sm:$0xff]  }
 0x185   : > { %7098 = vmatpush1.bf16.msra.mxu1 %v10296_v54  ;;  %v10388_v54 = vld [vmem:[%s11630_s8 + $0x5e4] ss:$8 sps:$4 sm:$0xff]  }
 0x186   : > { %7754 = vmatpush1.bf16.msra.mxu0 %v10299_v55  ;;  %7108 = vmatprep.subr.bf16.mxu1 %v10304_v39  ;;  %v10391_v55 = vld [vmem:[%s11630_s8 + $0x15e4] ss:$8 sps:$4 sm:$0xff]  }
 0x187   : > { %7764 = vmatprep.subr.bf16.mxu0 %v10307_v40  ;;  %v11364_v39 = vld [vmem:[%s11707_s13 + $0x8] sm:$0xff] }
 0x188   : > { %7100 = vmatmul.mubr.bf16.vlgmr.msra.gmra.mrb[0].mxu1 %v12074_v59  ;;  %v1376_v40 = vcombine.high %v11364_v39, %v11364_v39  ;;  %v10466_v39 = vld [vmem:[%s11630_s8 + $0x6b4] ss:$8 sps:$4 sm:$0xff]  }
 0x189   : > { %7756 = vmatmul.mubr.bf16.vlgmr.msra.gmra.mrb[0].mxu0 %v12078_v60  ;;  %7109 = vmatpush1.bf16.msra.mxu1 %v10302_v61  ;;  %v11365_v61 = vld [vmem:[%s11707_s13 + $0x28] sm:$0xff] }
 0x18a   : > { %7765 = vmatpush1.bf16.msra.mxu0 %v10305_v62  ;;  %7110 = vmatprep.subr.bf16.mxu1 %v10310_v63  ;;  %v1572_v62 = vcombine.high %v11365_v61, %v11365_v61  ;;  %v10386_v63 = vld [vmem:[%s11630_s8 + $0x5e0] ss:$8 sps:$4 sm:$0xff]   ;;  %v10464_v61 = vld [vmem:[%s11630_s8 + $0x6b0] ss:$8 sps:$4 sm:$0xff]  }
 0x18b   : > { %7766 = vmatprep.subr.bf16.mxu0 %v10313_v0  ;;  %7140 = vmatprep.mubr.bf16.mxu1 %v1423_v41  ;;  %v10389_v0 = vld [vmem:[%s11630_s8 + $0x15e0] ss:$8 sps:$4 sm:$0xff]   ;;  %v10394_v41 = vld [vmem:[%s11630_s8 + $0x5f4] ss:$8 sps:$4 sm:$0xff]  }
 0x18c   : > { %7796 = vmatprep.mubr.bf16.mxu0 %v1619_v1  ;;  %v10397_v1 = vld [vmem:[%s11630_s8 + $0x15f4] ss:$8 sps:$4 sm:$0xff]  }
 0x18d   : > { %7111 = vmatpush1.bf16.msra.mxu1 %v10308_v42  ;;  %v12149_v42 = vrot.slane %v1376_v40, %v11710_v50  ;;  %v10469_v40 = vld [vmem:[%s11630_s8 + $0x16b4] ss:$8 sps:$4 sm:$0xff]  }
 0x18e   : > { %7767 = vmatpush1.bf16.msra.mxu0 %v10311_v2  ;;  %7112 = vmatprep.subr.bf16.mxu1 %v10316_v56  ;;  %v12152_v2 = vrot.slane %v1572_v62, %v11710_v50  ;;  %v10392_v56 = vld [vmem:[%s11630_s8 + $0x5f0] ss:$8 sps:$4 sm:$0xff]  }
 0x18f   : > { %7768 = vmatprep.subr.bf16.mxu0 %v10319_v3  ;;  %v10395_v3 = vld [vmem:[%s11630_s8 + $0x15f0] ss:$8 sps:$4 sm:$0xff]  }
 0x190   : > { %v10467_v62 = vld [vmem:[%s11630_s8 + $0x16b0] ss:$8 sps:$4 sm:$0xff]  }
 0x191   : > { %7113 = vmatpush1.bf16.msra.mxu1 %v10314_v58  ;;  %v10400_v58 = vld [vmem:[%s11630_s8 + $0x604] ss:$8 sps:$4 sm:$0xff]  }
 0x192   : > { %7769 = vmatpush1.bf16.msra.mxu0 %v10317_v4  ;;  %7114 = vmatprep.subr.bf16.mxu1 %v10322_v5  ;;  %v10403_v4 = vld [vmem:[%s11630_s8 + $0x1604] ss:$8 sps:$4 sm:$0xff]   ;;  %v1392_v5 = vcombine.high %v12149_v42, %v12149_v42 }
 0x193   : > { %7770 = vmatprep.subr.bf16.mxu0 %v10325_v6  ;;  %v1588_v6 = vcombine.high %v12152_v2, %v12152_v2 }
 0x195   : > { %7115 = vmatpush1.bf16.msra.mxu1 %v10320_v7  ;;  %v1421_v7 = vcombine.high %v12074_v59, %v12074_v59  ;;  %v12174_v59 = vrot.slane %v1588_v6, %v11710_v50  ;;  %v10487_v6 = vld [vmem:[%s11630_s8 + $0x16e4] ss:$8 sps:$4 sm:$0xff]  }
 0x196   : > { %7771 = vmatpush1.bf16.msra.mxu0 %v10323_v8  ;;  %7116 = vmatprep.subr.bf16.mxu1 %v10328_v9  ;;  %v1617_v8 = vcombine.high %v12078_v60, %v12078_v60  ;;  %v10398_v9 = vld [vmem:[%s11630_s8 + $0x600] ss:$8 sps:$4 sm:$0xff]   ;;  %v10404_v60 = vld [vmem:[%s11630_s8 + $0x610] ss:$8 sps:$4 sm:$0xff]  }
 0x197   : > { %7772 = vmatprep.subr.bf16.mxu0 %v10331_v10  ;;  %v10401_v10 = vld [vmem:[%s11630_s8 + $0x1600] ss:$8 sps:$4 sm:$0xff]  }
 0x199   : > { %7117 = vmatpush1.bf16.msra.mxu1 %v10326_v11  ;;  %v10406_v11 = vld [vmem:[%s11630_s8 + $0x614] ss:$8 sps:$4 sm:$0xff]  }
 0x19a   : > { %7773 = vmatpush1.bf16.msra.mxu0 %v10329_v12  ;;  %7118 = vmatprep.subr.bf16.mxu1 %v10334_v13  ;;  %v10409_v12 = vld [vmem:[%s11630_s8 + $0x1614] ss:$8 sps:$4 sm:$0xff]   ;;  %v12171_v13 = vrot.slane %v1392_v5, %v11710_v50  ;;  %v10484_v5 = vld [vmem:[%s11630_s8 + $0x6e4] ss:$8 sps:$4 sm:$0xff]  }
 0x19b   : > { %7774 = vmatprep.subr.bf16.mxu0 %v10337_v14  ;;  %v10407_v14 = vld [vmem:[%s11630_s8 + $0x1610] ss:$8 sps:$4 sm:$0xff]  }
 0x19d   : > { %7119 = vmatpush1.bf16.msra.mxu1 %v10332_v15  ;;  %v10412_v15 = vld [vmem:[%s11630_s8 + $0x624] ss:$8 sps:$4 sm:$0xff]  }
 0x19e   : > { %7775 = vmatpush1.bf16.msra.mxu0 %v10335_v16  ;;  %7120 = vmatprep.subr.bf16.mxu1 %v10340_v19  ;;  %v10415_v16 = vld [vmem:[%s11630_s8 + $0x1624] ss:$8 sps:$4 sm:$0xff]   ;;  %v10410_v19 = vld [vmem:[%s11630_s8 + $0x620] ss:$8 sps:$4 sm:$0xff]  }
 0x19f   : > { %7776 = vmatprep.subr.bf16.mxu0 %v10343_v20  ;;  %v10413_v20 = vld [vmem:[%s11630_s8 + $0x1620] ss:$8 sps:$4 sm:$0xff]  }
 0x1a1   : > { %7121 = vmatpush1.bf16.msra.mxu1 %v10338_v21  ;;  %v10418_v21 = vld [vmem:[%s11630_s8 + $0x634] ss:$8 sps:$4 sm:$0xff]  }
 0x1a2   : > { %7777 = vmatpush1.bf16.msra.mxu0 %v10341_v22  ;;  %7122 = vmatprep.subr.bf16.mxu1 %v10346_v23  ;;  %v10421_v22 = vld [vmem:[%s11630_s8 + $0x1634] ss:$8 sps:$4 sm:$0xff]   ;;  %v10416_v23 = vld [vmem:[%s11630_s8 + $0x630] ss:$8 sps:$4 sm:$0xff]  }
 0x1a3   : > { %7778 = vmatprep.subr.bf16.mxu0 %v10349_v24  ;;  %v10419_v24 = vld [vmem:[%s11630_s8 + $0x1630] ss:$8 sps:$4 sm:$0xff]  }
 0x1a5   : > { %7123 = vmatpush1.bf16.msra.mxu1 %v10344_v53  ;;  %v10424_v53 = vld [vmem:[%s11630_s8 + $0x644] ss:$8 sps:$4 sm:$0xff]  }
 0x1a6   : > { %7779 = vmatpush1.bf16.msra.mxu0 %v10347_v57  ;;  %7124 = vmatprep.subr.bf16.mxu1 %v10352_v27  ;;  %v10427_v57 = vld [vmem:[%s11630_s8 + $0x1644] ss:$8 sps:$4 sm:$0xff]   ;;  %v10422_v27 = vld [vmem:[%s11630_s8 + $0x640] ss:$8 sps:$4 sm:$0xff]  }
 0x1a7   : > { %7780 = vmatprep.subr.bf16.mxu0 %v10355_v28  ;;  %v10425_v28 = vld [vmem:[%s11630_s8 + $0x1640] ss:$8 sps:$4 sm:$0xff]  }
 0x1a9   : > { %7125 = vmatpush1.bf16.msra.mxu1 %v10350_v29  ;;  %v10430_v29 = vld [vmem:[%s11630_s8 + $0x654] ss:$8 sps:$4 sm:$0xff]  }
 0x1aa   : > { %7781 = vmatpush1.bf16.msra.mxu0 %v10353_v30  ;;  %7126 = vmatprep.subr.bf16.mxu1 %v10358_v31  ;;  %v10433_v30 = vld [vmem:[%s11630_s8 + $0x1654] ss:$8 sps:$4 sm:$0xff]   ;;  %v10428_v31 = vld [vmem:[%s11630_s8 + $0x650] ss:$8 sps:$4 sm:$0xff]  }
 0x1ab   : > { %7782 = vmatprep.subr.bf16.mxu0 %v10361_v32  ;;  %v10431_v32 = vld [vmem:[%s11630_s8 + $0x1650] ss:$8 sps:$4 sm:$0xff]  }
 0x1ad   : > { %7127 = vmatpush1.bf16.msra.mxu1 %v10356_v33  ;;  %v10436_v33 = vld [vmem:[%s11630_s8 + $0x664] ss:$8 sps:$4 sm:$0xff]  }
 0x1ae   : > { %7783 = vmatpush1.bf16.msra.mxu0 %v10359_v34  ;;  %7128 = vmatprep.subr.bf16.mxu1 %v10364_v35  ;;  %v10439_v34 = vld [vmem:[%s11630_s8 + $0x1664] ss:$8 sps:$4 sm:$0xff]   ;;  %v10434_v35 = vld [vmem:[%s11630_s8 + $0x660] ss:$8 sps:$4 sm:$0xff]  }
 0x1af   : > { %7784 = vmatprep.subr.bf16.mxu0 %v10367_v36  ;;  %v10437_v36 = vld [vmem:[%s11630_s8 + $0x1660] ss:$8 sps:$4 sm:$0xff]  }
 0x1b1   : > { %7129 = vmatpush1.bf16.msra.mxu1 %v10362_v18  ;;  %v10442_v18 = vld [vmem:[%s11630_s8 + $0x674] ss:$8 sps:$4 sm:$0xff]  }
 0x1b2   : > { %7785 = vmatpush1.bf16.msra.mxu0 %v10365_v38  ;;  %7130 = vmatprep.subr.bf16.mxu1 %v10370_v43  ;;  %v10445_v38 = vld [vmem:[%s11630_s8 + $0x1674] ss:$8 sps:$4 sm:$0xff]   ;;  %v10440_v43 = vld [vmem:[%s11630_s8 + $0x670] ss:$8 sps:$4 sm:$0xff]  }
 0x1b3   : > { %7786 = vmatprep.subr.bf16.mxu0 %v10373_v45  ;;  %v10443_v45 = vld [vmem:[%s11630_s8 + $0x1670] ss:$8 sps:$4 sm:$0xff]  }
 0x1b5   : > { %7131 = vmatpush1.bf16.msra.mxu1 %v10368_v25  ;;  %v10448_v25 = vld [vmem:[%s11630_s8 + $0x684] ss:$8 sps:$4 sm:$0xff]  }
 0x1b6   : > { %7787 = vmatpush1.bf16.msra.mxu0 %v10371_v46  ;;  %7132 = vmatprep.subr.bf16.mxu1 %v10376_v26  ;;  %v10451_v46 = vld [vmem:[%s11630_s8 + $0x1684] ss:$8 sps:$4 sm:$0xff]   ;;  %v10446_v26 = vld [vmem:[%s11630_s8 + $0x680] ss:$8 sps:$4 sm:$0xff]  }
 0x1b7   : > { %7788 = vmatprep.subr.bf16.mxu0 %v10379_v47  ;;  %v10449_v47 = vld [vmem:[%s11630_s8 + $0x1680] ss:$8 sps:$4 sm:$0xff]  }
 0x1b9   : > { %7133 = vmatpush1.bf16.msra.mxu1 %v10374_v37  ;;  %v10454_v37 = vld [vmem:[%s11630_s8 + $0x694] ss:$8 sps:$4 sm:$0xff]  }
 0x1ba   : > { %7789 = vmatpush1.bf16.msra.mxu0 %v10377_v48  ;;  %7134 = vmatprep.subr.bf16.mxu1 %v10382_v17  ;;  %v10457_v48 = vld [vmem:[%s11630_s8 + $0x1694] ss:$8 sps:$4 sm:$0xff]   ;;  %v10452_v17 = vld [vmem:[%s11630_s8 + $0x690] ss:$8 sps:$4 sm:$0xff]  }
 0x1bb   : > { %7790 = vmatprep.subr.bf16.mxu0 %v10385_v49  ;;  %v10455_v49 = vld [vmem:[%s11630_s8 + $0x1690] ss:$8 sps:$4 sm:$0xff]  }
 0x1bd   : > { %7135 = vmatpush1.bf16.msra.mxu1 %v10380_v51  ;;  %v10460_v51 = vld [vmem:[%s11630_s8 + $0x6a4] ss:$8 sps:$4 sm:$0xff]  }
 0x1be   : > { %7791 = vmatpush1.bf16.msra.mxu0 %v10383_v52  ;;  %7136 = vmatprep.subr.bf16.mxu1 %v10388_v54  ;;  %v10463_v52 = vld [vmem:[%s11630_s8 + $0x16a4] ss:$8 sps:$4 sm:$0xff]   ;;  %v10458_v54 = vld [vmem:[%s11630_s8 + $0x6a0] ss:$8 sps:$4 sm:$0xff]  }
 0x1bf   : > { %7792 = vmatprep.subr.bf16.mxu0 %v10391_v55  ;;  %v10461_v55 = vld [vmem:[%s11630_s8 + $0x16a0] ss:$8 sps:$4 sm:$0xff]  }
 0x1c1   : > { %7137 = vmatpush1.bf16.msra.mxu1 %v10386_v63  ;;  %v10472_v63 = vld [vmem:[%s11630_s8 + $0x6c4] ss:$8 sps:$4 sm:$0xff]  }
 0x1c2   : > { %7793 = vmatpush1.bf16.msra.mxu0 %v10389_v0  ;;  %7138 = vmatprep.subr.bf16.mxu1 %v10394_v41  ;;  %v10475_v0 = vld [vmem:[%s11630_s8 + $0x16c4] ss:$8 sps:$4 sm:$0xff]   ;;  %v10470_v41 = vld [vmem:[%s11630_s8 + $0x6c0] ss:$8 sps:$4 sm:$0xff]  }
 0x1c3   : > { %7794 = vmatprep.subr.bf16.mxu0 %v10397_v1  ;;  %v10473_v1 = vld [vmem:[%s11630_s8 + $0x16c0] ss:$8 sps:$4 sm:$0xff]  }
 0x1c5   : > { %7139 = vmatpush1.bf16.msra.mxu1 %v10392_v56  ;;  %v10478_v56 = vld [vmem:[%s11630_s8 + $0x6d4] ss:$8 sps:$4 sm:$0xff]  }
 0x1c6   : > { %7795 = vmatpush1.bf16.msra.mxu0 %v10395_v3  ;;  %7149 = vmatprep.subr.bf16.mxu1 %v10400_v58  ;;  %v10481_v3 = vld [vmem:[%s11630_s8 + $0x16d4] ss:$8 sps:$4 sm:$0xff]   ;;  %v10476_v58 = vld [vmem:[%s11630_s8 + $0x6d0] ss:$8 sps:$4 sm:$0xff]  }
 0x1c7   : > { %7805 = vmatprep.subr.bf16.mxu0 %v10403_v4  ;;  %v10479_v4 = vld [vmem:[%s11630_s8 + $0x16d0] ss:$8 sps:$4 sm:$0xff]  }
 0x1c8   : > { %7141 = vmatmul.mubr.bf16.vlgmr.msra.gmra.mrb[0].mxu1 %v1421_v7  ;;  %v10482_v7 = vld [vmem:[%s11630_s8 + $0x6e0] ss:$8 sps:$4 sm:$0xff]  }
 0x1c9   : > { %7797 = vmatmul.mubr.bf16.vlgmr.msra.gmra.mrb[0].mxu0 %v1617_v8  ;;  %7150 = vmatpush1.bf16.msra.mxu1 %v10398_v9  ;;  %v10485_v8 = vld [vmem:[%s11630_s8 + $0x16e0] ss:$8 sps:$4 sm:$0xff]   ;;  %v10490_v9 = vld [vmem:[%s11630_s8 + $0x6f4] ss:$8 sps:$4 sm:$0xff]  }
 0x1ca   : > { %7806 = vmatpush1.bf16.msra.mxu0 %v10401_v10  ;;  %7151 = vmatprep.subr.bf16.mxu1 %v10406_v11  ;;  %v10493_v10 = vld [vmem:[%s11630_s8 + $0x16f4] ss:$8 sps:$4 sm:$0xff]   ;;  %v10488_v11 = vld [vmem:[%s11630_s8 + $0x6f0] ss:$8 sps:$4 sm:$0xff]  }
 0x1cb   : > { %7807 = vmatprep.subr.bf16.mxu0 %v10409_v12  ;;  %7181 = vmatprep.mubr.bf16.mxu1 %v12171_v13  ;;  %v10491_v12 = vld [vmem:[%s11630_s8 + $0x16f0] ss:$8 sps:$4 sm:$0xff]  }
 0x1cc   : > { %7837 = vmatprep.mubr.bf16.mxu0 %v12174_v59 }
 0x1cd   : > { %7152 = vmatpush1.bf16.msra.mxu1 %v10404_v60  ;;  %v10497_v60 = vld [vmem:[%s11630_s8 + $0x704] ss:$8 sps:$4 sm:$0xff]  }
 0x1ce   : > { %7808 = vmatpush1.bf16.msra.mxu0 %v10407_v14  ;;  %7153 = vmatprep.subr.bf16.mxu1 %v10412_v15  ;;  %v10501_v14 = vld [vmem:[%s11630_s8 + $0x1704] ss:$8 sps:$4 sm:$0xff]   ;;  %v12240_v15 = vrot.slane %v12149_v42, %v11710_v50  ;;  %v1424_v42 = vcombine.high %v12171_v13, %v12171_v13 }
 0x1cf   : > { %7809 = vmatprep.subr.bf16.mxu0 %v10415_v16  ;;  %v12244_v16 = vrot.slane %v12152_v2, %v11710_v50  ;;  %v10502_v2 = vld [vmem:[%s11630_s8 + $0x710] ss:$8 sps:$4 sm:$0xff]   ;;  %v10510_v13 = vld [vmem:[%s11630_s8 + $0x724] ss:$8 sps:$4 sm:$0xff]  }
 0x1d1   : > { %7154 = vmatpush1.bf16.msra.mxu1 %v10410_v19  ;;  %v10495_v19 = vld [vmem:[%s11630_s8 + $0x700] ss:$8 sps:$4 sm:$0xff]  }
 0x1d2   : > { %7810 = vmatpush1.bf16.msra.mxu0 %v10413_v20  ;;  %7155 = vmatprep.subr.bf16.mxu1 %v10418_v21  ;;  %v10499_v20 = vld [vmem:[%s11630_s8 + $0x1700] ss:$8 sps:$4 sm:$0xff]   ;;  %v10504_v21 = vld [vmem:[%s11630_s8 + $0x714] ss:$8 sps:$4 sm:$0xff]  }
 0x1d3   : > { %7811 = vmatprep.subr.bf16.mxu0 %v10421_v22  ;;  %v10507_v22 = vld [vmem:[%s11630_s8 + $0x1714] ss:$8 sps:$4 sm:$0xff]  }
 0x1d5   : > { %7156 = vmatpush1.bf16.msra.mxu1 %v10416_v23  ;;  %v1620_v23 = vcombine.high %v12174_v59, %v12174_v59  ;;  %v10508_v59 = vld [vmem:[%s11630_s8 + $0x720] ss:$8 sps:$4 sm:$0xff]  }
 0x1d6   : > { %7812 = vmatpush1.bf16.msra.mxu0 %v10419_v24  ;;  %7157 = vmatprep.subr.bf16.mxu1 %v10424_v53  ;;  %v10505_v24 = vld [vmem:[%s11630_s8 + $0x1710] ss:$8 sps:$4 sm:$0xff]   ;;  %v10513_v53 = vld [vmem:[%s11630_s8 + $0x1724] ss:$8 sps:$4 sm:$0xff]  }
 0x1d7   : > { %7813 = vmatprep.subr.bf16.mxu0 %v10427_v57  ;;  %v10511_v57 = vld [vmem:[%s11630_s8 + $0x1720] ss:$8 sps:$4 sm:$0xff]  }
 0x1d9   : > { %7158 = vmatpush1.bf16.msra.mxu1 %v10422_v27  ;;  %v10516_v27 = vld [vmem:[%s11630_s8 + $0x734] ss:$8 sps:$4 sm:$0xff]  }
 0x1da   : > { %7814 = vmatpush1.bf16.msra.mxu0 %v10425_v28  ;;  %7159 = vmatprep.subr.bf16.mxu1 %v10430_v29  ;;  %v10519_v28 = vld [vmem:[%s11630_s8 + $0x1734] ss:$8 sps:$4 sm:$0xff]   ;;  %v10514_v29 = vld [vmem:[%s11630_s8 + $0x730] ss:$8 sps:$4 sm:$0xff]  }
 0x1db   : > { %7815 = vmatprep.subr.bf16.mxu0 %v10433_v30  ;;  %v10517_v30 = vld [vmem:[%s11630_s8 + $0x1730] ss:$8 sps:$4 sm:$0xff]  }
 0x1dd   : > { %7160 = vmatpush1.bf16.msra.mxu1 %v10428_v31  ;;  %v10522_v31 = vld [vmem:[%s11630_s8 + $0x744] ss:$8 sps:$4 sm:$0xff]  }
 0x1de   : > { %7816 = vmatpush1.bf16.msra.mxu0 %v10431_v32  ;;  %7161 = vmatprep.subr.bf16.mxu1 %v10436_v33  ;;  %v10525_v32 = vld [vmem:[%s11630_s8 + $0x1744] ss:$8 sps:$4 sm:$0xff]   ;;  %v10520_v33 = vld [vmem:[%s11630_s8 + $0x740] ss:$8 sps:$4 sm:$0xff]  }
 0x1df   : > { %7817 = vmatprep.subr.bf16.mxu0 %v10439_v34  ;;  %v10523_v34 = vld [vmem:[%s11630_s8 + $0x1740] ss:$8 sps:$4 sm:$0xff]  }
 0x1e1   : > { %7162 = vmatpush1.bf16.msra.mxu1 %v10434_v35  ;;  %v10528_v35 = vld [vmem:[%s11630_s8 + $0x754] ss:$8 sps:$4 sm:$0xff]  }
 0x1e2   : > { %7818 = vmatpush1.bf16.msra.mxu0 %v10437_v36  ;;  %7163 = vmatprep.subr.bf16.mxu1 %v10442_v18  ;;  %v10531_v36 = vld [vmem:[%s11630_s8 + $0x1754] ss:$8 sps:$4 sm:$0xff]   ;;  %v10526_v18 = vld [vmem:[%s11630_s8 + $0x750] ss:$8 sps:$4 sm:$0xff]  }
 0x1e3   : > { %7819 = vmatprep.subr.bf16.mxu0 %v10445_v38  ;;  %v10529_v38 = vld [vmem:[%s11630_s8 + $0x1750] ss:$8 sps:$4 sm:$0xff]  }
 0x1e5   : > { %7164 = vmatpush1.bf16.msra.mxu1 %v10440_v43  ;;  %v10534_v43 = vld [vmem:[%s11630_s8 + $0x764] ss:$8 sps:$4 sm:$0xff]  }
 0x1e6   : > { %7820 = vmatpush1.bf16.msra.mxu0 %v10443_v45  ;;  %7165 = vmatprep.subr.bf16.mxu1 %v10448_v25  ;;  %v10537_v45 = vld [vmem:[%s11630_s8 + $0x1764] ss:$8 sps:$4 sm:$0xff]   ;;  %v10532_v25 = vld [vmem:[%s11630_s8 + $0x760] ss:$8 sps:$4 sm:$0xff]  }
 0x1e7   : > { %7821 = vmatprep.subr.bf16.mxu0 %v10451_v46  ;;  %v10535_v46 = vld [vmem:[%s11630_s8 + $0x1760] ss:$8 sps:$4 sm:$0xff]  }
 0x1e9   : > { %7166 = vmatpush1.bf16.msra.mxu1 %v10446_v26  ;;  %v10540_v26 = vld [vmem:[%s11630_s8 + $0x774] ss:$8 sps:$4 sm:$0xff]  }
 0x1ea   : > { %7822 = vmatpush1.bf16.msra.mxu0 %v10449_v47  ;;  %7167 = vmatprep.subr.bf16.mxu1 %v10454_v37  ;;  %v10543_v47 = vld [vmem:[%s11630_s8 + $0x1774] ss:$8 sps:$4 sm:$0xff]   ;;  %v10538_v37 = vld [vmem:[%s11630_s8 + $0x770] ss:$8 sps:$4 sm:$0xff]  }
 0x1eb   : > { %7823 = vmatprep.subr.bf16.mxu0 %v10457_v48  ;;  %v10541_v48 = vld [vmem:[%s11630_s8 + $0x1770] ss:$8 sps:$4 sm:$0xff]  }
 0x1ed   : > { %7168 = vmatpush1.bf16.msra.mxu1 %v10452_v17  ;;  %v10546_v17 = vld [vmem:[%s11630_s8 + $0x784] ss:$8 sps:$4 sm:$0xff]  }
 0x1ee   : > { %7824 = vmatpush1.bf16.msra.mxu0 %v10455_v49  ;;  %7169 = vmatprep.subr.bf16.mxu1 %v10460_v51  ;;  %v10549_v49 = vld [vmem:[%s11630_s8 + $0x1784] ss:$8 sps:$4 sm:$0xff]   ;;  %v10544_v51 = vld [vmem:[%s11630_s8 + $0x780] ss:$8 sps:$4 sm:$0xff]  }
 0x1ef   : > { %7825 = vmatprep.subr.bf16.mxu0 %v10463_v52  ;;  %v10547_v52 = vld [vmem:[%s11630_s8 + $0x1780] ss:$8 sps:$4 sm:$0xff]  }
 0x1f1   : > { %7170 = vmatpush1.bf16.msra.mxu1 %v10458_v54  ;;  %v10552_v54 = vld [vmem:[%s11630_s8 + $0x794] ss:$8 sps:$4 sm:$0xff]  }
 0x1f2   : > { %7826 = vmatpush1.bf16.msra.mxu0 %v10461_v55  ;;  %7171 = vmatprep.subr.bf16.mxu1 %v10466_v39  ;;  %v10555_v55 = vld [vmem:[%s11630_s8 + $0x1794] ss:$8 sps:$4 sm:$0xff]   ;;  %v10550_v39 = vld [vmem:[%s11630_s8 + $0x790] ss:$8 sps:$4 sm:$0xff]  }
 0x1f3   : > { %7827 = vmatprep.subr.bf16.mxu0 %v10469_v40  ;;  %v10553_v40 = vld [vmem:[%s11630_s8 + $0x1790] ss:$8 sps:$4 sm:$0xff]  }
 0x1f5   : > { %7172 = vmatpush1.bf16.msra.mxu1 %v10464_v61  ;;  %v10558_v61 = vld [vmem:[%s11630_s8 + $0x7a4] ss:$8 sps:$4 sm:$0xff]  }
 0x1f6   : > { %7828 = vmatpush1.bf16.msra.mxu0 %v10467_v62  ;;  %7173 = vmatprep.subr.bf16.mxu1 %v10472_v63  ;;  %v10561_v62 = vld [vmem:[%s11630_s8 + $0x17a4] ss:$8 sps:$4 sm:$0xff]   ;;  %v10556_v63 = vld [vmem:[%s11630_s8 + $0x7a0] ss:$8 sps:$4 sm:$0xff]  }
 0x1f7   : > { %7829 = vmatprep.subr.bf16.mxu0 %v10475_v0  ;;  %v10559_v0 = vld [vmem:[%s11630_s8 + $0x17a0] ss:$8 sps:$4 sm:$0xff]  }
 0x1f9   : > { %7174 = vmatpush1.bf16.msra.mxu1 %v10470_v41  ;;  %v10564_v41 = vld [vmem:[%s11630_s8 + $0x7b4] ss:$8 sps:$4 sm:$0xff]  }
 0x1fa   : > { %7830 = vmatpush1.bf16.msra.mxu0 %v10473_v1  ;;  %7175 = vmatprep.subr.bf16.mxu1 %v10478_v56  ;;  %v10567_v1 = vld [vmem:[%s11630_s8 + $0x17b4] ss:$8 sps:$4 sm:$0xff]   ;;  %v10562_v56 = vld [vmem:[%s11630_s8 + $0x7b0] ss:$8 sps:$4 sm:$0xff]  }
 0x1fb   : > { %7831 = vmatprep.subr.bf16.mxu0 %v10481_v3  ;;  %v10565_v3 = vld [vmem:[%s11630_s8 + $0x17b0] ss:$8 sps:$4 sm:$0xff]  }
 0x1fd   : > { %7176 = vmatpush1.bf16.msra.mxu1 %v10476_v58  ;;  %v10570_v58 = vld [vmem:[%s11630_s8 + $0x7c4] ss:$8 sps:$4 sm:$0xff]  }
 0x1fe   : > { %7832 = vmatpush1.bf16.msra.mxu0 %v10479_v4  ;;  %7177 = vmatprep.subr.bf16.mxu1 %v10484_v5  ;;  %v10573_v4 = vld [vmem:[%s11630_s8 + $0x17c4] ss:$8 sps:$4 sm:$0xff]   ;;  %v10568_v5 = vld [vmem:[%s11630_s8 + $0x7c0] ss:$8 sps:$4 sm:$0xff]  }
 0x1ff   : > { %7833 = vmatprep.subr.bf16.mxu0 %v10487_v6  ;;  %v10571_v6 = vld [vmem:[%s11630_s8 + $0x17c0] ss:$8 sps:$4 sm:$0xff]  }
 0x201   : > { %7178 = vmatpush1.bf16.msra.mxu1 %v10482_v7  ;;  %v10576_v7 = vld [vmem:[%s11630_s8 + $0x7d4] ss:$8 sps:$4 sm:$0xff]  }
 0x202   : > { %7834 = vmatpush1.bf16.msra.mxu0 %v10485_v8  ;;  %7179 = vmatprep.subr.bf16.mxu1 %v10490_v9  ;;  %v10579_v8 = vld [vmem:[%s11630_s8 + $0x17d4] ss:$8 sps:$4 sm:$0xff]   ;;  %v10574_v9 = vld [vmem:[%s11630_s8 + $0x7d0] ss:$8 sps:$4 sm:$0xff]  }
 0x203   : > { %7835 = vmatprep.subr.bf16.mxu0 %v10493_v10  ;;  %v10577_v10 = vld [vmem:[%s11630_s8 + $0x17d0] ss:$8 sps:$4 sm:$0xff]  }
 0x205   : > { %7180 = vmatpush1.bf16.msra.mxu1 %v10488_v11  ;;  %v10582_v11 = vld [vmem:[%s11630_s8 + $0x7e4] ss:$8 sps:$4 sm:$0xff]  }
 0x206   : > { %7836 = vmatpush1.bf16.msra.mxu0 %v10491_v12  ;;  %7190 = vmatprep.subr.bf16.mxu1 %v10497_v60  ;;  %v10585_v12 = vld [vmem:[%s11630_s8 + $0x17e4] ss:$8 sps:$4 sm:$0xff]  }
 0x207   : > { %7846 = vmatprep.subr.bf16.mxu0 %v10501_v14  ;;  %v12309_v60 = vld [vmem:[%s11707_s13 + $0x10] sm:$0xff] }
 0x208   : > { %7182 = vmatmul.mubr.bf16.vlgmr.msra.gmra.mrb[0].mxu1 %v12240_v15  ;;  %v12312_v14 = vld [vmem:[%s11707_s13 + $0x30] sm:$0xff] }
 0x209   : > { %7838 = vmatmul.mubr.bf16.vlgmr.msra.gmra.mrb[0].mxu0 %v12244_v16  ;;  %7191 = vmatpush1.bf16.msra.mxu1 %v10495_v19  ;;  %v10580_v19 = vld [vmem:[%s11630_s8 + $0x7e0] ss:$8 sps:$4 sm:$0xff]  }
 0x20a   : > { %7847 = vmatpush1.bf16.msra.mxu0 %v10499_v20  ;;  %7192 = vmatprep.subr.bf16.mxu1 %v10504_v21  ;;  %v10583_v20 = vld [vmem:[%s11630_s8 + $0x17e0] ss:$8 sps:$4 sm:$0xff]   ;;  %v10588_v21 = vld [vmem:[%s11630_s8 + $0x7f4] ss:$8 sps:$4 sm:$0xff]  }
 0x20b   : > { %7848 = vmatprep.subr.bf16.mxu0 %v10507_v22  ;;  %7222 = vmatprep.mubr.bf16.mxu1 %v1424_v42  ;;  %v10591_v22 = vld [vmem:[%s11630_s8 + $0x17f4] ss:$8 sps:$4 sm:$0xff]   ;;  %v12320_v42 = vrot.slane %v12309_v60, %v11710_v50 }
 0x20c   : > { %7878 = vmatprep.mubr.bf16.mxu0 %v1620_v23  ;;  %v12324_v23 = vrot.slane %v12312_v14, %v11710_v50 }
 0x20d   : > { %7193 = vmatpush1.bf16.msra.mxu1 %v10502_v2  ;;  %v10586_v2 = vld [vmem:[%s11630_s8 + $0x7f0] ss:$8 sps:$4 sm:$0xff]  }
 0x20e   : > { %7849 = vmatpush1.bf16.msra.mxu0 %v10505_v24  ;;  %7194 = vmatprep.subr.bf16.mxu1 %v10510_v13  ;;  %v10589_v24 = vld [vmem:[%s11630_s8 + $0x17f0] ss:$8 sps:$4 sm:$0xff]   ;;  %v10594_v13 = vld [vmem:[%s11630_s8 + $0x804] ss:$8 sps:$4 sm:$0xff]  }
 0x20f   : > { %7850 = vmatprep.subr.bf16.mxu0 %v10513_v53  ;;  %v10597_v53 = vld [vmem:[%s11630_s8 + $0x1804] ss:$8 sps:$4 sm:$0xff]  }
 0x211   : > { %7195 = vmatpush1.bf16.msra.mxu1 %v10508_v59  ;;  %v1440_v59 = vcombine.high %v12320_v42, %v12320_v42 }
 0x212   : > { %7851 = vmatpush1.bf16.msra.mxu0 %v10511_v57  ;;  %7196 = vmatprep.subr.bf16.mxu1 %v10516_v27  ;;  %v1636_v57 = vcombine.high %v12324_v23, %v12324_v23  ;;  %v1422_v27 = vcombine.high %v12240_v15, %v12240_v15 }
 0x213   : > { %7852 = vmatprep.subr.bf16.mxu0 %v10519_v28  ;;  %v1618_v28 = vcombine.high %v12244_v16, %v12244_v16  ;;  %v10598_v16 = vld [vmem:[%s11630_s8 + $0x810] ss:$8 sps:$4 sm:$0xff]  }
 0x214   : > { %v12346_v15 = vrot.slane %v1636_v57, %v11710_v50  ;;  %v10673_v57 = vld [vmem:[%s11630_s8 + $0x18d0] ss:$8 sps:$4 sm:$0xff]  }
 0x215   : > { %7197 = vmatpush1.bf16.msra.mxu1 %v10514_v29  ;;  %v10592_v29 = vld [vmem:[%s11630_s8 + $0x800] ss:$8 sps:$4 sm:$0xff]  }
 0x216   : > { %7853 = vmatpush1.bf16.msra.mxu0 %v10517_v30  ;;  %7198 = vmatprep.subr.bf16.mxu1 %v10522_v31  ;;  %v10595_v30 = vld [vmem:[%s11630_s8 + $0x1800] ss:$8 sps:$4 sm:$0xff]   ;;  %v10600_v31 = vld [vmem:[%s11630_s8 + $0x814] ss:$8 sps:$4 sm:$0xff]  }
 0x217   : > { %7854 = vmatprep.subr.bf16.mxu0 %v10525_v32  ;;  %v10603_v32 = vld [vmem:[%s11630_s8 + $0x1814] ss:$8 sps:$4 sm:$0xff]  }
 0x219   : > { %7199 = vmatpush1.bf16.msra.mxu1 %v10520_v33  ;;  %v12343_v33 = vrot.slane %v1440_v59, %v11710_v50  ;;  %v10670_v59 = vld [vmem:[%s11630_s8 + $0x8d0] ss:$8 sps:$4 sm:$0xff]  }
 0x21a   : > { %7855 = vmatpush1.bf16.msra.mxu0 %v10523_v34  ;;  %7200 = vmatprep.subr.bf16.mxu1 %v10528_v35  ;;  %v10601_v34 = vld [vmem:[%s11630_s8 + $0x1810] ss:$8 sps:$4 sm:$0xff]   ;;  %v10606_v35 = vld [vmem:[%s11630_s8 + $0x824] ss:$8 sps:$4 sm:$0xff]  }
 0x21b   : > { %7856 = vmatprep.subr.bf16.mxu0 %v10531_v36  ;;  %v10609_v36 = vld [vmem:[%s11630_s8 + $0x1824] ss:$8 sps:$4 sm:$0xff]  }
 0x21d   : > { %7201 = vmatpush1.bf16.msra.mxu1 %v10526_v18  ;;  %v10604_v18 = vld [vmem:[%s11630_s8 + $0x820] ss:$8 sps:$4 sm:$0xff]  }
 0x21e   : > { %7857 = vmatpush1.bf16.msra.mxu0 %v10529_v38  ;;  %7202 = vmatprep.subr.bf16.mxu1 %v10534_v43  ;;  %v10607_v38 = vld [vmem:[%s11630_s8 + $0x1820] ss:$8 sps:$4 sm:$0xff]   ;;  %v10612_v43 = vld [vmem:[%s11630_s8 + $0x834] ss:$8 sps:$4 sm:$0xff]  }
 0x21f   : > { %7858 = vmatprep.subr.bf16.mxu0 %v10537_v45  ;;  %v10615_v45 = vld [vmem:[%s11630_s8 + $0x1834] ss:$8 sps:$4 sm:$0xff]  }
 0x221   : > { %7203 = vmatpush1.bf16.msra.mxu1 %v10532_v25  ;;  %v10610_v25 = vld [vmem:[%s11630_s8 + $0x830] ss:$8 sps:$4 sm:$0xff]  }
 0x222   : > { %7859 = vmatpush1.bf16.msra.mxu0 %v10535_v46  ;;  %7204 = vmatprep.subr.bf16.mxu1 %v10540_v26  ;;  %v10613_v46 = vld [vmem:[%s11630_s8 + $0x1830] ss:$8 sps:$4 sm:$0xff]   ;;  %v10618_v26 = vld [vmem:[%s11630_s8 + $0x844] ss:$8 sps:$4 sm:$0xff]  }
 0x223   : > { %7860 = vmatprep.subr.bf16.mxu0 %v10543_v47  ;;  %v10621_v47 = vld [vmem:[%s11630_s8 + $0x1844] ss:$8 sps:$4 sm:$0xff]  }
 0x225   : > { %7205 = vmatpush1.bf16.msra.mxu1 %v10538_v37  ;;  %v10616_v37 = vld [vmem:[%s11630_s8 + $0x840] ss:$8 sps:$4 sm:$0xff]  }
 0x226   : > { %7861 = vmatpush1.bf16.msra.mxu0 %v10541_v48  ;;  %7206 = vmatprep.subr.bf16.mxu1 %v10546_v17  ;;  %v10619_v48 = vld [vmem:[%s11630_s8 + $0x1840] ss:$8 sps:$4 sm:$0xff]   ;;  %v10624_v17 = vld [vmem:[%s11630_s8 + $0x854] ss:$8 sps:$4 sm:$0xff]  }
 0x227   : > { %7862 = vmatprep.subr.bf16.mxu0 %v10549_v49  ;;  %v10627_v49 = vld [vmem:[%s11630_s8 + $0x1854] ss:$8 sps:$4 sm:$0xff]  }
 0x229   : > { %7207 = vmatpush1.bf16.msra.mxu1 %v10544_v51  ;;  %v10622_v51 = vld [vmem:[%s11630_s8 + $0x850] ss:$8 sps:$4 sm:$0xff]  }
 0x22a   : > { %7863 = vmatpush1.bf16.msra.mxu0 %v10547_v52  ;;  %7208 = vmatprep.subr.bf16.mxu1 %v10552_v54  ;;  %v10625_v52 = vld [vmem:[%s11630_s8 + $0x1850] ss:$8 sps:$4 sm:$0xff]   ;;  %v10630_v54 = vld [vmem:[%s11630_s8 + $0x864] ss:$8 sps:$4 sm:$0xff]  }
 0x22b   : > { %7864 = vmatprep.subr.bf16.mxu0 %v10555_v55  ;;  %v10633_v55 = vld [vmem:[%s11630_s8 + $0x1864] ss:$8 sps:$4 sm:$0xff]  }
 0x22d   : > { %7209 = vmatpush1.bf16.msra.mxu1 %v10550_v39  ;;  %v10628_v39 = vld [vmem:[%s11630_s8 + $0x860] ss:$8 sps:$4 sm:$0xff]  }
 0x22e   : > { %7865 = vmatpush1.bf16.msra.mxu0 %v10553_v40  ;;  %7210 = vmatprep.subr.bf16.mxu1 %v10558_v61  ;;  %v10631_v40 = vld [vmem:[%s11630_s8 + $0x1860] ss:$8 sps:$4 sm:$0xff]   ;;  %v10636_v61 = vld [vmem:[%s11630_s8 + $0x874] ss:$8 sps:$4 sm:$0xff]  }
 0x22f   : > { %7866 = vmatprep.subr.bf16.mxu0 %v10561_v62  ;;  %v10639_v62 = vld [vmem:[%s11630_s8 + $0x1874] ss:$8 sps:$4 sm:$0xff]  }
 0x231   : > { %7211 = vmatpush1.bf16.msra.mxu1 %v10556_v63  ;;  %v10634_v63 = vld [vmem:[%s11630_s8 + $0x870] ss:$8 sps:$4 sm:$0xff]  }
 0x232   : > { %7867 = vmatpush1.bf16.msra.mxu0 %v10559_v0  ;;  %7212 = vmatprep.subr.bf16.mxu1 %v10564_v41  ;;  %v10637_v0 = vld [vmem:[%s11630_s8 + $0x1870] ss:$8 sps:$4 sm:$0xff]   ;;  %v10642_v41 = vld [vmem:[%s11630_s8 + $0x884] ss:$8 sps:$4 sm:$0xff]  }
 0x233   : > { %7868 = vmatprep.subr.bf16.mxu0 %v10567_v1  ;;  %v10645_v1 = vld [vmem:[%s11630_s8 + $0x1884] ss:$8 sps:$4 sm:$0xff]  }
 0x235   : > { %7213 = vmatpush1.bf16.msra.mxu1 %v10562_v56  ;;  %v10640_v56 = vld [vmem:[%s11630_s8 + $0x880] ss:$8 sps:$4 sm:$0xff]  }
 0x236   : > { %7869 = vmatpush1.bf16.msra.mxu0 %v10565_v3  ;;  %7214 = vmatprep.subr.bf16.mxu1 %v10570_v58  ;;  %v10643_v3 = vld [vmem:[%s11630_s8 + $0x1880] ss:$8 sps:$4 sm:$0xff]   ;;  %v10648_v58 = vld [vmem:[%s11630_s8 + $0x894] ss:$8 sps:$4 sm:$0xff]  }
 0x237   : > { %7870 = vmatprep.subr.bf16.mxu0 %v10573_v4  ;;  %v10651_v4 = vld [vmem:[%s11630_s8 + $0x1894] ss:$8 sps:$4 sm:$0xff]  }
 0x239   : > { %7215 = vmatpush1.bf16.msra.mxu1 %v10568_v5  ;;  %v10646_v5 = vld [vmem:[%s11630_s8 + $0x890] ss:$8 sps:$4 sm:$0xff]  }
 0x23a   : > { %7871 = vmatpush1.bf16.msra.mxu0 %v10571_v6  ;;  %7216 = vmatprep.subr.bf16.mxu1 %v10576_v7  ;;  %v10649_v6 = vld [vmem:[%s11630_s8 + $0x1890] ss:$8 sps:$4 sm:$0xff]   ;;  %v10654_v7 = vld [vmem:[%s11630_s8 + $0x8a4] ss:$8 sps:$4 sm:$0xff]  }
 0x23b   : > { %7872 = vmatprep.subr.bf16.mxu0 %v10579_v8  ;;  %v10657_v8 = vld [vmem:[%s11630_s8 + $0x18a4] ss:$8 sps:$4 sm:$0xff]  }
 0x23d   : > { %7217 = vmatpush1.bf16.msra.mxu1 %v10574_v9  ;;  %v10652_v9 = vld [vmem:[%s11630_s8 + $0x8a0] ss:$8 sps:$4 sm:$0xff]  }
 0x23e   : > { %7873 = vmatpush1.bf16.msra.mxu0 %v10577_v10  ;;  %7218 = vmatprep.subr.bf16.mxu1 %v10582_v11  ;;  %v10655_v10 = vld [vmem:[%s11630_s8 + $0x18a0] ss:$8 sps:$4 sm:$0xff]   ;;  %v10660_v11 = vld [vmem:[%s11630_s8 + $0x8b4] ss:$8 sps:$4 sm:$0xff]  }
 0x23f   : > { %7874 = vmatprep.subr.bf16.mxu0 %v10585_v12  ;;  %v10663_v12 = vld [vmem:[%s11630_s8 + $0x18b4] ss:$8 sps:$4 sm:$0xff]  }
 0x241   : > { %7219 = vmatpush1.bf16.msra.mxu1 %v10580_v19  ;;  %v10658_v19 = vld [vmem:[%s11630_s8 + $0x8b0] ss:$8 sps:$4 sm:$0xff]  }
 0x242   : > { %7875 = vmatpush1.bf16.msra.mxu0 %v10583_v20  ;;  %7220 = vmatprep.subr.bf16.mxu1 %v10588_v21  ;;  %v10661_v20 = vld [vmem:[%s11630_s8 + $0x18b0] ss:$8 sps:$4 sm:$0xff]   ;;  %v10666_v21 = vld [vmem:[%s11630_s8 + $0x8c4] ss:$8 sps:$4 sm:$0xff]  }
 0x243   : > { %7876 = vmatprep.subr.bf16.mxu0 %v10591_v22  ;;  %v10669_v22 = vld [vmem:[%s11630_s8 + $0x18c4] ss:$8 sps:$4 sm:$0xff]  }
 0x245   : > { %7221 = vmatpush1.bf16.msra.mxu1 %v10586_v2  ;;  %v10664_v2 = vld [vmem:[%s11630_s8 + $0x8c0] ss:$8 sps:$4 sm:$0xff]  }
 0x246   : > { %7877 = vmatpush1.bf16.msra.mxu0 %v10589_v24  ;;  %7231 = vmatprep.subr.bf16.mxu1 %v10594_v13  ;;  %v10667_v24 = vld [vmem:[%s11630_s8 + $0x18c0] ss:$8 sps:$4 sm:$0xff]   ;;  %v10672_v13 = vld [vmem:[%s11630_s8 + $0x8d4] ss:$8 sps:$4 sm:$0xff]  }
 0x247   : > { %7887 = vmatprep.subr.bf16.mxu0 %v10597_v53  ;;  %v10675_v53 = vld [vmem:[%s11630_s8 + $0x18d4] ss:$8 sps:$4 sm:$0xff]  }
 0x248   : > { %7223 = vmatmul.mubr.bf16.vlgmr.msra.gmra.mrb[0].mxu1 %v1422_v27  ;;  %v10678_v27 = vld [vmem:[%s11630_s8 + $0x8e4] ss:$8 sps:$4 sm:$0xff]  }
 0x249   : > { %7879 = vmatmul.mubr.bf16.vlgmr.msra.gmra.mrb[0].mxu0 %v1618_v28  ;;  %7232 = vmatpush1.bf16.msra.mxu1 %v10592_v29  ;;  %v10681_v28 = vld [vmem:[%s11630_s8 + $0x18e4] ss:$8 sps:$4 sm:$0xff]   ;;  %v10676_v29 = vld [vmem:[%s11630_s8 + $0x8e0] ss:$8 sps:$4 sm:$0xff]  }
 0x24a   : > { %7888 = vmatpush1.bf16.msra.mxu0 %v10595_v30  ;;  %7233 = vmatprep.subr.bf16.mxu1 %v10600_v31  ;;  %v10679_v30 = vld [vmem:[%s11630_s8 + $0x18e0] ss:$8 sps:$4 sm:$0xff]   ;;  %v10684_v31 = vld [vmem:[%s11630_s8 + $0x8f4] ss:$8 sps:$4 sm:$0xff]  }
 0x24b   : > { %7889 = vmatprep.subr.bf16.mxu0 %v10603_v32  ;;  %7263 = vmatprep.mubr.bf16.mxu1 %v12343_v33  ;;  %v10687_v32 = vld [vmem:[%s11630_s8 + $0x18f4] ss:$8 sps:$4 sm:$0xff]  }
 0x24c   : > { %7919 = vmatprep.mubr.bf16.mxu0 %v12346_v15 }
 0x24d   : > { %7234 = vmatpush1.bf16.msra.mxu1 %v10598_v16  ;;  %v10682_v16 = vld [vmem:[%s11630_s8 + $0x8f0] ss:$8 sps:$4 sm:$0xff]  }
 0x24e   : > { %7890 = vmatpush1.bf16.msra.mxu0 %v10601_v34  ;;  %7235 = vmatprep.subr.bf16.mxu1 %v10606_v35  ;;  %v10685_v34 = vld [vmem:[%s11630_s8 + $0x18f0] ss:$8 sps:$4 sm:$0xff]   ;;  %v10690_v35 = vld [vmem:[%s11630_s8 + $0x904] ss:$8 sps:$4 sm:$0xff]  }
 0x24f   : > { %7891 = vmatprep.subr.bf16.mxu0 %v10609_v36  ;;  %v10693_v36 = vld [vmem:[%s11630_s8 + $0x1904] ss:$8 sps:$4 sm:$0xff]  }
 0x251   : > { %7236 = vmatpush1.bf16.msra.mxu1 %v10604_v18  ;;  %v12412_v18 = vrot.slane %v12320_v42, %v11710_v50  ;;  %v1472_v42 = vcombine.high %v12343_v33, %v12343_v33  ;;  %v10702_v33 = vld [vmem:[%s11630_s8 + $0x924] ss:$8 sps:$4 sm:$0xff]  }
 0x252   : > { %7892 = vmatpush1.bf16.msra.mxu0 %v10607_v38  ;;  %7237 = vmatprep.subr.bf16.mxu1 %v10612_v43  ;;  %v12416_v38 = vrot.slane %v12324_v23, %v11710_v50  ;;  %v10688_v43 = vld [vmem:[%s11630_s8 + $0x900] ss:$8 sps:$4 sm:$0xff]   ;;  %v10694_v23 = vld [vmem:[%s11630_s8 + $0x910] ss:$8 sps:$4 sm:$0xff]  }
 0x253   : > { %7893 = vmatprep.subr.bf16.mxu0 %v10615_v45  ;;  %v10691_v45 = vld [vmem:[%s11630_s8 + $0x1900] ss:$8 sps:$4 sm:$0xff]  }
 0x255   : > { %7238 = vmatpush1.bf16.msra.mxu1 %v10610_v25  ;;  %v10696_v25 = vld [vmem:[%s11630_s8 + $0x914] ss:$8 sps:$4 sm:$0xff]  }
 0x256   : > { %7894 = vmatpush1.bf16.msra.mxu0 %v10613_v46  ;;  %7239 = vmatprep.subr.bf16.mxu1 %v10618_v26  ;;  %v10699_v46 = vld [vmem:[%s11630_s8 + $0x1914] ss:$8 sps:$4 sm:$0xff]   ;;  %v1668_v26 = vcombine.high %v12346_v15, %v12346_v15  ;;  %v10700_v15 = vld [vmem:[%s11630_s8 + $0x920] ss:$8 sps:$4 sm:$0xff]  }
 0x257   : > { %7895 = vmatprep.subr.bf16.mxu0 %v10621_v47  ;;  %v10697_v47 = vld [vmem:[%s11630_s8 + $0x1910] ss:$8 sps:$4 sm:$0xff]  }
 0x259   : > { %7240 = vmatpush1.bf16.msra.mxu1 %v10616_v37  ;;  %v10705_v37 = vld [vmem:[%s11630_s8 + $0x1924] ss:$8 sps:$4 sm:$0xff]  }
 0x25a   : > { %7896 = vmatpush1.bf16.msra.mxu0 %v10619_v48  ;;  %7241 = vmatprep.subr.bf16.mxu1 %v10624_v17  ;;  %v10703_v48 = vld [vmem:[%s11630_s8 + $0x1920] ss:$8 sps:$4 sm:$0xff]   ;;  %v10708_v17 = vld [vmem:[%s11630_s8 + $0x934] ss:$8 sps:$4 sm:$0xff]  }
 0x25b   : > { %7897 = vmatprep.subr.bf16.mxu0 %v10627_v49  ;;  %v10711_v49 = vld [vmem:[%s11630_s8 + $0x1934] ss:$8 sps:$4 sm:$0xff]  }
 0x25d   : > { %7242 = vmatpush1.bf16.msra.mxu1 %v10622_v51  ;;  %v10706_v51 = vld [vmem:[%s11630_s8 + $0x930] ss:$8 sps:$4 sm:$0xff]  }
 0x25e   : > { %7898 = vmatpush1.bf16.msra.mxu0 %v10625_v52  ;;  %7243 = vmatprep.subr.bf16.mxu1 %v10630_v54  ;;  %v10709_v52 = vld [vmem:[%s11630_s8 + $0x1930] ss:$8 sps:$4 sm:$0xff]   ;;  %v10714_v54 = vld [vmem:[%s11630_s8 + $0x944] ss:$8 sps:$4 sm:$0xff]  }
 0x25f   : > { %7899 = vmatprep.subr.bf16.mxu0 %v10633_v55  ;;  %v10717_v55 = vld [vmem:[%s11630_s8 + $0x1944] ss:$8 sps:$4 sm:$0xff]  }
 0x261   : > { %7244 = vmatpush1.bf16.msra.mxu1 %v10628_v39  ;;  %v10712_v39 = vld [vmem:[%s11630_s8 + $0x940] ss:$8 sps:$4 sm:$0xff]  }
 0x262   : > { %7900 = vmatpush1.bf16.msra.mxu0 %v10631_v40  ;;  %7245 = vmatprep.subr.bf16.mxu1 %v10636_v61  ;;  %v10715_v40 = vld [vmem:[%s11630_s8 + $0x1940] ss:$8 sps:$4 sm:$0xff]   ;;  %v10720_v61 = vld [vmem:[%s11630_s8 + $0x954] ss:$8 sps:$4 sm:$0xff]  }
 0x263   : > { %7901 = vmatprep.subr.bf16.mxu0 %v10639_v62  ;;  %v10723_v62 = vld [vmem:[%s11630_s8 + $0x1954] ss:$8 sps:$4 sm:$0xff]  }
 0x265   : > { %7246 = vmatpush1.bf16.msra.mxu1 %v10634_v63  ;;  %v10718_v63 = vld [vmem:[%s11630_s8 + $0x950] ss:$8 sps:$4 sm:$0xff]  }
 0x266   : > { %7902 = vmatpush1.bf16.msra.mxu0 %v10637_v0  ;;  %7247 = vmatprep.subr.bf16.mxu1 %v10642_v41  ;;  %v10721_v0 = vld [vmem:[%s11630_s8 + $0x1950] ss:$8 sps:$4 sm:$0xff]   ;;  %v10726_v41 = vld [vmem:[%s11630_s8 + $0x964] ss:$8 sps:$4 sm:$0xff]  }
 0x267   : > { %7903 = vmatprep.subr.bf16.mxu0 %v10645_v1  ;;  %v10729_v1 = vld [vmem:[%s11630_s8 + $0x1964] ss:$8 sps:$4 sm:$0xff]  }
 0x269   : > { %7248 = vmatpush1.bf16.msra.mxu1 %v10640_v56  ;;  %v10724_v56 = vld [vmem:[%s11630_s8 + $0x960] ss:$8 sps:$4 sm:$0xff]  }
 0x26a   : > { %7904 = vmatpush1.bf16.msra.mxu0 %v10643_v3  ;;  %7249 = vmatprep.subr.bf16.mxu1 %v10648_v58  ;;  %v10727_v3 = vld [vmem:[%s11630_s8 + $0x1960] ss:$8 sps:$4 sm:$0xff]   ;;  %v10732_v58 = vld [vmem:[%s11630_s8 + $0x974] ss:$8 sps:$4 sm:$0xff]  }
 0x26b   : > { %7905 = vmatprep.subr.bf16.mxu0 %v10651_v4  ;;  %v10735_v4 = vld [vmem:[%s11630_s8 + $0x1974] ss:$8 sps:$4 sm:$0xff]  }
 0x26d   : > { %7250 = vmatpush1.bf16.msra.mxu1 %v10646_v5  ;;  %v10730_v5 = vld [vmem:[%s11630_s8 + $0x970] ss:$8 sps:$4 sm:$0xff]  }
 0x26e   : > { %7906 = vmatpush1.bf16.msra.mxu0 %v10649_v6  ;;  %7251 = vmatprep.subr.bf16.mxu1 %v10654_v7  ;;  %v10733_v6 = vld [vmem:[%s11630_s8 + $0x1970] ss:$8 sps:$4 sm:$0xff]   ;;  %v10738_v7 = vld [vmem:[%s11630_s8 + $0x984] ss:$8 sps:$4 sm:$0xff]  }
 0x26f   : > { %7907 = vmatprep.subr.bf16.mxu0 %v10657_v8  ;;  %v10741_v8 = vld [vmem:[%s11630_s8 + $0x1984] ss:$8 sps:$4 sm:$0xff]  }
 0x271   : > { %7252 = vmatpush1.bf16.msra.mxu1 %v10652_v9  ;;  %v10736_v9 = vld [vmem:[%s11630_s8 + $0x980] ss:$8 sps:$4 sm:$0xff]  }
 0x272   : > { %7908 = vmatpush1.bf16.msra.mxu0 %v10655_v10  ;;  %7253 = vmatprep.subr.bf16.mxu1 %v10660_v11  ;;  %v10739_v10 = vld [vmem:[%s11630_s8 + $0x1980] ss:$8 sps:$4 sm:$0xff]   ;;  %v10744_v11 = vld [vmem:[%s11630_s8 + $0x994] ss:$8 sps:$4 sm:$0xff]  }
 0x273   : > { %7909 = vmatprep.subr.bf16.mxu0 %v10663_v12  ;;  %v10747_v12 = vld [vmem:[%s11630_s8 + $0x1994] ss:$8 sps:$4 sm:$0xff]  }
 0x275   : > { %7254 = vmatpush1.bf16.msra.mxu1 %v10658_v19  ;;  %v10742_v19 = vld [vmem:[%s11630_s8 + $0x990] ss:$8 sps:$4 sm:$0xff]  }
 0x276   : > { %7910 = vmatpush1.bf16.msra.mxu0 %v10661_v20  ;;  %7255 = vmatprep.subr.bf16.mxu1 %v10666_v21  ;;  %v10745_v20 = vld [vmem:[%s11630_s8 + $0x1990] ss:$8 sps:$4 sm:$0xff]   ;;  %v10750_v21 = vld [vmem:[%s11630_s8 + $0x9a4] ss:$8 sps:$4 sm:$0xff]  }
 0x277   : > { %7911 = vmatprep.subr.bf16.mxu0 %v10669_v22  ;;  %v10753_v22 = vld [vmem:[%s11630_s8 + $0x19a4] ss:$8 sps:$4 sm:$0xff]  }
 0x279   : > { %7256 = vmatpush1.bf16.msra.mxu1 %v10664_v2  ;;  %v10748_v2 = vld [vmem:[%s11630_s8 + $0x9a0] ss:$8 sps:$4 sm:$0xff]  }
 0x27a   : > { %7912 = vmatpush1.bf16.msra.mxu0 %v10667_v24  ;;  %7257 = vmatprep.subr.bf16.mxu1 %v10672_v13  ;;  %v10751_v24 = vld [vmem:[%s11630_s8 + $0x19a0] ss:$8 sps:$4 sm:$0xff]   ;;  %v10756_v13 = vld [vmem:[%s11630_s8 + $0x9b4] ss:$8 sps:$4 sm:$0xff]  }
 0x27b   : > { %7913 = vmatprep.subr.bf16.mxu0 %v10675_v53  ;;  %v10759_v53 = vld [vmem:[%s11630_s8 + $0x19b4] ss:$8 sps:$4 sm:$0xff]  }
 0x27d   : > { %7258 = vmatpush1.bf16.msra.mxu1 %v10670_v59  ;;  %v10754_v59 = vld [vmem:[%s11630_s8 + $0x9b0] ss:$8 sps:$4 sm:$0xff]  }
 0x27e   : > { %7914 = vmatpush1.bf16.msra.mxu0 %v10673_v57  ;;  %7259 = vmatprep.subr.bf16.mxu1 %v10678_v27  ;;  %v10757_v57 = vld [vmem:[%s11630_s8 + $0x19b0] ss:$8 sps:$4 sm:$0xff]   ;;  %v10762_v27 = vld [vmem:[%s11630_s8 + $0x9c4] ss:$8 sps:$4 sm:$0xff]  }
 0x27f   : > { %7915 = vmatprep.subr.bf16.mxu0 %v10681_v28  ;;  %v10765_v28 = vld [vmem:[%s11630_s8 + $0x19c4] ss:$8 sps:$4 sm:$0xff]  }
 0x281   : > { %7260 = vmatpush1.bf16.msra.mxu1 %v10676_v29  ;;  %v10760_v29 = vld [vmem:[%s11630_s8 + $0x9c0] ss:$8 sps:$4 sm:$0xff]  }
 0x282   : > { %7916 = vmatpush1.bf16.msra.mxu0 %v10679_v30  ;;  %7261 = vmatprep.subr.bf16.mxu1 %v10684_v31  ;;  %v10763_v30 = vld [vmem:[%s11630_s8 + $0x19c0] ss:$8 sps:$4 sm:$0xff]   ;;  %v10768_v31 = vld [vmem:[%s11630_s8 + $0x9d4] ss:$8 sps:$4 sm:$0xff]  }
 0x283   : > { %7917 = vmatprep.subr.bf16.mxu0 %v10687_v32  ;;  %v10771_v32 = vld [vmem:[%s11630_s8 + $0x19d4] ss:$8 sps:$4 sm:$0xff]  }
 0x285   : > { %7262 = vmatpush1.bf16.msra.mxu1 %v10682_v16  ;;  %v10766_v16 = vld [vmem:[%s11630_s8 + $0x9d0] ss:$8 sps:$4 sm:$0xff]  }
 0x286   : > { %7918 = vmatpush1.bf16.msra.mxu0 %v10685_v34  ;;  %7272 = vmatprep.subr.bf16.mxu1 %v10690_v35  ;;  %v10769_v34 = vld [vmem:[%s11630_s8 + $0x19d0] ss:$8 sps:$4 sm:$0xff]   ;;  %v10774_v35 = vld [vmem:[%s11630_s8 + $0x9e4] ss:$8 sps:$4 sm:$0xff]  }
 0x287   : > { %7928 = vmatprep.subr.bf16.mxu0 %v10693_v36  ;;  %v10777_v36 = vld [vmem:[%s11630_s8 + $0x19e4] ss:$8 sps:$4 sm:$0xff]  }
 0x288   : > { %7264 = vmatmul.mubr.bf16.vlgmr.msra.gmra.mrb[0].mxu1 %v12412_v18 }
 0x289   : > { %7920 = vmatmul.mubr.bf16.vlgmr.msra.gmra.mrb[0].mxu0 %v12416_v38  ;;  %7273 = vmatpush1.bf16.msra.mxu1 %v10688_v43  ;;  %v1425_v43 = vcombine.high %v12309_v60, %v12309_v60  ;;  %v10778_v60 = vld [vmem:[%s11630_s8 + $0x9f0] ss:$8 sps:$4 sm:$0xff]  }
 0x28a   : > { %7929 = vmatpush1.bf16.msra.mxu0 %v10691_v45  ;;  %7274 = vmatprep.subr.bf16.mxu1 %v10696_v25  ;;  %v1621_v45 = vcombine.high %v12312_v14, %v12312_v14  ;;  %v10772_v25 = vld [vmem:[%s11630_s8 + $0x9e0] ss:$8 sps:$4 sm:$0xff]   ;;  %v10781_v14 = vld [vmem:[%s11630_s8 + $0x19f0] ss:$8 sps:$4 sm:$0xff]  }
 0x28b   : > { %7930 = vmatprep.subr.bf16.mxu0 %v10699_v46  ;;  %7304 = vmatprep.mubr.bf16.mxu1 %v1472_v42  ;;  %v10775_v46 = vld [vmem:[%s11630_s8 + $0x19e0] ss:$8 sps:$4 sm:$0xff]   ;;  %v10780_v42 = vld [vmem:[%s11630_s8 + $0x9f4] ss:$8 sps:$4 sm:$0xff]  }
 0x28c   : > { %7960 = vmatprep.mubr.bf16.mxu0 %v1668_v26  ;;  %v10783_v26 = vld [vmem:[%s11630_s8 + $0x19f4] ss:$8 sps:$4 sm:$0xff]  }
 0x28d   : > { %7275 = vmatpush1.bf16.msra.mxu1 %v10694_v23  ;;  %v12489_v23 = vrot.slane %v1425_v43, %v11710_v50  ;;  %v10850_v43 = vld [vmem:[%s11630_s8 + $0xab0] ss:$8 sps:$4 sm:$0xff]  }
 0x28e   : > { %7931 = vmatpush1.bf16.msra.mxu0 %v10697_v47  ;;  %7276 = vmatprep.subr.bf16.mxu1 %v10702_v33  ;;  %v12492_v47 = vrot.slane %v1621_v45, %v11710_v50  ;;  %v10786_v33 = vld [vmem:[%s11630_s8 + $0xa04] ss:$8 sps:$4 sm:$0xff]   ;;  %v10853_v45 = vld [vmem:[%s11630_s8 + $0x1ab0] ss:$8 sps:$4 sm:$0xff]  }
 0x28f   : > { %7932 = vmatprep.subr.bf16.mxu0 %v10705_v37  ;;  %v10789_v37 = vld [vmem:[%s11630_s8 + $0x1a04] ss:$8 sps:$4 sm:$0xff]  }
 0x291   : > { %7277 = vmatpush1.bf16.msra.mxu1 %v10700_v15  ;;  %v1441_v15 = vcombine.high %v12489_v23, %v12489_v23 }
 0x292   : > { %7933 = vmatpush1.bf16.msra.mxu0 %v10703_v48  ;;  %7278 = vmatprep.subr.bf16.mxu1 %v10708_v17  ;;  %v1637_v48 = vcombine.high %v12492_v47, %v12492_v47  ;;  %v1470_v17 = vcombine.high %v12412_v18, %v12412_v18 }
 0x293   : > { %7934 = vmatprep.subr.bf16.mxu0 %v10711_v49  ;;  %v1666_v49 = vcombine.high %v12416_v38, %v12416_v38  ;;  %v10790_v38 = vld [vmem:[%s11630_s8 + $0xa10] ss:$8 sps:$4 sm:$0xff]  }
 0x294   : > { %v12514_v18 = vrot.slane %v1637_v48, %v11710_v50  ;;  %v10873_v48 = vld [vmem:[%s11630_s8 + $0x1ae4] ss:$8 sps:$4 sm:$0xff]  }
 0x295   : > { %7279 = vmatpush1.bf16.msra.mxu1 %v10706_v51  ;;  %v10784_v51 = vld [vmem:[%s11630_s8 + $0xa00] ss:$8 sps:$4 sm:$0xff]  }
 0x296   : > { %7935 = vmatpush1.bf16.msra.mxu0 %v10709_v52  ;;  %7280 = vmatprep.subr.bf16.mxu1 %v10714_v54  ;;  %v10787_v52 = vld [vmem:[%s11630_s8 + $0x1a00] ss:$8 sps:$4 sm:$0xff]   ;;  %v10792_v54 = vld [vmem:[%s11630_s8 + $0xa14] ss:$8 sps:$4 sm:$0xff]  }
 0x297   : > { %7936 = vmatprep.subr.bf16.mxu0 %v10717_v55  ;;  %v10795_v55 = vld [vmem:[%s11630_s8 + $0x1a14] ss:$8 sps:$4 sm:$0xff]  }
 0x299   : > { %7281 = vmatpush1.bf16.msra.mxu1 %v10712_v39  ;;  %v12511_v39 = vrot.slane %v1441_v15, %v11710_v50  ;;  %v10870_v15 = vld [vmem:[%s11630_s8 + $0xae4] ss:$8 sps:$4 sm:$0xff]  }
 0x29a   : > { %7937 = vmatpush1.bf16.msra.mxu0 %v10715_v40  ;;  %7282 = vmatprep.subr.bf16.mxu1 %v10720_v61  ;;  %v10793_v40 = vld [vmem:[%s11630_s8 + $0x1a10] ss:$8 sps:$4 sm:$0xff]   ;;  %v10798_v61 = vld [vmem:[%s11630_s8 + $0xa24] ss:$8 sps:$4 sm:$0xff]  }
 0x29b   : > { %7938 = vmatprep.subr.bf16.mxu0 %v10723_v62  ;;  %v10801_v62 = vld [vmem:[%s11630_s8 + $0x1a24] ss:$8 sps:$4 sm:$0xff]  }
 0x29d   : > { %7283 = vmatpush1.bf16.msra.mxu1 %v10718_v63  ;;  %v10796_v63 = vld [vmem:[%s11630_s8 + $0xa20] ss:$8 sps:$4 sm:$0xff]  }
 0x29e   : > { %7939 = vmatpush1.bf16.msra.mxu0 %v10721_v0  ;;  %7284 = vmatprep.subr.bf16.mxu1 %v10726_v41  ;;  %v10799_v0 = vld [vmem:[%s11630_s8 + $0x1a20] ss:$8 sps:$4 sm:$0xff]   ;;  %v10804_v41 = vld [vmem:[%s11630_s8 + $0xa34] ss:$8 sps:$4 sm:$0xff]  }
 0x29f   : > { %7940 = vmatprep.subr.bf16.mxu0 %v10729_v1  ;;  %v10807_v1 = vld [vmem:[%s11630_s8 + $0x1a34] ss:$8 sps:$4 sm:$0xff]  }
 0x2a1   : > { %7285 = vmatpush1.bf16.msra.mxu1 %v10724_v56  ;;  %v10802_v56 = vld [vmem:[%s11630_s8 + $0xa30] ss:$8 sps:$4 sm:$0xff]  }
 0x2a2   : > { %7941 = vmatpush1.bf16.msra.mxu0 %v10727_v3  ;;  %7286 = vmatprep.subr.bf16.mxu1 %v10732_v58  ;;  %v10805_v3 = vld [vmem:[%s11630_s8 + $0x1a30] ss:$8 sps:$4 sm:$0xff]   ;;  %v10810_v58 = vld [vmem:[%s11630_s8 + $0xa44] ss:$8 sps:$4 sm:$0xff]  }
 0x2a3   : > { %7942 = vmatprep.subr.bf16.mxu0 %v10735_v4  ;;  %v10813_v4 = vld [vmem:[%s11630_s8 + $0x1a44] ss:$8 sps:$4 sm:$0xff]  }
 0x2a5   : > { %7287 = vmatpush1.bf16.msra.mxu1 %v10730_v5  ;;  %v10808_v5 = vld [vmem:[%s11630_s8 + $0xa40] ss:$8 sps:$4 sm:$0xff]  }
 0x2a6   : > { %7943 = vmatpush1.bf16.msra.mxu0 %v10733_v6  ;;  %7288 = vmatprep.subr.bf16.mxu1 %v10738_v7  ;;  %v10811_v6 = vld [vmem:[%s11630_s8 + $0x1a40] ss:$8 sps:$4 sm:$0xff]   ;;  %v10816_v7 = vld [vmem:[%s11630_s8 + $0xa54] ss:$8 sps:$4 sm:$0xff]  }
 0x2a7   : > { %7944 = vmatprep.subr.bf16.mxu0 %v10741_v8  ;;  %v10819_v8 = vld [vmem:[%s11630_s8 + $0x1a54] ss:$8 sps:$4 sm:$0xff]  }
 0x2a9   : > { %7289 = vmatpush1.bf16.msra.mxu1 %v10736_v9  ;;  %v10814_v9 = vld [vmem:[%s11630_s8 + $0xa50] ss:$8 sps:$4 sm:$0xff]  }
 0x2aa   : > { %7945 = vmatpush1.bf16.msra.mxu0 %v10739_v10  ;;  %7290 = vmatprep.subr.bf16.mxu1 %v10744_v11  ;;  %v10817_v10 = vld [vmem:[%s11630_s8 + $0x1a50] ss:$8 sps:$4 sm:$0xff]   ;;  %v10822_v11 = vld [vmem:[%s11630_s8 + $0xa64] ss:$8 sps:$4 sm:$0xff]  }
 0x2ab   : > { %7946 = vmatprep.subr.bf16.mxu0 %v10747_v12  ;;  %v10825_v12 = vld [vmem:[%s11630_s8 + $0x1a64] ss:$8 sps:$4 sm:$0xff]  }
 0x2ad   : > { %7291 = vmatpush1.bf16.msra.mxu1 %v10742_v19  ;;  %v10820_v19 = vld [vmem:[%s11630_s8 + $0xa60] ss:$8 sps:$4 sm:$0xff]  }
 0x2ae   : > { %7947 = vmatpush1.bf16.msra.mxu0 %v10745_v20  ;;  %7292 = vmatprep.subr.bf16.mxu1 %v10750_v21  ;;  %v10823_v20 = vld [vmem:[%s11630_s8 + $0x1a60] ss:$8 sps:$4 sm:$0xff]   ;;  %v10828_v21 = vld [vmem:[%s11630_s8 + $0xa74] ss:$8 sps:$4 sm:$0xff]  }
 0x2af   : > { %7948 = vmatprep.subr.bf16.mxu0 %v10753_v22  ;;  %v10831_v22 = vld [vmem:[%s11630_s8 + $0x1a74] ss:$8 sps:$4 sm:$0xff]  }
 0x2b1   : > { %7293 = vmatpush1.bf16.msra.mxu1 %v10748_v2  ;;  %v10826_v2 = vld [vmem:[%s11630_s8 + $0xa70] ss:$8 sps:$4 sm:$0xff]  }
 0x2b2   : > { %7949 = vmatpush1.bf16.msra.mxu0 %v10751_v24  ;;  %7294 = vmatprep.subr.bf16.mxu1 %v10756_v13  ;;  %v10829_v24 = vld [vmem:[%s11630_s8 + $0x1a70] ss:$8 sps:$4 sm:$0xff]   ;;  %v10834_v13 = vld [vmem:[%s11630_s8 + $0xa84] ss:$8 sps:$4 sm:$0xff]  }
 0x2b3   : > { %7950 = vmatprep.subr.bf16.mxu0 %v10759_v53  ;;  %v10837_v53 = vld [vmem:[%s11630_s8 + $0x1a84] ss:$8 sps:$4 sm:$0xff]  }
 0x2b5   : > { %7295 = vmatpush1.bf16.msra.mxu1 %v10754_v59  ;;  %v10832_v59 = vld [vmem:[%s11630_s8 + $0xa80] ss:$8 sps:$4 sm:$0xff]  }
 0x2b6   : > { %7951 = vmatpush1.bf16.msra.mxu0 %v10757_v57  ;;  %7296 = vmatprep.subr.bf16.mxu1 %v10762_v27  ;;  %v10835_v57 = vld [vmem:[%s11630_s8 + $0x1a80] ss:$8 sps:$4 sm:$0xff]   ;;  %v10840_v27 = vld [vmem:[%s11630_s8 + $0xa94] ss:$8 sps:$4 sm:$0xff]  }
 0x2b7   : > { %7952 = vmatprep.subr.bf16.mxu0 %v10765_v28  ;;  %v10843_v28 = vld [vmem:[%s11630_s8 + $0x1a94] ss:$8 sps:$4 sm:$0xff]  }
 0x2b9   : > { %7297 = vmatpush1.bf16.msra.mxu1 %v10760_v29  ;;  %v10838_v29 = vld [vmem:[%s11630_s8 + $0xa90] ss:$8 sps:$4 sm:$0xff]  }
 0x2ba   : > { %7953 = vmatpush1.bf16.msra.mxu0 %v10763_v30  ;;  %7298 = vmatprep.subr.bf16.mxu1 %v10768_v31  ;;  %v10841_v30 = vld [vmem:[%s11630_s8 + $0x1a90] ss:$8 sps:$4 sm:$0xff]   ;;  %v10846_v31 = vld [vmem:[%s11630_s8 + $0xaa4] ss:$8 sps:$4 sm:$0xff]  }
 0x2bb   : > { %7954 = vmatprep.subr.bf16.mxu0 %v10771_v32  ;;  %v10849_v32 = vld [vmem:[%s11630_s8 + $0x1aa4] ss:$8 sps:$4 sm:$0xff]  }
 0x2bd   : > { %7299 = vmatpush1.bf16.msra.mxu1 %v10766_v16  ;;  %v10844_v16 = vld [vmem:[%s11630_s8 + $0xaa0] ss:$8 sps:$4 sm:$0xff]  }
 0x2be   : > { %7955 = vmatpush1.bf16.msra.mxu0 %v10769_v34  ;;  %7300 = vmatprep.subr.bf16.mxu1 %v10774_v35  ;;  %v10847_v34 = vld [vmem:[%s11630_s8 + $0x1aa0] ss:$8 sps:$4 sm:$0xff]   ;;  %v10852_v35 = vld [vmem:[%s11630_s8 + $0xab4] ss:$8 sps:$4 sm:$0xff]  }
 0x2bf   : > { %7956 = vmatprep.subr.bf16.mxu0 %v10777_v36  ;;  %v10855_v36 = vld [vmem:[%s11630_s8 + $0x1ab4] ss:$8 sps:$4 sm:$0xff]  }
 0x2c1   : > { %7301 = vmatpush1.bf16.msra.mxu1 %v10772_v25  ;;  %v10858_v25 = vld [vmem:[%s11630_s8 + $0xac4] ss:$8 sps:$4 sm:$0xff]  }
 0x2c2   : > { %7957 = vmatpush1.bf16.msra.mxu0 %v10775_v46  ;;  %7302 = vmatprep.subr.bf16.mxu1 %v10780_v42  ;;  %v10861_v46 = vld [vmem:[%s11630_s8 + $0x1ac4] ss:$8 sps:$4 sm:$0xff]   ;;  %v10856_v42 = vld [vmem:[%s11630_s8 + $0xac0] ss:$8 sps:$4 sm:$0xff]  }
 0x2c3   : > { %7958 = vmatprep.subr.bf16.mxu0 %v10783_v26  ;;  %v10859_v26 = vld [vmem:[%s11630_s8 + $0x1ac0] ss:$8 sps:$4 sm:$0xff]  }
 0x2c5   : > { %7303 = vmatpush1.bf16.msra.mxu1 %v10778_v60  ;;  %v10864_v60 = vld [vmem:[%s11630_s8 + $0xad4] ss:$8 sps:$4 sm:$0xff]  }
 0x2c6   : > { %7959 = vmatpush1.bf16.msra.mxu0 %v10781_v14  ;;  %7313 = vmatprep.subr.bf16.mxu1 %v10786_v33  ;;  %v10867_v14 = vld [vmem:[%s11630_s8 + $0x1ad4] ss:$8 sps:$4 sm:$0xff]   ;;  %v10862_v33 = vld [vmem:[%s11630_s8 + $0xad0] ss:$8 sps:$4 sm:$0xff]  }
 0x2c7   : > { %7969 = vmatprep.subr.bf16.mxu0 %v10789_v37  ;;  %v10865_v37 = vld [vmem:[%s11630_s8 + $0x1ad0] ss:$8 sps:$4 sm:$0xff]  }
 0x2c8   : > { %7305 = vmatmul.mubr.bf16.vlgmr.msra.gmra.mrb[0].mxu1 %v1470_v17  ;;  %v10868_v17 = vld [vmem:[%s11630_s8 + $0xae0] ss:$8 sps:$4 sm:$0xff]  }
 0x2c9   : > { %7961 = vmatmul.mubr.bf16.vlgmr.msra.gmra.mrb[0].mxu0 %v1666_v49  ;;  %7314 = vmatpush1.bf16.msra.mxu1 %v10784_v51  ;;  %v10871_v49 = vld [vmem:[%s11630_s8 + $0x1ae0] ss:$8 sps:$4 sm:$0xff]   ;;  %v10876_v51 = vld [vmem:[%s11630_s8 + $0xaf4] ss:$8 sps:$4 sm:$0xff]  }
 0x2ca   : > { %7970 = vmatpush1.bf16.msra.mxu0 %v10787_v52  ;;  %7315 = vmatprep.subr.bf16.mxu1 %v10792_v54  ;;  %v10879_v52 = vld [vmem:[%s11630_s8 + $0x1af4] ss:$8 sps:$4 sm:$0xff]   ;;  %v10874_v54 = vld [vmem:[%s11630_s8 + $0xaf0] ss:$8 sps:$4 sm:$0xff]  }
 0x2cb   : > { %7971 = vmatprep.subr.bf16.mxu0 %v10795_v55  ;;  %7345 = vmatprep.mubr.bf16.mxu1 %v12511_v39  ;;  %v10877_v55 = vld [vmem:[%s11630_s8 + $0x1af0] ss:$8 sps:$4 sm:$0xff]  }
 0x2cc   : > { %8001 = vmatprep.mubr.bf16.mxu0 %v12514_v18 }
 0x2cd   : > { %7316 = vmatpush1.bf16.msra.mxu1 %v10790_v38  ;;  %v10883_v38 = vld [vmem:[%s11630_s8 + $0xb04] ss:$8 sps:$4 sm:$0xff]  }
 0x2ce   : > { %7972 = vmatpush1.bf16.msra.mxu0 %v10793_v40  ;;  %7317 = vmatprep.subr.bf16.mxu1 %v10798_v61  ;;  %v10887_v40 = vld [vmem:[%s11630_s8 + $0x1b04] ss:$8 sps:$4 sm:$0xff]   ;;  %v12580_v61 = vrot.slane %v12489_v23, %v11710_v50  ;;  %v1473_v23 = vcombine.high %v12511_v39, %v12511_v39 }
 0x2cf   : > { %7973 = vmatprep.subr.bf16.mxu0 %v10801_v62  ;;  %v12584_v62 = vrot.slane %v12492_v47, %v11710_v50  ;;  %v10888_v47 = vld [vmem:[%s11630_s8 + $0xb10] ss:$8 sps:$4 sm:$0xff]   ;;  %v10896_v39 = vld [vmem:[%s11630_s8 + $0xb24] ss:$8 sps:$4 sm:$0xff]  }
 0x2d1   : > { %7318 = vmatpush1.bf16.msra.mxu1 %v10796_v63  ;;  %v10881_v63 = vld [vmem:[%s11630_s8 + $0xb00] ss:$8 sps:$4 sm:$0xff]  }
 0x2d2   : > { %7974 = vmatpush1.bf16.msra.mxu0 %v10799_v0  ;;  %7319 = vmatprep.subr.bf16.mxu1 %v10804_v41  ;;  %v10885_v0 = vld [vmem:[%s11630_s8 + $0x1b00] ss:$8 sps:$4 sm:$0xff]   ;;  %v10890_v41 = vld [vmem:[%s11630_s8 + $0xb14] ss:$8 sps:$4 sm:$0xff]  }
 0x2d3   : > { %7975 = vmatprep.subr.bf16.mxu0 %v10807_v1  ;;  %v10893_v1 = vld [vmem:[%s11630_s8 + $0x1b14] ss:$8 sps:$4 sm:$0xff]  }
 0x2d5   : > { %7320 = vmatpush1.bf16.msra.mxu1 %v10802_v56  ;;  %v1669_v56 = vcombine.high %v12514_v18, %v12514_v18  ;;  %v10894_v18 = vld [vmem:[%s11630_s8 + $0xb20] ss:$8 sps:$4 sm:$0xff]  }
 0x2d6   : > { %7976 = vmatpush1.bf16.msra.mxu0 %v10805_v3  ;;  %7321 = vmatprep.subr.bf16.mxu1 %v10810_v58  ;;  %v10891_v3 = vld [vmem:[%s11630_s8 + $0x1b10] ss:$8 sps:$4 sm:$0xff]   ;;  %v10899_v58 = vld [vmem:[%s11630_s8 + $0x1b24] ss:$8 sps:$4 sm:$0xff]  }
 0x2d7   : > { %7977 = vmatprep.subr.bf16.mxu0 %v10813_v4  ;;  %v10897_v4 = vld [vmem:[%s11630_s8 + $0x1b20] ss:$8 sps:$4 sm:$0xff]  }
 0x2d9   : > { %7322 = vmatpush1.bf16.msra.mxu1 %v10808_v5  ;;  %v10902_v5 = vld [vmem:[%s11630_s8 + $0xb34] ss:$8 sps:$4 sm:$0xff]  }
 0x2da   : > { %7978 = vmatpush1.bf16.msra.mxu0 %v10811_v6  ;;  %7323 = vmatprep.subr.bf16.mxu1 %v10816_v7  ;;  %v10905_v6 = vld [vmem:[%s11630_s8 + $0x1b34] ss:$8 sps:$4 sm:$0xff]   ;;  %v10900_v7 = vld [vmem:[%s11630_s8 + $0xb30] ss:$8 sps:$4 sm:$0xff]  }
 0x2db   : > { %7979 = vmatprep.subr.bf16.mxu0 %v10819_v8  ;;  %v10903_v8 = vld [vmem:[%s11630_s8 + $0x1b30] ss:$8 sps:$4 sm:$0xff]  }
 0x2dd   : > { %7324 = vmatpush1.bf16.msra.mxu1 %v10814_v9  ;;  %v10908_v9 = vld [vmem:[%s11630_s8 + $0xb44] ss:$8 sps:$4 sm:$0xff]  }
 0x2de   : > { %7980 = vmatpush1.bf16.msra.mxu0 %v10817_v10  ;;  %7325 = vmatprep.subr.bf16.mxu1 %v10822_v11  ;;  %v10911_v10 = vld [vmem:[%s11630_s8 + $0x1b44] ss:$8 sps:$4 sm:$0xff]   ;;  %v10906_v11 = vld [vmem:[%s11630_s8 + $0xb40] ss:$8 sps:$4 sm:$0xff]  }
 0x2df   : > { %7981 = vmatprep.subr.bf16.mxu0 %v10825_v12  ;;  %v10909_v12 = vld [vmem:[%s11630_s8 + $0x1b40] ss:$8 sps:$4 sm:$0xff]  }
 0x2e1   : > { %7326 = vmatpush1.bf16.msra.mxu1 %v10820_v19  ;;  %v10914_v19 = vld [vmem:[%s11630_s8 + $0xb54] ss:$8 sps:$4 sm:$0xff]  }
 0x2e2   : > { %7982 = vmatpush1.bf16.msra.mxu0 %v10823_v20  ;;  %7327 = vmatprep.subr.bf16.mxu1 %v10828_v21  ;;  %v10917_v20 = vld [vmem:[%s11630_s8 + $0x1b54] ss:$8 sps:$4 sm:$0xff]   ;;  %v10912_v21 = vld [vmem:[%s11630_s8 + $0xb50] ss:$8 sps:$4 sm:$0xff]  }
 0x2e3   : > { %7983 = vmatprep.subr.bf16.mxu0 %v10831_v22  ;;  %v10915_v22 = vld [vmem:[%s11630_s8 + $0x1b50] ss:$8 sps:$4 sm:$0xff]  }
 0x2e5   : > { %7328 = vmatpush1.bf16.msra.mxu1 %v10826_v2  ;;  %v10920_v2 = vld [vmem:[%s11630_s8 + $0xb64] ss:$8 sps:$4 sm:$0xff]  }
 0x2e6   : > { %7984 = vmatpush1.bf16.msra.mxu0 %v10829_v24  ;;  %7329 = vmatprep.subr.bf16.mxu1 %v10834_v13  ;;  %v10923_v24 = vld [vmem:[%s11630_s8 + $0x1b64] ss:$8 sps:$4 sm:$0xff]   ;;  %v10918_v13 = vld [vmem:[%s11630_s8 + $0xb60] ss:$8 sps:$4 sm:$0xff]  }
 0x2e7   : > { %7985 = vmatprep.subr.bf16.mxu0 %v10837_v53  ;;  %v10921_v53 = vld [vmem:[%s11630_s8 + $0x1b60] ss:$8 sps:$4 sm:$0xff]  }
 0x2e9   : > { %7330 = vmatpush1.bf16.msra.mxu1 %v10832_v59  ;;  %v10926_v59 = vld [vmem:[%s11630_s8 + $0xb74] ss:$8 sps:$4 sm:$0xff]  }
 0x2ea   : > { %7986 = vmatpush1.bf16.msra.mxu0 %v10835_v57  ;;  %7331 = vmatprep.subr.bf16.mxu1 %v10840_v27  ;;  %v10929_v57 = vld [vmem:[%s11630_s8 + $0x1b74] ss:$8 sps:$4 sm:$0xff]   ;;  %v10924_v27 = vld [vmem:[%s11630_s8 + $0xb70] ss:$8 sps:$4 sm:$0xff]  }
 0x2eb   : > { %7987 = vmatprep.subr.bf16.mxu0 %v10843_v28  ;;  %v10927_v28 = vld [vmem:[%s11630_s8 + $0x1b70] ss:$8 sps:$4 sm:$0xff]  }
 0x2ed   : > { %7332 = vmatpush1.bf16.msra.mxu1 %v10838_v29  ;;  %v10932_v29 = vld [vmem:[%s11630_s8 + $0xb84] ss:$8 sps:$4 sm:$0xff]  }
 0x2ee   : > { %7988 = vmatpush1.bf16.msra.mxu0 %v10841_v30  ;;  %7333 = vmatprep.subr.bf16.mxu1 %v10846_v31  ;;  %v10935_v30 = vld [vmem:[%s11630_s8 + $0x1b84] ss:$8 sps:$4 sm:$0xff]   ;;  %v10930_v31 = vld [vmem:[%s11630_s8 + $0xb80] ss:$8 sps:$4 sm:$0xff]  }
 0x2ef   : > { %7989 = vmatprep.subr.bf16.mxu0 %v10849_v32  ;;  %v10933_v32 = vld [vmem:[%s11630_s8 + $0x1b80] ss:$8 sps:$4 sm:$0xff]  }
 0x2f1   : > { %7334 = vmatpush1.bf16.msra.mxu1 %v10844_v16  ;;  %v10938_v16 = vld [vmem:[%s11630_s8 + $0xb94] ss:$8 sps:$4 sm:$0xff]  }
 0x2f2   : > { %7990 = vmatpush1.bf16.msra.mxu0 %v10847_v34  ;;  %7335 = vmatprep.subr.bf16.mxu1 %v10852_v35  ;;  %v10941_v34 = vld [vmem:[%s11630_s8 + $0x1b94] ss:$8 sps:$4 sm:$0xff]   ;;  %v10936_v35 = vld [vmem:[%s11630_s8 + $0xb90] ss:$8 sps:$4 sm:$0xff]  }
 0x2f3   : > { %7991 = vmatprep.subr.bf16.mxu0 %v10855_v36  ;;  %v10939_v36 = vld [vmem:[%s11630_s8 + $0x1b90] ss:$8 sps:$4 sm:$0xff]  }
 0x2f5   : > { %7336 = vmatpush1.bf16.msra.mxu1 %v10850_v43  ;;  %v10944_v43 = vld [vmem:[%s11630_s8 + $0xba4] ss:$8 sps:$4 sm:$0xff]  }
 0x2f6   : > { %7992 = vmatpush1.bf16.msra.mxu0 %v10853_v45  ;;  %7337 = vmatprep.subr.bf16.mxu1 %v10858_v25  ;;  %v10947_v45 = vld [vmem:[%s11630_s8 + $0x1ba4] ss:$8 sps:$4 sm:$0xff]   ;;  %v10942_v25 = vld [vmem:[%s11630_s8 + $0xba0] ss:$8 sps:$4 sm:$0xff]  }
 0x2f7   : > { %7993 = vmatprep.subr.bf16.mxu0 %v10861_v46  ;;  %v10945_v46 = vld [vmem:[%s11630_s8 + $0x1ba0] ss:$8 sps:$4 sm:$0xff]  }
 0x2f9   : > { %7338 = vmatpush1.bf16.msra.mxu1 %v10856_v42  ;;  %v10950_v42 = vld [vmem:[%s11630_s8 + $0xbb4] ss:$8 sps:$4 sm:$0xff]  }
 0x2fa   : > { %7994 = vmatpush1.bf16.msra.mxu0 %v10859_v26  ;;  %7339 = vmatprep.subr.bf16.mxu1 %v10864_v60  ;;  %v10953_v26 = vld [vmem:[%s11630_s8 + $0x1bb4] ss:$8 sps:$4 sm:$0xff]   ;;  %v10948_v60 = vld [vmem:[%s11630_s8 + $0xbb0] ss:$8 sps:$4 sm:$0xff]  }
 0x2fb   : > { %7995 = vmatprep.subr.bf16.mxu0 %v10867_v14  ;;  %v10951_v14 = vld [vmem:[%s11630_s8 + $0x1bb0] ss:$8 sps:$4 sm:$0xff]  }
 0x2fd   : > { %7340 = vmatpush1.bf16.msra.mxu1 %v10862_v33  ;;  %v10956_v33 = vld [vmem:[%s11630_s8 + $0xbc4] ss:$8 sps:$4 sm:$0xff]  }
 0x2fe   : > { %7996 = vmatpush1.bf16.msra.mxu0 %v10865_v37  ;;  %7341 = vmatprep.subr.bf16.mxu1 %v10870_v15  ;;  %v10959_v37 = vld [vmem:[%s11630_s8 + $0x1bc4] ss:$8 sps:$4 sm:$0xff]   ;;  %v10954_v15 = vld [vmem:[%s11630_s8 + $0xbc0] ss:$8 sps:$4 sm:$0xff]  }
 0x2ff   : > { %7997 = vmatprep.subr.bf16.mxu0 %v10873_v48  ;;  %v10957_v48 = vld [vmem:[%s11630_s8 + $0x1bc0] ss:$8 sps:$4 sm:$0xff]  }
 0x301   : > { %7342 = vmatpush1.bf16.msra.mxu1 %v10868_v17  ;;  %v10962_v17 = vld [vmem:[%s11630_s8 + $0xbd4] ss:$8 sps:$4 sm:$0xff]  }
 0x302   : > { %7998 = vmatpush1.bf16.msra.mxu0 %v10871_v49  ;;  %7343 = vmatprep.subr.bf16.mxu1 %v10876_v51  ;;  %v10965_v49 = vld [vmem:[%s11630_s8 + $0x1bd4] ss:$8 sps:$4 sm:$0xff]   ;;  %v10960_v51 = vld [vmem:[%s11630_s8 + $0xbd0] ss:$8 sps:$4 sm:$0xff]  }
 0x303   : > { %7999 = vmatprep.subr.bf16.mxu0 %v10879_v52  ;;  %v10963_v52 = vld [vmem:[%s11630_s8 + $0x1bd0] ss:$8 sps:$4 sm:$0xff]  }
 0x305   : > { %7344 = vmatpush1.bf16.msra.mxu1 %v10874_v54  ;;  %v10968_v54 = vld [vmem:[%s11630_s8 + $0xbe4] ss:$8 sps:$4 sm:$0xff]  }
 0x306   : > { %8000 = vmatpush1.bf16.msra.mxu0 %v10877_v55  ;;  %7354 = vmatprep.subr.bf16.mxu1 %v10883_v38  ;;  %v10971_v55 = vld [vmem:[%s11630_s8 + $0x1be4] ss:$8 sps:$4 sm:$0xff]   ;;  %v12649_v38 = vld [vmem:[%s11707_s13 + $0x18] sm:$0xff] }
 0x307   : > { %8010 = vmatprep.subr.bf16.mxu0 %v10887_v40  ;;  %v12652_v40 = vld [vmem:[%s11707_s13 + $0x38] sm:$0xff] }
 0x308   : > { %7346 = vmatmul.mubr.bf16.vlgmr.msra.gmra.mrb[0].mxu1 %v12580_v61 }
 0x309   : > { %8002 = vmatmul.mubr.bf16.vlgmr.msra.gmra.mrb[0].mxu0 %v12584_v62  ;;  %7355 = vmatpush1.bf16.msra.mxu1 %v10881_v63  ;;  %v10966_v63 = vld [vmem:[%s11630_s8 + $0xbe0] ss:$8 sps:$4 sm:$0xff]  }
 0x30a   : > { %8011 = vmatpush1.bf16.msra.mxu0 %v10885_v0  ;;  %7356 = vmatprep.subr.bf16.mxu1 %v10890_v41  ;;  %v10969_v0 = vld [vmem:[%s11630_s8 + $0x1be0] ss:$8 sps:$4 sm:$0xff]   ;;  %v10974_v41 = vld [vmem:[%s11630_s8 + $0xbf4] ss:$8 sps:$4 sm:$0xff]  }
 0x30b   : > { %8012 = vmatprep.subr.bf16.mxu0 %v10893_v1  ;;  %7386 = vmatprep.mubr.bf16.mxu1 %v1473_v23  ;;  %v10977_v1 = vld [vmem:[%s11630_s8 + $0x1bf4] ss:$8 sps:$4 sm:$0xff]   ;;  %v12660_v23 = vrot.slane %v12649_v38, %v11710_v50 }
 0x30c   : > { %8042 = vmatprep.mubr.bf16.mxu0 %v1669_v56  ;;  %v12664_v56 = vrot.slane %v12652_v40, %v11710_v50 }
 0x30d   : > { %7357 = vmatpush1.bf16.msra.mxu1 %v10888_v47  ;;  %v10972_v47 = vld [vmem:[%s11630_s8 + $0xbf0] ss:$8 sps:$4 sm:$0xff]  }
 0x30e   : > { %8013 = vmatpush1.bf16.msra.mxu0 %v10891_v3  ;;  %7358 = vmatprep.subr.bf16.mxu1 %v10896_v39  ;;  %v10975_v3 = vld [vmem:[%s11630_s8 + $0x1bf0] ss:$8 sps:$4 sm:$0xff]   ;;  %v10980_v39 = vld [vmem:[%s11630_s8 + $0xc04] ss:$8 sps:$4 sm:$0xff]  }
 0x30f   : > { %8014 = vmatprep.subr.bf16.mxu0 %v10899_v58  ;;  %v10983_v58 = vld [vmem:[%s11630_s8 + $0x1c04] ss:$8 sps:$4 sm:$0xff]  }
 0x311   : > { %7359 = vmatpush1.bf16.msra.mxu1 %v10894_v18  ;;  %v1489_v18 = vcombine.high %v12660_v23, %v12660_v23 }
 0x312   : > { %8015 = vmatpush1.bf16.msra.mxu0 %v10897_v4  ;;  %7360 = vmatprep.subr.bf16.mxu1 %v10902_v5  ;;  %v1685_v4 = vcombine.high %v12664_v56, %v12664_v56  ;;  %v1471_v5 = vcombine.high %v12580_v61, %v12580_v61 }
 0x313   : > { %8016 = vmatprep.subr.bf16.mxu0 %v10905_v6  ;;  %v1667_v6 = vcombine.high %v12584_v62, %v12584_v62  ;;  %v10984_v62 = vld [vmem:[%s11630_s8 + $0xc10] ss:$8 sps:$4 sm:$0xff]  }
 0x314   : > { %v12686_v61 = vrot.slane %v1685_v4, %v11710_v50  ;;  %v11059_v4 = vld [vmem:[%s11630_s8 + $0x1cd0] ss:$8 sps:$4 sm:$0xff]  }
 0x315   : > { %7361 = vmatpush1.bf16.msra.mxu1 %v10900_v7  ;;  %v10978_v7 = vld [vmem:[%s11630_s8 + $0xc00] ss:$8 sps:$4 sm:$0xff]  }
 0x316   : > { %8017 = vmatpush1.bf16.msra.mxu0 %v10903_v8  ;;  %7362 = vmatprep.subr.bf16.mxu1 %v10908_v9  ;;  %v10981_v8 = vld [vmem:[%s11630_s8 + $0x1c00] ss:$8 sps:$4 sm:$0xff]   ;;  %v10986_v9 = vld [vmem:[%s11630_s8 + $0xc14] ss:$8 sps:$4 sm:$0xff]  }
 0x317   : > { %8018 = vmatprep.subr.bf16.mxu0 %v10911_v10  ;;  %v10989_v10 = vld [vmem:[%s11630_s8 + $0x1c14] ss:$8 sps:$4 sm:$0xff]  }
 0x319   : > { %7363 = vmatpush1.bf16.msra.mxu1 %v10906_v11  ;;  %v12683_v11 = vrot.slane %v1489_v18, %v11710_v50  ;;  %v11056_v18 = vld [vmem:[%s11630_s8 + $0xcd0] ss:$8 sps:$4 sm:$0xff]  }
 0x31a   : > { %8019 = vmatpush1.bf16.msra.mxu0 %v10909_v12  ;;  %7364 = vmatprep.subr.bf16.mxu1 %v10914_v19  ;;  %v10987_v12 = vld [vmem:[%s11630_s8 + $0x1c10] ss:$8 sps:$4 sm:$0xff]   ;;  %v10992_v19 = vld [vmem:[%s11630_s8 + $0xc24] ss:$8 sps:$4 sm:$0xff]  }
 0x31b   : > { %8020 = vmatprep.subr.bf16.mxu0 %v10917_v20  ;;  %v10995_v20 = vld [vmem:[%s11630_s8 + $0x1c24] ss:$8 sps:$4 sm:$0xff]  }
 0x31d   : > { %7365 = vmatpush1.bf16.msra.mxu1 %v10912_v21  ;;  %v10990_v21 = vld [vmem:[%s11630_s8 + $0xc20] ss:$8 sps:$4 sm:$0xff]  }
 0x31e   : > { %8021 = vmatpush1.bf16.msra.mxu0 %v10915_v22  ;;  %7366 = vmatprep.subr.bf16.mxu1 %v10920_v2  ;;  %v10993_v22 = vld [vmem:[%s11630_s8 + $0x1c20] ss:$8 sps:$4 sm:$0xff]   ;;  %v10998_v2 = vld [vmem:[%s11630_s8 + $0xc34] ss:$8 sps:$4 sm:$0xff]  }
 0x31f   : > { %8022 = vmatprep.subr.bf16.mxu0 %v10923_v24  ;;  %v11001_v24 = vld [vmem:[%s11630_s8 + $0x1c34] ss:$8 sps:$4 sm:$0xff]  }
 0x321   : > { %7367 = vmatpush1.bf16.msra.mxu1 %v10918_v13  ;;  %v10996_v13 = vld [vmem:[%s11630_s8 + $0xc30] ss:$8 sps:$4 sm:$0xff]  }
 0x322   : > { %8023 = vmatpush1.bf16.msra.mxu0 %v10921_v53  ;;  %7368 = vmatprep.subr.bf16.mxu1 %v10926_v59  ;;  %v10999_v53 = vld [vmem:[%s11630_s8 + $0x1c30] ss:$8 sps:$4 sm:$0xff]   ;;  %v11004_v59 = vld [vmem:[%s11630_s8 + $0xc44] ss:$8 sps:$4 sm:$0xff]  }
 0x323   : > { %8024 = vmatprep.subr.bf16.mxu0 %v10929_v57  ;;  %v11007_v57 = vld [vmem:[%s11630_s8 + $0x1c44] ss:$8 sps:$4 sm:$0xff]  }
 0x325   : > { %7369 = vmatpush1.bf16.msra.mxu1 %v10924_v27  ;;  %v11002_v27 = vld [vmem:[%s11630_s8 + $0xc40] ss:$8 sps:$4 sm:$0xff]  }
 0x326   : > { %8025 = vmatpush1.bf16.msra.mxu0 %v10927_v28  ;;  %7370 = vmatprep.subr.bf16.mxu1 %v10932_v29  ;;  %v11005_v28 = vld [vmem:[%s11630_s8 + $0x1c40] ss:$8 sps:$4 sm:$0xff]   ;;  %v11010_v29 = vld [vmem:[%s11630_s8 + $0xc54] ss:$8 sps:$4 sm:$0xff]  }
 0x327   : > { %8026 = vmatprep.subr.bf16.mxu0 %v10935_v30  ;;  %v11013_v30 = vld [vmem:[%s11630_s8 + $0x1c54] ss:$8 sps:$4 sm:$0xff]  }
 0x329   : > { %7371 = vmatpush1.bf16.msra.mxu1 %v10930_v31  ;;  %v11008_v31 = vld [vmem:[%s11630_s8 + $0xc50] ss:$8 sps:$4 sm:$0xff]  }
 0x32a   : > { %8027 = vmatpush1.bf16.msra.mxu0 %v10933_v32  ;;  %7372 = vmatprep.subr.bf16.mxu1 %v10938_v16  ;;  %v11011_v32 = vld [vmem:[%s11630_s8 + $0x1c50] ss:$8 sps:$4 sm:$0xff]   ;;  %v11016_v16 = vld [vmem:[%s11630_s8 + $0xc64] ss:$8 sps:$4 sm:$0xff]  }
 0x32b   : > { %8028 = vmatprep.subr.bf16.mxu0 %v10941_v34  ;;  %v11019_v34 = vld [vmem:[%s11630_s8 + $0x1c64] ss:$8 sps:$4 sm:$0xff]  }
 0x32d   : > { %7373 = vmatpush1.bf16.msra.mxu1 %v10936_v35  ;;  %v11014_v35 = vld [vmem:[%s11630_s8 + $0xc60] ss:$8 sps:$4 sm:$0xff]  }
 0x32e   : > { %8029 = vmatpush1.bf16.msra.mxu0 %v10939_v36  ;;  %7374 = vmatprep.subr.bf16.mxu1 %v10944_v43  ;;  %v11017_v36 = vld [vmem:[%s11630_s8 + $0x1c60] ss:$8 sps:$4 sm:$0xff]   ;;  %v11022_v43 = vld [vmem:[%s11630_s8 + $0xc74] ss:$8 sps:$4 sm:$0xff]  }
 0x32f   : > { %8030 = vmatprep.subr.bf16.mxu0 %v10947_v45  ;;  %v11025_v45 = vld [vmem:[%s11630_s8 + $0x1c74] ss:$8 sps:$4 sm:$0xff]  }
 0x331   : > { %7375 = vmatpush1.bf16.msra.mxu1 %v10942_v25  ;;  %v11020_v25 = vld [vmem:[%s11630_s8 + $0xc70] ss:$8 sps:$4 sm:$0xff]  }
 0x332   : > { %8031 = vmatpush1.bf16.msra.mxu0 %v10945_v46  ;;  %7376 = vmatprep.subr.bf16.mxu1 %v10950_v42  ;;  %v11023_v46 = vld [vmem:[%s11630_s8 + $0x1c70] ss:$8 sps:$4 sm:$0xff]   ;;  %v11028_v42 = vld [vmem:[%s11630_s8 + $0xc84] ss:$8 sps:$4 sm:$0xff]  }
 0x333   : > { %8032 = vmatprep.subr.bf16.mxu0 %v10953_v26  ;;  %v11031_v26 = vld [vmem:[%s11630_s8 + $0x1c84] ss:$8 sps:$4 sm:$0xff]  }
 0x335   : > { %7377 = vmatpush1.bf16.msra.mxu1 %v10948_v60  ;;  %v11026_v60 = vld [vmem:[%s11630_s8 + $0xc80] ss:$8 sps:$4 sm:$0xff]  }
 0x336   : > { %8033 = vmatpush1.bf16.msra.mxu0 %v10951_v14  ;;  %7378 = vmatprep.subr.bf16.mxu1 %v10956_v33  ;;  %v11029_v14 = vld [vmem:[%s11630_s8 + $0x1c80] ss:$8 sps:$4 sm:$0xff]   ;;  %v11034_v33 = vld [vmem:[%s11630_s8 + $0xc94] ss:$8 sps:$4 sm:$0xff]  }
 0x337   : > { %8034 = vmatprep.subr.bf16.mxu0 %v10959_v37  ;;  %v11037_v37 = vld [vmem:[%s11630_s8 + $0x1c94] ss:$8 sps:$4 sm:$0xff]  }
 0x339   : > { %7379 = vmatpush1.bf16.msra.mxu1 %v10954_v15  ;;  %v11032_v15 = vld [vmem:[%s11630_s8 + $0xc90] ss:$8 sps:$4 sm:$0xff]  }
 0x33a   : > { %8035 = vmatpush1.bf16.msra.mxu0 %v10957_v48  ;;  %7380 = vmatprep.subr.bf16.mxu1 %v10962_v17  ;;  %v11035_v48 = vld [vmem:[%s11630_s8 + $0x1c90] ss:$8 sps:$4 sm:$0xff]   ;;  %v11040_v17 = vld [vmem:[%s11630_s8 + $0xca4] ss:$8 sps:$4 sm:$0xff]  }
 0x33b   : > { %8036 = vmatprep.subr.bf16.mxu0 %v10965_v49  ;;  %v11043_v49 = vld [vmem:[%s11630_s8 + $0x1ca4] ss:$8 sps:$4 sm:$0xff]  }
 0x33d   : > { %7381 = vmatpush1.bf16.msra.mxu1 %v10960_v51  ;;  %v11038_v51 = vld [vmem:[%s11630_s8 + $0xca0] ss:$8 sps:$4 sm:$0xff]  }
 0x33e   : > { %8037 = vmatpush1.bf16.msra.mxu0 %v10963_v52  ;;  %7382 = vmatprep.subr.bf16.mxu1 %v10968_v54  ;;  %v11041_v52 = vld [vmem:[%s11630_s8 + $0x1ca0] ss:$8 sps:$4 sm:$0xff]   ;;  %v11046_v54 = vld [vmem:[%s11630_s8 + $0xcb4] ss:$8 sps:$4 sm:$0xff]  }
 0x33f   : > { %8038 = vmatprep.subr.bf16.mxu0 %v10971_v55  ;;  %v11049_v55 = vld [vmem:[%s11630_s8 + $0x1cb4] ss:$8 sps:$4 sm:$0xff]  }
 0x341   : > { %7383 = vmatpush1.bf16.msra.mxu1 %v10966_v63  ;;  %v11044_v63 = vld [vmem:[%s11630_s8 + $0xcb0] ss:$8 sps:$4 sm:$0xff]  }
 0x342   : > { %8039 = vmatpush1.bf16.msra.mxu0 %v10969_v0  ;;  %7384 = vmatprep.subr.bf16.mxu1 %v10974_v41  ;;  %v11047_v0 = vld [vmem:[%s11630_s8 + $0x1cb0] ss:$8 sps:$4 sm:$0xff]   ;;  %v11052_v41 = vld [vmem:[%s11630_s8 + $0xcc4] ss:$8 sps:$4 sm:$0xff]  }
 0x343   : > { %8040 = vmatprep.subr.bf16.mxu0 %v10977_v1  ;;  %v11055_v1 = vld [vmem:[%s11630_s8 + $0x1cc4] ss:$8 sps:$4 sm:$0xff]  }
 0x345   : > { %7385 = vmatpush1.bf16.msra.mxu1 %v10972_v47  ;;  %v11050_v47 = vld [vmem:[%s11630_s8 + $0xcc0] ss:$8 sps:$4 sm:$0xff]  }
 0x346   : > { %8041 = vmatpush1.bf16.msra.mxu0 %v10975_v3  ;;  %7395 = vmatprep.subr.bf16.mxu1 %v10980_v39  ;;  %v11053_v3 = vld [vmem:[%s11630_s8 + $0x1cc0] ss:$8 sps:$4 sm:$0xff]   ;;  %v11058_v39 = vld [vmem:[%s11630_s8 + $0xcd4] ss:$8 sps:$4 sm:$0xff]  }
 0x347   : > { %8051 = vmatprep.subr.bf16.mxu0 %v10983_v58  ;;  %v11061_v58 = vld [vmem:[%s11630_s8 + $0x1cd4] ss:$8 sps:$4 sm:$0xff]  }
 0x348   : > { %7387 = vmatmul.mubr.bf16.vlgmr.msra.gmra.mrb[0].mxu1 %v1471_v5  ;;  %v11064_v5 = vld [vmem:[%s11630_s8 + $0xce4] ss:$8 sps:$4 sm:$0xff]  }
 0x349   : > { %8043 = vmatmul.mubr.bf16.vlgmr.msra.gmra.mrb[0].mxu0 %v1667_v6  ;;  %7396 = vmatpush1.bf16.msra.mxu1 %v10978_v7  ;;  %v11067_v6 = vld [vmem:[%s11630_s8 + $0x1ce4] ss:$8 sps:$4 sm:$0xff]   ;;  %v11062_v7 = vld [vmem:[%s11630_s8 + $0xce0] ss:$8 sps:$4 sm:$0xff]  }
 0x34a   : > { %8052 = vmatpush1.bf16.msra.mxu0 %v10981_v8  ;;  %7397 = vmatprep.subr.bf16.mxu1 %v10986_v9  ;;  %v11065_v8 = vld [vmem:[%s11630_s8 + $0x1ce0] ss:$8 sps:$4 sm:$0xff]   ;;  %v11070_v9 = vld [vmem:[%s11630_s8 + $0xcf4] ss:$8 sps:$4 sm:$0xff]  }
 0x34b   : > { %8053 = vmatprep.subr.bf16.mxu0 %v10989_v10  ;;  %7427 = vmatprep.mubr.bf16.mxu1 %v12683_v11  ;;  %v11073_v10 = vld [vmem:[%s11630_s8 + $0x1cf4] ss:$8 sps:$4 sm:$0xff]  }
 0x34c   : > { %8083 = vmatprep.mubr.bf16.mxu0 %v12686_v61 }
 0x34d   : > { %7398 = vmatpush1.bf16.msra.mxu1 %v10984_v62  ;;  %v11068_v62 = vld [vmem:[%s11630_s8 + $0xcf0] ss:$8 sps:$4 sm:$0xff]  }
 0x34e   : > { %8054 = vmatpush1.bf16.msra.mxu0 %v10987_v12  ;;  %7399 = vmatprep.subr.bf16.mxu1 %v10992_v19  ;;  %v11071_v12 = vld [vmem:[%s11630_s8 + $0x1cf0] ss:$8 sps:$4 sm:$0xff]   ;;  %v11076_v19 = vld [vmem:[%s11630_s8 + $0xd04] ss:$8 sps:$4 sm:$0xff]  }
 0x34f   : > { %8055 = vmatprep.subr.bf16.mxu0 %v10995_v20  ;;  %v11079_v20 = vld [vmem:[%s11630_s8 + $0x1d04] ss:$8 sps:$4 sm:$0xff]  }
 0x351   : > { %7400 = vmatpush1.bf16.msra.mxu1 %v10990_v21  ;;  %v12752_v21 = vrot.slane %v12660_v23, %v11710_v50  ;;  %v1521_v23 = vcombine.high %v12683_v11, %v12683_v11  ;;  %v11088_v11 = vld [vmem:[%s11630_s8 + $0xd24] ss:$8 sps:$4 sm:$0xff]  }
 0x352   : > { %8056 = vmatpush1.bf16.msra.mxu0 %v10993_v22  ;;  %7401 = vmatprep.subr.bf16.mxu1 %v10998_v2  ;;  %v12756_v22 = vrot.slane %v12664_v56, %v11710_v50  ;;  %v11074_v2 = vld [vmem:[%s11630_s8 + $0xd00] ss:$8 sps:$4 sm:$0xff]   ;;  %v11080_v56 = vld [vmem:[%s11630_s8 + $0xd10] ss:$8 sps:$4 sm:$0xff]  }
 0x353   : > { %8057 = vmatprep.subr.bf16.mxu0 %v11001_v24  ;;  %v11077_v24 = vld [vmem:[%s11630_s8 + $0x1d00] ss:$8 sps:$4 sm:$0xff]  }
 0x355   : > { %7402 = vmatpush1.bf16.msra.mxu1 %v10996_v13  ;;  %v11082_v13 = vld [vmem:[%s11630_s8 + $0xd14] ss:$8 sps:$4 sm:$0xff]  }
 0x356   : > { %8058 = vmatpush1.bf16.msra.mxu0 %v10999_v53  ;;  %7403 = vmatprep.subr.bf16.mxu1 %v11004_v59  ;;  %v11085_v53 = vld [vmem:[%s11630_s8 + $0x1d14] ss:$8 sps:$4 sm:$0xff]   ;;  %v1717_v59 = vcombine.high %v12686_v61, %v12686_v61  ;;  %v11086_v61 = vld [vmem:[%s11630_s8 + $0xd20] ss:$8 sps:$4 sm:$0xff]  }
 0x357   : > { %8059 = vmatprep.subr.bf16.mxu0 %v11007_v57  ;;  %v11083_v57 = vld [vmem:[%s11630_s8 + $0x1d10] ss:$8 sps:$4 sm:$0xff]  }
 0x359   : > { %7404 = vmatpush1.bf16.msra.mxu1 %v11002_v27  ;;  %v11091_v27 = vld [vmem:[%s11630_s8 + $0x1d24] ss:$8 sps:$4 sm:$0xff]  }
 0x35a   : > { %8060 = vmatpush1.bf16.msra.mxu0 %v11005_v28  ;;  %7405 = vmatprep.subr.bf16.mxu1 %v11010_v29  ;;  %v11089_v28 = vld [vmem:[%s11630_s8 + $0x1d20] ss:$8 sps:$4 sm:$0xff]   ;;  %v11094_v29 = vld [vmem:[%s11630_s8 + $0xd34] ss:$8 sps:$4 sm:$0xff]  }
 0x35b   : > { %8061 = vmatprep.subr.bf16.mxu0 %v11013_v30  ;;  %v11097_v30 = vld [vmem:[%s11630_s8 + $0x1d34] ss:$8 sps:$4 sm:$0xff]  }
 0x35d   : > { %7406 = vmatpush1.bf16.msra.mxu1 %v11008_v31  ;;  %v11092_v31 = vld [vmem:[%s11630_s8 + $0xd30] ss:$8 sps:$4 sm:$0xff]  }
 0x35e   : > { %8062 = vmatpush1.bf16.msra.mxu0 %v11011_v32  ;;  %7407 = vmatprep.subr.bf16.mxu1 %v11016_v16  ;;  %v11095_v32 = vld [vmem:[%s11630_s8 + $0x1d30] ss:$8 sps:$4 sm:$0xff]   ;;  %v11100_v16 = vld [vmem:[%s11630_s8 + $0xd44] ss:$8 sps:$4 sm:$0xff]  }
 0x35f   : > { %8063 = vmatprep.subr.bf16.mxu0 %v11019_v34  ;;  %v11103_v34 = vld [vmem:[%s11630_s8 + $0x1d44] ss:$8 sps:$4 sm:$0xff]  }
 0x361   : > { %7408 = vmatpush1.bf16.msra.mxu1 %v11014_v35  ;;  %v11098_v35 = vld [vmem:[%s11630_s8 + $0xd40] ss:$8 sps:$4 sm:$0xff]  }
 0x362   : > { %8064 = vmatpush1.bf16.msra.mxu0 %v11017_v36  ;;  %7409 = vmatprep.subr.bf16.mxu1 %v11022_v43  ;;  %v11101_v36 = vld [vmem:[%s11630_s8 + $0x1d40] ss:$8 sps:$4 sm:$0xff]   ;;  %v11106_v43 = vld [vmem:[%s11630_s8 + $0xd54] ss:$8 sps:$4 sm:$0xff]  }
 0x363   : > { %8065 = vmatprep.subr.bf16.mxu0 %v11025_v45  ;;  %v11109_v45 = vld [vmem:[%s11630_s8 + $0x1d54] ss:$8 sps:$4 sm:$0xff]  }
 0x365   : > { %7410 = vmatpush1.bf16.msra.mxu1 %v11020_v25  ;;  %v11104_v25 = vld [vmem:[%s11630_s8 + $0xd50] ss:$8 sps:$4 sm:$0xff]  }
 0x366   : > { %8066 = vmatpush1.bf16.msra.mxu0 %v11023_v46  ;;  %7411 = vmatprep.subr.bf16.mxu1 %v11028_v42  ;;  %v11107_v46 = vld [vmem:[%s11630_s8 + $0x1d50] ss:$8 sps:$4 sm:$0xff]   ;;  %v11112_v42 = vld [vmem:[%s11630_s8 + $0xd64] ss:$8 sps:$4 sm:$0xff]  }
 0x367   : > { %8067 = vmatprep.subr.bf16.mxu0 %v11031_v26  ;;  %v11115_v26 = vld [vmem:[%s11630_s8 + $0x1d64] ss:$8 sps:$4 sm:$0xff]  }
 0x369   : > { %7412 = vmatpush1.bf16.msra.mxu1 %v11026_v60  ;;  %v11110_v60 = vld [vmem:[%s11630_s8 + $0xd60] ss:$8 sps:$4 sm:$0xff]  }
 0x36a   : > { %8068 = vmatpush1.bf16.msra.mxu0 %v11029_v14  ;;  %7413 = vmatprep.subr.bf16.mxu1 %v11034_v33  ;;  %v11113_v14 = vld [vmem:[%s11630_s8 + $0x1d60] ss:$8 sps:$4 sm:$0xff]   ;;  %v11118_v33 = vld [vmem:[%s11630_s8 + $0xd74] ss:$8 sps:$4 sm:$0xff]  }
 0x36b   : > { %8069 = vmatprep.subr.bf16.mxu0 %v11037_v37  ;;  %v11121_v37 = vld [vmem:[%s11630_s8 + $0x1d74] ss:$8 sps:$4 sm:$0xff]  }
 0x36d   : > { %7414 = vmatpush1.bf16.msra.mxu1 %v11032_v15  ;;  %v11116_v15 = vld [vmem:[%s11630_s8 + $0xd70] ss:$8 sps:$4 sm:$0xff]  }
 0x36e   : > { %8070 = vmatpush1.bf16.msra.mxu0 %v11035_v48  ;;  %7415 = vmatprep.subr.bf16.mxu1 %v11040_v17  ;;  %v11119_v48 = vld [vmem:[%s11630_s8 + $0x1d70] ss:$8 sps:$4 sm:$0xff]   ;;  %v11124_v17 = vld [vmem:[%s11630_s8 + $0xd84] ss:$8 sps:$4 sm:$0xff]  }
 0x36f   : > { %8071 = vmatprep.subr.bf16.mxu0 %v11043_v49  ;;  %v11127_v49 = vld [vmem:[%s11630_s8 + $0x1d84] ss:$8 sps:$4 sm:$0xff]  }
 0x371   : > { %7416 = vmatpush1.bf16.msra.mxu1 %v11038_v51  ;;  %v11122_v51 = vld [vmem:[%s11630_s8 + $0xd80] ss:$8 sps:$4 sm:$0xff]  }
 0x372   : > { %8072 = vmatpush1.bf16.msra.mxu0 %v11041_v52  ;;  %7417 = vmatprep.subr.bf16.mxu1 %v11046_v54  ;;  %v11125_v52 = vld [vmem:[%s11630_s8 + $0x1d80] ss:$8 sps:$4 sm:$0xff]   ;;  %v11130_v54 = vld [vmem:[%s11630_s8 + $0xd94] ss:$8 sps:$4 sm:$0xff]  }
 0x373   : > { %8073 = vmatprep.subr.bf16.mxu0 %v11049_v55  ;;  %v11133_v55 = vld [vmem:[%s11630_s8 + $0x1d94] ss:$8 sps:$4 sm:$0xff]  }
 0x375   : > { %7418 = vmatpush1.bf16.msra.mxu1 %v11044_v63  ;;  %v11128_v63 = vld [vmem:[%s11630_s8 + $0xd90] ss:$8 sps:$4 sm:$0xff]  }
 0x376   : > { %8074 = vmatpush1.bf16.msra.mxu0 %v11047_v0  ;;  %7419 = vmatprep.subr.bf16.mxu1 %v11052_v41  ;;  %v11131_v0 = vld [vmem:[%s11630_s8 + $0x1d90] ss:$8 sps:$4 sm:$0xff]   ;;  %v11136_v41 = vld [vmem:[%s11630_s8 + $0xda4] ss:$8 sps:$4 sm:$0xff]  }
 0x377   : > { %8075 = vmatprep.subr.bf16.mxu0 %v11055_v1  ;;  %v11139_v1 = vld [vmem:[%s11630_s8 + $0x1da4] ss:$8 sps:$4 sm:$0xff]  }
 0x379   : > { %7420 = vmatpush1.bf16.msra.mxu1 %v11050_v47  ;;  %v11134_v47 = vld [vmem:[%s11630_s8 + $0xda0] ss:$8 sps:$4 sm:$0xff]  }
 0x37a   : > { %8076 = vmatpush1.bf16.msra.mxu0 %v11053_v3  ;;  %7421 = vmatprep.subr.bf16.mxu1 %v11058_v39  ;;  %v11137_v3 = vld [vmem:[%s11630_s8 + $0x1da0] ss:$8 sps:$4 sm:$0xff]   ;;  %v11142_v39 = vld [vmem:[%s11630_s8 + $0xdb4] ss:$8 sps:$4 sm:$0xff]  }
 0x37b   : > { %8077 = vmatprep.subr.bf16.mxu0 %v11061_v58  ;;  %v11145_v58 = vld [vmem:[%s11630_s8 + $0x1db4] ss:$8 sps:$4 sm:$0xff]  }
 0x37d   : > { %7422 = vmatpush1.bf16.msra.mxu1 %v11056_v18  ;;  %v11140_v18 = vld [vmem:[%s11630_s8 + $0xdb0] ss:$8 sps:$4 sm:$0xff]  }
 0x37e   : > { %8078 = vmatpush1.bf16.msra.mxu0 %v11059_v4  ;;  %7423 = vmatprep.subr.bf16.mxu1 %v11064_v5  ;;  %v11143_v4 = vld [vmem:[%s11630_s8 + $0x1db0] ss:$8 sps:$4 sm:$0xff]   ;;  %v11148_v5 = vld [vmem:[%s11630_s8 + $0xdc4] ss:$8 sps:$4 sm:$0xff]  }
 0x37f   : > { %8079 = vmatprep.subr.bf16.mxu0 %v11067_v6  ;;  %v11151_v6 = vld [vmem:[%s11630_s8 + $0x1dc4] ss:$8 sps:$4 sm:$0xff]  }
 0x381   : > { %7424 = vmatpush1.bf16.msra.mxu1 %v11062_v7  ;;  %v11146_v7 = vld [vmem:[%s11630_s8 + $0xdc0] ss:$8 sps:$4 sm:$0xff]  }
 0x382   : > { %8080 = vmatpush1.bf16.msra.mxu0 %v11065_v8  ;;  %7425 = vmatprep.subr.bf16.mxu1 %v11070_v9  ;;  %v11149_v8 = vld [vmem:[%s11630_s8 + $0x1dc0] ss:$8 sps:$4 sm:$0xff]   ;;  %v11154_v9 = vld [vmem:[%s11630_s8 + $0xdd4] ss:$8 sps:$4 sm:$0xff]  }
 0x383   : > { %8081 = vmatprep.subr.bf16.mxu0 %v11073_v10  ;;  %v11157_v10 = vld [vmem:[%s11630_s8 + $0x1dd4] ss:$8 sps:$4 sm:$0xff]  }
 0x385   : > { %7426 = vmatpush1.bf16.msra.mxu1 %v11068_v62  ;;  %v11152_v62 = vld [vmem:[%s11630_s8 + $0xdd0] ss:$8 sps:$4 sm:$0xff]  }
 0x386   : > { %8082 = vmatpush1.bf16.msra.mxu0 %v11071_v12  ;;  %7436 = vmatprep.subr.bf16.mxu1 %v11076_v19  ;;  %v11155_v12 = vld [vmem:[%s11630_s8 + $0x1dd0] ss:$8 sps:$4 sm:$0xff]   ;;  %v11160_v19 = vld [vmem:[%s11630_s8 + $0xde4] ss:$8 sps:$4 sm:$0xff]  }
 0x387   : > { %8092 = vmatprep.subr.bf16.mxu0 %v11079_v20  ;;  %v11163_v20 = vld [vmem:[%s11630_s8 + $0x1de4] ss:$8 sps:$4 sm:$0xff]  }
 0x388   : > { %7428 = vmatmul.mubr.bf16.vlgmr.msra.gmra.mrb[0].mxu1 %v12752_v21 }
 0x389   : > { %8084 = vmatmul.mubr.bf16.vlgmr.msra.gmra.mrb[0].mxu0 %v12756_v22  ;;  %7437 = vmatpush1.bf16.msra.mxu1 %v11074_v2  ;;  %v1474_v2 = vcombine.high %v12649_v38, %v12649_v38  ;;  %v11164_v38 = vld [vmem:[%s11630_s8 + $0xdf0] ss:$8 sps:$4 sm:$0xff]  }
 0x38a   : > { %8093 = vmatpush1.bf16.msra.mxu0 %v11077_v24  ;;  %7438 = vmatprep.subr.bf16.mxu1 %v11082_v13  ;;  %v1670_v24 = vcombine.high %v12652_v40, %v12652_v40  ;;  %v11158_v13 = vld [vmem:[%s11630_s8 + $0xde0] ss:$8 sps:$4 sm:$0xff]   ;;  %v11167_v40 = vld [vmem:[%s11630_s8 + $0x1df0] ss:$8 sps:$4 sm:$0xff]  }
 0x38b   : > { %8094 = vmatprep.subr.bf16.mxu0 %v11085_v53  ;;  %7468 = vmatprep.mubr.bf16.mxu1 %v1521_v23  ;;  %v11161_v53 = vld [vmem:[%s11630_s8 + $0x1de0] ss:$8 sps:$4 sm:$0xff]   ;;  %v11166_v23 = vld [vmem:[%s11630_s8 + $0xdf4] ss:$8 sps:$4 sm:$0xff]  }
 0x38c   : > { %8124 = vmatprep.mubr.bf16.mxu0 %v1717_v59  ;;  %v11169_v59 = vld [vmem:[%s11630_s8 + $0x1df4] ss:$8 sps:$4 sm:$0xff]  }
 0x38d   : > { %7439 = vmatpush1.bf16.msra.mxu1 %v11080_v56  ;;  %v12829_v56 = vrot.slane %v1474_v2, %v11710_v50  ;;  %v11236_v2 = vld [vmem:[%s11630_s8 + $0xeb0] ss:$8 sps:$4 sm:$0xff]  }
 0x38e   : > { %8095 = vmatpush1.bf16.msra.mxu0 %v11083_v57  ;;  %7440 = vmatprep.subr.bf16.mxu1 %v11088_v11  ;;  %v12832_v57 = vrot.slane %v1670_v24, %v11710_v50  ;;  %v11172_v11 = vld [vmem:[%s11630_s8 + $0xe04] ss:$8 sps:$4 sm:$0xff]   ;;  %v11239_v24 = vld [vmem:[%s11630_s8 + $0x1eb0] ss:$8 sps:$4 sm:$0xff]  }
 0x38f   : > { %8096 = vmatprep.subr.bf16.mxu0 %v11091_v27  ;;  %v11175_v27 = vld [vmem:[%s11630_s8 + $0x1e04] ss:$8 sps:$4 sm:$0xff]  }
 0x391   : > { %7441 = vmatpush1.bf16.msra.mxu1 %v11086_v61  ;;  %v1490_v61 = vcombine.high %v12829_v56, %v12829_v56 }
 0x392   : > { %8097 = vmatpush1.bf16.msra.mxu0 %v11089_v28  ;;  %7442 = vmatprep.subr.bf16.mxu1 %v11094_v29  ;;  %v1686_v28 = vcombine.high %v12832_v57, %v12832_v57  ;;  %v1519_v29 = vcombine.high %v12752_v21, %v12752_v21 }
 0x393   : > { %8098 = vmatprep.subr.bf16.mxu0 %v11097_v30  ;;  %v1715_v30 = vcombine.high %v12756_v22, %v12756_v22  ;;  %v11176_v22 = vld [vmem:[%s11630_s8 + $0xe10] ss:$8 sps:$4 sm:$0xff]  }
 0x394   : > { %v12854_v21 = vrot.slane %v1686_v28, %v11710_v50  ;;  %v11259_v28 = vld [vmem:[%s11630_s8 + $0x1ee4] ss:$8 sps:$4 sm:$0xff]  }
 0x395   : > { %7443 = vmatpush1.bf16.msra.mxu1 %v11092_v31  ;;  %v11170_v31 = vld [vmem:[%s11630_s8 + $0xe00] ss:$8 sps:$4 sm:$0xff]  }
 0x396   : > { %8099 = vmatpush1.bf16.msra.mxu0 %v11095_v32  ;;  %7444 = vmatprep.subr.bf16.mxu1 %v11100_v16  ;;  %v11173_v32 = vld [vmem:[%s11630_s8 + $0x1e00] ss:$8 sps:$4 sm:$0xff]   ;;  %v11178_v16 = vld [vmem:[%s11630_s8 + $0xe14] ss:$8 sps:$4 sm:$0xff]  }
 0x397   : > { %8100 = vmatprep.subr.bf16.mxu0 %v11103_v34  ;;  %v11181_v34 = vld [vmem:[%s11630_s8 + $0x1e14] ss:$8 sps:$4 sm:$0xff]  }
 0x399   : > { %7445 = vmatpush1.bf16.msra.mxu1 %v11098_v35  ;;  %v12851_v35 = vrot.slane %v1490_v61, %v11710_v50  ;;  %v11256_v61 = vld [vmem:[%s11630_s8 + $0xee4] ss:$8 sps:$4 sm:$0xff]  }
 0x39a   : > { %8101 = vmatpush1.bf16.msra.mxu0 %v11101_v36  ;;  %7446 = vmatprep.subr.bf16.mxu1 %v11106_v43  ;;  %v11179_v36 = vld [vmem:[%s11630_s8 + $0x1e10] ss:$8 sps:$4 sm:$0xff]   ;;  %v11184_v43 = vld [vmem:[%s11630_s8 + $0xe24] ss:$8 sps:$4 sm:$0xff]  }
 0x39b   : > { %8102 = vmatprep.subr.bf16.mxu0 %v11109_v45  ;;  %v11187_v45 = vld [vmem:[%s11630_s8 + $0x1e24] ss:$8 sps:$4 sm:$0xff]  }
 0x39d   : > { %7447 = vmatpush1.bf16.msra.mxu1 %v11104_v25  ;;  %v11182_v25 = vld [vmem:[%s11630_s8 + $0xe20] ss:$8 sps:$4 sm:$0xff]  }
 0x39e   : > { %8103 = vmatpush1.bf16.msra.mxu0 %v11107_v46  ;;  %7448 = vmatprep.subr.bf16.mxu1 %v11112_v42  ;;  %v11185_v46 = vld [vmem:[%s11630_s8 + $0x1e20] ss:$8 sps:$4 sm:$0xff]   ;;  %v11190_v42 = vld [vmem:[%s11630_s8 + $0xe34] ss:$8 sps:$4 sm:$0xff]  }
 0x39f   : > { %8104 = vmatprep.subr.bf16.mxu0 %v11115_v26  ;;  %v11193_v26 = vld [vmem:[%s11630_s8 + $0x1e34] ss:$8 sps:$4 sm:$0xff]  }
 0x3a1   : > { %7449 = vmatpush1.bf16.msra.mxu1 %v11110_v60  ;;  %v11188_v60 = vld [vmem:[%s11630_s8 + $0xe30] ss:$8 sps:$4 sm:$0xff]  }
 0x3a2   : > { %8105 = vmatpush1.bf16.msra.mxu0 %v11113_v14  ;;  %7450 = vmatprep.subr.bf16.mxu1 %v11118_v33  ;;  %v11191_v14 = vld [vmem:[%s11630_s8 + $0x1e30] ss:$8 sps:$4 sm:$0xff]   ;;  %v11196_v33 = vld [vmem:[%s11630_s8 + $0xe44] ss:$8 sps:$4 sm:$0xff]  }
 0x3a3   : > { %8106 = vmatprep.subr.bf16.mxu0 %v11121_v37  ;;  %v11199_v37 = vld [vmem:[%s11630_s8 + $0x1e44] ss:$8 sps:$4 sm:$0xff]  }
 0x3a5   : > { %7451 = vmatpush1.bf16.msra.mxu1 %v11116_v15  ;;  %v11194_v15 = vld [vmem:[%s11630_s8 + $0xe40] ss:$8 sps:$4 sm:$0xff]  }
 0x3a6   : > { %8107 = vmatpush1.bf16.msra.mxu0 %v11119_v48  ;;  %7452 = vmatprep.subr.bf16.mxu1 %v11124_v17  ;;  %v11197_v48 = vld [vmem:[%s11630_s8 + $0x1e40] ss:$8 sps:$4 sm:$0xff]   ;;  %v11202_v17 = vld [vmem:[%s11630_s8 + $0xe54] ss:$8 sps:$4 sm:$0xff]  }
 0x3a7   : > { %8108 = vmatprep.subr.bf16.mxu0 %v11127_v49  ;;  %v11205_v49 = vld [vmem:[%s11630_s8 + $0x1e54] ss:$8 sps:$4 sm:$0xff]  }
 0x3a9   : > { %7453 = vmatpush1.bf16.msra.mxu1 %v11122_v51  ;;  %v11200_v51 = vld [vmem:[%s11630_s8 + $0xe50] ss:$8 sps:$4 sm:$0xff]  }
 0x3aa   : > { %8109 = vmatpush1.bf16.msra.mxu0 %v11125_v52  ;;  %7454 = vmatprep.subr.bf16.mxu1 %v11130_v54  ;;  %v11203_v52 = vld [vmem:[%s11630_s8 + $0x1e50] ss:$8 sps:$4 sm:$0xff]   ;;  %v11208_v54 = vld [vmem:[%s11630_s8 + $0xe64] ss:$8 sps:$4 sm:$0xff]  }
 0x3ab   : > { %8110 = vmatprep.subr.bf16.mxu0 %v11133_v55  ;;  %v11211_v55 = vld [vmem:[%s11630_s8 + $0x1e64] ss:$8 sps:$4 sm:$0xff]  }
 0x3ad   : > { %7455 = vmatpush1.bf16.msra.mxu1 %v11128_v63  ;;  %v11206_v63 = vld [vmem:[%s11630_s8 + $0xe60] ss:$8 sps:$4 sm:$0xff]  }
 0x3ae   : > { %8111 = vmatpush1.bf16.msra.mxu0 %v11131_v0  ;;  %7456 = vmatprep.subr.bf16.mxu1 %v11136_v41  ;;  %v11209_v0 = vld [vmem:[%s11630_s8 + $0x1e60] ss:$8 sps:$4 sm:$0xff]   ;;  %v11214_v41 = vld [vmem:[%s11630_s8 + $0xe74] ss:$8 sps:$4 sm:$0xff]  }
 0x3af   : > { %8112 = vmatprep.subr.bf16.mxu0 %v11139_v1  ;;  %v11217_v1 = vld [vmem:[%s11630_s8 + $0x1e74] ss:$8 sps:$4 sm:$0xff]  }
 0x3b1   : > { %7457 = vmatpush1.bf16.msra.mxu1 %v11134_v47  ;;  %v11212_v47 = vld [vmem:[%s11630_s8 + $0xe70] ss:$8 sps:$4 sm:$0xff]  }
 0x3b2   : > { %8113 = vmatpush1.bf16.msra.mxu0 %v11137_v3  ;;  %7458 = vmatprep.subr.bf16.mxu1 %v11142_v39  ;;  %v11215_v3 = vld [vmem:[%s11630_s8 + $0x1e70] ss:$8 sps:$4 sm:$0xff]   ;;  %v11220_v39 = vld [vmem:[%s11630_s8 + $0xe84] ss:$8 sps:$4 sm:$0xff]  }
 0x3b3   : > { %8114 = vmatprep.subr.bf16.mxu0 %v11145_v58  ;;  %v11223_v58 = vld [vmem:[%s11630_s8 + $0x1e84] ss:$8 sps:$4 sm:$0xff]  }
 0x3b5   : > { %7459 = vmatpush1.bf16.msra.mxu1 %v11140_v18  ;;  %v11218_v18 = vld [vmem:[%s11630_s8 + $0xe80] ss:$8 sps:$4 sm:$0xff]  }
 0x3b6   : > { %8115 = vmatpush1.bf16.msra.mxu0 %v11143_v4  ;;  %7460 = vmatprep.subr.bf16.mxu1 %v11148_v5  ;;  %v11221_v4 = vld [vmem:[%s11630_s8 + $0x1e80] ss:$8 sps:$4 sm:$0xff]   ;;  %v11226_v5 = vld [vmem:[%s11630_s8 + $0xe94] ss:$8 sps:$4 sm:$0xff]  }
 0x3b7   : > { %8116 = vmatprep.subr.bf16.mxu0 %v11151_v6  ;;  %v11229_v6 = vld [vmem:[%s11630_s8 + $0x1e94] ss:$8 sps:$4 sm:$0xff]  }
 0x3b9   : > { %7461 = vmatpush1.bf16.msra.mxu1 %v11146_v7  ;;  %v11224_v7 = vld [vmem:[%s11630_s8 + $0xe90] ss:$8 sps:$4 sm:$0xff]  }
 0x3ba   : > { %8117 = vmatpush1.bf16.msra.mxu0 %v11149_v8  ;;  %7462 = vmatprep.subr.bf16.mxu1 %v11154_v9  ;;  %v11227_v8 = vld [vmem:[%s11630_s8 + $0x1e90] ss:$8 sps:$4 sm:$0xff]   ;;  %v11232_v9 = vld [vmem:[%s11630_s8 + $0xea4] ss:$8 sps:$4 sm:$0xff]  }
 0x3bb   : > { %8118 = vmatprep.subr.bf16.mxu0 %v11157_v10  ;;  %v11235_v10 = vld [vmem:[%s11630_s8 + $0x1ea4] ss:$8 sps:$4 sm:$0xff]  }
 0x3bd   : > { %7463 = vmatpush1.bf16.msra.mxu1 %v11152_v62  ;;  %v11230_v62 = vld [vmem:[%s11630_s8 + $0xea0] ss:$8 sps:$4 sm:$0xff]  }
 0x3be   : > { %8119 = vmatpush1.bf16.msra.mxu0 %v11155_v12  ;;  %7464 = vmatprep.subr.bf16.mxu1 %v11160_v19  ;;  %v11233_v12 = vld [vmem:[%s11630_s8 + $0x1ea0] ss:$8 sps:$4 sm:$0xff]   ;;  %v11238_v19 = vld [vmem:[%s11630_s8 + $0xeb4] ss:$8 sps:$4 sm:$0xff]  }
 0x3bf   : > { %8120 = vmatprep.subr.bf16.mxu0 %v11163_v20  ;;  %v11241_v20 = vld [vmem:[%s11630_s8 + $0x1eb4] ss:$8 sps:$4 sm:$0xff]  }
 0x3c1   : > { %7465 = vmatpush1.bf16.msra.mxu1 %v11158_v13  ;;  %v11244_v13 = vld [vmem:[%s11630_s8 + $0xec4] ss:$8 sps:$4 sm:$0xff]  }
 0x3c2   : > { %8121 = vmatpush1.bf16.msra.mxu0 %v11161_v53  ;;  %7466 = vmatprep.subr.bf16.mxu1 %v11166_v23  ;;  %v11247_v53 = vld [vmem:[%s11630_s8 + $0x1ec4] ss:$8 sps:$4 sm:$0xff]   ;;  %v11242_v23 = vld [vmem:[%s11630_s8 + $0xec0] ss:$8 sps:$4 sm:$0xff]  }
 0x3c3   : > { %8122 = vmatprep.subr.bf16.mxu0 %v11169_v59  ;;  %v11245_v59 = vld [vmem:[%s11630_s8 + $0x1ec0] ss:$8 sps:$4 sm:$0xff]  }
 0x3c5   : > { %7467 = vmatpush1.bf16.msra.mxu1 %v11164_v38  ;;  %v11250_v38 = vld [vmem:[%s11630_s8 + $0xed4] ss:$8 sps:$4 sm:$0xff]  }
 0x3c6   : > { %8123 = vmatpush1.bf16.msra.mxu0 %v11167_v40  ;;  %7477 = vmatprep.subr.bf16.mxu1 %v11172_v11  ;;  %v11253_v40 = vld [vmem:[%s11630_s8 + $0x1ed4] ss:$8 sps:$4 sm:$0xff]   ;;  %v11248_v11 = vld [vmem:[%s11630_s8 + $0xed0] ss:$8 sps:$4 sm:$0xff]  }
 0x3c7   : > { %8133 = vmatprep.subr.bf16.mxu0 %v11175_v27  ;;  %v11251_v27 = vld [vmem:[%s11630_s8 + $0x1ed0] ss:$8 sps:$4 sm:$0xff]  }
 0x3c8   : > { %7469 = vmatmul.mubr.bf16.vlgmr.msra.gmra.mrb[0].mxu1 %v1519_v29  ;;  %v11254_v29 = vld [vmem:[%s11630_s8 + $0xee0] ss:$8 sps:$4 sm:$0xff]  }
 0x3c9   : > { %8125 = vmatmul.mubr.bf16.vlgmr.msra.gmra.mrb[0].mxu0 %v1715_v30  ;;  %7478 = vmatpush1.bf16.msra.mxu1 %v11170_v31  ;;  %v11257_v30 = vld [vmem:[%s11630_s8 + $0x1ee0] ss:$8 sps:$4 sm:$0xff]   ;;  %v11262_v31 = vld [vmem:[%s11630_s8 + $0xef4] ss:$8 sps:$4 sm:$0xff]  }
 0x3ca   : > { %8134 = vmatpush1.bf16.msra.mxu0 %v11173_v32  ;;  %7479 = vmatprep.subr.bf16.mxu1 %v11178_v16  ;;  %v11265_v32 = vld [vmem:[%s11630_s8 + $0x1ef4] ss:$8 sps:$4 sm:$0xff]   ;;  %v11260_v16 = vld [vmem:[%s11630_s8 + $0xef0] ss:$8 sps:$4 sm:$0xff]  }
 0x3cb   : > { %8135 = vmatprep.subr.bf16.mxu0 %v11181_v34  ;;  %7509 = vmatprep.mubr.bf16.mxu1 %v12851_v35  ;;  %v11263_v34 = vld [vmem:[%s11630_s8 + $0x1ef0] ss:$8 sps:$4 sm:$0xff]  }
 0x3cc   : > { %8165 = vmatprep.mubr.bf16.mxu0 %v12854_v21 }
 0x3cd   : > { %7480 = vmatpush1.bf16.msra.mxu1 %v11176_v22  ;;  %v11269_v22 = vld [vmem:[%s11630_s8 + $0xf04] ss:$8 sps:$4 sm:$0xff]  }
 0x3ce   : > { %8136 = vmatpush1.bf16.msra.mxu0 %v11179_v36  ;;  %7481 = vmatprep.subr.bf16.mxu1 %v11184_v43  ;;  %v11273_v36 = vld [vmem:[%s11630_s8 + $0x1f04] ss:$8 sps:$4 sm:$0xff]   ;;  %v12920_v43 = vrot.slane %v12829_v56, %v11710_v50  ;;  %v1522_v56 = vcombine.high %v12851_v35, %v12851_v35 }
 0x3cf   : > { %8137 = vmatprep.subr.bf16.mxu0 %v11187_v45  ;;  %v12924_v45 = vrot.slane %v12832_v57, %v11710_v50  ;;  %v11274_v50 = vld [vmem:[%s11630_s8 + $0xf10] ss:$8 sps:$4 sm:$0xff]   ;;  %v11282_v35 = vld [vmem:[%s11630_s8 + $0xf24] ss:$8 sps:$4 sm:$0xff]  }
 0x3d0   : > { %v11277_v57 = vld [vmem:[%s11630_s8 + $0x1f10] ss:$8 sps:$4 sm:$0xff]  }
 0x3d1   : > { %7482 = vmatpush1.bf16.msra.mxu1 %v11182_v25  ;;  %v11267_v25 = vld [vmem:[%s11630_s8 + $0xf00] ss:$8 sps:$4 sm:$0xff]  }
 0x3d2   : > { %8138 = vmatpush1.bf16.msra.mxu0 %v11185_v46  ;;  %7483 = vmatprep.subr.bf16.mxu1 %v11190_v42  ;;  %v11271_v46 = vld [vmem:[%s11630_s8 + $0x1f00] ss:$8 sps:$4 sm:$0xff]   ;;  %v11276_v42 = vld [vmem:[%s11630_s8 + $0xf14] ss:$8 sps:$4 sm:$0xff]  }
 0x3d3   : > { %8139 = vmatprep.subr.bf16.mxu0 %v11193_v26  ;;  %v11279_v26 = vld [vmem:[%s11630_s8 + $0x1f14] ss:$8 sps:$4 sm:$0xff]  }
 0x3d5   : > { %7484 = vmatpush1.bf16.msra.mxu1 %v11188_v60  ;;  %v1718_v60 = vcombine.high %v12854_v21, %v12854_v21  ;;  %v11280_v21 = vld [vmem:[%s11630_s8 + $0xf20] ss:$8 sps:$4 sm:$0xff]  }
 0x3d6   : > { %8140 = vmatpush1.bf16.msra.mxu0 %v11191_v14  ;;  %7485 = vmatprep.subr.bf16.mxu1 %v11196_v33  ;;  %v11285_v14 = vld [vmem:[%s11630_s8 + $0x1f24] ss:$8 sps:$4 sm:$0xff]   ;;  %v11283_v33 = vld [vmem:[%s11630_s8 + $0x1f20] ss:$8 sps:$4 sm:$0xff]  }
 0x3d7   : > { %8141 = vmatprep.subr.bf16.mxu0 %v11199_v37  ;;  %v11288_v37 = vld [vmem:[%s11630_s8 + $0xf34] ss:$8 sps:$4 sm:$0xff]  }
 0x3d9   : > { %7486 = vmatpush1.bf16.msra.mxu1 %v11194_v15  ;;  %v11291_v15 = vld [vmem:[%s11630_s8 + $0x1f34] ss:$8 sps:$4 sm:$0xff]  }
 0x3da   : > { %8142 = vmatpush1.bf16.msra.mxu0 %v11197_v48  ;;  %7487 = vmatprep.subr.bf16.mxu1 %v11202_v17  ;;  %v11286_v48 = vld [vmem:[%s11630_s8 + $0xf30] ss:$8 sps:$4 sm:$0xff]  }
 0x3db   : > { %8143 = vmatprep.subr.bf16.mxu0 %v11205_v49  ;;  %v11289_v17 = vld [vmem:[%s11630_s8 + $0x1f30] ss:$8 sps:$4 sm:$0xff]   ;;  %v11294_v49 = vld [vmem:[%s11630_s8 + $0xf44] ss:$8 sps:$4 sm:$0xff]  }
 0x3dd   : > { %7488 = vmatpush1.bf16.msra.mxu1 %v11200_v51  ;;  %v11297_v51 = vld [vmem:[%s11630_s8 + $0x1f44] ss:$8 sps:$4 sm:$0xff]  }
 0x3de   : > { %8144 = vmatpush1.bf16.msra.mxu0 %v11203_v52  ;;  %7489 = vmatprep.subr.bf16.mxu1 %v11208_v54  ;;  %v11292_v52 = vld [vmem:[%s11630_s8 + $0xf40] ss:$8 sps:$4 sm:$0xff]  }
 0x3df   : > { %8145 = vmatprep.subr.bf16.mxu0 %v11211_v55  ;;  %v11295_v54 = vld [vmem:[%s11630_s8 + $0x1f40] ss:$8 sps:$4 sm:$0xff]   ;;  %v11300_v55 = vld [vmem:[%s11630_s8 + $0xf54] ss:$8 sps:$4 sm:$0xff]  }
 0x3e1   : > { %7490 = vmatpush1.bf16.msra.mxu1 %v11206_v63  ;;  %v11303_v63 = vld [vmem:[%s11630_s8 + $0x1f54] ss:$8 sps:$4 sm:$0xff]  }
 0x3e2   : > { %8146 = vmatpush1.bf16.msra.mxu0 %v11209_v0  ;;  %7491 = vmatprep.subr.bf16.mxu1 %v11214_v41  ;;  %v11298_v0 = vld [vmem:[%s11630_s8 + $0xf50] ss:$8 sps:$4 sm:$0xff]  }
 0x3e3   : > { %8147 = vmatprep.subr.bf16.mxu0 %v11217_v1  ;;  %v11301_v41 = vld [vmem:[%s11630_s8 + $0x1f50] ss:$8 sps:$4 sm:$0xff]   ;;  %v11306_v1 = vld [vmem:[%s11630_s8 + $0xf64] ss:$8 sps:$4 sm:$0xff]  }
 0x3e5   : > { %7492 = vmatpush1.bf16.msra.mxu1 %v11212_v47  ;;  %v11309_v47 = vld [vmem:[%s11630_s8 + $0x1f64] ss:$8 sps:$4 sm:$0xff]  }
 0x3e6   : > { %8148 = vmatpush1.bf16.msra.mxu0 %v11215_v3  ;;  %7493 = vmatprep.subr.bf16.mxu1 %v11220_v39  ;;  %v11304_v3 = vld [vmem:[%s11630_s8 + $0xf60] ss:$8 sps:$4 sm:$0xff]  }
 0x3e7   : > { %8149 = vmatprep.subr.bf16.mxu0 %v11223_v58  ;;  %v11307_v39 = vld [vmem:[%s11630_s8 + $0x1f60] ss:$8 sps:$4 sm:$0xff]   ;;  %v11312_v58 = vld [vmem:[%s11630_s8 + $0xf74] ss:$8 sps:$4 sm:$0xff]  }
 0x3e9   : > { %7494 = vmatpush1.bf16.msra.mxu1 %v11218_v18  ;;  %v11315_v18 = vld [vmem:[%s11630_s8 + $0x1f74] ss:$8 sps:$4 sm:$0xff]  }
 0x3ea   : > { %8150 = vmatpush1.bf16.msra.mxu0 %v11221_v4  ;;  %7495 = vmatprep.subr.bf16.mxu1 %v11226_v5  ;;  %v11310_v4 = vld [vmem:[%s11630_s8 + $0xf70] ss:$8 sps:$4 sm:$0xff]  }
 0x3eb   : > { %8151 = vmatprep.subr.bf16.mxu0 %v11229_v6  ;;  %v11313_v5 = vld [vmem:[%s11630_s8 + $0x1f70] ss:$8 sps:$4 sm:$0xff]   ;;  %v11318_v6 = vld [vmem:[%s11630_s8 + $0xf84] ss:$8 sps:$4 sm:$0xff]  }
 0x3ed   : > { %7496 = vmatpush1.bf16.msra.mxu1 %v11224_v7  ;;  %v11321_v7 = vld [vmem:[%s11630_s8 + $0x1f84] ss:$8 sps:$4 sm:$0xff]  }
 0x3ee   : > { %8152 = vmatpush1.bf16.msra.mxu0 %v11227_v8  ;;  %7497 = vmatprep.subr.bf16.mxu1 %v11232_v9  ;;  %v11316_v8 = vld [vmem:[%s11630_s8 + $0xf80] ss:$8 sps:$4 sm:$0xff]  }
 0x3ef   : > { %8153 = vmatprep.subr.bf16.mxu0 %v11235_v10  ;;  %v11319_v9 = vld [vmem:[%s11630_s8 + $0x1f80] ss:$8 sps:$4 sm:$0xff]   ;;  %v11324_v10 = vld [vmem:[%s11630_s8 + $0xf94] ss:$8 sps:$4 sm:$0xff]  }
 0x3f1   : > { %7498 = vmatpush1.bf16.msra.mxu1 %v11230_v62  ;;  %v11327_v62 = vld [vmem:[%s11630_s8 + $0x1f94] ss:$8 sps:$4 sm:$0xff]  }
 0x3f2   : > { %8154 = vmatpush1.bf16.msra.mxu0 %v11233_v12  ;;  %7499 = vmatprep.subr.bf16.mxu1 %v11238_v19  ;;  %v11322_v12 = vld [vmem:[%s11630_s8 + $0xf90] ss:$8 sps:$4 sm:$0xff]  }
 0x3f3   : > { %8155 = vmatprep.subr.bf16.mxu0 %v11241_v20  ;;  %v11325_v19 = vld [vmem:[%s11630_s8 + $0x1f90] ss:$8 sps:$4 sm:$0xff]   ;;  %v11330_v20 = vld [vmem:[%s11630_s8 + $0xfa4] ss:$8 sps:$4 sm:$0xff]  }
 0x3f5   : > { %7500 = vmatpush1.bf16.msra.mxu1 %v11236_v2  ;;  %v11333_v2 = vld [vmem:[%s11630_s8 + $0x1fa4] ss:$8 sps:$4 sm:$0xff]  }
 0x3f6   : > { %8156 = vmatpush1.bf16.msra.mxu0 %v11239_v24  ;;  %7501 = vmatprep.subr.bf16.mxu1 %v11244_v13  ;;  %v11328_v24 = vld [vmem:[%s11630_s8 + $0xfa0] ss:$8 sps:$4 sm:$0xff]  }
 0x3f7   : > { %8157 = vmatprep.subr.bf16.mxu0 %v11247_v53  ;;  %v11331_v13 = vld [vmem:[%s11630_s8 + $0x1fa0] ss:$8 sps:$4 sm:$0xff]   ;;  %v11336_v53 = vld [vmem:[%s11630_s8 + $0xfb4] ss:$8 sps:$4 sm:$0xff]  }
 0x3f9   : > { %7502 = vmatpush1.bf16.msra.mxu1 %v11242_v23  ;;  %v11339_v23 = vld [vmem:[%s11630_s8 + $0x1fb4] ss:$8 sps:$4 sm:$0xff]  }
 0x3fa   : > { %8158 = vmatpush1.bf16.msra.mxu0 %v11245_v59  ;;  %7503 = vmatprep.subr.bf16.mxu1 %v11250_v38  ;;  %v11334_v59 = vld [vmem:[%s11630_s8 + $0xfb0] ss:$8 sps:$4 sm:$0xff]  }
 0x3fb   : > { %8159 = vmatprep.subr.bf16.mxu0 %v11253_v40  ;;  %v11337_v38 = vld [vmem:[%s11630_s8 + $0x1fb0] ss:$8 sps:$4 sm:$0xff]   ;;  %v11342_v40 = vld [vmem:[%s11630_s8 + $0xfc4] ss:$8 sps:$4 sm:$0xff]  }
 0x3fd   : > { %7504 = vmatpush1.bf16.msra.mxu1 %v11248_v11  ;;  %v11345_v11 = vld [vmem:[%s11630_s8 + $0x1fc4] ss:$8 sps:$4 sm:$0xff]  }
 0x3fe   : > { %8160 = vmatpush1.bf16.msra.mxu0 %v11251_v27  ;;  %7505 = vmatprep.subr.bf16.mxu1 %v11256_v61  ;;  %v11340_v27 = vld [vmem:[%s11630_s8 + $0xfc0] ss:$8 sps:$4 sm:$0xff]  }
 0x3ff   : > { %8161 = vmatprep.subr.bf16.mxu0 %v11259_v28  ;;  %v11343_v61 = vld [vmem:[%s11630_s8 + $0x1fc0] ss:$8 sps:$4 sm:$0xff]   ;;  %v11348_v28 = vld [vmem:[%s11630_s8 + $0xfd4] ss:$8 sps:$4 sm:$0xff]  }
 0x401   : > { %7506 = vmatpush1.bf16.msra.mxu1 %v11254_v29  ;;  %v11351_v29 = vld [vmem:[%s11630_s8 + $0x1fd4] ss:$8 sps:$4 sm:$0xff]  }
 0x402   : > { %8162 = vmatpush1.bf16.msra.mxu0 %v11257_v30  ;;  %7507 = vmatprep.subr.bf16.mxu1 %v11262_v31  ;;  %v11346_v30 = vld [vmem:[%s11630_s8 + $0xfd0] ss:$8 sps:$4 sm:$0xff]  }
 0x403   : > { %8163 = vmatprep.subr.bf16.mxu0 %v11265_v32  ;;  %v11349_v31 = vld [vmem:[%s11630_s8 + $0x1fd0] ss:$8 sps:$4 sm:$0xff]   ;;  %v11354_v32 = vld [vmem:[%s11630_s8 + $0xfe4] ss:$8 sps:$4 sm:$0xff]  }
 0x405   : > { %7508 = vmatpush1.bf16.msra.mxu1 %v11260_v16  ;;  %v11357_v16 = vld [vmem:[%s11630_s8 + $0x1fe4] ss:$8 sps:$4 sm:$0xff]  }
 0x406   : > { %8164 = vmatpush1.bf16.msra.mxu0 %v11263_v34  ;;  %7518 = vmatprep.subr.bf16.mxu1 %v11269_v22  ;;  %v11352_v34 = vld [vmem:[%s11630_s8 + $0xfe0] ss:$8 sps:$4 sm:$0xff]  }
 0x407   : > { %8174 = vmatprep.subr.bf16.mxu0 %v11273_v36  ;;  %v11355_v22 = vld [vmem:[%s11630_s8 + $0x1fe0] ss:$8 sps:$4 sm:$0xff]   ;;  %v11360_v36 = vld [vmem:[%s11630_s8 + $0xff4] ss:$8 sps:$4 sm:$0xff]  }
 0x408   : > { %7510 = vmatmul.mubr.bf16.vlgmr.msra.gmra.mrb[0].mxu1 %v12920_v43 }
 0x409   : > { %8166 = vmatmul.mubr.bf16.vlgmr.msra.gmra.mrb[0].mxu0 %v12924_v45  ;;  %7519 = vmatpush1.bf16.msra.mxu1 %v11267_v25  ;;  %v11363_v25 = vld [vmem:[%s11630_s8 + $0x1ff4] ss:$8 sps:$4 sm:$0xff]  }
 0x40a   : > { %8175 = vmatpush1.bf16.msra.mxu0 %v11271_v46  ;;  %7520 = vmatprep.subr.bf16.mxu1 %v11276_v42  ;;  %v11358_v46 = vld [vmem:[%s11630_s8 + $0xff0] ss:$8 sps:$4 sm:$0xff]  }
 0x40b   : > { %8176 = vmatprep.subr.bf16.mxu0 %v11279_v26  ;;  %7550 = vmatprep.mubr.bf16.mxu1 %v1522_v56  ;;  %v11361_v42 = vld [vmem:[%s11630_s8 + $0x1ff0] ss:$8 sps:$4 sm:$0xff]   ;;  %v1520_v26 = vcombine.high %v12920_v43, %v12920_v43  ;;  %v1716_v56 = vcombine.high %v12924_v45, %v12924_v45 }
 0x40c   : > { %8206 = vmatprep.mubr.bf16.mxu0 %v1718_v60  ;;  %v11488_v60 = vmov 1983009808  }
 0x40d   : > { %7521 = vmatpush1.bf16.msra.mxu1 %v11274_v50  ;;  %v8219_v50 = vunpack.c.l.s4 %v11488_v60 }
 0x40e   : > { %8177 = vmatpush1.bf16.msra.mxu0 %v11277_v57  ;;  %7522 = vmatprep.subr.bf16.mxu1 %v11282_v35 }
 0x40f   : > { %8178 = vmatprep.subr.bf16.mxu0 %v11285_v14  ;;  %v8220_v57 = vunpack.c.0.s8 %v8219_v50 }
 0x411   : > { %7523 = vmatpush1.bf16.msra.mxu1 %v11280_v21 }
 0x412   : > { %8179 = vmatpush1.bf16.msra.mxu0 %v11283_v33  ;;  %7524 = vmatprep.subr.bf16.mxu1 %v11288_v37 }
 0x413   : > { %8180 = vmatprep.subr.bf16.mxu0 %v11291_v15 }
 0x415   : > { %7525 = vmatpush1.bf16.msra.mxu1 %v11286_v48  ;;  %v8223_v48 = vsub.s32 %v8220_v57, %v11697_v44 }
 0x416   : > { %8181 = vmatpush1.bf16.msra.mxu0 %v11289_v17  ;;  %7526 = vmatprep.subr.bf16.mxu1 %v11294_v49 }
 0x417   : > { %8182 = vmatprep.subr.bf16.mxu0 %v11297_v51 }
 0x419   : > { %7527 = vmatpush1.bf16.msra.mxu1 %v11292_v52  ;;  %v283_v52 = vld [vmem:[#allocation2] sm:$0xf] }
 0x41a   : > { %8183 = vmatpush1.bf16.msra.mxu0 %v11295_v54  ;;  %7528 = vmatprep.subr.bf16.mxu1 %v11300_v55 }
 0x41b   : > { %8184 = vmatprep.subr.bf16.mxu0 %v11303_v63  ;;  %v11366_v63 = vld [vmem:[%s11648_s12 + $0x40] sm:$0xff] (!%p9579_p8)  }
 0x41d   : > { %7529 = vmatpush1.bf16.msra.mxu1 %v11298_v0  ;;  %v11367_v0 = vld [vmem:[%s11648_s12] sm:$0xff] (!%p9579_p8)  }
 0x41e   : > { %8185 = vmatpush1.bf16.msra.mxu0 %v11301_v41  ;;  %7530 = vmatprep.subr.bf16.mxu1 %v11306_v1  ;;  %v11368_v41 = vld [vmem:[%s11648_s12 + $0x48] sm:$0xff] (!%p9579_p8)  }
 0x41f   : > { %8186 = vmatprep.subr.bf16.mxu0 %v11309_v47  ;;  %v11369_v1 = vld [vmem:[%s11648_s12 + $0x8] sm:$0xff] (!%p9579_p8)   ;;  %v11370_v47 = vld [vmem:[%s11648_s12 + $0x50] sm:$0xff] (!%p9579_p8)  }
 0x421   : > { %7531 = vmatpush1.bf16.msra.mxu1 %v11304_v3  ;;  %v11371_v3 = vld [vmem:[%s11648_s12 + $0x10] sm:$0xff] (!%p9579_p8)  }
 0x422   : > { %8187 = vmatpush1.bf16.msra.mxu0 %v11307_v39  ;;  %7532 = vmatprep.subr.bf16.mxu1 %v11312_v58  ;;  %v11372_v39 = vld [vmem:[%s11648_s12 + $0x58] sm:$0xff] (!%p9579_p8)  }
 0x423   : > { %8188 = vmatprep.subr.bf16.mxu0 %v11315_v18  ;;  %v11373_v58 = vld [vmem:[%s11648_s12 + $0x18] sm:$0xff] (!%p9579_p8)   ;;  %v11374_v18 = vld [vmem:[%s11648_s12 + $0x60] sm:$0xff] (!%p9579_p8)  }
 0x425   : > { %7533 = vmatpush1.bf16.msra.mxu1 %v11310_v4  ;;  %v8237_v4 = vsub.s32 (!%p9579_p8), 0, %v11697_v44 }
 0x426   : > { %8189 = vmatpush1.bf16.msra.mxu0 %v11313_v5  ;;  %7534 = vmatprep.subr.bf16.mxu1 %v11318_v6  ;;  %v8241_v5 = vsub.s32 (!%p9579_p8), 1, %v11697_v44  ;;  %v11375_v6 = vld [vmem:[%s11648_s12 + $0x20] sm:$0xff] (!%p9579_p8)  }
 0x427   : > { %8190 = vmatprep.subr.bf16.mxu0 %v11321_v7  ;;  %v11376_v7 = vld [vmem:[%s11648_s12 + $0x68] sm:$0xff] (!%p9579_p8)  }
 0x429   : > { %7535 = vmatpush1.bf16.msra.mxu1 %v11316_v8  ;;  %v8233_v8 = vld [vmem:[%s264_s10] sm:$0x3] (!%p9579_p8) }
 0x42a   : > { %8191 = vmatpush1.bf16.msra.mxu0 %v11319_v9  ;;  %7536 = vmatprep.subr.bf16.mxu1 %v11324_v10  ;;  %v8238_v9 = vrot.slane (!%p9579_p8), %v8233_v8, %v8237_v4  ;;  %v8242_v10 = vrot.slane (!%p9579_p8), %v8233_v8, %v8241_v5 }
 0x42b   : > { %8192 = vmatprep.subr.bf16.mxu0 %v11327_v62  ;;  %v11377_v62 = vld [vmem:[%s11648_s12 + $0x28] sm:$0xff] (!%p9579_p8)  }
 0x42d   : > { %7537 = vmatpush1.bf16.msra.mxu1 %v11322_v12  ;;  %v8243_v12 = vcombine.low (!%p9579_p8), %v8238_v9, %v8242_v10 }
 0x42e   : > { %8193 = vmatpush1.bf16.msra.mxu0 %v11325_v19  ;;  %7538 = vmatprep.subr.bf16.mxu1 %v11330_v20  ;;  %v11378_v19 = vld [vmem:[%s11648_s12 + $0x70] sm:$0xff] (!%p9579_p8)  }
 0x42f   : > { %8194 = vmatprep.subr.bf16.mxu0 %v11333_v2  ;;  %v8250_v20 = vrot.slane (!%p9579_p8), %v8243_v12, %v8223_v48  ;;  %v11379_v2 = vld [vmem:[%s11648_s12 + $0x30] sm:$0xff] (!%p9579_p8)  }
 0x431   : > { %7539 = vmatpush1.bf16.msra.mxu1 %v11328_v24 }
 0x432   : > { %8195 = vmatpush1.bf16.msra.mxu0 %v11331_v13  ;;  %7540 = vmatprep.subr.bf16.mxu1 %v11336_v53  ;;  %v11380_v13 = vld [vmem:[%s11648_s12 + $0x78] sm:$0xff] (!%p9579_p8)  }
 0x433   : > { %8196 = vmatprep.subr.bf16.mxu0 %v11339_v23  ;;  %v11381_v23 = vld [vmem:[%s11648_s12 + $0x38] sm:$0xff] (!%p9579_p8)  }
 0x435   : > { %7541 = vmatpush1.bf16.msra.mxu1 %v11334_v59 }
 0x436   : > { %8197 = vmatpush1.bf16.msra.mxu0 %v11337_v38  ;;  %7542 = vmatprep.subr.bf16.mxu1 %v11342_v40 }
 0x437   : > { %8198 = vmatprep.subr.bf16.mxu0 %v11345_v11 }
 0x439   : > { %7543 = vmatpush1.bf16.msra.mxu1 %v11340_v27 }
 0x43a   : > { %8199 = vmatpush1.bf16.msra.mxu0 %v11343_v61  ;;  %7544 = vmatprep.subr.bf16.mxu1 %v11348_v28 }
 0x43b   : > { %8200 = vmatprep.subr.bf16.mxu0 %v11351_v29 }
 0x43d   : > { %7545 = vmatpush1.bf16.msra.mxu1 %v11346_v30 }
 0x43e   : > { %8201 = vmatpush1.bf16.msra.mxu0 %v11349_v31  ;;  %7546 = vmatprep.subr.bf16.mxu1 %v11354_v32 }
 0x43f   : > { %8202 = vmatprep.subr.bf16.mxu0 %v11357_v16 }
 0x441   : > { %7547 = vmatpush1.bf16.msra.mxu1 %v11352_v34 }
 0x442   : > { %8203 = vmatpush1.bf16.msra.mxu0 %v11355_v22  ;;  %7548 = vmatprep.subr.bf16.mxu1 %v11360_v36 }
 0x443   : > { %8204 = vmatprep.subr.bf16.mxu0 %v11363_v25 }
 0x445   : > { %7549 = vmatpush1.bf16.msra.mxu1 %v11358_v46 }
 0x446   : > { %8205 = vmatpush1.bf16.msra.mxu0 %v11361_v42 }
 0x447   : > { %9599 = vmatprep.subr.bf16.mxu0 (!%p9579_p8), %v11366_v63 }
 0x448   : > { %7551 = vmatmul.mubr.bf16.vlgmr.msra.gmra.mrb[0].mxu1 %v1520_v26 }
 0x449   : > { %8207 = vmatmul.mubr.bf16.vlgmr.msra.gmra.mrb[0].mxu0 %v1716_v56 }
 0x44a   : > { %9600 = vmatpush3.bf16.msra.mxu0 (!%p9579_p8), %v11367_v0 }
 0x44b   : > { %9601 = vmatprep.subr.bf16.mxu0 (!%p9579_p8), %v11368_v41 }
 0x44e   : > { %9602 = vmatpush3.bf16.msra.mxu0 (!%p9579_p8), %v11369_v1 }
 0x44f   : > { %9603 = vmatprep.subr.bf16.mxu0 (!%p9579_p8), %v11370_v47 }
 0x452   : > { %9604 = vmatpush3.bf16.msra.mxu0 (!%p9579_p8), %v11371_v3 }
 0x453   : > { %9605 = vmatprep.subr.bf16.mxu0 (!%p9579_p8), %v11372_v39 }
 0x456   : > { %9606 = vmatpush3.bf16.msra.mxu0 (!%p9579_p8), %v11373_v58 }
 0x457   : > { %9607 = vmatprep.subr.bf16.mxu0 (!%p9579_p8), %v11374_v18 }
 0x45a   : > { %9608 = vmatpush3.bf16.msra.mxu0 (!%p9579_p8), %v11375_v6 }
 0x45b   : > { %9609 = vmatprep.subr.bf16.mxu0 (!%p9579_p8), %v11376_v7 }
 0x45e   : > { %9610 = vmatpush3.bf16.msra.mxu0 (!%p9579_p8), %v11377_v62 }
 0x45f   : > { %9611 = vmatprep.subr.bf16.mxu0 (!%p9579_p8), %v11378_v19 }
 0x462   : > { %9612 = vmatpush3.bf16.msra.mxu0 (!%p9579_p8), %v11379_v2 }
 0x463   : > { %9613 = vmatprep.subr.bf16.mxu0 (!%p9579_p8), %v11380_v13 }
 0x466   : > { %9614 = vmatpush3.bf16.msra.mxu0 (!%p9579_p8), %v11381_v23 }
 0x51b   : > { %v7552_v35 = vpop.f32.mrb[0].mxu1 }
 0x51c   : > { %v8208_v14 = vpop.f32.mrb[0].mxu0  ;;  %v7554_v33 = vpop.f32.mrb[1].mxu1 }
 0x51d   : > { %v9621_v21 = vadd.f32 %v8208_v14, %v7552_v35  ;;  %v8210_v37 = vpop.f32.mrb[1].mxu0  ;;  %v7556_v17 = vpop.f32.mrb[2].mxu1 }
 0x51e   : > { %v9622_v15 = vadd.f32 %v8210_v37, %v7554_v33  ;;  %v8212_v43 = vpop.f32.mrb[2].mxu0  ;;  %v7557_v49 = vpop.f32.mrb[3].mxu1 }
 0x51f   : > { %v8213_v51 = vpop.f32.mrb[3].mxu0 }
 0x520   : > { %v8217_v45 = vcombine.low %v9621_v21, %v9622_v15  ;;  %8231 = sbr.rel (%p9579_p8) target bundleno = 1553 (0x611), region = 48 }
 0x522   : > { %v8224_v54 = vrot.slane %v8217_v45, %v8223_v48 }
 0x524   : > { %v8226_v55 = vadd.f32 %v8224_v54, %v283_v52 }
 0x526   : > { %8227 = vst [vmem:[#allocation2] sm:$0xf] %v8226_v55 }
 0x52d   : > { %v8232_v44 = vld [vmem:[#allocation2] sm:$0xf] }
 0x52e   : > { %v8252_v24 = vadd.f32 %v8250_v20, %v8232_v44 }
 0x530   : > { %v8253_v53 = vmax.f32 %v8252_v24, 0.0 }
 0x532   : > { %v8261_v59 = vrot.slane %v8253_v53, %v8223_v48 }
 0x534   : > { %v8262_v38 = vcombine.high %v8261_v59, %v8261_v59  ;;  %v8265_v40 = vpack.c.bf16 %v8261_v59, %v8261_v59 }
 0x536   : > { %v8266_v11 = vpack.c.bf16 %v8262_v38, %v8262_v38 }
 0x538   : > { %8427 = vmatprep.mubr.bf16.mxu0 %v8266_v11 }
 0x539   : > { %8428 = vmatmul.mubr.bf16.vlgmr.msra.gmra.mrb[0].mxu0 %v8265_v40 }
 0x60c   : > { %v9615_v27 = vpop.f32.mrb[0].mxu0 }
 0x60d   : > { %v9616_v61 = vpop.f32.mrb[1].mxu0 }
 0x60e   : > { %v9617_v28 = vadd.f32 %v9616_v61, %v9615_v27  ;;  %v9618_v29 = vpop.f32.mrb[2].mxu0 }
 0x60f   : > { %v9619_v30 = vpop.f32.mrb[3].mxu0 }
 0x610   : > { %8436 = vst.msk [vmem:[%s11654_s30] sm:$0x3] %vm8435_vm0, %v9617_v28 }
 0x611 PF: > { %s17_s22 = sadd.s32 1, %s11480_s22   ;;  %s13058_s24 = sld [smem:[#allocation6_spill]] }
 0x612   : > { %p14_p9 = scmp.ge.s32.totalorder %s17_s22, 10   ;;  %s13059_s15 = smov %s11456_s16 }
 0x613   : > { %s13060_s16 = smov %s11460_s17  ;;  %s13061_s17 = smov %s11581_s9 }
 0x614   : > { %s13062_s18 = smov %s11472_s20  ;;  %s13063_s19 = smov %s11476_s21 }
 0x615   : > { %s13065_s21 = smov %s13071_s25  ;;  %16 = sbr.rel (!%p14_p9) target bundleno = 5 (0x5), region = 91 }
 0x617   : > { %s13064_s20 = smov %s13058_s24 }
 0x61c   :  { %8456 = vsyncpa [#allocation4], 1 }
 0x61d   :  { %8458 = vsyncpa [#allocation4 + $0x1], 1 }

</bundles_post_ra>
